<compile_context>
chip_gen: v7x
topology: tpu7x:2x2x1
jax: 0.10.0
libtpu: 0.0.40
codegen_flags: <defaults>
</compile_context>

<pallas_src>
import jax
import jax.numpy as jnp
from jax.experimental import pallas as pl
from jax.experimental.pallas import tpu as pltpu

KH, KW = 5, 5
PAD = 2
C_BLK = 128          # lane-block size for the in-kernel channel chunking


def dwconv5x5_kernel(x_ref, w_ref, o_ref):
    """Depthwise 5x5 conv, stride 1, for one batch element / one row tile.

    x_ref: (Hp, Wp, C)   spatially pre-padded input (VMEM-resident across row tiles)
    w_ref: (KH*KW, C)    per-channel taps, row index = kh*KW + kw (resident)
    o_ref: (TH, W, C)    output row tile
    """
    TH, W, C = o_ref.shape
    row0 = pl.multiple_of(pl.program_id(1) * TH, TH)

    # Process channels in 128-lane chunks: per-chunk f32 accumulator
    # (TH, W, 128) is ~16 vregs -> stays in registers for all 25 taps.
    for c0 in range(0, C, C_BLK):
        cs = min(C_BLK, C - c0)
        w_c = w_ref[:, c0:c0 + cs].astype(jnp.float32)           # (25, cs), loaded once
        acc = jnp.zeros((TH, W, cs), jnp.float32)
        for kh in range(KH):
            # One aligned, full-width row-slab load per (kh, chunk);
            # leading-dim (H) slicing is cheap.
            slab = x_ref[pl.ds(row0 + kh, TH), :, c0:c0 + cs].astype(jnp.float32)
            for kw in range(KW):
                # kw shift along W done in-register (sublane shift), not as a
                # separate misaligned load per tap.
                tap = slab[:, kw:kw + W, :]
                acc = acc + tap * w_c[kh * KW + kw][None, None, :]
        o_ref[:, :, c0:c0 + cs] = acc.astype(o_ref.dtype)


def _pick_tile_h(H):
    for th in (8, 4, 2, 1):
        if H % th == 0:
            return th
    return 1


@jax.jit
def depthwise_conv5x5(x_nchw, w_oihw):
    """x_nchw: (N, C, H, W); w_oihw: (C, 1, 5, 5) -- groups=C, stride 1, pad 2."""
    N, C, H, W = x_nchw.shape
    assert w_oihw.shape == (C, 1, KH, KW)

    # (C, 1, 5, 5) -> (25, C), row index = kh*KW + kw
    w_taps = jnp.transpose(w_oihw.reshape(C, KH * KW), (1, 0))

    # NCHW -> NHWC and spatial zero-pad by 2 (matches the PyTorch interface).
    # TODO(synk): if this op sits inside a larger HWC network, keep activations
    # in HWC end-to-end and fold the padding into the producer so these layout
    # passes disappear.
    x_hwc = jnp.transpose(x_nchw, (0, 2, 3, 1))
    x_pad = jnp.pad(x_hwc, ((0, 0), (PAD, PAD), (PAD, PAD), (0, 0)))
    Hp, Wp = H + 2 * PAD, W + 2 * PAD

    tile_h = _pick_tile_h(H)
    grid = (N, H // tile_h)

    out_hwc = pl.pallas_call(
        dwconv5x5_kernel,
        out_shape=jax.ShapeDtypeStruct((N, H, W, C), x_nchw.dtype),
        grid=grid,
        in_specs=[
            # Full padded image of one batch element; resident across row tiles.
            pl.BlockSpec((None, Hp, Wp, C), lambda n, h: (n, 0, 0, 0)),
            # All 25 taps; resident.
            pl.BlockSpec((KH * KW, C), lambda n, h: (0, 0)),
        ],
        out_specs=pl.BlockSpec((None, tile_h, W, C), lambda n, h: (n, h, 0, 0)),
        compiler_params=pltpu.CompilerParams(
            dimension_semantics=("parallel", "parallel")),
    )(x_pad, w_taps)

    return jnp.transpose(out_hwc, (0, 3, 1, 2))  # back to NCHW


if __name__ == "__main__":
    # Shapes from the PyTorch module: x147 = randn(1, 432, 28, 28)
    N, C, H, W = 1, 432, 28, 28

    key = jax.random.PRNGKey(0)
    kx, kw_key = jax.random.split(key)
    x = jax.random.normal(kx, (N, C, H, W), dtype=jnp.float32)
    # Conv2d(432, 432, 5x5, groups=432, bias=False) weight: (432, 1, 5, 5)
    w = jax.random.normal(kw_key, (C, 1, KH, KW), dtype=jnp.float32) * 0.1

    out = depthwise_conv5x5(x, w)
    out = jax.block_until_ready(out)
    assert out.shape == (N, C, H, W), out.shape

    # Cross-check against XLA's grouped conv (same semantics as torch Conv2d).
    ref = jax.lax.conv_general_dilated(
        x, w,
        window_strides=(1, 1),
        padding=((PAD, PAD), (PAD, PAD)),
        dimension_numbers=("NCHW", "OIHW", "NCHW"),
        feature_group_count=C,
    )
    ref = jax.block_until_ready(ref)
    max_err = float(jnp.max(jnp.abs(out - ref)))
    assert jnp.allclose(out, ref, atol=1e-3, rtol=1e-3), max_err

    print("KERNEL_OK")
</pallas_src>

<mosaic_0001>
module attributes {stable_mosaic.version = 11 : i64} {
  func.func @dwconv5x5_kernel(%arg0: i32, %arg1: i32, %arg2: memref<1x32x32x432xf32, #tpu.memory_space<vmem>>, %arg3: memref<25x432xf32, #tpu.memory_space<vmem>>, %arg4: memref<1x4x28x432xf32, #tpu.memory_space<vmem>>) attributes {dimension_semantics = [#tpu.dimension_semantics<parallel>, #tpu.dimension_semantics<parallel>], iteration_bounds = array<i64: 1, 7>, scalar_prefetch = 0 : i64, scratch_operands = 0 : i64, tpu.core_type = #tpu.core_type<tc>, window_params = [{transform_indices = @transform_0, window_bounds = array<i64: 1, 32, 32, 432>}, {pipeline_mode = #tpu.pipeline_mode<synchronous>, transform_indices = @transform_1, window_bounds = array<i64: 25, 432>}, {transform_indices = @transform_2, window_bounds = array<i64: 1, 4, 28, 432>}]} {
    %c4_i32 = arith.constant 4 : i32
    %0 = arith.muli %arg1, %c4_i32 : i32
    %1 = tpu.assume_multiple %0, 4 : i32
    %c0 = arith.constant 0 : index
    %c0_0 = arith.constant 0 : index
    %2 = vector.load %arg3[%c0, %c0_0] : memref<25x432xf32, #tpu.memory_space<vmem>>, vector<25x128xf32>
    %cst = arith.constant 0.000000e+00 : f32
    %3 = vector.broadcast %cst : f32 to vector<4x28x128xf32>
    %c0_i32 = arith.constant 0 : i32
    %4 = arith.addi %1, %c0_i32 : i32
    %c0_1 = arith.constant 0 : index
    %5 = arith.index_cast %4 : i32 to index
    %c0_2 = arith.constant 0 : index
    %c0_3 = arith.constant 0 : index
    %6 = vector.load %arg2[%c0_1, %5, %c0_2, %c0_3] : memref<1x32x32x432xf32, #tpu.memory_space<vmem>>, vector<1x4x32x128xf32>
    %7 = vector.shape_cast %6 : vector<1x4x32x128xf32> to vector<4x32x128xf32>
    %8 = vector.extract_strided_slice %7 {offsets = [0, 0, 0], sizes = [4, 28, 128], strides = [1, 1, 1]} : vector<4x32x128xf32> to vector<4x28x128xf32>
    %9 = vector.extract_strided_slice %2 {offsets = [0, 0], sizes = [1, 128], strides = [1, 1]} : vector<25x128xf32> to vector<1x128xf32>
    %10 = vector.shape_cast %9 : vector<1x128xf32> to vector<128xf32>
    %11 = vector.shape_cast %10 : vector<128xf32> to vector<1x1x128xf32>
    %12 = vector.broadcast %11 : vector<1x1x128xf32> to vector<4x28x128xf32>
    %13 = arith.mulf %8, %12 : vector<4x28x128xf32>
    %14 = arith.addf %3, %13 : vector<4x28x128xf32>
    %15 = vector.extract_strided_slice %7 {offsets = [0, 1, 0], sizes = [4, 28, 128], strides = [1, 1, 1]} : vector<4x32x128xf32> to vector<4x28x128xf32>
    %16 = vector.extract_strided_slice %2 {offsets = [1, 0], sizes = [1, 128], strides = [1, 1]} : vector<25x128xf32> to vector<1x128xf32>
    %17 = vector.shape_cast %16 : vector<1x128xf32> to vector<128xf32>
    %18 = vector.shape_cast %17 : vector<128xf32> to vector<1x1x128xf32>
    %19 = vector.broadcast %18 : vector<1x1x128xf32> to vector<4x28x128xf32>
    %20 = arith.mulf %15, %19 : vector<4x28x128xf32>
    %21 = arith.addf %14, %20 : vector<4x28x128xf32>
    %22 = vector.extract_strided_slice %7 {offsets = [0, 2, 0], sizes = [4, 28, 128], strides = [1, 1, 1]} : vector<4x32x128xf32> to vector<4x28x128xf32>
    %23 = vector.extract_strided_slice %2 {offsets = [2, 0], sizes = [1, 128], strides = [1, 1]} : vector<25x128xf32> to vector<1x128xf32>
    %24 = vector.shape_cast %23 : vector<1x128xf32> to vector<128xf32>
    %25 = vector.shape_cast %24 : vector<128xf32> to vector<1x1x128xf32>
    %26 = vector.broadcast %25 : vector<1x1x128xf32> to vector<4x28x128xf32>
    %27 = arith.mulf %22, %26 : vector<4x28x128xf32>
    %28 = arith.addf %21, %27 : vector<4x28x128xf32>
    %29 = vector.extract_strided_slice %7 {offsets = [0, 3, 0], sizes = [4, 28, 128], strides = [1, 1, 1]} : vector<4x32x128xf32> to vector<4x28x128xf32>
    %30 = vector.extract_strided_slice %2 {offsets = [3, 0], sizes = [1, 128], strides = [1, 1]} : vector<25x128xf32> to vector<1x128xf32>
    %31 = vector.shape_cast %30 : vector<1x128xf32> to vector<128xf32>
    %32 = vector.shape_cast %31 : vector<128xf32> to vector<1x1x128xf32>
    %33 = vector.broadcast %32 : vector<1x1x128xf32> to vector<4x28x128xf32>
    %34 = arith.mulf %29, %33 : vector<4x28x128xf32>
    %35 = arith.addf %28, %34 : vector<4x28x128xf32>
    %36 = vector.extract_strided_slice %7 {offsets = [0, 4, 0], sizes = [4, 28, 128], strides = [1, 1, 1]} : vector<4x32x128xf32> to vector<4x28x128xf32>
    %37 = vector.extract_strided_slice %2 {offsets = [4, 0], sizes = [1, 128], strides = [1, 1]} : vector<25x128xf32> to vector<1x128xf32>
    %38 = vector.shape_cast %37 : vector<1x128xf32> to vector<128xf32>
    %39 = vector.shape_cast %38 : vector<128xf32> to vector<1x1x128xf32>
    %40 = vector.broadcast %39 : vector<1x1x128xf32> to vector<4x28x128xf32>
    %41 = arith.mulf %36, %40 : vector<4x28x128xf32>
    %42 = arith.addf %35, %41 : vector<4x28x128xf32>
    %c1_i32 = arith.constant 1 : i32
    %43 = arith.addi %1, %c1_i32 : i32
    %c0_4 = arith.constant 0 : index
    %44 = arith.index_cast %43 : i32 to index
    %c0_5 = arith.constant 0 : index
    %c0_6 = arith.constant 0 : index
    %45 = vector.load %arg2[%c0_4, %44, %c0_5, %c0_6] : memref<1x32x32x432xf32, #tpu.memory_space<vmem>>, vector<1x4x32x128xf32>
    %46 = vector.shape_cast %45 : vector<1x4x32x128xf32> to vector<4x32x128xf32>
    %47 = vector.extract_strided_slice %46 {offsets = [0, 0, 0], sizes = [4, 28, 128], strides = [1, 1, 1]} : vector<4x32x128xf32> to vector<4x28x128xf32>
    %48 = vector.extract_strided_slice %2 {offsets = [5, 0], sizes = [1, 128], strides = [1, 1]} : vector<25x128xf32> to vector<1x128xf32>
    %49 = vector.shape_cast %48 : vector<1x128xf32> to vector<128xf32>
    %50 = vector.shape_cast %49 : vector<128xf32> to vector<1x1x128xf32>
    %51 = vector.broadcast %50 : vector<1x1x128xf32> to vector<4x28x128xf32>
    %52 = arith.mulf %47, %51 : vector<4x28x128xf32>
    %53 = arith.addf %42, %52 : vector<4x28x128xf32>
    %54 = vector.extract_strided_slice %46 {offsets = [0, 1, 0], sizes = [4, 28, 128], strides = [1, 1, 1]} : vector<4x32x128xf32> to vector<4x28x128xf32>
    %55 = vector.extract_strided_slice %2 {offsets = [6, 0], sizes = [1, 128], strides = [1, 1]} : vector<25x128xf32> to vector<1x128xf32>
    %56 = vector.shape_cast %55 : vector<1x128xf32> to vector<128xf32>
    %57 = vector.shape_cast %56 : vector<128xf32> to vector<1x1x128xf32>
    %58 = vector.broadcast %57 : vector<1x1x128xf32> to vector<4x28x128xf32>
    %59 = arith.mulf %54, %58 : vector<4x28x128xf32>
    %60 = arith.addf %53, %59 : vector<4x28x128xf32>
    %61 = vector.extract_strided_slice %46 {offsets = [0, 2, 0], sizes = [4, 28, 128], strides = [1, 1, 1]} : vector<4x32x128xf32> to vector<4x28x128xf32>
    %62 = vector.extract_strided_slice %2 {offsets = [7, 0], sizes = [1, 128], strides = [1, 1]} : vector<25x128xf32> to vector<1x128xf32>
    %63 = vector.shape_cast %62 : vector<1x128xf32> to vector<128xf32>
    %64 = vector.shape_cast %63 : vector<128xf32> to vector<1x1x128xf32>
    %65 = vector.broadcast %64 : vector<1x1x128xf32> to vector<4x28x128xf32>
    %66 = arith.mulf %61, %65 : vector<4x28x128xf32>
    %67 = arith.addf %60, %66 : vector<4x28x128xf32>
    %68 = vector.extract_strided_slice %46 {offsets = [0, 3, 0], sizes = [4, 28, 128], strides = [1, 1, 1]} : vector<4x32x128xf32> to vector<4x28x128xf32>
    %69 = vector.extract_strided_slice %2 {offsets = [8, 0], sizes = [1, 128], strides = [1, 1]} : vector<25x128xf32> to vector<1x128xf32>
    %70 = vector.shape_cast %69 : vector<1x128xf32> to vector<128xf32>
    %71 = vector.shape_cast %70 : vector<128xf32> to vector<1x1x128xf32>
    %72 = vector.broadcast %71 : vector<1x1x128xf32> to vector<4x28x128xf32>
    %73 = arith.mulf %68, %72 : vector<4x28x128xf32>
    %74 = arith.addf %67, %73 : vector<4x28x128xf32>
    %75 = vector.extract_strided_slice %46 {offsets = [0, 4, 0], sizes = [4, 28, 128], strides = [1, 1, 1]} : vector<4x32x128xf32> to vector<4x28x128xf32>
    %76 = vector.extract_strided_slice %2 {offsets = [9, 0], sizes = [1, 128], strides = [1, 1]} : vector<25x128xf32> to vector<1x128xf32>
    %77 = vector.shape_cast %76 : vector<1x128xf32> to vector<128xf32>
    %78 = vector.shape_cast %77 : vector<128xf32> to vector<1x1x128xf32>
    %79 = vector.broadcast %78 : vector<1x1x128xf32> to vector<4x28x128xf32>
    %80 = arith.mulf %75, %79 : vector<4x28x128xf32>
    %81 = arith.addf %74, %80 : vector<4x28x128xf32>
    %c2_i32 = arith.constant 2 : i32
    %82 = arith.addi %1, %c2_i32 : i32
    %c0_7 = arith.constant 0 : index
    %83 = arith.index_cast %82 : i32 to index
    %c0_8 = arith.constant 0 : index
    %c0_9 = arith.constant 0 : index
    %84 = vector.load %arg2[%c0_7, %83, %c0_8, %c0_9] : memref<1x32x32x432xf32, #tpu.memory_space<vmem>>, vector<1x4x32x128xf32>
    %85 = vector.shape_cast %84 : vector<1x4x32x128xf32> to vector<4x32x128xf32>
    %86 = vector.extract_strided_slice %85 {offsets = [0, 0, 0], sizes = [4, 28, 128], strides = [1, 1, 1]} : vector<4x32x128xf32> to vector<4x28x128xf32>
    %87 = vector.extract_strided_slice %2 {offsets = [10, 0], sizes = [1, 128], strides = [1, 1]} : vector<25x128xf32> to vector<1x128xf32>
    %88 = vector.shape_cast %87 : vector<1x128xf32> to vector<128xf32>
    %89 = vector.shape_cast %88 : vector<128xf32> to vector<1x1x128xf32>
    %90 = vector.broadcast %89 : vector<1x1x128xf32> to vector<4x28x128xf32>
    %91 = arith.mulf %86, %90 : vector<4x28x128xf32>
    %92 = arith.addf %81, %91 : vector<4x28x128xf32>
    %93 = vector.extract_strided_slice %85 {offsets = [0, 1, 0], sizes = [4, 28, 128], strides = [1, 1, 1]} : vector<4x32x128xf32> to vector<4x28x128xf32>
    %94 = vector.extract_strided_slice %2 {offsets = [11, 0], sizes = [1, 128], strides = [1, 1]} : vector<25x128xf32> to vector<1x128xf32>
    %95 = vector.shape_cast %94 : vector<1x128xf32> to vector<128xf32>
    %96 = vector.shape_cast %95 : vector<128xf32> to vector<1x1x128xf32>
    %97 = vector.broadcast %96 : vector<1x1x128xf32> to vector<4x28x128xf32>
    %98 = arith.mulf %93, %97 : vector<4x28x128xf32>
    %99 = arith.addf %92, %98 : vector<4x28x128xf32>
    %100 = vector.extract_strided_slice %85 {offsets = [0, 2, 0], sizes = [4, 28, 128], strides = [1, 1, 1]} : vector<4x32x128xf32> to vector<4x28x128xf32>
    %101 = vector.extract_strided_slice %2 {offsets = [12, 0], sizes = [1, 128], strides = [1, 1]} : vector<25x128xf32> to vector<1x128xf32>
    %102 = vector.shape_cast %101 : vector<1x128xf32> to vector<128xf32>
    %103 = vector.shape_cast %102 : vector<128xf32> to vector<1x1x128xf32>
    %104 = vector.broadcast %103 : vector<1x1x128xf32> to vector<4x28x128xf32>
    %105 = arith.mulf %100, %104 : vector<4x28x128xf32>
    %106 = arith.addf %99, %105 : vector<4x28x128xf32>
    %107 = vector.extract_strided_slice %85 {offsets = [0, 3, 0], sizes = [4, 28, 128], strides = [1, 1, 1]} : vector<4x32x128xf32> to vector<4x28x128xf32>
    %108 = vector.extract_strided_slice %2 {offsets = [13, 0], sizes = [1, 128], strides = [1, 1]} : vector<25x128xf32> to vector<1x128xf32>
    %109 = vector.shape_cast %108 : vector<1x128xf32> to vector<128xf32>
    %110 = vector.shape_cast %109 : vector<128xf32> to vector<1x1x128xf32>
    %111 = vector.broadcast %110 : vector<1x1x128xf32> to vector<4x28x128xf32>
    %112 = arith.mulf %107, %111 : vector<4x28x128xf32>
    %113 = arith.addf %106, %112 : vector<4x28x128xf32>
    %114 = vector.extract_strided_slice %85 {offsets = [0, 4, 0], sizes = [4, 28, 128], strides = [1, 1, 1]} : vector<4x32x128xf32> to vector<4x28x128xf32>
    %115 = vector.extract_strided_slice %2 {offsets = [14, 0], sizes = [1, 128], strides = [1, 1]} : vector<25x128xf32> to vector<1x128xf32>
    %116 = vector.shape_cast %115 : vector<1x128xf32> to vector<128xf32>
    %117 = vector.shape_cast %116 : vector<128xf32> to vector<1x1x128xf32>
    %118 = vector.broadcast %117 : vector<1x1x128xf32> to vector<4x28x128xf32>
    %119 = arith.mulf %114, %118 : vector<4x28x128xf32>
    %120 = arith.addf %113, %119 : vector<4x28x128xf32>
    %c3_i32 = arith.constant 3 : i32
    %121 = arith.addi %1, %c3_i32 : i32
    %c0_10 = arith.constant 0 : index
    %122 = arith.index_cast %121 : i32 to index
    %c0_11 = arith.constant 0 : index
    %c0_12 = arith.constant 0 : index
    %123 = vector.load %arg2[%c0_10, %122, %c0_11, %c0_12] : memref<1x32x32x432xf32, #tpu.memory_space<vmem>>, vector<1x4x32x128xf32>
    %124 = vector.shape_cast %123 : vector<1x4x32x128xf32> to vector<4x32x128xf32>
    %125 = vector.extract_strided_slice %124 {offsets = [0, 0, 0], sizes = [4, 28, 128], strides = [1, 1, 1]} : vector<4x32x128xf32> to vector<4x28x128xf32>
    %126 = vector.extract_strided_slice %2 {offsets = [15, 0], sizes = [1, 128], strides = [1, 1]} : vector<25x128xf32> to vector<1x128xf32>
    %127 = vector.shape_cast %126 : vector<1x128xf32> to vector<128xf32>
    %128 = vector.shape_cast %127 : vector<128xf32> to vector<1x1x128xf32>
    %129 = vector.broadcast %128 : vector<1x1x128xf32> to vector<4x28x128xf32>
    %130 = arith.mulf %125, %129 : vector<4x28x128xf32>
    %131 = arith.addf %120, %130 : vector<4x28x128xf32>
    %132 = vector.extract_strided_slice %124 {offsets = [0, 1, 0], sizes = [4, 28, 128], strides = [1, 1, 1]} : vector<4x32x128xf32> to vector<4x28x128xf32>
    %133 = vector.extract_strided_slice %2 {offsets = [16, 0], sizes = [1, 128], strides = [1, 1]} : vector<25x128xf32> to vector<1x128xf32>
    %134 = vector.shape_cast %133 : vector<1x128xf32> to vector<128xf32>
    %135 = vector.shape_cast %134 : vector<128xf32> to vector<1x1x128xf32>
    %136 = vector.broadcast %135 : vector<1x1x128xf32> to vector<4x28x128xf32>
    %137 = arith.mulf %132, %136 : vector<4x28x128xf32>
    %138 = arith.addf %131, %137 : vector<4x28x128xf32>
    %139 = vector.extract_strided_slice %124 {offsets = [0, 2, 0], sizes = [4, 28, 128], strides = [1, 1, 1]} : vector<4x32x128xf32> to vector<4x28x128xf32>
    %140 = vector.extract_strided_slice %2 {offsets = [17, 0], sizes = [1, 128], strides = [1, 1]} : vector<25x128xf32> to vector<1x128xf32>
    %141 = vector.shape_cast %140 : vector<1x128xf32> to vector<128xf32>
    %142 = vector.shape_cast %141 : vector<128xf32> to vector<1x1x128xf32>
    %143 = vector.broadcast %142 : vector<1x1x128xf32> to vector<4x28x128xf32>
    %144 = arith.mulf %139, %143 : vector<4x28x128xf32>
    %145 = arith.addf %138, %144 : vector<4x28x128xf32>
    %146 = vector.extract_strided_slice %124 {offsets = [0, 3, 0], sizes = [4, 28, 128], strides = [1, 1, 1]} : vector<4x32x128xf32> to vector<4x28x128xf32>
    %147 = vector.extract_strided_slice %2 {offsets = [18, 0], sizes = [1, 128], strides = [1, 1]} : vector<25x128xf32> to vector<1x128xf32>
    %148 = vector.shape_cast %147 : vector<1x128xf32> to vector<128xf32>
    %149 = vector.shape_cast %148 : vector<128xf32> to vector<1x1x128xf32>
    %150 = vector.broadcast %149 : vector<1x1x128xf32> to vector<4x28x128xf32>
    %151 = arith.mulf %146, %150 : vector<4x28x128xf32>
    %152 = arith.addf %145, %151 : vector<4x28x128xf32>
    %153 = vector.extract_strided_slice %124 {offsets = [0, 4, 0], sizes = [4, 28, 128], strides = [1, 1, 1]} : vector<4x32x128xf32> to vector<4x28x128xf32>
    %154 = vector.extract_strided_slice %2 {offsets = [19, 0], sizes = [1, 128], strides = [1, 1]} : vector<25x128xf32> to vector<1x128xf32>
    %155 = vector.shape_cast %154 : vector<1x128xf32> to vector<128xf32>
    %156 = vector.shape_cast %155 : vector<128xf32> to vector<1x1x128xf32>
    %157 = vector.broadcast %156 : vector<1x1x128xf32> to vector<4x28x128xf32>
    %158 = arith.mulf %153, %157 : vector<4x28x128xf32>
    %159 = arith.addf %152, %158 : vector<4x28x128xf32>
    %c4_i32_13 = arith.constant 4 : i32
    %160 = arith.addi %1, %c4_i32_13 : i32
    %c0_14 = arith.constant 0 : index
    %161 = arith.index_cast %160 : i32 to index
    %c0_15 = arith.constant 0 : index
    %c0_16 = arith.constant 0 : index
    %162 = vector.load %arg2[%c0_14, %161, %c0_15, %c0_16] : memref<1x32x32x432xf32, #tpu.memory_space<vmem>>, vector<1x4x32x128xf32>
    %163 = vector.shape_cast %162 : vector<1x4x32x128xf32> to vector<4x32x128xf32>
    %164 = vector.extract_strided_slice %163 {offsets = [0, 0, 0], sizes = [4, 28, 128], strides = [1, 1, 1]} : vector<4x32x128xf32> to vector<4x28x128xf32>
    %165 = vector.extract_strided_slice %2 {offsets = [20, 0], sizes = [1, 128], strides = [1, 1]} : vector<25x128xf32> to vector<1x128xf32>
    %166 = vector.shape_cast %165 : vector<1x128xf32> to vector<128xf32>
    %167 = vector.shape_cast %166 : vector<128xf32> to vector<1x1x128xf32>
    %168 = vector.broadcast %167 : vector<1x1x128xf32> to vector<4x28x128xf32>
    %169 = arith.mulf %164, %168 : vector<4x28x128xf32>
    %170 = arith.addf %159, %169 : vector<4x28x128xf32>
    %171 = vector.extract_strided_slice %163 {offsets = [0, 1, 0], sizes = [4, 28, 128], strides = [1, 1, 1]} : vector<4x32x128xf32> to vector<4x28x128xf32>
    %172 = vector.extract_strided_slice %2 {offsets = [21, 0], sizes = [1, 128], strides = [1, 1]} : vector<25x128xf32> to vector<1x128xf32>
    %173 = vector.shape_cast %172 : vector<1x128xf32> to vector<128xf32>
    %174 = vector.shape_cast %173 : vector<128xf32> to vector<1x1x128xf32>
    %175 = vector.broadcast %174 : vector<1x1x128xf32> to vector<4x28x128xf32>
    %176 = arith.mulf %171, %175 : vector<4x28x128xf32>
    %177 = arith.addf %170, %176 : vector<4x28x128xf32>
    %178 = vector.extract_strided_slice %163 {offsets = [0, 2, 0], sizes = [4, 28, 128], strides = [1, 1, 1]} : vector<4x32x128xf32> to vector<4x28x128xf32>
    %179 = vector.extract_strided_slice %2 {offsets = [22, 0], sizes = [1, 128], strides = [1, 1]} : vector<25x128xf32> to vector<1x128xf32>
    %180 = vector.shape_cast %179 : vector<1x128xf32> to vector<128xf32>
    %181 = vector.shape_cast %180 : vector<128xf32> to vector<1x1x128xf32>
    %182 = vector.broadcast %181 : vector<1x1x128xf32> to vector<4x28x128xf32>
    %183 = arith.mulf %178, %182 : vector<4x28x128xf32>
    %184 = arith.addf %177, %183 : vector<4x28x128xf32>
    %185 = vector.extract_strided_slice %163 {offsets = [0, 3, 0], sizes = [4, 28, 128], strides = [1, 1, 1]} : vector<4x32x128xf32> to vector<4x28x128xf32>
    %186 = vector.extract_strided_slice %2 {offsets = [23, 0], sizes = [1, 128], strides = [1, 1]} : vector<25x128xf32> to vector<1x128xf32>
    %187 = vector.shape_cast %186 : vector<1x128xf32> to vector<128xf32>
    %188 = vector.shape_cast %187 : vector<128xf32> to vector<1x1x128xf32>
    %189 = vector.broadcast %188 : vector<1x1x128xf32> to vector<4x28x128xf32>
    %190 = arith.mulf %185, %189 : vector<4x28x128xf32>
    %191 = arith.addf %184, %190 : vector<4x28x128xf32>
    %192 = vector.extract_strided_slice %163 {offsets = [0, 4, 0], sizes = [4, 28, 128], strides = [1, 1, 1]} : vector<4x32x128xf32> to vector<4x28x128xf32>
    %193 = vector.extract_strided_slice %2 {offsets = [24, 0], sizes = [1, 128], strides = [1, 1]} : vector<25x128xf32> to vector<1x128xf32>
    %194 = vector.shape_cast %193 : vector<1x128xf32> to vector<128xf32>
    %195 = vector.shape_cast %194 : vector<128xf32> to vector<1x1x128xf32>
    %196 = vector.broadcast %195 : vector<1x1x128xf32> to vector<4x28x128xf32>
    %197 = arith.mulf %192, %196 : vector<4x28x128xf32>
    %198 = arith.addf %191, %197 : vector<4x28x128xf32>
    %c0_17 = arith.constant 0 : index
    %c0_18 = arith.constant 0 : index
    %c0_19 = arith.constant 0 : index
    %c0_20 = arith.constant 0 : index
    %199 = vector.load %arg4[%c0_17, %c0_18, %c0_19, %c0_20] : memref<1x4x28x432xf32, #tpu.memory_space<vmem>>, vector<1x4x28x128xf32>
    %200 = vector.shape_cast %199 : vector<1x4x28x128xf32> to vector<4x28x128xf32>
    %201 = vector.shape_cast %198 : vector<4x28x128xf32> to vector<1x4x28x128xf32>
    tpu.vector_store %arg4[%c0_17, %c0_18, %c0_19, %c0_20], %201 {strides = array<i32>} : memref<1x4x28x432xf32, #tpu.memory_space<vmem>>, vector<1x4x28x128xf32>,
    %c0_21 = arith.constant 0 : index
    %c128 = arith.constant 128 : index
    %202 = vector.load %arg3[%c0_21, %c128] : memref<25x432xf32, #tpu.memory_space<vmem>>, vector<25x128xf32>
    %cst_22 = arith.constant 0.000000e+00 : f32
    %203 = vector.broadcast %cst_22 : f32 to vector<4x28x128xf32>
    %c0_i32_23 = arith.constant 0 : i32
    %204 = arith.addi %1, %c0_i32_23 : i32
    %c0_24 = arith.constant 0 : index
    %205 = arith.index_cast %204 : i32 to index
    %c0_25 = arith.constant 0 : index
    %c128_26 = arith.constant 128 : index
    %206 = vector.load %arg2[%c0_24, %205, %c0_25, %c128_26] : memref<1x32x32x432xf32, #tpu.memory_space<vmem>>, vector<1x4x32x128xf32>
    %207 = vector.shape_cast %206 : vector<1x4x32x128xf32> to vector<4x32x128xf32>
    %208 = vector.extract_strided_slice %207 {offsets = [0, 0, 0], sizes = [4, 28, 128], strides = [1, 1, 1]} : vector<4x32x128xf32> to vector<4x28x128xf32>
    %209 = vector.extract_strided_slice %202 {offsets = [0, 0], sizes = [1, 128], strides = [1, 1]} : vector<25x128xf32> to vector<1x128xf32>
    %210 = vector.shape_cast %209 : vector<1x128xf32> to vector<128xf32>
    %211 = vector.shape_cast %210 : vector<128xf32> to vector<1x1x128xf32>
    %212 = vector.broadcast %211 : vector<1x1x128xf32> to vector<4x28x128xf32>
    %213 = arith.mulf %208, %212 : vector<4x28x128xf32>
    %214 = arith.addf %203, %213 : vector<4x28x128xf32>
    %215 = vector.extract_strided_slice %207 {offsets = [0, 1, 0], sizes = [4, 28, 128], strides = [1, 1, 1]} : vector<4x32x128xf32> to vector<4x28x128xf32>
    %216 = vector.extract_strided_slice %202 {offsets = [1, 0], sizes = [1, 128], strides = [1, 1]} : vector<25x128xf32> to vector<1x128xf32>
    %217 = vector.shape_cast %216 : vector<1x128xf32> to vector<128xf32>
    %218 = vector.shape_cast %217 : vector<128xf32> to vector<1x1x128xf32>
    %219 = vector.broadcast %218 : vector<1x1x128xf32> to vector<4x28x128xf32>
    %220 = arith.mulf %215, %219 : vector<4x28x128xf32>
    %221 = arith.addf %214, %220 : vector<4x28x128xf32>
    %222 = vector.extract_strided_slice %207 {offsets = [0, 2, 0], sizes = [4, 28, 128], strides = [1, 1, 1]} : vector<4x32x128xf32> to vector<4x28x128xf32>
    %223 = vector.extract_strided_slice %202 {offsets = [2, 0], sizes = [1, 128], strides = [1, 1]} : vector<25x128xf32> to vector<1x128xf32>
    %224 = vector.shape_cast %223 : vector<1x128xf32> to vector<128xf32>
    %225 = vector.shape_cast %224 : vector<128xf32> to vector<1x1x128xf32>
    %226 = vector.broadcast %225 : vector<1x1x128xf32> to vector<4x28x128xf32>
    %227 = arith.mulf %222, %226 : vector<4x28x128xf32>
    %228 = arith.addf %221, %227 : vector<4x28x128xf32>
    %229 = vector.extract_strided_slice %207 {offsets = [0, 3, 0], sizes = [4, 28, 128], strides = [1, 1, 1]} : vector<4x32x128xf32> to vector<4x28x128xf32>
    %230 = vector.extract_strided_slice %202 {offsets = [3, 0], sizes = [1, 128], strides = [1, 1]} : vector<25x128xf32> to vector<1x128xf32>
    %231 = vector.shape_cast %230 : vector<1x128xf32> to vector<128xf32>
    %232 = vector.shape_cast %231 : vector<128xf32> to vector<1x1x128xf32>
    %233 = vector.broadcast %232 : vector<1x1x128xf32> to vector<4x28x128xf32>
    %234 = arith.mulf %229, %233 : vector<4x28x128xf32>
    %235 = arith.addf %228, %234 : vector<4x28x128xf32>
    %236 = vector.extract_strided_slice %207 {offsets = [0, 4, 0], sizes = [4, 28, 128], strides = [1, 1, 1]} : vector<4x32x128xf32> to vector<4x28x128xf32>
    %237 = vector.extract_strided_slice %202 {offsets = [4, 0], sizes = [1, 128], strides = [1, 1]} : vector<25x128xf32> to vector<1x128xf32>
    %238 = vector.shape_cast %237 : vector<1x128xf32> to vector<128xf32>
    %239 = vector.shape_cast %238 : vector<128xf32> to vector<1x1x128xf32>
    %240 = vector.broadcast %239 : vector<1x1x128xf32> to vector<4x28x128xf32>
    %241 = arith.mulf %236, %240 : vector<4x28x128xf32>
    %242 = arith.addf %235, %241 : vector<4x28x128xf32>
    %c1_i32_27 = arith.constant 1 : i32
    %243 = arith.addi %1, %c1_i32_27 : i32
    %c0_28 = arith.constant 0 : index
    %244 = arith.index_cast %243 : i32 to index
    %c0_29 = arith.constant 0 : index
    %c128_30 = arith.constant 128 : index
    %245 = vector.load %arg2[%c0_28, %244, %c0_29, %c128_30] : memref<1x32x32x432xf32, #tpu.memory_space<vmem>>, vector<1x4x32x128xf32>
    %246 = vector.shape_cast %245 : vector<1x4x32x128xf32> to vector<4x32x128xf32>
    %247 = vector.extract_strided_slice %246 {offsets = [0, 0, 0], sizes = [4, 28, 128], strides = [1, 1, 1]} : vector<4x32x128xf32> to vector<4x28x128xf32>
    %248 = vector.extract_strided_slice %202 {offsets = [5, 0], sizes = [1, 128], strides = [1, 1]} : vector<25x128xf32> to vector<1x128xf32>
    %249 = vector.shape_cast %248 : vector<1x128xf32> to vector<128xf32>
    %250 = vector.shape_cast %249 : vector<128xf32> to vector<1x1x128xf32>
    %251 = vector.broadcast %250 : vector<1x1x128xf32> to vector<4x28x128xf32>
    %252 = arith.mulf %247, %251 : vector<4x28x128xf32>
    %253 = arith.addf %242, %252 : vector<4x28x128xf32>
    %254 = vector.extract_strided_slice %246 {offsets = [0, 1, 0], sizes = [4, 28, 128], strides = [1, 1, 1]} : vector<4x32x128xf32> to vector<4x28x128xf32>
    %255 = vector.extract_strided_slice %202 {offsets = [6, 0], sizes = [1, 128], strides = [1, 1]} : vector<25x128xf32> to vector<1x128xf32>
    %256 = vector.shape_cast %255 : vector<1x128xf32> to vector<128xf32>
    %257 = vector.shape_cast %256 : vector<128xf32> to vector<1x1x128xf32>
    %258 = vector.broadcast %257 : vector<1x1x128xf32> to vector<4x28x128xf32>
    %259 = arith.mulf %254, %258 : vector<4x28x128xf32>
    %260 = arith.addf %253, %259 : vector<4x28x128xf32>
    %261 = vector.extract_strided_slice %246 {offsets = [0, 2, 0], sizes = [4, 28, 128], strides = [1, 1, 1]} : vector<4x32x128xf32> to vector<4x28x128xf32>
    %262 = vector.extract_strided_slice %202 {offsets = [7, 0], sizes = [1, 128], strides = [1, 1]} : vector<25x128xf32> to vector<1x128xf32>
    %263 = vector.shape_cast %262 : vector<1x128xf32> to vector<128xf32>
    %264 = vector.shape_cast %263 : vector<128xf32> to vector<1x1x128xf32>
    %265 = vector.broadcast %264 : vector<1x1x128xf32> to vector<4x28x128xf32>
    %266 = arith.mulf %261, %265 : vector<4x28x128xf32>
    %267 = arith.addf %260, %266 : vector<4x28x128xf32>
    %268 = vector.extract_strided_slice %246 {offsets = [0, 3, 0], sizes = [4, 28, 128], strides = [1, 1, 1]} : vector<4x32x128xf32> to vector<4x28x128xf32>
    %269 = vector.extract_strided_slice %202 {offsets = [8, 0], sizes = [1, 128], strides = [1, 1]} : vector<25x128xf32> to vector<1x128xf32>
    %270 = vector.shape_cast %269 : vector<1x128xf32> to vector<128xf32>
    %271 = vector.shape_cast %270 : vector<128xf32> to vector<1x1x128xf32>
    %272 = vector.broadcast %271 : vector<1x1x128xf32> to vector<4x28x128xf32>
    %273 = arith.mulf %268, %272 : vector<4x28x128xf32>
    %274 = arith.addf %267, %273 : vector<4x28x128xf32>
    %275 = vector.extract_strided_slice %246 {offsets = [0, 4, 0], sizes = [4, 28, 128], strides = [1, 1, 1]} : vector<4x32x128xf32> to vector<4x28x128xf32>
    %276 = vector.extract_strided_slice %202 {offsets = [9, 0], sizes = [1, 128], strides = [1, 1]} : vector<25x128xf32> to vector<1x128xf32>
    %277 = vector.shape_cast %276 : vector<1x128xf32> to vector<128xf32>
    %278 = vector.shape_cast %277 : vector<128xf32> to vector<1x1x128xf32>
    %279 = vector.broadcast %278 : vector<1x1x128xf32> to vector<4x28x128xf32>
    %280 = arith.mulf %275, %279 : vector<4x28x128xf32>
    %281 = arith.addf %274, %280 : vector<4x28x128xf32>
    %c2_i32_31 = arith.constant 2 : i32
    %282 = arith.addi %1, %c2_i32_31 : i32
    %c0_32 = arith.constant 0 : index
    %283 = arith.index_cast %282 : i32 to index
    %c0_33 = arith.constant 0 : index
    %c128_34 = arith.constant 128 : index
    %284 = vector.load %arg2[%c0_32, %283, %c0_33, %c128_34] : memref<1x32x32x432xf32, #tpu.memory_space<vmem>>, vector<1x4x32x128xf32>
    %285 = vector.shape_cast %284 : vector<1x4x32x128xf32> to vector<4x32x128xf32>
    %286 = vector.extract_strided_slice %285 {offsets = [0, 0, 0], sizes = [4, 28, 128], strides = [1, 1, 1]} : vector<4x32x128xf32> to vector<4x28x128xf32>
    %287 = vector.extract_strided_slice %202 {offsets = [10, 0], sizes = [1, 128], strides = [1, 1]} : vector<25x128xf32> to vector<1x128xf32>
    %288 = vector.shape_cast %287 : vector<1x128xf32> to vector<128xf32>
    %289 = vector.shape_cast %288 : vector<128xf32> to vector<1x1x128xf32>
    %290 = vector.broadcast %289 : vector<1x1x128xf32> to vector<4x28x128xf32>
    %291 = arith.mulf %286, %290 : vector<4x28x128xf32>
    %292 = arith.addf %281, %291 : vector<4x28x128xf32>
    %293 = vector.extract_strided_slice %285 {offsets = [0, 1, 0], sizes = [4, 28, 128], strides = [1, 1, 1]} : vector<4x32x128xf32> to vector<4x28x128xf32>
    %294 = vector.extract_strided_slice %202 {offsets = [11, 0], sizes = [1, 128], strides = [1, 1]} : vector<25x128xf32> to vector<1x128xf32>
    %295 = vector.shape_cast %294 : vector<1x128xf32> to vector<128xf32>
    %296 = vector.shape_cast %295 : vector<128xf32> to vector<1x1x128xf32>
    %297 = vector.broadcast %296 : vector<1x1x128xf32> to vector<4x28x128xf32>
    %298 = arith.mulf %293, %297 : vector<4x28x128xf32>
    %299 = arith.addf %292, %298 : vector<4x28x128xf32>
    %300 = vector.extract_strided_slice %285 {offsets = [0, 2, 0], sizes = [4, 28, 128], strides = [1, 1, 1]} : vector<4x32x128xf32> to vector<4x28x128xf32>
    %301 = vector.extract_strided_slice %202 {offsets = [12, 0], sizes = [1, 128], strides = [1, 1]} : vector<25x128xf32> to vector<1x128xf32>
    %302 = vector.shape_cast %301 : vector<1x128xf32> to vector<128xf32>
    %303 = vector.shape_cast %302 : vector<128xf32> to vector<1x1x128xf32>
    %304 = vector.broadcast %303 : vector<1x1x128xf32> to vector<4x28x128xf32>
    %305 = arith.mulf %300, %304 : vector<4x28x128xf32>
    %306 = arith.addf %299, %305 : vector<4x28x128xf32>
    %307 = vector.extract_strided_slice %285 {offsets = [0, 3, 0], sizes = [4, 28, 128], strides = [1, 1, 1]} : vector<4x32x128xf32> to vector<4x28x128xf32>
    %308 = vector.extract_strided_slice %202 {offsets = [13, 0], sizes = [1, 128], strides = [1, 1]} : vector<25x128xf32> to vector<1x128xf32>
    %309 = vector.shape_cast %308 : vector<1x128xf32> to vector<128xf32>
    %310 = vector.shape_cast %309 : vector<128xf32> to vector<1x1x128xf32>
    %311 = vector.broadcast %310 : vector<1x1x128xf32> to vector<4x28x128xf32>
    %312 = arith.mulf %307, %311 : vector<4x28x128xf32>
    %313 = arith.addf %306, %312 : vector<4x28x128xf32>
    %314 = vector.extract_strided_slice %285 {offsets = [0, 4, 0], sizes = [4, 28, 128], strides = [1, 1, 1]} : vector<4x32x128xf32> to vector<4x28x128xf32>
    %315 = vector.extract_strided_slice %202 {offsets = [14, 0], sizes = [1, 128], strides = [1, 1]} : vector<25x128xf32> to vector<1x128xf32>
    %316 = vector.shape_cast %315 : vector<1x128xf32> to vector<128xf32>
    %317 = vector.shape_cast %316 : vector<128xf32> to vector<1x1x128xf32>
    %318 = vector.broadcast %317 : vector<1x1x128xf32> to vector<4x28x128xf32>
    %319 = arith.mulf %314, %318 : vector<4x28x128xf32>
    %320 = arith.addf %313, %319 : vector<4x28x128xf32>
    %c3_i32_35 = arith.constant 3 : i32
    %321 = arith.addi %1, %c3_i32_35 : i32
    %c0_36 = arith.constant 0 : index
    %322 = arith.index_cast %321 : i32 to index
    %c0_37 = arith.constant 0 : index
    %c128_38 = arith.constant 128 : index
    %323 = vector.load %arg2[%c0_36, %322, %c0_37, %c128_38] : memref<1x32x32x432xf32, #tpu.memory_space<vmem>>, vector<1x4x32x128xf32>
    %324 = vector.shape_cast %323 : vector<1x4x32x128xf32> to vector<4x32x128xf32>
    %325 = vector.extract_strided_slice %324 {offsets = [0, 0, 0], sizes = [4, 28, 128], strides = [1, 1, 1]} : vector<4x32x128xf32> to vector<4x28x128xf32>
    %326 = vector.extract_strided_slice %202 {offsets = [15, 0], sizes = [1, 128], strides = [1, 1]} : vector<25x128xf32> to vector<1x128xf32>
    %327 = vector.shape_cast %326 : vector<1x128xf32> to vector<128xf32>
    %328 = vector.shape_cast %327 : vector<128xf32> to vector<1x1x128xf32>
    %329 = vector.broadcast %328 : vector<1x1x128xf32> to vector<4x28x128xf32>
    %330 = arith.mulf %325, %329 : vector<4x28x128xf32>
    %331 = arith.addf %320, %330 : vector<4x28x128xf32>
    %332 = vector.extract_strided_slice %324 {offsets = [0, 1, 0], sizes = [4, 28, 128], strides = [1, 1, 1]} : vector<4x32x128xf32> to vector<4x28x128xf32>
    %333 = vector.extract_strided_slice %202 {offsets = [16, 0], sizes = [1, 128], strides = [1, 1]} : vector<25x128xf32> to vector<1x128xf32>
    %334 = vector.shape_cast %333 : vector<1x128xf32> to vector<128xf32>
    %335 = vector.shape_cast %334 : vector<128xf32> to vector<1x1x128xf32>
    %336 = vector.broadcast %335 : vector<1x1x128xf32> to vector<4x28x128xf32>
    %337 = arith.mulf %332, %336 : vector<4x28x128xf32>
    %338 = arith.addf %331, %337 : vector<4x28x128xf32>
    %339 = vector.extract_strided_slice %324 {offsets = [0, 2, 0], sizes = [4, 28, 128], strides = [1, 1, 1]} : vector<4x32x128xf32> to vector<4x28x128xf32>
    %340 = vector.extract_strided_slice %202 {offsets = [17, 0], sizes = [1, 128], strides = [1, 1]} : vector<25x128xf32> to vector<1x128xf32>
    %341 = vector.shape_cast %340 : vector<1x128xf32> to vector<128xf32>
    %342 = vector.shape_cast %341 : vector<128xf32> to vector<1x1x128xf32>
    %343 = vector.broadcast %342 : vector<1x1x128xf32> to vector<4x28x128xf32>
    %344 = arith.mulf %339, %343 : vector<4x28x128xf32>
    %345 = arith.addf %338, %344 : vector<4x28x128xf32>
    %346 = vector.extract_strided_slice %324 {offsets = [0, 3, 0], sizes = [4, 28, 128], strides = [1, 1, 1]} : vector<4x32x128xf32> to vector<4x28x128xf32>
    %347 = vector.extract_strided_slice %202 {offsets = [18, 0], sizes = [1, 128], strides = [1, 1]} : vector<25x128xf32> to vector<1x128xf32>
    %348 = vector.shape_cast %347 : vector<1x128xf32> to vector<128xf32>
    %349 = vector.shape_cast %348 : vector<128xf32> to vector<1x1x128xf32>
    %350 = vector.broadcast %349 : vector<1x1x128xf32> to vector<4x28x128xf32>
    %351 = arith.mulf %346, %350 : vector<4x28x128xf32>
    %352 = arith.addf %345, %351 : vector<4x28x128xf32>
    %353 = vector.extract_strided_slice %324 {offsets = [0, 4, 0], sizes = [4, 28, 128], strides = [1, 1, 1]} : vector<4x32x128xf32> to vector<4x28x128xf32>
    %354 = vector.extract_strided_slice %202 {offsets = [19, 0], sizes = [1, 128], strides = [1, 1]} : vector<25x128xf32> to vector<1x128xf32>
    %355 = vector.shape_cast %354 : vector<1x128xf32> to vector<128xf32>
    %356 = vector.shape_cast %355 : vector<128xf32> to vector<1x1x128xf32>
    %357 = vector.broadcast %356 : vector<1x1x128xf32> to vector<4x28x128xf32>
    %358 = arith.mulf %353, %357 : vector<4x28x128xf32>
    %359 = arith.addf %352, %358 : vector<4x28x128xf32>
    %c4_i32_39 = arith.constant 4 : i32
    %360 = arith.addi %1, %c4_i32_39 : i32
    %c0_40 = arith.constant 0 : index
    %361 = arith.index_cast %360 : i32 to index
    %c0_41 = arith.constant 0 : index
    %c128_42 = arith.constant 128 : index
    %362 = vector.load %arg2[%c0_40, %361, %c0_41, %c128_42] : memref<1x32x32x432xf32, #tpu.memory_space<vmem>>, vector<1x4x32x128xf32>
    %363 = vector.shape_cast %362 : vector<1x4x32x128xf32> to vector<4x32x128xf32>
    %364 = vector.extract_strided_slice %363 {offsets = [0, 0, 0], sizes = [4, 28, 128], strides = [1, 1, 1]} : vector<4x32x128xf32> to vector<4x28x128xf32>
    %365 = vector.extract_strided_slice %202 {offsets = [20, 0], sizes = [1, 128], strides = [1, 1]} : vector<25x128xf32> to vector<1x128xf32>
    %366 = vector.shape_cast %365 : vector<1x128xf32> to vector<128xf32>
    %367 = vector.shape_cast %366 : vector<128xf32> to vector<1x1x128xf32>
    %368 = vector.broadcast %367 : vector<1x1x128xf32> to vector<4x28x128xf32>
    %369 = arith.mulf %364, %368 : vector<4x28x128xf32>
    %370 = arith.addf %359, %369 : vector<4x28x128xf32>
    %371 = vector.extract_strided_slice %363 {offsets = [0, 1, 0], sizes = [4, 28, 128], strides = [1, 1, 1]} : vector<4x32x128xf32> to vector<4x28x128xf32>
    %372 = vector.extract_strided_slice %202 {offsets = [21, 0], sizes = [1, 128], strides = [1, 1]} : vector<25x128xf32> to vector<1x128xf32>
    %373 = vector.shape_cast %372 : vector<1x128xf32> to vector<128xf32>
    %374 = vector.shape_cast %373 : vector<128xf32> to vector<1x1x128xf32>
    %375 = vector.broadcast %374 : vector<1x1x128xf32> to vector<4x28x128xf32>
    %376 = arith.mulf %371, %375 : vector<4x28x128xf32>
    %377 = arith.addf %370, %376 : vector<4x28x128xf32>
    %378 = vector.extract_strided_slice %363 {offsets = [0, 2, 0], sizes = [4, 28, 128], strides = [1, 1, 1]} : vector<4x32x128xf32> to vector<4x28x128xf32>
    %379 = vector.extract_strided_slice %202 {offsets = [22, 0], sizes = [1, 128], strides = [1, 1]} : vector<25x128xf32> to vector<1x128xf32>
    %380 = vector.shape_cast %379 : vector<1x128xf32> to vector<128xf32>
    %381 = vector.shape_cast %380 : vector<128xf32> to vector<1x1x128xf32>
    %382 = vector.broadcast %381 : vector<1x1x128xf32> to vector<4x28x128xf32>
    %383 = arith.mulf %378, %382 : vector<4x28x128xf32>
    %384 = arith.addf %377, %383 : vector<4x28x128xf32>
    %385 = vector.extract_strided_slice %363 {offsets = [0, 3, 0], sizes = [4, 28, 128], strides = [1, 1, 1]} : vector<4x32x128xf32> to vector<4x28x128xf32>
    %386 = vector.extract_strided_slice %202 {offsets = [23, 0], sizes = [1, 128], strides = [1, 1]} : vector<25x128xf32> to vector<1x128xf32>
    %387 = vector.shape_cast %386 : vector<1x128xf32> to vector<128xf32>
    %388 = vector.shape_cast %387 : vector<128xf32> to vector<1x1x128xf32>
    %389 = vector.broadcast %388 : vector<1x1x128xf32> to vector<4x28x128xf32>
    %390 = arith.mulf %385, %389 : vector<4x28x128xf32>
    %391 = arith.addf %384, %390 : vector<4x28x128xf32>
    %392 = vector.extract_strided_slice %363 {offsets = [0, 4, 0], sizes = [4, 28, 128], strides = [1, 1, 1]} : vector<4x32x128xf32> to vector<4x28x128xf32>
    %393 = vector.extract_strided_slice %202 {offsets = [24, 0], sizes = [1, 128], strides = [1, 1]} : vector<25x128xf32> to vector<1x128xf32>
    %394 = vector.shape_cast %393 : vector<1x128xf32> to vector<128xf32>
    %395 = vector.shape_cast %394 : vector<128xf32> to vector<1x1x128xf32>
    %396 = vector.broadcast %395 : vector<1x1x128xf32> to vector<4x28x128xf32>
    %397 = arith.mulf %392, %396 : vector<4x28x128xf32>
    %398 = arith.addf %391, %397 : vector<4x28x128xf32>
    %c0_43 = arith.constant 0 : index
    %c0_44 = arith.constant 0 : index
    %c0_45 = arith.constant 0 : index
    %c128_46 = arith.constant 128 : index
    %399 = vector.load %arg4[%c0_43, %c0_44, %c0_45, %c128_46] : memref<1x4x28x432xf32, #tpu.memory_space<vmem>>, vector<1x4x28x128xf32>
    %400 = vector.shape_cast %399 : vector<1x4x28x128xf32> to vector<4x28x128xf32>
    %401 = vector.shape_cast %398 : vector<4x28x128xf32> to vector<1x4x28x128xf32>
    tpu.vector_store %arg4[%c0_43, %c0_44, %c0_45, %c128_46], %401 {strides = array<i32>} : memref<1x4x28x432xf32, #tpu.memory_space<vmem>>, vector<1x4x28x128xf32>,
    %c0_47 = arith.constant 0 : index
    %c256 = arith.constant 256 : index
    %402 = vector.load %arg3[%c0_47, %c256] : memref<25x432xf32, #tpu.memory_space<vmem>>, vector<25x128xf32>
    %cst_48 = arith.constant 0.000000e+00 : f32
    %403 = vector.broadcast %cst_48 : f32 to vector<4x28x128xf32>
    %c0_i32_49 = arith.constant 0 : i32
    %404 = arith.addi %1, %c0_i32_49 : i32
    %c0_50 = arith.constant 0 : index
    %405 = arith.index_cast %404 : i32 to index
    %c0_51 = arith.constant 0 : index
    %c256_52 = arith.constant 256 : index
    %406 = vector.load %arg2[%c0_50, %405, %c0_51, %c256_52] : memref<1x32x32x432xf32, #tpu.memory_space<vmem>>, vector<1x4x32x128xf32>
    %407 = vector.shape_cast %406 : vector<1x4x32x128xf32> to vector<4x32x128xf32>
    %408 = vector.extract_strided_slice %407 {offsets = [0, 0, 0], sizes = [4, 28, 128], strides = [1, 1, 1]} : vector<4x32x128xf32> to vector<4x28x128xf32>
    %409 = vector.extract_strided_slice %402 {offsets = [0, 0], sizes = [1, 128], strides = [1, 1]} : vector<25x128xf32> to vector<1x128xf32>
    %410 = vector.shape_cast %409 : vector<1x128xf32> to vector<128xf32>
    %411 = vector.shape_cast %410 : vector<128xf32> to vector<1x1x128xf32>
    %412 = vector.broadcast %411 : vector<1x1x128xf32> to vector<4x28x128xf32>
    %413 = arith.mulf %408, %412 : vector<4x28x128xf32>
    %414 = arith.addf %403, %413 : vector<4x28x128xf32>
    %415 = vector.extract_strided_slice %407 {offsets = [0, 1, 0], sizes = [4, 28, 128], strides = [1, 1, 1]} : vector<4x32x128xf32> to vector<4x28x128xf32>
    %416 = vector.extract_strided_slice %402 {offsets = [1, 0], sizes = [1, 128], strides = [1, 1]} : vector<25x128xf32> to vector<1x128xf32>
    %417 = vector.shape_cast %416 : vector<1x128xf32> to vector<128xf32>
    %418 = vector.shape_cast %417 : vector<128xf32> to vector<1x1x128xf32>
    %419 = vector.broadcast %418 : vector<1x1x128xf32> to vector<4x28x128xf32>
    %420 = arith.mulf %415, %419 : vector<4x28x128xf32>
    %421 = arith.addf %414, %420 : vector<4x28x128xf32>
    %422 = vector.extract_strided_slice %407 {offsets = [0, 2, 0], sizes = [4, 28, 128], strides = [1, 1, 1]} : vector<4x32x128xf32> to vector<4x28x128xf32>
    %423 = vector.extract_strided_slice %402 {offsets = [2, 0], sizes = [1, 128], strides = [1, 1]} : vector<25x128xf32> to vector<1x128xf32>
    %424 = vector.shape_cast %423 : vector<1x128xf32> to vector<128xf32>
    %425 = vector.shape_cast %424 : vector<128xf32> to vector<1x1x128xf32>
    %426 = vector.broadcast %425 : vector<1x1x128xf32> to vector<4x28x128xf32>
    %427 = arith.mulf %422, %426 : vector<4x28x128xf32>
    %428 = arith.addf %421, %427 : vector<4x28x128xf32>
    %429 = vector.extract_strided_slice %407 {offsets = [0, 3, 0], sizes = [4, 28, 128], strides = [1, 1, 1]} : vector<4x32x128xf32> to vector<4x28x128xf32>
    %430 = vector.extract_strided_slice %402 {offsets = [3, 0], sizes = [1, 128], strides = [1, 1]} : vector<25x128xf32> to vector<1x128xf32>
    %431 = vector.shape_cast %430 : vector<1x128xf32> to vector<128xf32>
    %432 = vector.shape_cast %431 : vector<128xf32> to vector<1x1x128xf32>
    %433 = vector.broadcast %432 : vector<1x1x128xf32> to vector<4x28x128xf32>
    %434 = arith.mulf %429, %433 : vector<4x28x128xf32>
    %435 = arith.addf %428, %434 : vector<4x28x128xf32>
    %436 = vector.extract_strided_slice %407 {offsets = [0, 4, 0], sizes = [4, 28, 128], strides = [1, 1, 1]} : vector<4x32x128xf32> to vector<4x28x128xf32>
    %437 = vector.extract_strided_slice %402 {offsets = [4, 0], sizes = [1, 128], strides = [1, 1]} : vector<25x128xf32> to vector<1x128xf32>
    %438 = vector.shape_cast %437 : vector<1x128xf32> to vector<128xf32>
    %439 = vector.shape_cast %438 : vector<128xf32> to vector<1x1x128xf32>
    %440 = vector.broadcast %439 : vector<1x1x128xf32> to vector<4x28x128xf32>
    %441 = arith.mulf %436, %440 : vector<4x28x128xf32>
    %442 = arith.addf %435, %441 : vector<4x28x128xf32>
    %c1_i32_53 = arith.constant 1 : i32
    %443 = arith.addi %1, %c1_i32_53 : i32
    %c0_54 = arith.constant 0 : index
    %444 = arith.index_cast %443 : i32 to index
    %c0_55 = arith.constant 0 : index
    %c256_56 = arith.constant 256 : index
    %445 = vector.load %arg2[%c0_54, %444, %c0_55, %c256_56] : memref<1x32x32x432xf32, #tpu.memory_space<vmem>>, vector<1x4x32x128xf32>
    %446 = vector.shape_cast %445 : vector<1x4x32x128xf32> to vector<4x32x128xf32>
    %447 = vector.extract_strided_slice %446 {offsets = [0, 0, 0], sizes = [4, 28, 128], strides = [1, 1, 1]} : vector<4x32x128xf32> to vector<4x28x128xf32>
    %448 = vector.extract_strided_slice %402 {offsets = [5, 0], sizes = [1, 128], strides = [1, 1]} : vector<25x128xf32> to vector<1x128xf32>
    %449 = vector.shape_cast %448 : vector<1x128xf32> to vector<128xf32>
    %450 = vector.shape_cast %449 : vector<128xf32> to vector<1x1x128xf32>
    %451 = vector.broadcast %450 : vector<1x1x128xf32> to vector<4x28x128xf32>
    %452 = arith.mulf %447, %451 : vector<4x28x128xf32>
    %453 = arith.addf %442, %452 : vector<4x28x128xf32>
    %454 = vector.extract_strided_slice %446 {offsets = [0, 1, 0], sizes = [4, 28, 128], strides = [1, 1, 1]} : vector<4x32x128xf32> to vector<4x28x128xf32>
    %455 = vector.extract_strided_slice %402 {offsets = [6, 0], sizes = [1, 128], strides = [1, 1]} : vector<25x128xf32> to vector<1x128xf32>
    %456 = vector.shape_cast %455 : vector<1x128xf32> to vector<128xf32>
    %457 = vector.shape_cast %456 : vector<128xf32> to vector<1x1x128xf32>
    %458 = vector.broadcast %457 : vector<1x1x128xf32> to vector<4x28x128xf32>
    %459 = arith.mulf %454, %458 : vector<4x28x128xf32>
    %460 = arith.addf %453, %459 : vector<4x28x128xf32>
    %461 = vector.extract_strided_slice %446 {offsets = [0, 2, 0], sizes = [4, 28, 128], strides = [1, 1, 1]} : vector<4x32x128xf32> to vector<4x28x128xf32>
    %462 = vector.extract_strided_slice %402 {offsets = [7, 0], sizes = [1, 128], strides = [1, 1]} : vector<25x128xf32> to vector<1x128xf32>
    %463 = vector.shape_cast %462 : vector<1x128xf32> to vector<128xf32>
    %464 = vector.shape_cast %463 : vector<128xf32> to vector<1x1x128xf32>
    %465 = vector.broadcast %464 : vector<1x1x128xf32> to vector<4x28x128xf32>
    %466 = arith.mulf %461, %465 : vector<4x28x128xf32>
    %467 = arith.addf %460, %466 : vector<4x28x128xf32>
    %468 = vector.extract_strided_slice %446 {offsets = [0, 3, 0], sizes = [4, 28, 128], strides = [1, 1, 1]} : vector<4x32x128xf32> to vector<4x28x128xf32>
    %469 = vector.extract_strided_slice %402 {offsets = [8, 0], sizes = [1, 128], strides = [1, 1]} : vector<25x128xf32> to vector<1x128xf32>
    %470 = vector.shape_cast %469 : vector<1x128xf32> to vector<128xf32>
    %471 = vector.shape_cast %470 : vector<128xf32> to vector<1x1x128xf32>
    %472 = vector.broadcast %471 : vector<1x1x128xf32> to vector<4x28x128xf32>
    %473 = arith.mulf %468, %472 : vector<4x28x128xf32>
    %474 = arith.addf %467, %473 : vector<4x28x128xf32>
    %475 = vector.extract_strided_slice %446 {offsets = [0, 4, 0], sizes = [4, 28, 128], strides = [1, 1, 1]} : vector<4x32x128xf32> to vector<4x28x128xf32>
    %476 = vector.extract_strided_slice %402 {offsets = [9, 0], sizes = [1, 128], strides = [1, 1]} : vector<25x128xf32> to vector<1x128xf32>
    %477 = vector.shape_cast %476 : vector<1x128xf32> to vector<128xf32>
    %478 = vector.shape_cast %477 : vector<128xf32> to vector<1x1x128xf32>
    %479 = vector.broadcast %478 : vector<1x1x128xf32> to vector<4x28x128xf32>
    %480 = arith.mulf %475, %479 : vector<4x28x128xf32>
    %481 = arith.addf %474, %480 : vector<4x28x128xf32>
    %c2_i32_57 = arith.constant 2 : i32
    %482 = arith.addi %1, %c2_i32_57 : i32
    %c0_58 = arith.constant 0 : index
    %483 = arith.index_cast %482 : i32 to index
    %c0_59 = arith.constant 0 : index
    %c256_60 = arith.constant 256 : index
    %484 = vector.load %arg2[%c0_58, %483, %c0_59, %c256_60] : memref<1x32x32x432xf32, #tpu.memory_space<vmem>>, vector<1x4x32x128xf32>
    %485 = vector.shape_cast %484 : vector<1x4x32x128xf32> to vector<4x32x128xf32>
    %486 = vector.extract_strided_slice %485 {offsets = [0, 0, 0], sizes = [4, 28, 128], strides = [1, 1, 1]} : vector<4x32x128xf32> to vector<4x28x128xf32>
    %487 = vector.extract_strided_slice %402 {offsets = [10, 0], sizes = [1, 128], strides = [1, 1]} : vector<25x128xf32> to vector<1x128xf32>
    %488 = vector.shape_cast %487 : vector<1x128xf32> to vector<128xf32>
    %489 = vector.shape_cast %488 : vector<128xf32> to vector<1x1x128xf32>
    %490 = vector.broadcast %489 : vector<1x1x128xf32> to vector<4x28x128xf32>
    %491 = arith.mulf %486, %490 : vector<4x28x128xf32>
    %492 = arith.addf %481, %491 : vector<4x28x128xf32>
    %493 = vector.extract_strided_slice %485 {offsets = [0, 1, 0], sizes = [4, 28, 128], strides = [1, 1, 1]} : vector<4x32x128xf32> to vector<4x28x128xf32>
    %494 = vector.extract_strided_slice %402 {offsets = [11, 0], sizes = [1, 128], strides = [1, 1]} : vector<25x128xf32> to vector<1x128xf32>
    %495 = vector.shape_cast %494 : vector<1x128xf32> to vector<128xf32>
    %496 = vector.shape_cast %495 : vector<128xf32> to vector<1x1x128xf32>
    %497 = vector.broadcast %496 : vector<1x1x128xf32> to vector<4x28x128xf32>
    %498 = arith.mulf %493, %497 : vector<4x28x128xf32>
    %499 = arith.addf %492, %498 : vector<4x28x128xf32>
    %500 = vector.extract_strided_slice %485 {offsets = [0, 2, 0], sizes = [4, 28, 128], strides = [1, 1, 1]} : vector<4x32x128xf32> to vector<4x28x128xf32>
    %501 = vector.extract_strided_slice %402 {offsets = [12, 0], sizes = [1, 128], strides = [1, 1]} : vector<25x128xf32> to vector<1x128xf32>
    %502 = vector.shape_cast %501 : vector<1x128xf32> to vector<128xf32>
    %503 = vector.shape_cast %502 : vector<128xf32> to vector<1x1x128xf32>
    %504 = vector.broadcast %503 : vector<1x1x128xf32> to vector<4x28x128xf32>
    %505 = arith.mulf %500, %504 : vector<4x28x128xf32>
    %506 = arith.addf %499, %505 : vector<4x28x128xf32>
    %507 = vector.extract_strided_slice %485 {offsets = [0, 3, 0], sizes = [4, 28, 128], strides = [1, 1, 1]} : vector<4x32x128xf32> to vector<4x28x128xf32>
    %508 = vector.extract_strided_slice %402 {offsets = [13, 0], sizes = [1, 128], strides = [1, 1]} : vector<25x128xf32> to vector<1x128xf32>
    %509 = vector.shape_cast %508 : vector<1x128xf32> to vector<128xf32>
    %510 = vector.shape_cast %509 : vector<128xf32> to vector<1x1x128xf32>
    %511 = vector.broadcast %510 : vector<1x1x128xf32> to vector<4x28x128xf32>
    %512 = arith.mulf %507, %511 : vector<4x28x128xf32>
    %513 = arith.addf %506, %512 : vector<4x28x128xf32>
    %514 = vector.extract_strided_slice %485 {offsets = [0, 4, 0], sizes = [4, 28, 128], strides = [1, 1, 1]} : vector<4x32x128xf32> to vector<4x28x128xf32>
    %515 = vector.extract_strided_slice %402 {offsets = [14, 0], sizes = [1, 128], strides = [1, 1]} : vector<25x128xf32> to vector<1x128xf32>
    %516 = vector.shape_cast %515 : vector<1x128xf32> to vector<128xf32>
    %517 = vector.shape_cast %516 : vector<128xf32> to vector<1x1x128xf32>
    %518 = vector.broadcast %517 : vector<1x1x128xf32> to vector<4x28x128xf32>
    %519 = arith.mulf %514, %518 : vector<4x28x128xf32>
    %520 = arith.addf %513, %519 : vector<4x28x128xf32>
    %c3_i32_61 = arith.constant 3 : i32
    %521 = arith.addi %1, %c3_i32_61 : i32
    %c0_62 = arith.constant 0 : index
    %522 = arith.index_cast %521 : i32 to index
    %c0_63 = arith.constant 0 : index
    %c256_64 = arith.constant 256 : index
    %523 = vector.load %arg2[%c0_62, %522, %c0_63, %c256_64] : memref<1x32x32x432xf32, #tpu.memory_space<vmem>>, vector<1x4x32x128xf32>
    %524 = vector.shape_cast %523 : vector<1x4x32x128xf32> to vector<4x32x128xf32>
    %525 = vector.extract_strided_slice %524 {offsets = [0, 0, 0], sizes = [4, 28, 128], strides = [1, 1, 1]} : vector<4x32x128xf32> to vector<4x28x128xf32>
    %526 = vector.extract_strided_slice %402 {offsets = [15, 0], sizes = [1, 128], strides = [1, 1]} : vector<25x128xf32> to vector<1x128xf32>
    %527 = vector.shape_cast %526 : vector<1x128xf32> to vector<128xf32>
    %528 = vector.shape_cast %527 : vector<128xf32> to vector<1x1x128xf32>
    %529 = vector.broadcast %528 : vector<1x1x128xf32> to vector<4x28x128xf32>
    %530 = arith.mulf %525, %529 : vector<4x28x128xf32>
    %531 = arith.addf %520, %530 : vector<4x28x128xf32>
    %532 = vector.extract_strided_slice %524 {offsets = [0, 1, 0], sizes = [4, 28, 128], strides = [1, 1, 1]} : vector<4x32x128xf32> to vector<4x28x128xf32>
    %533 = vector.extract_strided_slice %402 {offsets = [16, 0], sizes = [1, 128], strides = [1, 1]} : vector<25x128xf32> to vector<1x128xf32>
    %534 = vector.shape_cast %533 : vector<1x128xf32> to vector<128xf32>
    %535 = vector.shape_cast %534 : vector<128xf32> to vector<1x1x128xf32>
    %536 = vector.broadcast %535 : vector<1x1x128xf32> to vector<4x28x128xf32>
    %537 = arith.mulf %532, %536 : vector<4x28x128xf32>
    %538 = arith.addf %531, %537 : vector<4x28x128xf32>
    %539 = vector.extract_strided_slice %524 {offsets = [0, 2, 0], sizes = [4, 28, 128], strides = [1, 1, 1]} : vector<4x32x128xf32> to vector<4x28x128xf32>
    %540 = vector.extract_strided_slice %402 {offsets = [17, 0], sizes = [1, 128], strides = [1, 1]} : vector<25x128xf32> to vector<1x128xf32>
    %541 = vector.shape_cast %540 : vector<1x128xf32> to vector<128xf32>
    %542 = vector.shape_cast %541 : vector<128xf32> to vector<1x1x128xf32>
    %543 = vector.broadcast %542 : vector<1x1x128xf32> to vector<4x28x128xf32>
    %544 = arith.mulf %539, %543 : vector<4x28x128xf32>
    %545 = arith.addf %538, %544 : vector<4x28x128xf32>
    %546 = vector.extract_strided_slice %524 {offsets = [0, 3, 0], sizes = [4, 28, 128], strides = [1, 1, 1]} : vector<4x32x128xf32> to vector<4x28x128xf32>
    %547 = vector.extract_strided_slice %402 {offsets = [18, 0], sizes = [1, 128], strides = [1, 1]} : vector<25x128xf32> to vector<1x128xf32>
    %548 = vector.shape_cast %547 : vector<1x128xf32> to vector<128xf32>
    %549 = vector.shape_cast %548 : vector<128xf32> to vector<1x1x128xf32>
    %550 = vector.broadcast %549 : vector<1x1x128xf32> to vector<4x28x128xf32>
    %551 = arith.mulf %546, %550 : vector<4x28x128xf32>
    %552 = arith.addf %545, %551 : vector<4x28x128xf32>
    %553 = vector.extract_strided_slice %524 {offsets = [0, 4, 0], sizes = [4, 28, 128], strides = [1, 1, 1]} : vector<4x32x128xf32> to vector<4x28x128xf32>
    %554 = vector.extract_strided_slice %402 {offsets = [19, 0], sizes = [1, 128], strides = [1, 1]} : vector<25x128xf32> to vector<1x128xf32>
    %555 = vector.shape_cast %554 : vector<1x128xf32> to vector<128xf32>
    %556 = vector.shape_cast %555 : vector<128xf32> to vector<1x1x128xf32>
    %557 = vector.broadcast %556 : vector<1x1x128xf32> to vector<4x28x128xf32>
    %558 = arith.mulf %553, %557 : vector<4x28x128xf32>
    %559 = arith.addf %552, %558 : vector<4x28x128xf32>
    %c4_i32_65 = arith.constant 4 : i32
    %560 = arith.addi %1, %c4_i32_65 : i32
    %c0_66 = arith.constant 0 : index
    %561 = arith.index_cast %560 : i32 to index
    %c0_67 = arith.constant 0 : index
    %c256_68 = arith.constant 256 : index
    %562 = vector.load %arg2[%c0_66, %561, %c0_67, %c256_68] : memref<1x32x32x432xf32, #tpu.memory_space<vmem>>, vector<1x4x32x128xf32>
    %563 = vector.shape_cast %562 : vector<1x4x32x128xf32> to vector<4x32x128xf32>
    %564 = vector.extract_strided_slice %563 {offsets = [0, 0, 0], sizes = [4, 28, 128], strides = [1, 1, 1]} : vector<4x32x128xf32> to vector<4x28x128xf32>
    %565 = vector.extract_strided_slice %402 {offsets = [20, 0], sizes = [1, 128], strides = [1, 1]} : vector<25x128xf32> to vector<1x128xf32>
    %566 = vector.shape_cast %565 : vector<1x128xf32> to vector<128xf32>
    %567 = vector.shape_cast %566 : vector<128xf32> to vector<1x1x128xf32>
    %568 = vector.broadcast %567 : vector<1x1x128xf32> to vector<4x28x128xf32>
    %569 = arith.mulf %564, %568 : vector<4x28x128xf32>
    %570 = arith.addf %559, %569 : vector<4x28x128xf32>
    %571 = vector.extract_strided_slice %563 {offsets = [0, 1, 0], sizes = [4, 28, 128], strides = [1, 1, 1]} : vector<4x32x128xf32> to vector<4x28x128xf32>
    %572 = vector.extract_strided_slice %402 {offsets = [21, 0], sizes = [1, 128], strides = [1, 1]} : vector<25x128xf32> to vector<1x128xf32>
    %573 = vector.shape_cast %572 : vector<1x128xf32> to vector<128xf32>
    %574 = vector.shape_cast %573 : vector<128xf32> to vector<1x1x128xf32>
    %575 = vector.broadcast %574 : vector<1x1x128xf32> to vector<4x28x128xf32>
    %576 = arith.mulf %571, %575 : vector<4x28x128xf32>
    %577 = arith.addf %570, %576 : vector<4x28x128xf32>
    %578 = vector.extract_strided_slice %563 {offsets = [0, 2, 0], sizes = [4, 28, 128], strides = [1, 1, 1]} : vector<4x32x128xf32> to vector<4x28x128xf32>
    %579 = vector.extract_strided_slice %402 {offsets = [22, 0], sizes = [1, 128], strides = [1, 1]} : vector<25x128xf32> to vector<1x128xf32>
    %580 = vector.shape_cast %579 : vector<1x128xf32> to vector<128xf32>
    %581 = vector.shape_cast %580 : vector<128xf32> to vector<1x1x128xf32>
    %582 = vector.broadcast %581 : vector<1x1x128xf32> to vector<4x28x128xf32>
    %583 = arith.mulf %578, %582 : vector<4x28x128xf32>
    %584 = arith.addf %577, %583 : vector<4x28x128xf32>
    %585 = vector.extract_strided_slice %563 {offsets = [0, 3, 0], sizes = [4, 28, 128], strides = [1, 1, 1]} : vector<4x32x128xf32> to vector<4x28x128xf32>
    %586 = vector.extract_strided_slice %402 {offsets = [23, 0], sizes = [1, 128], strides = [1, 1]} : vector<25x128xf32> to vector<1x128xf32>
    %587 = vector.shape_cast %586 : vector<1x128xf32> to vector<128xf32>
    %588 = vector.shape_cast %587 : vector<128xf32> to vector<1x1x128xf32>
    %589 = vector.broadcast %588 : vector<1x1x128xf32> to vector<4x28x128xf32>
    %590 = arith.mulf %585, %589 : vector<4x28x128xf32>
    %591 = arith.addf %584, %590 : vector<4x28x128xf32>
    %592 = vector.extract_strided_slice %563 {offsets = [0, 4, 0], sizes = [4, 28, 128], strides = [1, 1, 1]} : vector<4x32x128xf32> to vector<4x28x128xf32>
    %593 = vector.extract_strided_slice %402 {offsets = [24, 0], sizes = [1, 128], strides = [1, 1]} : vector<25x128xf32> to vector<1x128xf32>
    %594 = vector.shape_cast %593 : vector<1x128xf32> to vector<128xf32>
    %595 = vector.shape_cast %594 : vector<128xf32> to vector<1x1x128xf32>
    %596 = vector.broadcast %595 : vector<1x1x128xf32> to vector<4x28x128xf32>
    %597 = arith.mulf %592, %596 : vector<4x28x128xf32>
    %598 = arith.addf %591, %597 : vector<4x28x128xf32>
    %c0_69 = arith.constant 0 : index
    %c0_70 = arith.constant 0 : index
    %c0_71 = arith.constant 0 : index
    %c256_72 = arith.constant 256 : index
    %599 = vector.load %arg4[%c0_69, %c0_70, %c0_71, %c256_72] : memref<1x4x28x432xf32, #tpu.memory_space<vmem>>, vector<1x4x28x128xf32>
    %600 = vector.shape_cast %599 : vector<1x4x28x128xf32> to vector<4x28x128xf32>
    %601 = vector.shape_cast %598 : vector<4x28x128xf32> to vector<1x4x28x128xf32>
    tpu.vector_store %arg4[%c0_69, %c0_70, %c0_71, %c256_72], %601 {strides = array<i32>} : memref<1x4x28x432xf32, #tpu.memory_space<vmem>>, vector<1x4x28x128xf32>,
    %c0_73 = arith.constant 0 : index
    %c384 = arith.constant 384 : index
    %602 = vector.load %arg3[%c0_73, %c384] : memref<25x432xf32, #tpu.memory_space<vmem>>, vector<25x48xf32>
    %cst_74 = arith.constant 0.000000e+00 : f32
    %603 = vector.broadcast %cst_74 : f32 to vector<4x28x48xf32>
    %c0_i32_75 = arith.constant 0 : i32
    %604 = arith.addi %1, %c0_i32_75 : i32
    %c0_76 = arith.constant 0 : index
    %605 = arith.index_cast %604 : i32 to index
    %c0_77 = arith.constant 0 : index
    %c384_78 = arith.constant 384 : index
    %606 = vector.load %arg2[%c0_76, %605, %c0_77, %c384_78] : memref<1x32x32x432xf32, #tpu.memory_space<vmem>>, vector<1x4x32x48xf32>
    %607 = vector.shape_cast %606 : vector<1x4x32x48xf32> to vector<4x32x48xf32>
    %608 = vector.extract_strided_slice %607 {offsets = [0, 0, 0], sizes = [4, 28, 48], strides = [1, 1, 1]} : vector<4x32x48xf32> to vector<4x28x48xf32>
    %609 = vector.extract_strided_slice %602 {offsets = [0, 0], sizes = [1, 48], strides = [1, 1]} : vector<25x48xf32> to vector<1x48xf32>
    %610 = vector.shape_cast %609 : vector<1x48xf32> to vector<48xf32>
    %611 = vector.shape_cast %610 : vector<48xf32> to vector<1x1x48xf32>
    %612 = vector.broadcast %611 : vector<1x1x48xf32> to vector<4x28x48xf32>
    %613 = arith.mulf %608, %612 : vector<4x28x48xf32>
    %614 = arith.addf %603, %613 : vector<4x28x48xf32>
    %615 = vector.extract_strided_slice %607 {offsets = [0, 1, 0], sizes = [4, 28, 48], strides = [1, 1, 1]} : vector<4x32x48xf32> to vector<4x28x48xf32>
    %616 = vector.extract_strided_slice %602 {offsets = [1, 0], sizes = [1, 48], strides = [1, 1]} : vector<25x48xf32> to vector<1x48xf32>
    %617 = vector.shape_cast %616 : vector<1x48xf32> to vector<48xf32>
    %618 = vector.shape_cast %617 : vector<48xf32> to vector<1x1x48xf32>
    %619 = vector.broadcast %618 : vector<1x1x48xf32> to vector<4x28x48xf32>
    %620 = arith.mulf %615, %619 : vector<4x28x48xf32>
    %621 = arith.addf %614, %620 : vector<4x28x48xf32>
    %622 = vector.extract_strided_slice %607 {offsets = [0, 2, 0], sizes = [4, 28, 48], strides = [1, 1, 1]} : vector<4x32x48xf32> to vector<4x28x48xf32>
    %623 = vector.extract_strided_slice %602 {offsets = [2, 0], sizes = [1, 48], strides = [1, 1]} : vector<25x48xf32> to vector<1x48xf32>
    %624 = vector.shape_cast %623 : vector<1x48xf32> to vector<48xf32>
    %625 = vector.shape_cast %624 : vector<48xf32> to vector<1x1x48xf32>
    %626 = vector.broadcast %625 : vector<1x1x48xf32> to vector<4x28x48xf32>
    %627 = arith.mulf %622, %626 : vector<4x28x48xf32>
    %628 = arith.addf %621, %627 : vector<4x28x48xf32>
    %629 = vector.extract_strided_slice %607 {offsets = [0, 3, 0], sizes = [4, 28, 48], strides = [1, 1, 1]} : vector<4x32x48xf32> to vector<4x28x48xf32>
    %630 = vector.extract_strided_slice %602 {offsets = [3, 0], sizes = [1, 48], strides = [1, 1]} : vector<25x48xf32> to vector<1x48xf32>
    %631 = vector.shape_cast %630 : vector<1x48xf32> to vector<48xf32>
    %632 = vector.shape_cast %631 : vector<48xf32> to vector<1x1x48xf32>
    %633 = vector.broadcast %632 : vector<1x1x48xf32> to vector<4x28x48xf32>
    %634 = arith.mulf %629, %633 : vector<4x28x48xf32>
    %635 = arith.addf %628, %634 : vector<4x28x48xf32>
    %636 = vector.extract_strided_slice %607 {offsets = [0, 4, 0], sizes = [4, 28, 48], strides = [1, 1, 1]} : vector<4x32x48xf32> to vector<4x28x48xf32>
    %637 = vector.extract_strided_slice %602 {offsets = [4, 0], sizes = [1, 48], strides = [1, 1]} : vector<25x48xf32> to vector<1x48xf32>
    %638 = vector.shape_cast %637 : vector<1x48xf32> to vector<48xf32>
    %639 = vector.shape_cast %638 : vector<48xf32> to vector<1x1x48xf32>
    %640 = vector.broadcast %639 : vector<1x1x48xf32> to vector<4x28x48xf32>
    %641 = arith.mulf %636, %640 : vector<4x28x48xf32>
    %642 = arith.addf %635, %641 : vector<4x28x48xf32>
    %c1_i32_79 = arith.constant 1 : i32
    %643 = arith.addi %1, %c1_i32_79 : i32
    %c0_80 = arith.constant 0 : index
    %644 = arith.index_cast %643 : i32 to index
    %c0_81 = arith.constant 0 : index
    %c384_82 = arith.constant 384 : index
    %645 = vector.load %arg2[%c0_80, %644, %c0_81, %c384_82] : memref<1x32x32x432xf32, #tpu.memory_space<vmem>>, vector<1x4x32x48xf32>
    %646 = vector.shape_cast %645 : vector<1x4x32x48xf32> to vector<4x32x48xf32>
    %647 = vector.extract_strided_slice %646 {offsets = [0, 0, 0], sizes = [4, 28, 48], strides = [1, 1, 1]} : vector<4x32x48xf32> to vector<4x28x48xf32>
    %648 = vector.extract_strided_slice %602 {offsets = [5, 0], sizes = [1, 48], strides = [1, 1]} : vector<25x48xf32> to vector<1x48xf32>
    %649 = vector.shape_cast %648 : vector<1x48xf32> to vector<48xf32>
    %650 = vector.shape_cast %649 : vector<48xf32> to vector<1x1x48xf32>
    %651 = vector.broadcast %650 : vector<1x1x48xf32> to vector<4x28x48xf32>
    %652 = arith.mulf %647, %651 : vector<4x28x48xf32>
    %653 = arith.addf %642, %652 : vector<4x28x48xf32>
    %654 = vector.extract_strided_slice %646 {offsets = [0, 1, 0], sizes = [4, 28, 48], strides = [1, 1, 1]} : vector<4x32x48xf32> to vector<4x28x48xf32>
    %655 = vector.extract_strided_slice %602 {offsets = [6, 0], sizes = [1, 48], strides = [1, 1]} : vector<25x48xf32> to vector<1x48xf32>
    %656 = vector.shape_cast %655 : vector<1x48xf32> to vector<48xf32>
    %657 = vector.shape_cast %656 : vector<48xf32> to vector<1x1x48xf32>
    %658 = vector.broadcast %657 : vector<1x1x48xf32> to vector<4x28x48xf32>
    %659 = arith.mulf %654, %658 : vector<4x28x48xf32>
    %660 = arith.addf %653, %659 : vector<4x28x48xf32>
    %661 = vector.extract_strided_slice %646 {offsets = [0, 2, 0], sizes = [4, 28, 48], strides = [1, 1, 1]} : vector<4x32x48xf32> to vector<4x28x48xf32>
    %662 = vector.extract_strided_slice %602 {offsets = [7, 0], sizes = [1, 48], strides = [1, 1]} : vector<25x48xf32> to vector<1x48xf32>
    %663 = vector.shape_cast %662 : vector<1x48xf32> to vector<48xf32>
    %664 = vector.shape_cast %663 : vector<48xf32> to vector<1x1x48xf32>
    %665 = vector.broadcast %664 : vector<1x1x48xf32> to vector<4x28x48xf32>
    %666 = arith.mulf %661, %665 : vector<4x28x48xf32>
    %667 = arith.addf %660, %666 : vector<4x28x48xf32>
    %668 = vector.extract_strided_slice %646 {offsets = [0, 3, 0], sizes = [4, 28, 48], strides = [1, 1, 1]} : vector<4x32x48xf32> to vector<4x28x48xf32>
    %669 = vector.extract_strided_slice %602 {offsets = [8, 0], sizes = [1, 48], strides = [1, 1]} : vector<25x48xf32> to vector<1x48xf32>
    %670 = vector.shape_cast %669 : vector<1x48xf32> to vector<48xf32>
    %671 = vector.shape_cast %670 : vector<48xf32> to vector<1x1x48xf32>
    %672 = vector.broadcast %671 : vector<1x1x48xf32> to vector<4x28x48xf32>
    %673 = arith.mulf %668, %672 : vector<4x28x48xf32>
    %674 = arith.addf %667, %673 : vector<4x28x48xf32>
    %675 = vector.extract_strided_slice %646 {offsets = [0, 4, 0], sizes = [4, 28, 48], strides = [1, 1, 1]} : vector<4x32x48xf32> to vector<4x28x48xf32>
    %676 = vector.extract_strided_slice %602 {offsets = [9, 0], sizes = [1, 48], strides = [1, 1]} : vector<25x48xf32> to vector<1x48xf32>
    %677 = vector.shape_cast %676 : vector<1x48xf32> to vector<48xf32>
    %678 = vector.shape_cast %677 : vector<48xf32> to vector<1x1x48xf32>
    %679 = vector.broadcast %678 : vector<1x1x48xf32> to vector<4x28x48xf32>
    %680 = arith.mulf %675, %679 : vector<4x28x48xf32>
    %681 = arith.addf %674, %680 : vector<4x28x48xf32>
    %c2_i32_83 = arith.constant 2 : i32
    %682 = arith.addi %1, %c2_i32_83 : i32
    %c0_84 = arith.constant 0 : index
    %683 = arith.index_cast %682 : i32 to index
    %c0_85 = arith.constant 0 : index
    %c384_86 = arith.constant 384 : index
    %684 = vector.load %arg2[%c0_84, %683, %c0_85, %c384_86] : memref<1x32x32x432xf32, #tpu.memory_space<vmem>>, vector<1x4x32x48xf32>
    %685 = vector.shape_cast %684 : vector<1x4x32x48xf32> to vector<4x32x48xf32>
    %686 = vector.extract_strided_slice %685 {offsets = [0, 0, 0], sizes = [4, 28, 48], strides = [1, 1, 1]} : vector<4x32x48xf32> to vector<4x28x48xf32>
    %687 = vector.extract_strided_slice %602 {offsets = [10, 0], sizes = [1, 48], strides = [1, 1]} : vector<25x48xf32> to vector<1x48xf32>
    %688 = vector.shape_cast %687 : vector<1x48xf32> to vector<48xf32>
    %689 = vector.shape_cast %688 : vector<48xf32> to vector<1x1x48xf32>
    %690 = vector.broadcast %689 : vector<1x1x48xf32> to vector<4x28x48xf32>
    %691 = arith.mulf %686, %690 : vector<4x28x48xf32>
    %692 = arith.addf %681, %691 : vector<4x28x48xf32>
    %693 = vector.extract_strided_slice %685 {offsets = [0, 1, 0], sizes = [4, 28, 48], strides = [1, 1, 1]} : vector<4x32x48xf32> to vector<4x28x48xf32>
    %694 = vector.extract_strided_slice %602 {offsets = [11, 0], sizes = [1, 48], strides = [1, 1]} : vector<25x48xf32> to vector<1x48xf32>
    %695 = vector.shape_cast %694 : vector<1x48xf32> to vector<48xf32>
    %696 = vector.shape_cast %695 : vector<48xf32> to vector<1x1x48xf32>
    %697 = vector.broadcast %696 : vector<1x1x48xf32> to vector<4x28x48xf32>
    %698 = arith.mulf %693, %697 : vector<4x28x48xf32>
    %699 = arith.addf %692, %698 : vector<4x28x48xf32>
    %700 = vector.extract_strided_slice %685 {offsets = [0, 2, 0], sizes = [4, 28, 48], strides = [1, 1, 1]} : vector<4x32x48xf32> to vector<4x28x48xf32>
    %701 = vector.extract_strided_slice %602 {offsets = [12, 0], sizes = [1, 48], strides = [1, 1]} : vector<25x48xf32> to vector<1x48xf32>
    %702 = vector.shape_cast %701 : vector<1x48xf32> to vector<48xf32>
    %703 = vector.shape_cast %702 : vector<48xf32> to vector<1x1x48xf32>
    %704 = vector.broadcast %703 : vector<1x1x48xf32> to vector<4x28x48xf32>
    %705 = arith.mulf %700, %704 : vector<4x28x48xf32>
    %706 = arith.addf %699, %705 : vector<4x28x48xf32>
    %707 = vector.extract_strided_slice %685 {offsets = [0, 3, 0], sizes = [4, 28, 48], strides = [1, 1, 1]} : vector<4x32x48xf32> to vector<4x28x48xf32>
    %708 = vector.extract_strided_slice %602 {offsets = [13, 0], sizes = [1, 48], strides = [1, 1]} : vector<25x48xf32> to vector<1x48xf32>
    %709 = vector.shape_cast %708 : vector<1x48xf32> to vector<48xf32>
    %710 = vector.shape_cast %709 : vector<48xf32> to vector<1x1x48xf32>
    %711 = vector.broadcast %710 : vector<1x1x48xf32> to vector<4x28x48xf32>
    %712 = arith.mulf %707, %711 : vector<4x28x48xf32>
    %713 = arith.addf %706, %712 : vector<4x28x48xf32>
    %714 = vector.extract_strided_slice %685 {offsets = [0, 4, 0], sizes = [4, 28, 48], strides = [1, 1, 1]} : vector<4x32x48xf32> to vector<4x28x48xf32>
    %715 = vector.extract_strided_slice %602 {offsets = [14, 0], sizes = [1, 48], strides = [1, 1]} : vector<25x48xf32> to vector<1x48xf32>
    %716 = vector.shape_cast %715 : vector<1x48xf32> to vector<48xf32>
    %717 = vector.shape_cast %716 : vector<48xf32> to vector<1x1x48xf32>
    %718 = vector.broadcast %717 : vector<1x1x48xf32> to vector<4x28x48xf32>
    %719 = arith.mulf %714, %718 : vector<4x28x48xf32>
    %720 = arith.addf %713, %719 : vector<4x28x48xf32>
    %c3_i32_87 = arith.constant 3 : i32
    %721 = arith.addi %1, %c3_i32_87 : i32
    %c0_88 = arith.constant 0 : index
    %722 = arith.index_cast %721 : i32 to index
    %c0_89 = arith.constant 0 : index
    %c384_90 = arith.constant 384 : index
    %723 = vector.load %arg2[%c0_88, %722, %c0_89, %c384_90] : memref<1x32x32x432xf32, #tpu.memory_space<vmem>>, vector<1x4x32x48xf32>
    %724 = vector.shape_cast %723 : vector<1x4x32x48xf32> to vector<4x32x48xf32>
    %725 = vector.extract_strided_slice %724 {offsets = [0, 0, 0], sizes = [4, 28, 48], strides = [1, 1, 1]} : vector<4x32x48xf32> to vector<4x28x48xf32>
    %726 = vector.extract_strided_slice %602 {offsets = [15, 0], sizes = [1, 48], strides = [1, 1]} : vector<25x48xf32> to vector<1x48xf32>
    %727 = vector.shape_cast %726 : vector<1x48xf32> to vector<48xf32>
    %728 = vector.shape_cast %727 : vector<48xf32> to vector<1x1x48xf32>
    %729 = vector.broadcast %728 : vector<1x1x48xf32> to vector<4x28x48xf32>
    %730 = arith.mulf %725, %729 : vector<4x28x48xf32>
    %731 = arith.addf %720, %730 : vector<4x28x48xf32>
    %732 = vector.extract_strided_slice %724 {offsets = [0, 1, 0], sizes = [4, 28, 48], strides = [1, 1, 1]} : vector<4x32x48xf32> to vector<4x28x48xf32>
    %733 = vector.extract_strided_slice %602 {offsets = [16, 0], sizes = [1, 48], strides = [1, 1]} : vector<25x48xf32> to vector<1x48xf32>
    %734 = vector.shape_cast %733 : vector<1x48xf32> to vector<48xf32>
    %735 = vector.shape_cast %734 : vector<48xf32> to vector<1x1x48xf32>
    %736 = vector.broadcast %735 : vector<1x1x48xf32> to vector<4x28x48xf32>
    %737 = arith.mulf %732, %736 : vector<4x28x48xf32>
    %738 = arith.addf %731, %737 : vector<4x28x48xf32>
    %739 = vector.extract_strided_slice %724 {offsets = [0, 2, 0], sizes = [4, 28, 48], strides = [1, 1, 1]} : vector<4x32x48xf32> to vector<4x28x48xf32>
    %740 = vector.extract_strided_slice %602 {offsets = [17, 0], sizes = [1, 48], strides = [1, 1]} : vector<25x48xf32> to vector<1x48xf32>
    %741 = vector.shape_cast %740 : vector<1x48xf32> to vector<48xf32>
    %742 = vector.shape_cast %741 : vector<48xf32> to vector<1x1x48xf32>
    %743 = vector.broadcast %742 : vector<1x1x48xf32> to vector<4x28x48xf32>
    %744 = arith.mulf %739, %743 : vector<4x28x48xf32>
    %745 = arith.addf %738, %744 : vector<4x28x48xf32>
    %746 = vector.extract_strided_slice %724 {offsets = [0, 3, 0], sizes = [4, 28, 48], strides = [1, 1, 1]} : vector<4x32x48xf32> to vector<4x28x48xf32>
    %747 = vector.extract_strided_slice %602 {offsets = [18, 0], sizes = [1, 48], strides = [1, 1]} : vector<25x48xf32> to vector<1x48xf32>
    %748 = vector.shape_cast %747 : vector<1x48xf32> to vector<48xf32>
    %749 = vector.shape_cast %748 : vector<48xf32> to vector<1x1x48xf32>
    %750 = vector.broadcast %749 : vector<1x1x48xf32> to vector<4x28x48xf32>
    %751 = arith.mulf %746, %750 : vector<4x28x48xf32>
    %752 = arith.addf %745, %751 : vector<4x28x48xf32>
    %753 = vector.extract_strided_slice %724 {offsets = [0, 4, 0], sizes = [4, 28, 48], strides = [1, 1, 1]} : vector<4x32x48xf32> to vector<4x28x48xf32>
    %754 = vector.extract_strided_slice %602 {offsets = [19, 0], sizes = [1, 48], strides = [1, 1]} : vector<25x48xf32> to vector<1x48xf32>
    %755 = vector.shape_cast %754 : vector<1x48xf32> to vector<48xf32>
    %756 = vector.shape_cast %755 : vector<48xf32> to vector<1x1x48xf32>
    %757 = vector.broadcast %756 : vector<1x1x48xf32> to vector<4x28x48xf32>
    %758 = arith.mulf %753, %757 : vector<4x28x48xf32>
    %759 = arith.addf %752, %758 : vector<4x28x48xf32>
    %c4_i32_91 = arith.constant 4 : i32
    %760 = arith.addi %1, %c4_i32_91 : i32
    %c0_92 = arith.constant 0 : index
    %761 = arith.index_cast %760 : i32 to index
    %c0_93 = arith.constant 0 : index
    %c384_94 = arith.constant 384 : index
    %762 = vector.load %arg2[%c0_92, %761, %c0_93, %c384_94] : memref<1x32x32x432xf32, #tpu.memory_space<vmem>>, vector<1x4x32x48xf32>
    %763 = vector.shape_cast %762 : vector<1x4x32x48xf32> to vector<4x32x48xf32>
    %764 = vector.extract_strided_slice %763 {offsets = [0, 0, 0], sizes = [4, 28, 48], strides = [1, 1, 1]} : vector<4x32x48xf32> to vector<4x28x48xf32>
    %765 = vector.extract_strided_slice %602 {offsets = [20, 0], sizes = [1, 48], strides = [1, 1]} : vector<25x48xf32> to vector<1x48xf32>
    %766 = vector.shape_cast %765 : vector<1x48xf32> to vector<48xf32>
    %767 = vector.shape_cast %766 : vector<48xf32> to vector<1x1x48xf32>
    %768 = vector.broadcast %767 : vector<1x1x48xf32> to vector<4x28x48xf32>
    %769 = arith.mulf %764, %768 : vector<4x28x48xf32>
    %770 = arith.addf %759, %769 : vector<4x28x48xf32>
    %771 = vector.extract_strided_slice %763 {offsets = [0, 1, 0], sizes = [4, 28, 48], strides = [1, 1, 1]} : vector<4x32x48xf32> to vector<4x28x48xf32>
    %772 = vector.extract_strided_slice %602 {offsets = [21, 0], sizes = [1, 48], strides = [1, 1]} : vector<25x48xf32> to vector<1x48xf32>
    %773 = vector.shape_cast %772 : vector<1x48xf32> to vector<48xf32>
    %774 = vector.shape_cast %773 : vector<48xf32> to vector<1x1x48xf32>
    %775 = vector.broadcast %774 : vector<1x1x48xf32> to vector<4x28x48xf32>
    %776 = arith.mulf %771, %775 : vector<4x28x48xf32>
    %777 = arith.addf %770, %776 : vector<4x28x48xf32>
    %778 = vector.extract_strided_slice %763 {offsets = [0, 2, 0], sizes = [4, 28, 48], strides = [1, 1, 1]} : vector<4x32x48xf32> to vector<4x28x48xf32>
    %779 = vector.extract_strided_slice %602 {offsets = [22, 0], sizes = [1, 48], strides = [1, 1]} : vector<25x48xf32> to vector<1x48xf32>
    %780 = vector.shape_cast %779 : vector<1x48xf32> to vector<48xf32>
    %781 = vector.shape_cast %780 : vector<48xf32> to vector<1x1x48xf32>
    %782 = vector.broadcast %781 : vector<1x1x48xf32> to vector<4x28x48xf32>
    %783 = arith.mulf %778, %782 : vector<4x28x48xf32>
    %784 = arith.addf %777, %783 : vector<4x28x48xf32>
    %785 = vector.extract_strided_slice %763 {offsets = [0, 3, 0], sizes = [4, 28, 48], strides = [1, 1, 1]} : vector<4x32x48xf32> to vector<4x28x48xf32>
    %786 = vector.extract_strided_slice %602 {offsets = [23, 0], sizes = [1, 48], strides = [1, 1]} : vector<25x48xf32> to vector<1x48xf32>
    %787 = vector.shape_cast %786 : vector<1x48xf32> to vector<48xf32>
    %788 = vector.shape_cast %787 : vector<48xf32> to vector<1x1x48xf32>
    %789 = vector.broadcast %788 : vector<1x1x48xf32> to vector<4x28x48xf32>
    %790 = arith.mulf %785, %789 : vector<4x28x48xf32>
    %791 = arith.addf %784, %790 : vector<4x28x48xf32>
    %792 = vector.extract_strided_slice %763 {offsets = [0, 4, 0], sizes = [4, 28, 48], strides = [1, 1, 1]} : vector<4x32x48xf32> to vector<4x28x48xf32>
    %793 = vector.extract_strided_slice %602 {offsets = [24, 0], sizes = [1, 48], strides = [1, 1]} : vector<25x48xf32> to vector<1x48xf32>
    %794 = vector.shape_cast %793 : vector<1x48xf32> to vector<48xf32>
    %795 = vector.shape_cast %794 : vector<48xf32> to vector<1x1x48xf32>
    %796 = vector.broadcast %795 : vector<1x1x48xf32> to vector<4x28x48xf32>
    %797 = arith.mulf %792, %796 : vector<4x28x48xf32>
    %798 = arith.addf %791, %797 : vector<4x28x48xf32>
    %c0_95 = arith.constant 0 : index
    %c0_96 = arith.constant 0 : index
    %c0_97 = arith.constant 0 : index
    %c384_98 = arith.constant 384 : index
    %799 = vector.load %arg4[%c0_95, %c0_96, %c0_97, %c384_98] : memref<1x4x28x432xf32, #tpu.memory_space<vmem>>, vector<1x4x28x48xf32>
    %800 = vector.shape_cast %799 : vector<1x4x28x48xf32> to vector<4x28x48xf32>
    %801 = vector.shape_cast %798 : vector<4x28x48xf32> to vector<1x4x28x48xf32>
    tpu.vector_store %arg4[%c0_95, %c0_96, %c0_97, %c384_98], %801 {strides = array<i32>} : memref<1x4x28x432xf32, #tpu.memory_space<vmem>>, vector<1x4x28x48xf32>,
    return
  }
  func.func @transform_0(%arg0: i32, %arg1: i32) -> (i32, i32, i32, i32) {
    %c0_i32 = arith.constant 0 : i32
    %c0_i32_0 = arith.constant 0 : i32
    %c0_i32_1 = arith.constant 0 : i32
    %c0_i32_2 = arith.constant 0 : i32
    return %arg0, %c0_i32, %c0_i32_0, %c0_i32_1 : i32, i32, i32, i32
  }
  func.func @transform_1(%arg0: i32, %arg1: i32) -> (i32, i32) {
    %c0_i32 = arith.constant 0 : i32
    %c0_i32_0 = arith.constant 0 : i32
    %c0_i32_1 = arith.constant 0 : i32
    return %c0_i32, %c0_i32_0 : i32, i32
  }
  func.func @transform_2(%arg0: i32, %arg1: i32) -> (i32, i32, i32, i32) {
    %c0_i32 = arith.constant 0 : i32
    %c0_i32_0 = arith.constant 0 : i32
    %c0_i32_1 = arith.constant 0 : i32
    return %arg0, %arg1, %c0_i32, %c0_i32_0 : i32, i32, i32, i32
  }
}

</mosaic_0001>

<bundles_post_ra>
// kernel: depthwise_conv5x5.1
= control target key start
LH: loop header
LB: loop body
LE: loop exit
PB: predicated region body
PF: predicated region fallthrough
CT: control target
= control target key end

     0   :  { %s9502_s9 = smov 0   ;;  %s9504_s10 = smov 0   ;;  %s15436_s0 = inlined_call_operand.vmem [shape: f32[1,32,32,432], index: 0, kind: input, shape index: {}]   ;;  %s15437_s1 = inlined_call_operand.vmem [shape: f32[25,432], index: 1, kind: input, shape index: {}]   ;;  %s15438_s2 = inlined_call_operand.vmem [shape: f32[1,28,28,432], index: 2, kind: output, shape index: {}]  }
   0x1   :  { %s9506_s11 = smov 0  }
   0x2 LB: > { %s21_s12 = sadd.s32 1, %s9481_s10  ;;  %p9107_p0 = scmp.ge.s32.totalorder %s9485_s11, 1  ;;  %s9485_s11 = sphi %s9506_s11, %s12_s11   ;;  %s9481_s10 = sphi %s9504_s10, %s16040_s10   ;;  %s9477_s9 = sphi %s9502_s9, %s16039_s9  }
   0x3   : > { %p22_p1 = scmp.ge.s32.totalorder %s21_s12, 7  ;;  %p126_p2 = scmp.lt.s32.totalorder %s9485_s11, 8 }
   0x5   : > { %s16042_s12 = smov (%p22_p1, %s21_s12), 0  ;;  %p127_p3 = pnand %p9107_p0, %p126_p2 }
   0x7   : > { %130 = sbr.rel (%p127_p3) target bundleno = 1406 (0x57e), region = 28 }
   0xe   : > { %s9386_s13 = sshll.u32 %s9477_s9, 9  ;;  %v193_v0 = vlaneseq  ;;  %v9531_v2 = vld [vmem:[%s15437_s1] sm:$0xff]  ;;  %vm265_vm0 = vcmask 1046528   ;;  %vm362_vm1 = vcmask 1045504   ;;  %vm459_vm2 = vcmask 1044480   ;;  %s9108_s25 = sshll.u32 %s9477_s9, 2 }
   0xf   : > { %s9526_s16 = scalar_lea.vmem %s15436_s0, %s9386_s13  ;;  %15644 = vst [vmem:[#allocation2_spill] sm:$0xff] %v9531_v2  ;;  %vm556_vm3 = vcmask 1043456   ;;  %p10952_p4 = scmp.lt.s32.totalorder %s9108_s25, 27  ;;  %vm8977_vm4 = vcmask 392192   ;;  %vm8981_vm5 = vcmask 388096  }
  0x10   : > { %v194_v1 = vshrl.u32 %v193_v0, 7  ;;  %v9540_v6 = vld [vmem:[%s9526_s16] sm:$0xff] }
  0x11   : > { %v9547_v9 = vld [vmem:[%s9526_s16 + $0x20] sm:$0xff]  ;;  %s16044_s25 = smov (!%p10952_p4, %s9108_s25), 27 }
  0x12   : > { %v9533_v3 = vsub.s32 0, %v194_v1  ;;  %v9535_v4 = vsub.s32 1, %v194_v1  ;;  %v9537_v5 = vsub.s32 2, %v194_v1  ;;  %v9542_v7 = vsub.s32 3, %v194_v1  ;;  %v9550_v10 = vld [vmem:[%s9526_s16 + $0x40] sm:$0xff]  ;;  %s9384_s27 = sshll.u32 %s16044_s25, 7 }
  0x13   : > { %v9544_v8 = vsub.s32 4, %v194_v1  ;;  %v9553_v11 = vld [vmem:[%s9526_s16 + $0x60] sm:$0xff]  ;;  %v9563_v15 = vsub.s32 5, %v194_v1  ;;  %v9582_v21 = vsub.s32 6, %v194_v1  ;;  %v9584_v22 = vsub.s32 7, %v194_v1  ;;  %s11008_s30 = scalar_lea.vmem %s15438_s2, %s9384_s27 }
  0x14   : > { %15645 = vst [vmem:[#allocation3_spill] sm:$0xff] %v9533_v3  ;;  %15646 = vst [vmem:[#allocation4_spill] sm:$0xff] %v9535_v4  ;;  %v196_v12 = vrot.slane %v9531_v2, %v9533_v3  ;;  %v232_v13 = vrot.slane %v9531_v2, %v9535_v4  ;;  %v9561_v14 = vrot.slane %v9531_v2, %v9537_v5  ;;  %v9566_v16 = vld [vmem:[%s9526_s16 + $0x80] sm:$0xff] }
  0x15   : > { %15647 = vst [vmem:[#allocation5_spill] sm:$0xff] %v9537_v5  ;;  %15648 = vst [vmem:[#allocation6_spill] sm:$0xff] %v9542_v7  ;;  %v9569_v17 = vld [vmem:[%s9526_s16 + $0xa0] sm:$0xff]  ;;  %v9576_v19 = vrot.slane %v9531_v2, %v9542_v7  ;;  %v9580_v20 = vrot.slane %v9531_v2, %v9544_v8 }
  0x16   : > { %15649 = vst [vmem:[#allocation7_spill] sm:$0xff] %v9544_v8  ;;  %15650 = vst [vmem:[#allocation8_spill] sm:$0xff] %v9563_v15  ;;  %v9572_v18 = vld [vmem:[%s9526_s16 + $0xc0] sm:$0xff]  ;;  %v197_v26 = vmul.f32 %v196_v12, %v9540_v6  ;;  %v9597_v27 = vmul.f32 %v196_v12, %v9547_v9  ;;  %v9600_v28 = vmul.f32 %v196_v12, %v9550_v10 }
  0x17   : > { %15651 = vst [vmem:[#allocation9_spill] sm:$0xff] %v9576_v19  ;;  %15652 = vst [vmem:[#allocation10_spill] sm:$0xff] %v9580_v20  ;;  %v9587_v23 = vld [vmem:[%s9526_s16 + $0xe0] sm:$0xff]  ;;  %v9603_v29 = vmul.f32 %v196_v12, %v9553_v11  ;;  %v9615_v33 = vmul.f32 %v196_v12, %v9566_v16  ;;  %v9618_v34 = vmul.f32 %v196_v12, %v9569_v17 }
  0x18   : > { %15653 = vst [vmem:[#allocation11_spill] sm:$0xff] %v9582_v21  ;;  %15654 = vst [vmem:[#allocation12_spill] sm:$0xff] %v9584_v22  ;;  %v9590_v24 = vld [vmem:[%s9526_s16 + $0x100] sm:$0xff]  ;;  %v9621_v35 = vmul.f32 %v196_v12, %v9572_v18  ;;  %v9624_v36 = vmul.f32 %v196_v12, %v9587_v23  ;;  %v233_v48 = vmul.f32 %v232_v13, %v9540_v6 }
  0x19   : > { %v9593_v25 = vld [vmem:[%s9526_s16 + $0x120] sm:$0xff]  ;;  %v205_v40 = vmul.f32 %v196_v12, %v9590_v24  ;;  %v234_v49 = vmul.f32 %v232_v13, %v9547_v9  ;;  %v235_v50 = vmul.f32 %v232_v13, %v9550_v10  ;;  %v236_v51 = vmul.f32 %v232_v13, %v9553_v11 }
  0x1a   : > { %v9606_v30 = vld [vmem:[%s9526_s16 + $0x140] sm:$0xff]  ;;  %v206_v41 = vmul.f32 %v196_v12, %v9593_v25  ;;  %v237_v52 = vmul.f32 %v232_v13, %v9566_v16  ;;  %v238_v53 = vmul.f32 %v232_v13, %v9569_v17  ;;  %v239_v54 = vmul.f32 %v232_v13, %v9572_v18 }
  0x1b   : > { %v9609_v31 = vld [vmem:[%s9526_s16 + $0x160] sm:$0xff]  ;;  %v207_v42 = vmul.f32 %v196_v12, %v9606_v30  ;;  %v240_v55 = vmul.f32 %v232_v13, %v9587_v23  ;;  %v241_v56 = vmul.f32 %v232_v13, %v9590_v24  ;;  %v242_v57 = vmul.f32 %v232_v13, %v9593_v25 }
  0x1c   : > { %v9612_v32 = vld [vmem:[%s9526_s16 + $0x180] sm:$0xff]  ;;  %v208_v43 = vmul.f32 %v196_v12, %v9609_v31  ;;  %v243_v58 = vmul.f32 %v232_v13, %v9606_v30  ;;  %v244_v59 = vmul.f32 %v232_v13, %v9609_v31  ;;  %v266_v0 = vrot.slane %v233_v48, 1 }
  0x1d   : > { %v9627_v37 = vld [vmem:[%s9526_s16 + $0x1a0] sm:$0xff]  ;;  %v209_v44 = vmul.f32 %v196_v12, %v9612_v32  ;;  %v245_v60 = vmul.f32 %v232_v13, %v9612_v32  ;;  %v267_v1 = vrot.slane %v234_v49, 1  ;;  %v271_v8 = vrot.slane %v236_v51, 1 }
  0x1e   : > { %v9630_v38 = vld [vmem:[%s9526_s16 + $0x1c0] sm:$0xff]  ;;  %v210_v45 = vmul.f32 %v196_v12, %v9627_v37  ;;  %v246_v61 = vmul.f32 %v232_v13, %v9627_v37  ;;  %v273_v7 = vrot.slane %v237_v52, 1  ;;  %v274_v5 = vrot.slane %v238_v53, 1 }
  0x1f   : > { %v9633_v39 = vld [vmem:[%s9526_s16 + $0x1e0] sm:$0xff]  ;;  %v211_v46 = vmul.f32 %v196_v12, %v9630_v38  ;;  %v247_v62 = vmul.f32 %v232_v13, %v9630_v38  ;;  %v276_v4 = vrot.slane %v239_v54, 1  ;;  %v278_v3 = vrot.slane %v240_v55, 1 }
  0x20   : > { %v212_v47 = vmul.f32 %v196_v12, %v9633_v39  ;;  %v248_v63 = vmul.f32 %v232_v13, %v9633_v39  ;;  %v269_v12 = vrot.slane %v235_v50, 1  ;;  %v268_v22 = vsel %vm265_vm0, %v266_v0, %v267_v1 }
  0x21   : > { %v280_v15 = vrot.slane %v241_v56, 1  ;;  %v275_v20 = vsel %vm265_vm0, %v273_v7, %v274_v5  ;;  %v277_v19 = vsel %vm265_vm0, %v274_v5, %v276_v4  ;;  %v279_v13 = vsel %vm265_vm0, %v276_v4, %v278_v3 }
  0x22   : > { %v270_v21 = vsel %vm265_vm0, %v267_v1, %v269_v12  ;;  %v272_v2 = vsel %vm265_vm0, %v269_v12, %v271_v8  ;;  %v281_v48 = vrot.slane %v242_v57, 1  ;;  %v283_v49 = vrot.slane %v243_v58, 1 }
  0x23   : > { %v285_v50 = vrot.slane %v244_v59, 1  ;;  %v287_v51 = vrot.slane %v245_v60, 1  ;;  %v288_v52 = vrot.slane %v246_v61, 1  ;;  %v290_v54 = vrot.slane %v247_v62, 1 }
  0x24   : > { %v282_v53 = vsel %vm265_vm0, %v280_v15, %v281_v48  ;;  %v292_v55 = vrot.slane %v248_v63, 1  ;;  %v310_v0 = vadd.f32 %v268_v22, %v197_v26  ;;  %v284_v1 = vsel %vm265_vm0, %v281_v48, %v283_v49 }
  0x25   : > { %v286_v56 = vsel %vm265_vm0, %v283_v49, %v285_v50  ;;  %v289_v7 = vsel %vm265_vm0, %v287_v51, %v288_v52  ;;  %v311_v5 = vadd.f32 %v270_v21, %v9597_v27  ;;  %v291_v4 = vsel %vm265_vm0, %v288_v52, %v290_v54 }
  0x26   : > { %v293_v57 = vsel %vm265_vm0, %v290_v54, %v292_v55  ;;  %v312_v58 = vadd.f32 %v272_v2, %v9600_v28  ;;  %v313_v15 = vadd.f32 %v271_v8, %v9603_v29  ;;  %v314_v59 = vadd.f32 %v275_v20, %v9615_v33 }
  0x27   : > { %v315_v22 = vadd.f32 %v277_v19, %v9618_v34  ;;  %v316_v26 = vadd.f32 %v279_v13, %v9621_v35  ;;  %v317_v60 = vadd.f32 %v278_v3, %v9624_v36  ;;  %v318_v61 = vadd.f32 %v282_v53, %v205_v40 }
  0x28   : > { %v319_v62 = vadd.f32 %v284_v1, %v206_v41  ;;  %v320_v21 = vadd.f32 %v286_v56, %v207_v42  ;;  %v321_v27 = vadd.f32 %v285_v50, %v208_v43  ;;  %v322_v63 = vadd.f32 %v289_v7, %v209_v44 }
  0x29   : > { %v323_v12 = vadd.f32 %v291_v4, %v210_v45  ;;  %v324_v48 = vadd.f32 %v293_v57, %v211_v46  ;;  %v325_v49 = vadd.f32 %v292_v55, %v212_v47  ;;  %v330_v2 = vmul.f32 %v9561_v14, %v9540_v6 }
  0x2a   : > { %v331_v8 = vmul.f32 %v9561_v14, %v9547_v9  ;;  %v332_v19 = vmul.f32 %v9561_v14, %v9550_v10  ;;  %v333_v3 = vmul.f32 %v9561_v14, %v9553_v11  ;;  %v334_v20 = vmul.f32 %v9561_v14, %v9566_v16 }
  0x2b   : > { %v335_v28 = vmul.f32 %v9561_v14, %v9569_v17  ;;  %v336_v29 = vmul.f32 %v9561_v14, %v9572_v18  ;;  %v337_v33 = vmul.f32 %v9561_v14, %v9587_v23  ;;  %v338_v34 = vmul.f32 %v9561_v14, %v9590_v24 }
  0x2c   : > { %v339_v35 = vmul.f32 %v9561_v14, %v9593_v25  ;;  %v340_v36 = vmul.f32 %v9561_v14, %v9606_v30  ;;  %v341_v40 = vmul.f32 %v9561_v14, %v9609_v31  ;;  %v342_v41 = vmul.f32 %v9561_v14, %v9612_v32 }
  0x2d   : > { %v343_v42 = vmul.f32 %v9561_v14, %v9627_v37  ;;  %v344_v43 = vmul.f32 %v9561_v14, %v9630_v38  ;;  %v345_v44 = vmul.f32 %v9561_v14, %v9633_v39  ;;  %v363_v45 = vrot.slane %v330_v2, 2 }
  0x2e   : > { %v364_v46 = vrot.slane %v331_v8, 2  ;;  %v366_v47 = vrot.slane %v332_v19, 2  ;;  %v368_v13 = vrot.slane %v333_v3, 2  ;;  %v370_v50 = vrot.slane %v334_v20, 2 }
  0x2f   : > { %v371_v51 = vrot.slane %v335_v28, 2  ;;  %v373_v52 = vrot.slane %v336_v29, 2  ;;  %v375_v53 = vrot.slane %v337_v33, 2  ;;  %v377_v56 = vrot.slane %v338_v34, 2 }
  0x30   : > { %v365_v54 = vsel %vm362_vm1, %v363_v45, %v364_v46  ;;  %v367_v55 = vsel %vm362_vm1, %v364_v46, %v366_v47  ;;  %v369_v1 = vsel %vm362_vm1, %v366_v47, %v368_v13  ;;  %v378_v57 = vrot.slane %v339_v35, 2 }
  0x31   : > { %v372_v7 = vsel %vm362_vm1, %v370_v50, %v371_v51  ;;  %v374_v4 = vsel %vm362_vm1, %v371_v51, %v373_v52  ;;  %v376_v14 = vsel %vm362_vm1, %v373_v52, %v375_v53  ;;  %v380_v2 = vrot.slane %v340_v36, 2 }
  0x32   : > { %v382_v8 = vrot.slane %v341_v40, 2  ;;  %v384_v19 = vrot.slane %v342_v41, 2  ;;  %v385_v3 = vrot.slane %v343_v42, 2  ;;  %v379_v20 = vsel %vm362_vm1, %v377_v56, %v378_v57 }
  0x33   : > { %v387_v28 = vrot.slane %v344_v43, 2  ;;  %v389_v29 = vrot.slane %v345_v44, 2  ;;  %v407_v33 = vadd.f32 %v365_v54, %v310_v0  ;;  %v381_v45 = vsel %vm362_vm1, %v378_v57, %v380_v2 }
  0x34   : > { %v383_v34 = vsel %vm362_vm1, %v380_v2, %v382_v8  ;;  %v386_v46 = vsel %vm362_vm1, %v384_v19, %v385_v3  ;;  %v408_v47 = vadd.f32 %v367_v55, %v311_v5  ;;  %v409_v36 = vadd.f32 %v369_v1, %v312_v58  ;;  %v15655_v5 = vld [vmem:[#allocation9_spill] sm:$0xff] }
  0x35   : > { %v388_v50 = vsel %vm362_vm1, %v385_v3, %v387_v28  ;;  %v390_v35 = vsel %vm362_vm1, %v387_v28, %v389_v29  ;;  %v410_v40 = vadd.f32 %v368_v13, %v313_v15  ;;  %v411_v41 = vadd.f32 %v372_v7, %v314_v59 }
  0x36   : > { %v412_v42 = vadd.f32 %v374_v4, %v315_v22  ;;  %v413_v51 = vadd.f32 %v376_v14, %v316_v26  ;;  %v414_v43 = vadd.f32 %v375_v53, %v317_v60  ;;  %v415_v44 = vadd.f32 %v379_v20, %v318_v61 }
  0x37   : > { %v416_v0 = vadd.f32 %v381_v45, %v319_v62  ;;  %v417_v52 = vadd.f32 %v383_v34, %v320_v21  ;;  %v418_v54 = vadd.f32 %v382_v8, %v321_v27  ;;  %v419_v56 = vadd.f32 %v386_v46, %v322_v63 }
  0x38   : > { %v420_v57 = vadd.f32 %v388_v50, %v323_v12  ;;  %v421_v2 = vadd.f32 %v390_v35, %v324_v48  ;;  %v422_v19 = vadd.f32 %v389_v29, %v325_v49  ;;  %v427_v55 = vmul.f32 %v15655_v5, %v9540_v6 }
  0x39   : > { %v428_v3 = vmul.f32 %v15655_v5, %v9547_v9  ;;  %v429_v58 = vmul.f32 %v15655_v5, %v9550_v10  ;;  %v430_v15 = vmul.f32 %v15655_v5, %v9553_v11  ;;  %v431_v59 = vmul.f32 %v15655_v5, %v9566_v16 }
  0x3a   : > { %v432_v22 = vmul.f32 %v15655_v5, %v9569_v17  ;;  %v433_v26 = vmul.f32 %v15655_v5, %v9572_v18  ;;  %v434_v60 = vmul.f32 %v15655_v5, %v9587_v23  ;;  %v435_v61 = vmul.f32 %v15655_v5, %v9590_v24 }
  0x3b   : > { %v436_v62 = vmul.f32 %v15655_v5, %v9593_v25  ;;  %v437_v21 = vmul.f32 %v15655_v5, %v9606_v30  ;;  %v438_v27 = vmul.f32 %v15655_v5, %v9609_v31  ;;  %v439_v63 = vmul.f32 %v15655_v5, %v9612_v32 }
  0x3c   : > { %v440_v12 = vmul.f32 %v15655_v5, %v9627_v37  ;;  %v441_v48 = vmul.f32 %v15655_v5, %v9630_v38  ;;  %v442_v49 = vmul.f32 %v15655_v5, %v9633_v39  ;;  %v460_v13 = vrot.slane %v427_v55, 3 }
  0x3d   : > { %v461_v53 = vrot.slane %v428_v3, 3  ;;  %v463_v1 = vrot.slane %v429_v58, 3  ;;  %v465_v7 = vrot.slane %v430_v15, 3  ;;  %v467_v4 = vrot.slane %v431_v59, 3 }
  0x3e   : > { %v468_v14 = vrot.slane %v432_v22, 3  ;;  %v470_v8 = vrot.slane %v433_v26, 3  ;;  %v472_v20 = vrot.slane %v434_v60, 3  ;;  %v474_v34 = vrot.slane %v435_v61, 3 }
  0x3f   : > { %v462_v28 = vsel %vm459_vm2, %v460_v13, %v461_v53  ;;  %v464_v29 = vsel %vm459_vm2, %v461_v53, %v463_v1  ;;  %v466_v45 = vsel %vm459_vm2, %v463_v1, %v465_v7  ;;  %v475_v5 = vrot.slane %v436_v62, 3 }
  0x40   : > { %v469_v46 = vsel %vm459_vm2, %v467_v4, %v468_v14  ;;  %v471_v50 = vsel %vm459_vm2, %v468_v14, %v470_v8  ;;  %v473_v35 = vsel %vm459_vm2, %v470_v8, %v472_v20  ;;  %v477_v55 = vrot.slane %v437_v21, 3 }
  0x41   : > { %v479_v3 = vrot.slane %v438_v27, 3  ;;  %v481_v58 = vrot.slane %v439_v63, 3  ;;  %v482_v15 = vrot.slane %v440_v12, 3  ;;  %v476_v59 = vsel %vm459_vm2, %v474_v34, %v475_v5 }
  0x42   : > { %v484_v22 = vrot.slane %v441_v48, 3  ;;  %v486_v26 = vrot.slane %v442_v49, 3  ;;  %v504_v60 = vadd.f32 %v462_v28, %v407_v33  ;;  %v478_v13 = vsel %vm459_vm2, %v475_v5, %v477_v55 }
  0x43   : > { %v480_v61 = vsel %vm459_vm2, %v477_v55, %v479_v3  ;;  %v483_v53 = vsel %vm459_vm2, %v481_v58, %v482_v15  ;;  %v505_v1 = vadd.f32 %v464_v29, %v408_v47  ;;  %v506_v21 = vadd.f32 %v466_v45, %v409_v36  ;;  %v15656_v47 = vld [vmem:[#allocation10_spill] sm:$0xff] }
  0x44   : > { %v485_v4 = vsel %vm459_vm2, %v482_v15, %v484_v22  ;;  %v487_v62 = vsel %vm459_vm2, %v484_v22, %v486_v26  ;;  %v507_v27 = vadd.f32 %v465_v7, %v410_v40  ;;  %v508_v63 = vadd.f32 %v469_v46, %v411_v41 }
  0x45   : > { %v509_v12 = vadd.f32 %v471_v50, %v412_v42  ;;  %v510_v14 = vadd.f32 %v473_v35, %v413_v51  ;;  %v511_v48 = vadd.f32 %v472_v20, %v414_v43  ;;  %v512_v49 = vadd.f32 %v476_v59, %v415_v44 }
  0x46   : > { %v513_v33 = vadd.f32 %v478_v13, %v416_v0  ;;  %v514_v8 = vadd.f32 %v480_v61, %v417_v52  ;;  %v515_v28 = vadd.f32 %v479_v3, %v418_v54  ;;  %v516_v34 = vadd.f32 %v483_v53, %v419_v56 }
  0x47   : > { %v517_v5 = vadd.f32 %v485_v4, %v420_v57  ;;  %v518_v55 = vadd.f32 %v487_v62, %v421_v2  ;;  %v519_v58 = vadd.f32 %v486_v26, %v422_v19  ;;  %v524_v29 = vmul.f32 %v15656_v47, %v9540_v6 }
  0x48   : > { %v525_v15 = vmul.f32 %v15656_v47, %v9547_v9  ;;  %v526_v36 = vmul.f32 %v15656_v47, %v9550_v10  ;;  %v527_v40 = vmul.f32 %v15656_v47, %v9553_v11  ;;  %v528_v41 = vmul.f32 %v15656_v47, %v9566_v16 }
  0x49   : > { %v529_v42 = vmul.f32 %v15656_v47, %v9569_v17  ;;  %v530_v51 = vmul.f32 %v15656_v47, %v9572_v18  ;;  %v531_v6 = vmul.f32 %v15656_v47, %v9587_v23  ;;  %v532_v9 = vmul.f32 %v15656_v47, %v9590_v24 }
  0x4a   : > { %v533_v10 = vmul.f32 %v15656_v47, %v9593_v25  ;;  %v534_v11 = vmul.f32 %v15656_v47, %v9606_v30  ;;  %v535_v43 = vmul.f32 %v15656_v47, %v9609_v31  ;;  %v536_v44 = vmul.f32 %v15656_v47, %v9612_v32 }
  0x4b   : > { %v537_v0 = vmul.f32 %v15656_v47, %v9627_v37  ;;  %v538_v52 = vmul.f32 %v15656_v47, %v9630_v38  ;;  %v539_v54 = vmul.f32 %v15656_v47, %v9633_v39  ;;  %v557_v56 = vrot.slane %v524_v29, 4 }
  0x4c   : > { %v558_v57 = vrot.slane %v525_v15, 4  ;;  %v560_v2 = vrot.slane %v526_v36, 4  ;;  %v562_v19 = vrot.slane %v527_v40, 4  ;;  %v564_v7 = vrot.slane %v528_v41, 4 }
  0x4d   : > { %v565_v20 = vrot.slane %v529_v42, 4  ;;  %v567_v45 = vrot.slane %v530_v51, 4  ;;  %v569_v46 = vrot.slane %v531_v6, 4  ;;  %v571_v59 = vrot.slane %v532_v9, 4 }
  0x4e   : > { %v559_v50 = vsel %vm556_vm3, %v557_v56, %v558_v57  ;;  %v561_v35 = vsel %vm556_vm3, %v558_v57, %v560_v2  ;;  %v563_v3 = vsel %vm556_vm3, %v560_v2, %v562_v19  ;;  %v572_v61 = vrot.slane %v533_v10, 4 }
  0x4f   : > { %v566_v22 = vsel %vm556_vm3, %v564_v7, %v565_v20  ;;  %v568_v26 = vsel %vm556_vm3, %v565_v20, %v567_v45  ;;  %v570_v13 = vsel %vm556_vm3, %v567_v45, %v569_v46  ;;  %v574_v53 = vrot.slane %v534_v11, 4  ;;  %v15658_v20 = vld [vmem:[#allocation8_spill] sm:$0xff]  ;;  %v15659_v45 = vld [vmem:[#allocation2_spill] sm:$0xff] }
  0x50   : > { %v576_v4 = vrot.slane %v535_v43, 4  ;;  %v578_v62 = vrot.slane %v536_v44, 4  ;;  %v579_v47 = vrot.slane %v537_v0, 4  ;;  %v573_v29 = vsel %vm556_vm3, %v571_v59, %v572_v61  ;;  %v9813_v44 = vld [vmem:[%s15437_s1 + $0x20] sm:$0xff] }
  0x51   : > { %v581_v15 = vrot.slane %v538_v52, 4  ;;  %v583_v36 = vrot.slane %v539_v54, 4  ;;  %v601_v40 = vadd.f32 %v559_v50, %v504_v60  ;;  %v575_v41 = vsel %vm556_vm3, %v572_v61, %v574_v53  ;;  %15657 = vst [vmem:[#allocation9_spill] sm:$0xff] %v9813_v44  ;;  %v9847_v59 = vld [vmem:[%s9526_s16 + $0x220] sm:$0xff] }
  0x52   : > { %v577_v42 = vsel %vm556_vm3, %v574_v53, %v576_v4  ;;  %v580_v51 = vsel %vm556_vm3, %v578_v62, %v579_v47  ;;  %v602_v6 = vadd.f32 %v561_v35, %v505_v1  ;;  %v603_v11 = vadd.f32 %v563_v3, %v506_v21  ;;  %v15660_v35 = vld [vmem:[#allocation11_spill] sm:$0xff]  ;;  %15674 = vst [vmem:[#allocation18_spill] sm:$0xff] %v9847_v59 }
  0x53   : > { %v582_v9 = vsel %vm556_vm3, %v579_v47, %v581_v15  ;;  %v584_v10 = vsel %vm556_vm3, %v581_v15, %v583_v36  ;;  %v604_v43 = vadd.f32 %v562_v19, %v507_v27  ;;  %v605_v0 = vadd.f32 %v566_v22, %v508_v63  ;;  %v9850_v22 = vld [vmem:[%s9526_s16 + $0x240] sm:$0xff] }
  0x54   : > { %v606_v60 = vadd.f32 %v568_v26, %v509_v12  ;;  %v607_v52 = vadd.f32 %v570_v13, %v510_v14  ;;  %v608_v54 = vadd.f32 %v569_v46, %v511_v48  ;;  %v609_v56 = vadd.f32 %v573_v29, %v512_v49  ;;  %v15661_v12 = vld [vmem:[#allocation12_spill] sm:$0xff]  ;;  %v15663_v48 = vld [vmem:[#allocation3_spill] sm:$0xff]  ;;  %15675 = vst [vmem:[#allocation19_spill] sm:$0xff] %v9850_v22  ;;  %v9853_v26 = vld [vmem:[%s9526_s16 + $0x260] sm:$0xff] }
  0x55   : > { %v610_v57 = vadd.f32 %v575_v41, %v513_v33  ;;  %v611_v1 = vadd.f32 %v577_v42, %v514_v8  ;;  %v612_v2 = vadd.f32 %v576_v4, %v515_v28  ;;  %v613_v7 = vadd.f32 %v580_v51, %v516_v34  ;;  %v9828_v33 = vld [vmem:[%s9526_s16 + $0x200] sm:$0xff]  ;;  %v15666_v8 = vld [vmem:[#allocation4_spill] sm:$0xff]  ;;  %v15668_v34 = vld [vmem:[#allocation5_spill] sm:$0xff]  ;;  %15676 = vst [vmem:[#allocation20_spill] sm:$0xff] %v9853_v26 }
  0x56   : > { %v614_v21 = vadd.f32 %v582_v9, %v517_v5  ;;  %v615_v27 = vadd.f32 %v584_v10, %v518_v55  ;;  %v616_v19 = vadd.f32 %v583_v36, %v519_v58  ;;  %v640_v50 = vrot.slane %v15659_v45, %v15658_v20  ;;  %15665 = vst [vmem:[#allocation13_spill] sm:$0xff] %v9828_v33  ;;  %v15670_v55 = vld [vmem:[#allocation6_spill] sm:$0xff]  ;;  %v15672_v46 = vld [vmem:[#allocation7_spill] sm:$0xff] }
  0x57   : > { %v676_v63 = vrot.slane %v15659_v45, %v15660_v35  ;;  %v9821_v14 = vrot.slane %v15659_v45, %v15661_v12  ;;  %v9825_v49 = vrot.slane %v9813_v44, %v15663_v48  ;;  %v9832_v28 = vrot.slane %v9813_v44, %v15666_v8 }
  0x58   : > { %v9836_v5 = vrot.slane %v9813_v44, %v15668_v34  ;;  %v9840_v58 = vrot.slane %v9813_v44, %v15670_v55  ;;  %v9844_v3 = vrot.slane %v9813_v44, %v15672_v46  ;;  %v641_v13 = vmul.f32 %v640_v50, %v9566_v16 }
  0x59   : > { %15662 = vst [vmem:[#allocation10_spill] sm:$0xff] %v9821_v14  ;;  %15664 = vst [vmem:[#allocation2_spill] sm:$0xff] %v9825_v49  ;;  %v642_v61 = vmul.f32 %v640_v50, %v9569_v17  ;;  %v643_v53 = vmul.f32 %v640_v50, %v9572_v18  ;;  %v644_v4 = vmul.f32 %v640_v50, %v9587_v23 }
  0x5a   : > { %15667 = vst [vmem:[#allocation14_spill] sm:$0xff] %v9832_v28  ;;  %15669 = vst [vmem:[#allocation15_spill] sm:$0xff] %v9836_v5  ;;  %v645_v62 = vmul.f32 %v640_v50, %v9590_v24  ;;  %v646_v47 = vmul.f32 %v640_v50, %v9593_v25  ;;  %v647_v29 = vmul.f32 %v640_v50, %v9606_v30 }
  0x5b   : > { %15671 = vst [vmem:[#allocation16_spill] sm:$0xff] %v9840_v58  ;;  %15673 = vst [vmem:[#allocation17_spill] sm:$0xff] %v9844_v3  ;;  %v648_v15 = vmul.f32 %v640_v50, %v9609_v31  ;;  %v649_v36 = vmul.f32 %v640_v50, %v9612_v32  ;;  %v650_v41 = vmul.f32 %v640_v50, %v9627_v37 }
  0x5c   : > { %v651_v42 = vmul.f32 %v640_v50, %v9630_v38  ;;  %v652_v51 = vmul.f32 %v640_v50, %v9633_v39  ;;  %v653_v9 = vmul.f32 %v9828_v33, %v640_v50  ;;  %v654_v10 = vmul.f32 %v9847_v59, %v640_v50 }
  0x5d   : > { %v655_v45 = vmul.f32 %v9850_v22, %v640_v50  ;;  %v656_v46 = vmul.f32 %v9853_v26, %v640_v50  ;;  %v657_v55 = vadd.f32 %v641_v13, %v601_v40  ;;  %v658_v34 = vadd.f32 %v642_v61, %v602_v6 }
  0x5e   : > { %v659_v8 = vadd.f32 %v643_v53, %v603_v11  ;;  %v660_v48 = vadd.f32 %v644_v4, %v604_v43  ;;  %v661_v12 = vadd.f32 %v645_v62, %v605_v0  ;;  %v662_v35 = vadd.f32 %v646_v47, %v606_v60 }
  0x5f   : > { %v663_v44 = vadd.f32 %v647_v29, %v607_v52  ;;  %v664_v20 = vadd.f32 %v648_v15, %v608_v54  ;;  %v665_v3 = vadd.f32 %v649_v36, %v609_v56  ;;  %v666_v58 = vadd.f32 %v650_v41, %v610_v57 }
  0x60   : > { %v667_v5 = vadd.f32 %v651_v42, %v611_v1  ;;  %v668_v28 = vadd.f32 %v652_v51, %v612_v2  ;;  %v669_v49 = vadd.f32 %v653_v9, %v613_v7  ;;  %v670_v14 = vadd.f32 %v654_v10, %v614_v21  ;;  %v15677_v1 = vld [vmem:[#allocation13_spill] sm:$0xff]  ;;  %v15678_v7 = vld [vmem:[#allocation18_spill] sm:$0xff] }
  0x61   : > { %v671_v33 = vadd.f32 %v655_v45, %v615_v27  ;;  %v672_v59 = vadd.f32 %v656_v46, %v616_v19  ;;  %v677_v22 = vmul.f32 %v676_v63, %v9566_v16  ;;  %v678_v50 = vmul.f32 %v676_v63, %v9569_v17  ;;  %v15679_v27 = vld [vmem:[#allocation19_spill] sm:$0xff] }
  0x62   : > { %v679_v40 = vmul.f32 %v676_v63, %v9572_v18  ;;  %v680_v6 = vmul.f32 %v676_v63, %v9587_v23  ;;  %v681_v11 = vmul.f32 %v676_v63, %v9590_v24  ;;  %v682_v43 = vmul.f32 %v676_v63, %v9593_v25 }
  0x63   : > { %v683_v0 = vmul.f32 %v676_v63, %v9606_v30  ;;  %v684_v60 = vmul.f32 %v676_v63, %v9609_v31  ;;  %v685_v52 = vmul.f32 %v676_v63, %v9612_v32  ;;  %v686_v54 = vmul.f32 %v676_v63, %v9627_v37 }
  0x64   : > { %v687_v56 = vmul.f32 %v676_v63, %v9630_v38  ;;  %v688_v57 = vmul.f32 %v676_v63, %v9633_v39  ;;  %v689_v2 = vmul.f32 %v15677_v1, %v676_v63  ;;  %v690_v21 = vmul.f32 %v15678_v7, %v676_v63 }
  0x65   : > { %v691_v19 = vmul.f32 %v15679_v27, %v676_v63  ;;  %v692_v46 = vmul.f32 %v9853_v26, %v676_v63  ;;  %v709_v13 = vrot.slane %v677_v22, 1  ;;  %v710_v61 = vrot.slane %v678_v50, 1 }
  0x66   : > { %v712_v53 = vrot.slane %v679_v40, 1  ;;  %v714_v4 = vrot.slane %v680_v6, 1  ;;  %v716_v62 = vrot.slane %v681_v11, 1  ;;  %v717_v47 = vrot.slane %v682_v43, 1 }
  0x67   : > { %v719_v29 = vrot.slane %v683_v0, 1  ;;  %v721_v15 = vrot.slane %v684_v60, 1  ;;  %v711_v36 = vsel %vm265_vm0, %v709_v13, %v710_v61  ;;  %v723_v51 = vrot.slane %v685_v52, 1 }
  0x68   : > { %v713_v41 = vsel %vm265_vm0, %v710_v61, %v712_v53  ;;  %v715_v42 = vsel %vm265_vm0, %v712_v53, %v714_v4  ;;  %v718_v9 = vsel %vm265_vm0, %v716_v62, %v717_v47  ;;  %v724_v22 = vrot.slane %v686_v54, 1 }
  0x69   : > { %v720_v10 = vsel %vm265_vm0, %v717_v47, %v719_v29  ;;  %v722_v63 = vsel %vm265_vm0, %v719_v29, %v721_v15  ;;  %v726_v45 = vrot.slane %v687_v56, 1  ;;  %v728_v50 = vrot.slane %v688_v57, 1 }
  0x6a   : > { %v730_v40 = vrot.slane %v689_v2, 1  ;;  %v731_v6 = vrot.slane %v690_v21, 1  ;;  %v725_v11 = vsel %vm265_vm0, %v723_v51, %v724_v22  ;;  %v733_v43 = vrot.slane %v691_v19, 1 }
  0x6b   : > { %v735_v0 = vrot.slane %v692_v46, 1  ;;  %v753_v60 = vadd.f32 %v711_v36, %v657_v55  ;;  %v727_v13 = vsel %vm265_vm0, %v724_v22, %v726_v45  ;;  %v729_v52 = vsel %vm265_vm0, %v726_v45, %v728_v50 }
  0x6c   : > { %v732_v61 = vsel %vm265_vm0, %v730_v40, %v731_v6  ;;  %v754_v53 = vadd.f32 %v713_v41, %v658_v34  ;;  %v734_v62 = vsel %vm265_vm0, %v731_v6, %v733_v43  ;;  %v755_v56 = vadd.f32 %v715_v42, %v659_v8  ;;  %v15680_v34 = vld [vmem:[#allocation10_spill] sm:$0xff] }
  0x6d   : > { %v736_v54 = vsel %vm265_vm0, %v733_v43, %v735_v0  ;;  %v756_v57 = vadd.f32 %v714_v4, %v660_v48  ;;  %v757_v2 = vadd.f32 %v718_v9, %v661_v12  ;;  %v758_v21 = vadd.f32 %v720_v10, %v662_v35 }
  0x6e   : > { %v759_v47 = vadd.f32 %v722_v63, %v663_v44  ;;  %v760_v29 = vadd.f32 %v721_v15, %v664_v20  ;;  %v761_v19 = vadd.f32 %v725_v11, %v665_v3  ;;  %v762_v46 = vadd.f32 %v727_v13, %v666_v58 }
  0x6f   : > { %v763_v55 = vadd.f32 %v729_v52, %v667_v5  ;;  %v764_v36 = vadd.f32 %v728_v50, %v668_v28  ;;  %v765_v51 = vadd.f32 %v732_v61, %v669_v49  ;;  %v766_v22 = vadd.f32 %v734_v62, %v670_v14 }
  0x70   : > { %v767_v45 = vadd.f32 %v736_v54, %v671_v33  ;;  %v768_v26 = vadd.f32 %v735_v0, %v672_v59  ;;  %v773_v41 = vmul.f32 %v15680_v34, %v9566_v16  ;;  %v774_v40 = vmul.f32 %v15680_v34, %v9569_v17  ;;  %v15681_v59 = vld [vmem:[#allocation20_spill] sm:$0xff] }
  0x71   : > { %v775_v12 = vmul.f32 %v15680_v34, %v9572_v18  ;;  %v776_v44 = vmul.f32 %v15680_v34, %v9587_v23  ;;  %v777_v20 = vmul.f32 %v15680_v34, %v9590_v24  ;;  %v778_v35 = vmul.f32 %v15680_v34, %v9593_v25 }
  0x72   : > { %v779_v14 = vmul.f32 %v15680_v34, %v9606_v30  ;;  %v780_v48 = vmul.f32 %v15680_v34, %v9609_v31  ;;  %v781_v49 = vmul.f32 %v15680_v34, %v9612_v32  ;;  %v782_v33 = vmul.f32 %v15680_v34, %v9627_v37 }
  0x73   : > { %v783_v8 = vmul.f32 %v15680_v34, %v9630_v38  ;;  %v784_v28 = vmul.f32 %v15680_v34, %v9633_v39  ;;  %v785_v5 = vmul.f32 %v15677_v1, %v15680_v34  ;;  %v786_v58 = vmul.f32 %v15678_v7, %v15680_v34 }
  0x74   : > { %v787_v3 = vmul.f32 %v15679_v27, %v15680_v34  ;;  %v788_v4 = vmul.f32 %v15681_v59, %v15680_v34  ;;  %v805_v15 = vrot.slane %v773_v41, 2  ;;  %v806_v42 = vrot.slane %v774_v40, 2 }
  0x75   : > { %v808_v9 = vrot.slane %v775_v12, 2  ;;  %v810_v10 = vrot.slane %v776_v44, 2  ;;  %v812_v63 = vrot.slane %v777_v20, 2  ;;  %v813_v50 = vrot.slane %v778_v35, 2 }
  0x76   : > { %v815_v6 = vrot.slane %v779_v14, 2  ;;  %v817_v11 = vrot.slane %v780_v48, 2  ;;  %v807_v43 = vsel %vm362_vm1, %v805_v15, %v806_v42  ;;  %v819_v52 = vrot.slane %v781_v49, 2 }
  0x77   : > { %v809_v0 = vsel %vm362_vm1, %v806_v42, %v808_v9  ;;  %v811_v13 = vsel %vm362_vm1, %v808_v9, %v810_v10  ;;  %v814_v61 = vsel %vm362_vm1, %v812_v63, %v813_v50  ;;  %v820_v34 = vrot.slane %v782_v33, 2 }
  0x78   : > { %v816_v62 = vsel %vm362_vm1, %v813_v50, %v815_v6  ;;  %v818_v54 = vsel %vm362_vm1, %v815_v6, %v817_v11  ;;  %v822_v41 = vrot.slane %v783_v8, 2  ;;  %v824_v40 = vrot.slane %v784_v28, 2 }
  0x79   : > { %v826_v12 = vrot.slane %v785_v5, 2  ;;  %v827_v44 = vrot.slane %v786_v58, 2  ;;  %v821_v20 = vsel %vm362_vm1, %v819_v52, %v820_v34  ;;  %v829_v35 = vrot.slane %v787_v3, 2 }
  0x7a   : > { %v831_v14 = vrot.slane %v788_v4, 2  ;;  %v849_v48 = vadd.f32 %v807_v43, %v753_v60  ;;  %v823_v15 = vsel %vm362_vm1, %v820_v34, %v822_v41  ;;  %v825_v49 = vsel %vm362_vm1, %v822_v41, %v824_v40 }
  0x7b   : > { %v828_v42 = vsel %vm362_vm1, %v826_v12, %v827_v44  ;;  %v850_v9 = vadd.f32 %v809_v0, %v754_v53  ;;  %v830_v63 = vsel %vm362_vm1, %v827_v44, %v829_v35  ;;  %v851_v8 = vadd.f32 %v811_v13, %v755_v56  ;;  %v15682_v53 = vld [vmem:[#allocation2_spill] sm:$0xff] }
  0x7c   : > { %v832_v33 = vsel %vm362_vm1, %v829_v35, %v831_v14  ;;  %v852_v28 = vadd.f32 %v810_v10, %v756_v57  ;;  %v853_v5 = vadd.f32 %v814_v61, %v757_v2  ;;  %v854_v58 = vadd.f32 %v816_v62, %v758_v21 }
  0x7d   : > { %v855_v50 = vadd.f32 %v818_v54, %v759_v47  ;;  %v856_v6 = vadd.f32 %v817_v11, %v760_v29  ;;  %v857_v3 = vadd.f32 %v821_v20, %v761_v19  ;;  %v858_v4 = vadd.f32 %v823_v15, %v762_v46 }
  0x7e   : > { %v859_v60 = vadd.f32 %v825_v49, %v763_v55  ;;  %v860_v43 = vadd.f32 %v824_v40, %v764_v36  ;;  %v861_v52 = vadd.f32 %v828_v42, %v765_v51  ;;  %v862_v34 = vadd.f32 %v830_v63, %v766_v22 }
  0x7f   : > { %v863_v41 = vadd.f32 %v832_v33, %v767_v45  ;;  %v864_v59 = vadd.f32 %v831_v14, %v768_v26  ;;  %v869_v0 = vmul.f32 %v15682_v53, %v9566_v16  ;;  %v870_v12 = vmul.f32 %v15682_v53, %v9569_v17  ;;  %v15683_v45 = vld [vmem:[#allocation20_spill] sm:$0xff] }
  0x80   : > { %v871_v56 = vmul.f32 %v15682_v53, %v9572_v18  ;;  %v872_v57 = vmul.f32 %v15682_v53, %v9587_v23  ;;  %v873_v2 = vmul.f32 %v15682_v53, %v9590_v24  ;;  %v874_v21 = vmul.f32 %v15682_v53, %v9593_v25 }
  0x81   : > { %v875_v26 = vmul.f32 %v15682_v53, %v9606_v30  ;;  %v876_v47 = vmul.f32 %v15682_v53, %v9609_v31  ;;  %v877_v29 = vmul.f32 %v15682_v53, %v9612_v32  ;;  %v878_v19 = vmul.f32 %v15682_v53, %v9627_v37 }
  0x82   : > { %v879_v46 = vmul.f32 %v15682_v53, %v9630_v38  ;;  %v880_v55 = vmul.f32 %v15682_v53, %v9633_v39  ;;  %v881_v36 = vmul.f32 %v15677_v1, %v15682_v53  ;;  %v882_v51 = vmul.f32 %v15678_v7, %v15682_v53 }
  0x83   : > { %v883_v22 = vmul.f32 %v15679_v27, %v15682_v53  ;;  %v884_v10 = vmul.f32 %v15683_v45, %v15682_v53  ;;  %v901_v11 = vrot.slane %v869_v0, 3  ;;  %v902_v13 = vrot.slane %v870_v12, 3 }
  0x84   : > { %v904_v61 = vrot.slane %v871_v56, 3  ;;  %v906_v62 = vrot.slane %v872_v57, 3  ;;  %v908_v54 = vrot.slane %v873_v2, 3  ;;  %v909_v40 = vrot.slane %v874_v21, 3 }
  0x85   : > { %v911_v44 = vrot.slane %v875_v26, 3  ;;  %v913_v20 = vrot.slane %v876_v47, 3  ;;  %v903_v35 = vsel %vm459_vm2, %v901_v11, %v902_v13  ;;  %v915_v49 = vrot.slane %v877_v29, 3 }
  0x86   : > { %v905_v14 = vsel %vm459_vm2, %v902_v13, %v904_v61  ;;  %v907_v15 = vsel %vm459_vm2, %v904_v61, %v906_v62  ;;  %v910_v42 = vsel %vm459_vm2, %v908_v54, %v909_v40  ;;  %v916_v53 = vrot.slane %v878_v19, 3 }
  0x87   : > { %v912_v63 = vsel %vm459_vm2, %v909_v40, %v911_v44  ;;  %v914_v33 = vsel %vm459_vm2, %v911_v44, %v913_v20  ;;  %v918_v0 = vrot.slane %v879_v46, 3  ;;  %v920_v12 = vrot.slane %v880_v55, 3 }
  0x88   : > { %v922_v56 = vrot.slane %v881_v36, 3  ;;  %v923_v57 = vrot.slane %v882_v51, 3  ;;  %v917_v2 = vsel %vm459_vm2, %v915_v49, %v916_v53  ;;  %v925_v21 = vrot.slane %v883_v22, 3 }
  0x89   : > { %v927_v26 = vrot.slane %v884_v10, 3  ;;  %v945_v47 = vadd.f32 %v903_v35, %v849_v48  ;;  %v919_v11 = vsel %vm459_vm2, %v916_v53, %v918_v0  ;;  %v921_v29 = vsel %vm459_vm2, %v918_v0, %v920_v12 }
  0x8a   : > { %v924_v13 = vsel %vm459_vm2, %v922_v56, %v923_v57  ;;  %v946_v61 = vadd.f32 %v905_v14, %v850_v9  ;;  %v926_v54 = vsel %vm459_vm2, %v923_v57, %v925_v21  ;;  %v947_v46 = vadd.f32 %v907_v15, %v851_v8 }
  0x8b   : > { %v928_v19 = vsel %vm459_vm2, %v925_v21, %v927_v26  ;;  %v948_v55 = vadd.f32 %v906_v62, %v852_v28  ;;  %v949_v36 = vadd.f32 %v910_v42, %v853_v5  ;;  %v950_v51 = vadd.f32 %v912_v63, %v854_v58  ;;  %v15684_v28 = vld [vmem:[#allocation14_spill] sm:$0xff] }
  0x8c   : > { %v951_v40 = vadd.f32 %v914_v33, %v855_v50  ;;  %v952_v44 = vadd.f32 %v913_v20, %v856_v6  ;;  %v9987_v22 = vadd.f32 %v917_v2, %v857_v3  ;;  %v9989_v48 = vadd.f32 %v919_v11, %v858_v4 }
  0x8d   : > { %v9991_v10 = vadd.f32 %v921_v29, %v859_v60  ;;  %v9993_v35 = vadd.f32 %v920_v12, %v860_v43  ;;  %v9995_v49 = vadd.f32 %v924_v13, %v861_v52  ;;  %v9997_v9 = vadd.f32 %v926_v54, %v862_v34 }
  0x8e   : > { %v9999_v14 = vadd.f32 %v928_v19, %v863_v41  ;;  %v10001_v8 = vadd.f32 %v927_v26, %v864_v59  ;;  %v965_v5 = vmul.f32 %v15684_v28, %v9566_v16  ;;  %v966_v58 = vmul.f32 %v15684_v28, %v9569_v17 }
  0x8f   : > { %v967_v50 = vmul.f32 %v15684_v28, %v9572_v18  ;;  %v968_v6 = vmul.f32 %v15684_v28, %v9587_v23  ;;  %v969_v3 = vmul.f32 %v15684_v28, %v9590_v24  ;;  %v970_v4 = vmul.f32 %v15684_v28, %v9593_v25 }
  0x90   : > { %v971_v59 = vmul.f32 %v15684_v28, %v9606_v30  ;;  %v972_v16 = vmul.f32 %v15684_v28, %v9609_v31  ;;  %v973_v17 = vmul.f32 %v15684_v28, %v9612_v32  ;;  %v974_v18 = vmul.f32 %v15684_v28, %v9627_v37 }
  0x91   : > { %v975_v23 = vmul.f32 %v15684_v28, %v9630_v38  ;;  %v976_v24 = vmul.f32 %v15684_v28, %v9633_v39  ;;  %v977_v25 = vmul.f32 %v15677_v1, %v15684_v28  ;;  %v978_v30 = vmul.f32 %v15678_v7, %v15684_v28 }
  0x92   : > { %v979_v31 = vmul.f32 %v15679_v27, %v15684_v28  ;;  %v980_v32 = vmul.f32 %v15683_v45, %v15684_v28  ;;  %v997_v60 = vrot.slane %v965_v5, 4  ;;  %v998_v37 = vrot.slane %v966_v58, 4 }
  0x93   : > { %v1000_v43 = vrot.slane %v967_v50, 4  ;;  %v1002_v52 = vrot.slane %v968_v6, 4  ;;  %v1004_v38 = vrot.slane %v969_v3, 4  ;;  %v1005_v34 = vrot.slane %v970_v4, 4  ;;  %v10048_v3 = vld [vmem:[%s9526_s16 + $0x100] sm:$0xff] }
  0x94   : > { %v1007_v41 = vrot.slane %v971_v59, 4  ;;  %v1009_v39 = vrot.slane %v972_v16, 4  ;;  %v999_v62 = vsel %vm556_vm3, %v997_v60, %v998_v37  ;;  %v1011_v42 = vrot.slane %v973_v17, 4  ;;  %v15689_v60 = vld [vmem:[#allocation15_spill] sm:$0xff] }
  0x95   : > { %v1001_v20 = vsel %vm556_vm3, %v998_v37, %v1000_v43  ;;  %v1003_v15 = vsel %vm556_vm3, %v1000_v43, %v1002_v52  ;;  %v1006_v63 = vsel %vm556_vm3, %v1004_v38, %v1005_v34  ;;  %v1012_v0 = vrot.slane %v974_v18, 4  ;;  %v10057_v18 = vld [vmem:[%s9526_s16 + $0x160] sm:$0xff] }
  0x96   : > { %v1008_v33 = vsel %vm556_vm3, %v1005_v34, %v1007_v41  ;;  %v1010_v53 = vsel %vm556_vm3, %v1007_v41, %v1009_v39  ;;  %v1014_v12 = vrot.slane %v975_v23, 4  ;;  %v1016_v56 = vrot.slane %v976_v24, 4 }
  0x97   : > { %v1018_v57 = vrot.slane %v977_v25, 4  ;;  %v1019_v2 = vrot.slane %v978_v30, 4  ;;  %v1013_v21 = vsel %vm556_vm3, %v1011_v42, %v1012_v0  ;;  %v1021_v26 = vrot.slane %v979_v31, 4 }
  0x98   : > { %v1023_v11 = vrot.slane %v980_v32, 4  ;;  %v1041_v29 = vadd.f32 %v999_v62, %v945_v47  ;;  %v1015_v13 = vsel %vm556_vm3, %v1012_v0, %v1014_v12  ;;  %v1017_v54 = vsel %vm556_vm3, %v1014_v12, %v1016_v56  ;;  %v10051_v47 = vld [vmem:[%s9526_s16 + $0x120] sm:$0xff] }
  0x99   : > { %v1020_v19 = vsel %vm556_vm3, %v1018_v57, %v1019_v2  ;;  %v1042_v28 = vadd.f32 %v1001_v20, %v946_v61  ;;  %v1022_v5 = vsel %vm556_vm3, %v1019_v2, %v1021_v26  ;;  %v1043_v50 = vadd.f32 %v1003_v15, %v947_v46  ;;  %v10054_v61 = vld [vmem:[%s9526_s16 + $0x140] sm:$0xff] }
  0x9a   : > { %v1024_v58 = vsel %vm556_vm3, %v1021_v26, %v1023_v11  ;;  %v1044_v6 = vadd.f32 %v1002_v52, %v948_v55  ;;  %v1045_v4 = vadd.f32 %v1006_v63, %v949_v36  ;;  %v1046_v59 = vadd.f32 %v1008_v33, %v950_v51  ;;  %v10060_v46 = vld [vmem:[%s9526_s16 + $0x180] sm:$0xff] }
  0x9b   : > { %v1047_v16 = vadd.f32 %v1010_v53, %v951_v40  ;;  %v1048_v17 = vadd.f32 %v1009_v39, %v952_v44  ;;  %v1049_v55 = vadd.f32 %v1013_v21, %v9987_v22  ;;  %v1050_v23 = vadd.f32 %v1015_v13, %v9989_v48  ;;  %v10067_v51 = vld [vmem:[%s9526_s16 + $0x1a0] sm:$0xff] }
  0x9c   : > { %v1051_v24 = vadd.f32 %v1017_v54, %v9991_v10  ;;  %v1052_v36 = vadd.f32 %v1016_v56, %v9993_v35  ;;  %v10070_v40 = vld [vmem:[%s9526_s16 + $0x1c0] sm:$0xff]  ;;  %v1053_v25 = vadd.f32 %v1020_v19, %v9995_v49  ;;  %v1054_v30 = vadd.f32 %v1022_v5, %v9997_v9 }
  0x9d   : > { %v10073_v44 = vld [vmem:[%s9526_s16 + $0x1e0] sm:$0xff]  ;;  %v1055_v31 = vadd.f32 %v1024_v58, %v9999_v14  ;;  %v1056_v22 = vadd.f32 %v1023_v11, %v10001_v8  ;;  %v1081_v37 = vmul.f32 %v10048_v3, %v15689_v60  ;;  %v1082_v49 = vmul.f32 %v10051_v47, %v15689_v60 }
  0x9e   : > { %v10080_v32 = vld [vmem:[%s9526_s16 + $0x280] sm:$0xff]  ;;  %v1083_v9 = vmul.f32 %v10054_v61, %v15689_v60  ;;  %v1084_v14 = vmul.f32 %v10057_v18, %v15689_v60  ;;  %v1085_v8 = vmul.f32 %v10060_v46, %v15689_v60  ;;  %v1086_v43 = vmul.f32 %v10067_v51, %v15689_v60 }
  0x9f   : > { %15685 = vst [vmem:[#allocation13_spill] sm:$0xff] %v10080_v32  ;;  %v10083_v48 = vld [vmem:[%s9526_s16 + $0x2a0] sm:$0xff]  ;;  %v1087_v52 = vmul.f32 %v10070_v40, %v15689_v60  ;;  %v1088_v38 = vmul.f32 %v10073_v44, %v15689_v60  ;;  %v1089_v34 = vmul.f32 %v15677_v1, %v15689_v60  ;;  %v1090_v41 = vmul.f32 %v15678_v7, %v15689_v60 }
  0xa0   : > { %15686 = vst [vmem:[#allocation18_spill] sm:$0xff] %v10083_v48  ;;  %v10086_v10 = vld [vmem:[%s9526_s16 + $0x2c0] sm:$0xff]  ;;  %v1091_v39 = vmul.f32 %v15679_v27, %v15689_v60  ;;  %v1092_v62 = vmul.f32 %v15683_v45, %v15689_v60  ;;  %v1093_v20 = vmul.f32 %v10080_v32, %v15689_v60  ;;  %v1094_v15 = vmul.f32 %v10083_v48, %v15689_v60 }
  0xa1   : > { %15687 = vst [vmem:[#allocation19_spill] sm:$0xff] %v10086_v10  ;;  %v10089_v35 = vld [vmem:[%s9526_s16 + $0x2e0] sm:$0xff]  ;;  %v1095_v42 = vmul.f32 %v10086_v10, %v15689_v60  ;;  %v1097_v33 = vadd.f32 %v1081_v37, %v1041_v29  ;;  %v1098_v53 = vadd.f32 %v1082_v49, %v1042_v28  ;;  %v1099_v0 = vadd.f32 %v1083_v9, %v1043_v50  ;;  %v15690_v10 = vld [vmem:[#allocation16_spill] sm:$0xff] }
  0xa2   : > { %15688 = vst [vmem:[#allocation10_spill] sm:$0xff] %v10089_v35  ;;  %v1096_v63 = vmul.f32 %v10089_v35, %v15689_v60  ;;  %v1100_v12 = vadd.f32 %v1084_v14, %v1044_v6  ;;  %v1101_v56 = vadd.f32 %v1085_v8, %v1045_v4  ;;  %v1102_v57 = vadd.f32 %v1086_v43, %v1046_v59 }
  0xa3   : > { %v1103_v2 = vadd.f32 %v1087_v52, %v1047_v16  ;;  %v1104_v21 = vadd.f32 %v1088_v38, %v1048_v17  ;;  %v1105_v26 = vadd.f32 %v1089_v34, %v1049_v55  ;;  %v1106_v11 = vadd.f32 %v1090_v41, %v1050_v23 }
  0xa4   : > { %v1107_v13 = vadd.f32 %v1091_v39, %v1051_v24  ;;  %v1108_v54 = vadd.f32 %v1092_v62, %v1052_v36  ;;  %v1109_v19 = vadd.f32 %v1093_v20, %v1053_v25  ;;  %v1110_v5 = vadd.f32 %v1094_v15, %v1054_v30 }
  0xa5   : > { %v1111_v58 = vadd.f32 %v1095_v42, %v1055_v31  ;;  %v1112_v48 = vadd.f32 %v1096_v63, %v1056_v22  ;;  %v1117_v32 = vmul.f32 %v10048_v3, %v15690_v10  ;;  %v1118_v29 = vmul.f32 %v10051_v47, %v15690_v10 }
  0xa6   : > { %v1119_v28 = vmul.f32 %v10054_v61, %v15690_v10  ;;  %v1120_v50 = vmul.f32 %v10057_v18, %v15690_v10  ;;  %v1121_v6 = vmul.f32 %v10060_v46, %v15690_v10  ;;  %v1122_v4 = vmul.f32 %v10067_v51, %v15690_v10  ;;  %v15691_v36 = vld [vmem:[#allocation13_spill] sm:$0xff] }
  0xa7   : > { %v1123_v59 = vmul.f32 %v10070_v40, %v15690_v10  ;;  %v1124_v16 = vmul.f32 %v10073_v44, %v15690_v10  ;;  %v1125_v17 = vmul.f32 %v15677_v1, %v15690_v10  ;;  %v1126_v55 = vmul.f32 %v15678_v7, %v15690_v10  ;;  %v15692_v30 = vld [vmem:[#allocation18_spill] sm:$0xff] }
  0xa8   : > { %v1127_v23 = vmul.f32 %v15679_v27, %v15690_v10  ;;  %v1128_v24 = vmul.f32 %v15683_v45, %v15690_v10  ;;  %v1129_v25 = vmul.f32 %v15691_v36, %v15690_v10  ;;  %v1130_v31 = vmul.f32 %v15692_v30, %v15690_v10  ;;  %v15693_v22 = vld [vmem:[#allocation19_spill] sm:$0xff] }
  0xa9   : > { %v1131_v60 = vmul.f32 %v15693_v22, %v15690_v10  ;;  %v1132_v37 = vmul.f32 %v10089_v35, %v15690_v10  ;;  %v1149_v49 = vrot.slane %v1117_v32, 1  ;;  %v1150_v9 = vrot.slane %v1118_v29, 1 }
  0xaa   : > { %v1152_v14 = vrot.slane %v1119_v28, 1  ;;  %v1154_v8 = vrot.slane %v1120_v50, 1  ;;  %v1156_v43 = vrot.slane %v1121_v6, 1  ;;  %v1157_v52 = vrot.slane %v1122_v4, 1 }
  0xab   : > { %v1159_v38 = vrot.slane %v1123_v59, 1  ;;  %v1161_v34 = vrot.slane %v1124_v16, 1  ;;  %v1151_v41 = vsel %vm265_vm0, %v1149_v49, %v1150_v9  ;;  %v1163_v20 = vrot.slane %v1125_v17, 1 }
  0xac   : > { %v1153_v39 = vsel %vm265_vm0, %v1150_v9, %v1152_v14  ;;  %v1155_v62 = vsel %vm265_vm0, %v1152_v14, %v1154_v8  ;;  %v1158_v15 = vsel %vm265_vm0, %v1156_v43, %v1157_v52  ;;  %v1164_v10 = vrot.slane %v1126_v55, 1 }
  0xad   : > { %v1160_v42 = vsel %vm265_vm0, %v1157_v52, %v1159_v38  ;;  %v1162_v32 = vsel %vm265_vm0, %v1159_v38, %v1161_v34  ;;  %v1166_v63 = vrot.slane %v1127_v23, 1  ;;  %v1168_v29 = vrot.slane %v1128_v24, 1 }
  0xae   : > { %v1170_v28 = vrot.slane %v1129_v25, 1  ;;  %v1171_v50 = vrot.slane %v1130_v31, 1  ;;  %v1165_v6 = vsel %vm265_vm0, %v1163_v20, %v1164_v10  ;;  %v1173_v4 = vrot.slane %v1131_v60, 1 }
  0xaf   : > { %v1175_v59 = vrot.slane %v1132_v37, 1  ;;  %v1193_v16 = vadd.f32 %v1151_v41, %v1097_v33  ;;  %v1167_v49 = vsel %vm265_vm0, %v1164_v10, %v1166_v63  ;;  %v1169_v17 = vsel %vm265_vm0, %v1166_v63, %v1168_v29 }
  0xb0   : > { %v1172_v9 = vsel %vm265_vm0, %v1170_v28, %v1171_v50  ;;  %v1194_v14 = vadd.f32 %v1153_v39, %v1098_v53  ;;  %v1174_v43 = vsel %vm265_vm0, %v1171_v50, %v1173_v4  ;;  %v1195_v23 = vadd.f32 %v1155_v62, %v1099_v0  ;;  %v15694_v28 = vld [vmem:[#allocation17_spill] sm:$0xff] }
  0xb1   : > { %v1176_v55 = vsel %vm265_vm0, %v1173_v4, %v1175_v59  ;;  %v1196_v24 = vadd.f32 %v1154_v8, %v1100_v12  ;;  %v1197_v25 = vadd.f32 %v1158_v15, %v1101_v56  ;;  %v1198_v31 = vadd.f32 %v1160_v42, %v1102_v57 }
  0xb2   : > { %v1199_v52 = vadd.f32 %v1162_v32, %v1103_v2  ;;  %v1200_v38 = vadd.f32 %v1161_v34, %v1104_v21  ;;  %v1201_v60 = vadd.f32 %v1165_v6, %v1105_v26  ;;  %v1202_v37 = vadd.f32 %v1167_v49, %v1106_v11 }
  0xb3   : > { %v1203_v33 = vadd.f32 %v1169_v17, %v1107_v13  ;;  %v1204_v41 = vadd.f32 %v1168_v29, %v1108_v54  ;;  %v1205_v20 = vadd.f32 %v1172_v9, %v1109_v19  ;;  %v1206_v10 = vadd.f32 %v1174_v43, %v1110_v5 }
  0xb4   : > { %v1207_v63 = vadd.f32 %v1176_v55, %v1111_v58  ;;  %v1208_v35 = vadd.f32 %v1175_v59, %v1112_v48  ;;  %v1213_v53 = vmul.f32 %v10048_v3, %v15694_v28  ;;  %v1214_v39 = vmul.f32 %v10051_v47, %v15694_v28  ;;  %v15695_v58 = vld [vmem:[#allocation10_spill] sm:$0xff] }
  0xb5   : > { %v1215_v0 = vmul.f32 %v10054_v61, %v15694_v28  ;;  %v1216_v12 = vmul.f32 %v10057_v18, %v15694_v28  ;;  %v1217_v56 = vmul.f32 %v10060_v46, %v15694_v28  ;;  %v1218_v57 = vmul.f32 %v10067_v51, %v15694_v28 }
  0xb6   : > { %v1219_v48 = vmul.f32 %v10070_v40, %v15694_v28  ;;  %v1220_v2 = vmul.f32 %v10073_v44, %v15694_v28  ;;  %v1221_v21 = vmul.f32 %v15677_v1, %v15694_v28  ;;  %v1222_v26 = vmul.f32 %v15678_v7, %v15694_v28 }
  0xb7   : > { %v1223_v11 = vmul.f32 %v15679_v27, %v15694_v28  ;;  %v1224_v13 = vmul.f32 %v15683_v45, %v15694_v28  ;;  %v1225_v54 = vmul.f32 %v15691_v36, %v15694_v28  ;;  %v1226_v19 = vmul.f32 %v15692_v30, %v15694_v28 }
  0xb8   : > { %v1227_v5 = vmul.f32 %v15693_v22, %v15694_v28  ;;  %v1228_v8 = vmul.f32 %v15695_v58, %v15694_v28  ;;  %v1245_v34 = vrot.slane %v1213_v53, 2  ;;  %v1246_v62 = vrot.slane %v1214_v39, 2 }
  0xb9   : > { %v1248_v15 = vrot.slane %v1215_v0, 2  ;;  %v1250_v42 = vrot.slane %v1216_v12, 2  ;;  %v1252_v32 = vrot.slane %v1217_v56, 2  ;;  %v1253_v29 = vrot.slane %v1218_v57, 2 }
  0xba   : > { %v1255_v50 = vrot.slane %v1219_v48, 2  ;;  %v1257_v6 = vrot.slane %v1220_v2, 2  ;;  %v1247_v4 = vsel %vm362_vm1, %v1245_v34, %v1246_v62  ;;  %v1259_v17 = vrot.slane %v1221_v21, 2 }
  0xbb   : > { %v1249_v59 = vsel %vm362_vm1, %v1246_v62, %v1248_v15  ;;  %v1251_v49 = vsel %vm362_vm1, %v1248_v15, %v1250_v42  ;;  %v1254_v9 = vsel %vm362_vm1, %v1252_v32, %v1253_v29  ;;  %v1260_v28 = vrot.slane %v1222_v26, 2 }
  0xbc   : > { %v1256_v43 = vsel %vm362_vm1, %v1253_v29, %v1255_v50  ;;  %v1258_v55 = vsel %vm362_vm1, %v1255_v50, %v1257_v6  ;;  %v1262_v53 = vrot.slane %v1223_v11, 2  ;;  %v1264_v39 = vrot.slane %v1224_v13, 2 }
  0xbd   : > { %v1266_v0 = vrot.slane %v1225_v54, 2  ;;  %v1267_v12 = vrot.slane %v1226_v19, 2  ;;  %v1261_v56 = vsel %vm362_vm1, %v1259_v17, %v1260_v28  ;;  %v1269_v57 = vrot.slane %v1227_v5, 2 }
  0xbe   : > { %v1271_v48 = vrot.slane %v1228_v8, 2  ;;  %v10206_v2 = vadd.f32 %v1247_v4, %v1193_v16  ;;  %v1263_v34 = vsel %vm362_vm1, %v1260_v28, %v1262_v53  ;;  %v1265_v21 = vsel %vm362_vm1, %v1262_v53, %v1264_v39  ;;  %v10222_v16 = vld [vmem:[%s15437_s1 + $0x40] sm:$0xff]  ;;  %v15698_v4 = vld [vmem:[#allocation9_spill] sm:$0xff] }
  0xbf   : > { %v1268_v62 = vsel %vm362_vm1, %v1266_v0, %v1267_v12  ;;  %v10211_v15 = vadd.f32 %v1249_v59, %v1194_v14  ;;  %v1270_v26 = vsel %vm362_vm1, %v1267_v12, %v1269_v57  ;;  %v10215_v13 = vadd.f32 %v1251_v49, %v1195_v23  ;;  %15696 = vst [vmem:[#allocation2_spill] sm:$0xff] %v10222_v16  ;;  %v15706_v49 = vld [vmem:[#allocation6_spill] sm:$0xff] }
  0xc0   : > { %v1272_v11 = vsel %vm362_vm1, %v1269_v57, %v1271_v48  ;;  %v10217_v54 = vadd.f32 %v1250_v42, %v1196_v24  ;;  %v10224_v19 = vadd.f32 %v1254_v9, %v1197_v25  ;;  %v10226_v5 = vadd.f32 %v1256_v43, %v1198_v31  ;;  %v15708_v9 = vld [vmem:[#allocation7_spill] sm:$0xff] }
  0xc1   : > { %v10228_v8 = vadd.f32 %v1258_v55, %v1199_v52  ;;  %v10230_v14 = vadd.f32 %v1257_v6, %v1200_v38  ;;  %v10232_v32 = vadd.f32 %v1261_v56, %v1201_v60  ;;  %v10234_v29 = vadd.f32 %v1263_v34, %v1202_v37  ;;  %v15697_v52 = vld [vmem:[#allocation8_spill] sm:$0xff]  ;;  %v15699_v6 = vld [vmem:[#allocation11_spill] sm:$0xff] }
  0xc2   : > { %v10236_v23 = vadd.f32 %v1265_v21, %v1203_v33  ;;  %v10238_v24 = vadd.f32 %v1264_v39, %v1204_v41  ;;  %v10240_v42 = vadd.f32 %v1268_v62, %v1205_v20  ;;  %v10242_v50 = vadd.f32 %v1270_v26, %v1206_v10  ;;  %v15700_v37 = vld [vmem:[#allocation12_spill] sm:$0xff]  ;;  %v15701_v41 = vld [vmem:[#allocation3_spill] sm:$0xff] }
  0xc3   : > { %v10244_v25 = vadd.f32 %v1272_v11, %v1207_v63  ;;  %v10246_v31 = vadd.f32 %v1271_v48, %v1208_v35  ;;  %v1308_v38 = vrot.slane %v15698_v4, %v15697_v52  ;;  %v10252_v60 = vrot.slane %v15698_v4, %v15699_v6  ;;  %v15702_v10 = vld [vmem:[#allocation4_spill] sm:$0xff]  ;;  %v15704_v35 = vld [vmem:[#allocation5_spill] sm:$0xff] }
  0xc4   : > { %v10256_v33 = vrot.slane %v15698_v4, %v15700_v37  ;;  %v10260_v20 = vrot.slane %v10222_v16, %v15701_v41  ;;  %v10264_v63 = vrot.slane %v10222_v16, %v15702_v10  ;;  %v10268_v59 = vrot.slane %v10222_v16, %v15704_v35 }
  0xc5   : > { %v10272_v17 = vrot.slane %v10222_v16, %v15706_v49  ;;  %v10276_v43 = vrot.slane %v10222_v16, %v15708_v9  ;;  %v1309_v55 = vmul.f32 %v10048_v3, %v1308_v38  ;;  %v1310_v28 = vmul.f32 %v10051_v47, %v1308_v38 }
  0xc6   : > { %15703 = vst [vmem:[#allocation20_spill] sm:$0xff] %v10264_v63  ;;  %15705 = vst [vmem:[#allocation14_spill] sm:$0xff] %v10268_v59  ;;  %v1311_v53 = vmul.f32 %v10054_v61, %v1308_v38  ;;  %v1312_v39 = vmul.f32 %v10057_v18, %v1308_v38  ;;  %v1313_v0 = vmul.f32 %v10060_v46, %v1308_v38 }
  0xc7   : > { %15707 = vst [vmem:[#allocation15_spill] sm:$0xff] %v10272_v17  ;;  %15709 = vst [vmem:[#allocation16_spill] sm:$0xff] %v10276_v43  ;;  %v1314_v12 = vmul.f32 %v10067_v51, %v1308_v38  ;;  %v1315_v56 = vmul.f32 %v10070_v40, %v1308_v38  ;;  %v1316_v57 = vmul.f32 %v10073_v44, %v1308_v38  ;;  %v1341_v49 = vrot.slane %v1309_v55, 3 }
  0xc8   : > { %v1317_v48 = vmul.f32 %v15677_v1, %v1308_v38  ;;  %v1318_v34 = vmul.f32 %v15678_v7, %v1308_v38  ;;  %v1319_v21 = vmul.f32 %v15679_v27, %v1308_v38  ;;  %v1320_v62 = vmul.f32 %v15683_v45, %v1308_v38 }
  0xc9   : > { %v1321_v26 = vmul.f32 %v15691_v36, %v1308_v38  ;;  %v1322_v11 = vmul.f32 %v15692_v30, %v1308_v38  ;;  %v1323_v4 = vmul.f32 %v15693_v22, %v1308_v38  ;;  %v1324_v9 = vmul.f32 %v15695_v58, %v1308_v38 }
  0xca   : > { %v1342_v35 = vrot.slane %v1310_v28, 3  ;;  %v1344_v10 = vrot.slane %v1311_v53, 3  ;;  %v1346_v41 = vrot.slane %v1312_v39, 3  ;;  %v1348_v37 = vrot.slane %v1313_v0, 3 }
  0xcb   : > { %v1349_v1 = vrot.slane %v1314_v12, 3  ;;  %v1351_v6 = vrot.slane %v1315_v56, 3  ;;  %v1353_v7 = vrot.slane %v1316_v57, 3  ;;  %v1355_v52 = vrot.slane %v1317_v48, 3 }
  0xcc   : > { %v1343_v27 = vsel %vm459_vm2, %v1341_v49, %v1342_v35  ;;  %v1345_v45 = vsel %vm459_vm2, %v1342_v35, %v1344_v10  ;;  %v1347_v16 = vsel %vm459_vm2, %v1344_v10, %v1346_v41  ;;  %v1356_v55 = vrot.slane %v1318_v34, 3 }
  0xcd   : > { %v1350_v43 = vsel %vm459_vm2, %v1348_v37, %v1349_v1  ;;  %v1352_v17 = vsel %vm459_vm2, %v1349_v1, %v1351_v6  ;;  %v1354_v38 = vsel %vm459_vm2, %v1351_v6, %v1353_v7  ;;  %v1358_v28 = vrot.slane %v1319_v21, 3 }
  0xce   : > { %v1360_v53 = vrot.slane %v1320_v62, 3  ;;  %v1362_v39 = vrot.slane %v1321_v26, 3  ;;  %v1363_v0 = vrot.slane %v1322_v11, 3  ;;  %v1357_v12 = vsel %vm459_vm2, %v1355_v52, %v1356_v55 }
  0xcf   : > { %v1365_v56 = vrot.slane %v1323_v4, 3  ;;  %v1367_v49 = vrot.slane %v1324_v9, 3  ;;  %v10302_v35 = vadd.f32 %v1343_v27, %v10206_v2  ;;  %v1359_v10 = vsel %vm459_vm2, %v1356_v55, %v1358_v28 }
  0xd0   : > { %v1361_v37 = vsel %vm459_vm2, %v1358_v28, %v1360_v53  ;;  %v1364_v57 = vsel %vm459_vm2, %v1362_v39, %v1363_v0  ;;  %v10308_v6 = vadd.f32 %v1345_v45, %v10211_v15  ;;  %v10313_v52 = vadd.f32 %v1347_v16, %v10215_v13 }
  0xd1   : > { %v1366_v48 = vsel %vm459_vm2, %v1363_v0, %v1365_v56  ;;  %v1368_v34 = vsel %vm459_vm2, %v1365_v56, %v1367_v49  ;;  %v10316_v9 = vadd.f32 %v1346_v41, %v10217_v54  ;;  %v10319_v2 = vadd.f32 %v1350_v43, %v10224_v19  ;;  %v9416_v41 = vld [vmem:[%s9526_s16 + $0x220] sm:$0xff] }
  0xd2   : > { %v10322_v21 = vadd.f32 %v1352_v17, %v10226_v5  ;;  %v10325_v62 = vadd.f32 %v1354_v38, %v10228_v8  ;;  %v10328_v15 = vadd.f32 %v1353_v7, %v10230_v14  ;;  %v10331_v26 = vadd.f32 %v1357_v12, %v10232_v32  ;;  %v9417_v17 = vld [vmem:[%s9526_s16 + $0x240] sm:$0xff] }
  0xd3   : > { %v10334_v13 = vadd.f32 %v1359_v10, %v10234_v29  ;;  %v10337_v54 = vadd.f32 %v1361_v37, %v10236_v23  ;;  %v10340_v16 = vadd.f32 %v1360_v53, %v10238_v24  ;;  %v10343_v19 = vadd.f32 %v1364_v57, %v10240_v42  ;;  %v9418_v43 = vld [vmem:[%s9526_s16 + $0x260] sm:$0xff] }
  0xd4   : > { %v10346_v5 = vadd.f32 %v1366_v48, %v10242_v50  ;;  %v10349_v8 = vadd.f32 %v1368_v34, %v10244_v25  ;;  %v10352_v14 = vadd.f32 %v1367_v49, %v10246_v31  ;;  %v1405_v32 = vmul.f32 %v10048_v3, %v10252_v60  ;;  %v9415_v31 = vld [vmem:[%s9526_s16 + $0x200] sm:$0xff] }
  0xd5   : > { %v1406_v29 = vmul.f32 %v10051_v47, %v10252_v60  ;;  %v1407_v23 = vmul.f32 %v10054_v61, %v10252_v60  ;;  %v1408_v24 = vmul.f32 %v10057_v18, %v10252_v60  ;;  %v1409_v42 = vmul.f32 %v10060_v46, %v10252_v60 }
  0xd6   : > { %v1410_v50 = vmul.f32 %v10067_v51, %v10252_v60  ;;  %v1411_v25 = vmul.f32 %v10070_v40, %v10252_v60  ;;  %v1412_v3 = vmul.f32 %v10073_v44, %v10252_v60  ;;  %v1413_v47 = vmul.f32 %v9415_v31, %v10252_v60 }
  0xd7   : > { %v1414_v61 = vmul.f32 %v9416_v41, %v10252_v60  ;;  %v1415_v18 = vmul.f32 %v9417_v17, %v10252_v60  ;;  %v1416_v11 = vmul.f32 %v9418_v43, %v10252_v60  ;;  %v1417_v4 = vmul.f32 %v15691_v36, %v10252_v60 }
  0xd8   : > { %v1418_v1 = vmul.f32 %v15692_v30, %v10252_v60  ;;  %v1419_v7 = vmul.f32 %v15693_v22, %v10252_v60  ;;  %v1420_v27 = vmul.f32 %v15695_v58, %v10252_v60  ;;  %v1437_v45 = vrot.slane %v1405_v32, 4 }
  0xd9   : > { %v1438_v38 = vrot.slane %v1406_v29, 4  ;;  %v1440_v55 = vrot.slane %v1407_v23, 4  ;;  %v1442_v28 = vrot.slane %v1408_v24, 4  ;;  %v1444_v53 = vrot.slane %v1409_v42, 4 }
  0xda   : > { %v1445_v39 = vrot.slane %v1410_v50, 4  ;;  %v1447_v0 = vrot.slane %v1411_v25, 4  ;;  %v1449_v12 = vrot.slane %v1412_v3, 4  ;;  %v1451_v37 = vrot.slane %v1413_v47, 4 }
  0xdb   : > { %v1439_v56 = vsel %vm556_vm3, %v1437_v45, %v1438_v38  ;;  %v1441_v49 = vsel %vm556_vm3, %v1438_v38, %v1440_v55  ;;  %v1443_v10 = vsel %vm556_vm3, %v1440_v55, %v1442_v28  ;;  %v1452_v34 = vrot.slane %v1414_v61, 4  ;;  %v10414_v45 = vld [vmem:[%s9526_s16 + $0x220] sm:$0xff] }
  0xdc   : > { %v1446_v57 = vsel %vm556_vm3, %v1444_v53, %v1445_v39  ;;  %v1448_v48 = vsel %vm556_vm3, %v1445_v39, %v1447_v0  ;;  %v1450_v60 = vsel %vm556_vm3, %v1447_v0, %v1449_v12  ;;  %v1454_v32 = vrot.slane %v1415_v18, 4  ;;  %v10420_v38 = vld [vmem:[%s9526_s16 + $0x260] sm:$0xff] }
  0xdd   : > { %v1456_v29 = vrot.slane %v1416_v11, 4  ;;  %v1458_v23 = vrot.slane %v1417_v4, 4  ;;  %v1459_v24 = vrot.slane %v1418_v1, 4  ;;  %v1453_v42 = vsel %vm556_vm3, %v1451_v37, %v1452_v34 }
  0xde   : > { %v1461_v50 = vrot.slane %v1419_v7, 4  ;;  %v1463_v25 = vrot.slane %v1420_v27, 4  ;;  %v1481_v3 = vadd.f32 %v1439_v56, %v10302_v35  ;;  %v1455_v31 = vsel %vm556_vm3, %v1452_v34, %v1454_v32  ;;  %v10407_v7 = vld [vmem:[%s9526_s16 + $0x200] sm:$0xff] }
  0xdf   : > { %v1457_v47 = vsel %vm556_vm3, %v1454_v32, %v1456_v29  ;;  %v1460_v41 = vsel %vm556_vm3, %v1458_v23, %v1459_v24  ;;  %v1482_v61 = vadd.f32 %v1441_v49, %v10308_v6  ;;  %v1483_v43 = vadd.f32 %v1443_v10, %v10313_v52 }
  0xe0   : > { %v1462_v17 = vsel %vm556_vm3, %v1459_v24, %v1461_v50  ;;  %v1464_v18 = vsel %vm556_vm3, %v1461_v50, %v1463_v25  ;;  %v1484_v11 = vadd.f32 %v1442_v28, %v10316_v9  ;;  %v1485_v35 = vadd.f32 %v1446_v57, %v10319_v2  ;;  %v10427_v28 = vld [vmem:[%s9526_s16 + $0x300] sm:$0xff] }
  0xe1   : > { %v1486_v4 = vadd.f32 %v1448_v48, %v10322_v21  ;;  %v1487_v1 = vadd.f32 %v1450_v60, %v10325_v62  ;;  %v1488_v6 = vadd.f32 %v1449_v12, %v10328_v15  ;;  %v1489_v27 = vadd.f32 %v1453_v42, %v10331_v26  ;;  %v10417_v21 = vld [vmem:[%s9526_s16 + $0x240] sm:$0xff]  ;;  %15710 = vst [vmem:[#allocation13_spill] sm:$0xff] %v10427_v28 }
  0xe2   : > { %v1490_v52 = vadd.f32 %v1455_v31, %v10334_v13  ;;  %v1491_v9 = vadd.f32 %v1457_v47, %v10337_v54  ;;  %v1492_v2 = vadd.f32 %v1456_v29, %v10340_v16  ;;  %v1493_v62 = vadd.f32 %v1460_v41, %v10343_v19  ;;  %v10430_v13 = vld [vmem:[%s9526_s16 + $0x320] sm:$0xff] }
  0xe3   : > { %v1494_v15 = vadd.f32 %v1462_v17, %v10346_v5  ;;  %v1495_v55 = vadd.f32 %v1464_v18, %v10349_v8  ;;  %v1496_v26 = vadd.f32 %v1463_v25, %v10352_v14  ;;  %15711 = vst [vmem:[#allocation18_spill] sm:$0xff] %v10430_v13  ;;  %v10433_v54 = vld [vmem:[%s9526_s16 + $0x340] sm:$0xff]  ;;  %v1521_v53 = vmul.f32 %v10060_v46, %v10256_v33 }
  0xe4   : > { %15712 = vst [vmem:[#allocation19_spill] sm:$0xff] %v10433_v54  ;;  %v10436_v16 = vld [vmem:[%s9526_s16 + $0x360] sm:$0xff]  ;;  %v1522_v19 = vmul.f32 %v10067_v51, %v10256_v33  ;;  %v1523_v5 = vmul.f32 %v10070_v40, %v10256_v33  ;;  %v1524_v8 = vmul.f32 %v10073_v44, %v10256_v33  ;;  %v1525_v14 = vmul.f32 %v10407_v7, %v10256_v33 }
  0xe5   : > { %15713 = vst [vmem:[#allocation17_spill] sm:$0xff] %v10436_v16  ;;  %v1526_v39 = vmul.f32 %v10414_v45, %v10256_v33  ;;  %v1527_v0 = vmul.f32 %v10417_v21, %v10256_v33  ;;  %v1528_v12 = vmul.f32 %v10420_v38, %v10256_v33  ;;  %v1529_v56 = vmul.f32 %v15691_v36, %v10256_v33 }
  0xe6   : > { %v1530_v49 = vmul.f32 %v15692_v30, %v10256_v33  ;;  %v1531_v10 = vmul.f32 %v15693_v22, %v10256_v33  ;;  %v1532_v37 = vmul.f32 %v15695_v58, %v10256_v33  ;;  %v1533_v57 = vmul.f32 %v10427_v28, %v10256_v33 }
  0xe7   : > { %v1534_v48 = vmul.f32 %v10430_v13, %v10256_v33  ;;  %v1535_v60 = vmul.f32 %v10433_v54, %v10256_v33  ;;  %v1536_v34 = vmul.f32 %v10436_v16, %v10256_v33  ;;  %v1537_v32 = vadd.f32 %v1521_v53, %v1481_v3 }
  0xe8   : > { %v1538_v29 = vadd.f32 %v1522_v19, %v1482_v61  ;;  %v1539_v23 = vadd.f32 %v1523_v5, %v1483_v43  ;;  %v1540_v24 = vadd.f32 %v1524_v8, %v1484_v11  ;;  %v1541_v42 = vadd.f32 %v1525_v14, %v1485_v35 }
  0xe9   : > { %v1542_v50 = vadd.f32 %v1526_v39, %v1486_v4  ;;  %v1543_v25 = vadd.f32 %v1527_v0, %v1487_v1  ;;  %v1544_v31 = vadd.f32 %v1528_v12, %v1488_v6  ;;  %v1545_v47 = vadd.f32 %v1529_v56, %v1489_v27 }
  0xea   : > { %v1546_v41 = vadd.f32 %v1530_v49, %v1490_v52  ;;  %v1547_v17 = vadd.f32 %v1531_v10, %v1491_v9  ;;  %v1548_v18 = vadd.f32 %v1532_v37, %v1492_v2  ;;  %v1549_v59 = vadd.f32 %v1533_v57, %v1493_v62  ;;  %v15714_v9 = vld [vmem:[#allocation13_spill] sm:$0xff]  ;;  %v15715_v62 = vld [vmem:[#allocation18_spill] sm:$0xff] }
  0xeb   : > { %v1550_v63 = vadd.f32 %v1534_v48, %v1494_v15  ;;  %v1551_v13 = vadd.f32 %v1535_v60, %v1495_v55  ;;  %v1552_v28 = vadd.f32 %v1536_v34, %v1496_v26  ;;  %v1557_v54 = vmul.f32 %v10060_v46, %v10260_v20  ;;  %v15716_v55 = vld [vmem:[#allocation19_spill] sm:$0xff] }
  0xec   : > { %v1558_v33 = vmul.f32 %v10067_v51, %v10260_v20  ;;  %v1559_v3 = vmul.f32 %v10070_v40, %v10260_v20  ;;  %v1560_v61 = vmul.f32 %v10073_v44, %v10260_v20  ;;  %v1561_v43 = vmul.f32 %v10407_v7, %v10260_v20 }
  0xed   : > { %v1562_v11 = vmul.f32 %v10414_v45, %v10260_v20  ;;  %v1563_v35 = vmul.f32 %v10417_v21, %v10260_v20  ;;  %v1564_v4 = vmul.f32 %v10420_v38, %v10260_v20  ;;  %v1565_v1 = vmul.f32 %v15691_v36, %v10260_v20 }
  0xee   : > { %v1566_v6 = vmul.f32 %v15692_v30, %v10260_v20  ;;  %v1567_v27 = vmul.f32 %v15693_v22, %v10260_v20  ;;  %v1568_v52 = vmul.f32 %v15695_v58, %v10260_v20  ;;  %v1569_v2 = vmul.f32 %v15714_v9, %v10260_v20 }
  0xef   : > { %v1570_v15 = vmul.f32 %v15715_v62, %v10260_v20  ;;  %v1571_v26 = vmul.f32 %v15716_v55, %v10260_v20  ;;  %v1572_v53 = vmul.f32 %v10436_v16, %v10260_v20  ;;  %v1589_v19 = vrot.slane %v1557_v54, 1 }
  0xf0   : > { %v1590_v5 = vrot.slane %v1558_v33, 1  ;;  %v1592_v8 = vrot.slane %v1559_v3, 1  ;;  %v1594_v14 = vrot.slane %v1560_v61, 1  ;;  %v1596_v39 = vrot.slane %v1561_v43, 1 }
  0xf1   : > { %v1597_v0 = vrot.slane %v1562_v11, 1  ;;  %v1599_v12 = vrot.slane %v1563_v35, 1  ;;  %v1601_v56 = vrot.slane %v1564_v4, 1  ;;  %v1603_v57 = vrot.slane %v1565_v1, 1 }
  0xf2   : > { %v1591_v49 = vsel %vm265_vm0, %v1589_v19, %v1590_v5  ;;  %v1593_v10 = vsel %vm265_vm0, %v1590_v5, %v1592_v8  ;;  %v1595_v37 = vsel %vm265_vm0, %v1592_v8, %v1594_v14  ;;  %v1604_v54 = vrot.slane %v1566_v6, 1 }
  0xf3   : > { %v1598_v48 = vsel %vm265_vm0, %v1596_v39, %v1597_v0  ;;  %v1600_v60 = vsel %vm265_vm0, %v1597_v0, %v1599_v12  ;;  %v1602_v20 = vsel %vm265_vm0, %v1599_v12, %v1601_v56  ;;  %v1606_v34 = vrot.slane %v1567_v27, 1 }
  0xf4   : > { %v1608_v33 = vrot.slane %v1568_v52, 1  ;;  %v1610_v3 = vrot.slane %v1569_v2, 1  ;;  %v1611_v61 = vrot.slane %v1570_v15, 1  ;;  %v1605_v43 = vsel %vm265_vm0, %v1603_v57, %v1604_v54 }
  0xf5   : > { %v1613_v11 = vrot.slane %v1571_v26, 1  ;;  %v1615_v35 = vrot.slane %v1572_v53, 1  ;;  %v1633_v4 = vadd.f32 %v1591_v49, %v1537_v32  ;;  %v1607_v19 = vsel %vm265_vm0, %v1604_v54, %v1606_v34 }
  0xf6   : > { %v1609_v1 = vsel %vm265_vm0, %v1606_v34, %v1608_v33  ;;  %v1612_v5 = vsel %vm265_vm0, %v1610_v3, %v1611_v61  ;;  %v1634_v8 = vadd.f32 %v1593_v10, %v1538_v29  ;;  %v1635_v27 = vadd.f32 %v1595_v37, %v1539_v23  ;;  %v15717_v3 = vld [vmem:[#allocation20_spill] sm:$0xff] }
  0xf7   : > { %v1614_v39 = vsel %vm265_vm0, %v1611_v61, %v1613_v11  ;;  %v1616_v6 = vsel %vm265_vm0, %v1613_v11, %v1615_v35  ;;  %v1636_v52 = vadd.f32 %v1594_v14, %v1540_v24  ;;  %v1637_v2 = vadd.f32 %v1598_v48, %v1541_v42 }
  0xf8   : > { %v1638_v15 = vadd.f32 %v1600_v60, %v1542_v50  ;;  %v1639_v0 = vadd.f32 %v1602_v20, %v1543_v25  ;;  %v1640_v12 = vadd.f32 %v1601_v56, %v1544_v31  ;;  %v1641_v26 = vadd.f32 %v1605_v43, %v1545_v47 }
  0xf9   : > { %v1642_v53 = vadd.f32 %v1607_v19, %v1546_v41  ;;  %v1643_v32 = vadd.f32 %v1609_v1, %v1547_v17  ;;  %v1644_v49 = vadd.f32 %v1608_v33, %v1548_v18  ;;  %v1645_v57 = vadd.f32 %v1612_v5, %v1549_v59  ;;  %v15718_v18 = vld [vmem:[#allocation17_spill] sm:$0xff] }
  0xfa   : > { %v1646_v54 = vadd.f32 %v1614_v39, %v1550_v63  ;;  %v1647_v34 = vadd.f32 %v1616_v6, %v1551_v13  ;;  %v1648_v16 = vadd.f32 %v1615_v35, %v1552_v28  ;;  %v1653_v29 = vmul.f32 %v10060_v46, %v15717_v3 }
  0xfb   : > { %v1654_v10 = vmul.f32 %v10067_v51, %v15717_v3  ;;  %v1655_v23 = vmul.f32 %v10070_v40, %v15717_v3  ;;  %v1656_v24 = vmul.f32 %v10073_v44, %v15717_v3  ;;  %v1657_v42 = vmul.f32 %v10407_v7, %v15717_v3 }
  0xfc   : > { %v1658_v63 = vmul.f32 %v10414_v45, %v15717_v3  ;;  %v1659_v59 = vmul.f32 %v10417_v21, %v15717_v3  ;;  %v1660_v28 = vmul.f32 %v10420_v38, %v15717_v3  ;;  %v1661_v13 = vmul.f32 %v15691_v36, %v15717_v3 }
  0xfd   : > { %v1662_v50 = vmul.f32 %v15692_v30, %v15717_v3  ;;  %v1663_v25 = vmul.f32 %v15693_v22, %v15717_v3  ;;  %v1664_v31 = vmul.f32 %v15695_v58, %v15717_v3  ;;  %v1665_v47 = vmul.f32 %v15714_v9, %v15717_v3 }
  0xfe   : > { %v1666_v41 = vmul.f32 %v15715_v62, %v15717_v3  ;;  %v1667_v17 = vmul.f32 %v15716_v55, %v15717_v3  ;;  %v1668_v14 = vmul.f32 %v15718_v18, %v15717_v3  ;;  %v1685_v56 = vrot.slane %v1653_v29, 2 }
  0xff   : > { %v1686_v37 = vrot.slane %v1654_v10, 2  ;;  %v1688_v48 = vrot.slane %v1655_v23, 2  ;;  %v1690_v60 = vrot.slane %v1656_v24, 2  ;;  %v1692_v20 = vrot.slane %v1657_v42, 2 }
 0x100   : > { %v1693_v33 = vrot.slane %v1658_v63, 2  ;;  %v1695_v61 = vrot.slane %v1659_v59, 2  ;;  %v1697_v43 = vrot.slane %v1660_v28, 2  ;;  %v1699_v1 = vrot.slane %v1661_v13, 2 }
 0x101   : > { %v1687_v11 = vsel %vm362_vm1, %v1685_v56, %v1686_v37  ;;  %v1689_v35 = vsel %vm362_vm1, %v1686_v37, %v1688_v48  ;;  %v1691_v19 = vsel %vm362_vm1, %v1688_v48, %v1690_v60  ;;  %v1700_v3 = vrot.slane %v1662_v50, 2 }
 0x102   : > { %v1694_v5 = vsel %vm362_vm1, %v1692_v20, %v1693_v33  ;;  %v1696_v39 = vsel %vm362_vm1, %v1693_v33, %v1695_v61  ;;  %v1698_v6 = vsel %vm362_vm1, %v1695_v61, %v1697_v43  ;;  %v1702_v29 = vrot.slane %v1663_v25, 2 }
 0x103   : > { %v1704_v10 = vrot.slane %v1664_v31, 2  ;;  %v1706_v23 = vrot.slane %v1665_v47, 2  ;;  %v1707_v24 = vrot.slane %v1666_v41, 2  ;;  %v1701_v42 = vsel %vm362_vm1, %v1699_v1, %v1700_v3 }
 0x104   : > { %v1709_v63 = vrot.slane %v1667_v17, 2  ;;  %v1711_v59 = vrot.slane %v1668_v14, 2  ;;  %v1729_v28 = vadd.f32 %v1687_v11, %v1633_v4  ;;  %v1703_v56 = vsel %vm362_vm1, %v1700_v3, %v1702_v29 }
 0x105   : > { %v1705_v13 = vsel %vm362_vm1, %v1702_v29, %v1704_v10  ;;  %v1708_v37 = vsel %vm362_vm1, %v1706_v23, %v1707_v24  ;;  %v1730_v48 = vadd.f32 %v1689_v35, %v1634_v8  ;;  %v1731_v25 = vadd.f32 %v1691_v19, %v1635_v27  ;;  %v15719_v23 = vld [vmem:[#allocation14_spill] sm:$0xff] }
 0x106   : > { %v1710_v20 = vsel %vm362_vm1, %v1707_v24, %v1709_v63  ;;  %v1712_v50 = vsel %vm362_vm1, %v1709_v63, %v1711_v59  ;;  %v1732_v31 = vadd.f32 %v1690_v60, %v1636_v52  ;;  %v1733_v47 = vadd.f32 %v1694_v5, %v1637_v2 }
 0x107   : > { %v1734_v41 = vadd.f32 %v1696_v39, %v1638_v15  ;;  %v1735_v33 = vadd.f32 %v1698_v6, %v1639_v0  ;;  %v1736_v61 = vadd.f32 %v1697_v43, %v1640_v12  ;;  %v1737_v17 = vadd.f32 %v1701_v42, %v1641_v26 }
 0x108   : > { %v1738_v14 = vadd.f32 %v1703_v56, %v1642_v53  ;;  %v1739_v4 = vadd.f32 %v1705_v13, %v1643_v32  ;;  %v1740_v11 = vadd.f32 %v1704_v10, %v1644_v49  ;;  %v1741_v1 = vadd.f32 %v1708_v37, %v1645_v57 }
 0x109   : > { %v1742_v3 = vadd.f32 %v1710_v20, %v1646_v54  ;;  %v1743_v29 = vadd.f32 %v1712_v50, %v1647_v34  ;;  %v1744_v18 = vadd.f32 %v1711_v59, %v1648_v16  ;;  %v1749_v8 = vmul.f32 %v10060_v46, %v15719_v23 }
 0x10a   : > { %v1750_v35 = vmul.f32 %v10067_v51, %v15719_v23  ;;  %v1751_v27 = vmul.f32 %v10070_v40, %v15719_v23  ;;  %v1752_v52 = vmul.f32 %v10073_v44, %v15719_v23  ;;  %v1753_v2 = vmul.f32 %v10407_v7, %v15719_v23 }
 0x10b   : > { %v1754_v15 = vmul.f32 %v10414_v45, %v15719_v23  ;;  %v1755_v16 = vmul.f32 %v10417_v21, %v15719_v23  ;;  %v1756_v46 = vmul.f32 %v10420_v38, %v15719_v23  ;;  %v1757_v51 = vmul.f32 %v15691_v36, %v15719_v23  ;;  %v15720_v36 = vld [vmem:[#allocation17_spill] sm:$0xff] }
 0x10c   : > { %v1758_v40 = vmul.f32 %v15692_v30, %v15719_v23  ;;  %v1759_v44 = vmul.f32 %v15693_v22, %v15719_v23  ;;  %v1760_v0 = vmul.f32 %v15695_v58, %v15719_v23  ;;  %v1761_v12 = vmul.f32 %v15714_v9, %v15719_v23 }
 0x10d   : > { %v1762_v26 = vmul.f32 %v15715_v62, %v15719_v23  ;;  %v1763_v53 = vmul.f32 %v15716_v55, %v15719_v23  ;;  %v1764_v32 = vmul.f32 %v15720_v36, %v15719_v23  ;;  %v1781_v49 = vrot.slane %v1749_v8, 3 }
 0x10e   : > { %v1782_v30 = vrot.slane %v1750_v35, 3  ;;  %v1784_v57 = vrot.slane %v1751_v27, 3  ;;  %v1786_v54 = vrot.slane %v1752_v52, 3  ;;  %v1788_v22 = vrot.slane %v1753_v2, 3 }
 0x10f   : > { %v1789_v34 = vrot.slane %v1754_v15, 3  ;;  %v1791_v60 = vrot.slane %v1755_v16, 3  ;;  %v1793_v58 = vrot.slane %v1756_v46, 3  ;;  %v1795_v39 = vrot.slane %v1757_v51, 3 }
 0x110   : > { %v1783_v43 = vsel %vm459_vm2, %v1781_v49, %v1782_v30  ;;  %v1785_v19 = vsel %vm459_vm2, %v1782_v30, %v1784_v57  ;;  %v1787_v5 = vsel %vm459_vm2, %v1784_v57, %v1786_v54  ;;  %v1796_v42 = vrot.slane %v1758_v40, 3  ;;  %v9423_v30 = vld [vmem:[%s9526_s16 + $0x280] sm:$0xff] }
 0x111   : > { %v1790_v6 = vsel %vm459_vm2, %v1788_v22, %v1789_v34  ;;  %v1792_v10 = vsel %vm459_vm2, %v1789_v34, %v1791_v60  ;;  %v1794_v24 = vsel %vm459_vm2, %v1791_v60, %v1793_v58  ;;  %v1798_v63 = vrot.slane %v1759_v44, 3  ;;  %v9425_v34 = vld [vmem:[%s9526_s16 + $0x2c0] sm:$0xff] }
 0x112   : > { %v1800_v59 = vrot.slane %v1760_v0, 3  ;;  %v1802_v56 = vrot.slane %v1761_v12, 3  ;;  %v1803_v13 = vrot.slane %v1762_v26, 3  ;;  %v1797_v37 = vsel %vm459_vm2, %v1795_v39, %v1796_v42  ;;  %v15721_v26 = vld [vmem:[#allocation15_spill] sm:$0xff] }
 0x113   : > { %v1805_v20 = vrot.slane %v1763_v53, 3  ;;  %v1807_v50 = vrot.slane %v1764_v32, 3  ;;  %v10597_v23 = vadd.f32 %v1783_v43, %v1729_v28  ;;  %v1799_v8 = vsel %vm459_vm2, %v1796_v42, %v1798_v63  ;;  %v9422_v53 = vld [vmem:[%s9526_s16 + $0x1e0] sm:$0xff] }
 0x114   : > { %v1801_v35 = vsel %vm459_vm2, %v1798_v63, %v1800_v59  ;;  %v1804_v27 = vsel %vm459_vm2, %v1802_v56, %v1803_v13  ;;  %v10602_v52 = vadd.f32 %v1785_v19, %v1730_v48  ;;  %v10606_v16 = vadd.f32 %v1787_v5, %v1731_v25 }
 0x115   : > { %v1806_v2 = vsel %vm459_vm2, %v1803_v13, %v1805_v20  ;;  %v1808_v15 = vsel %vm459_vm2, %v1805_v20, %v1807_v50  ;;  %v10608_v46 = vadd.f32 %v1786_v54, %v1732_v31  ;;  %v10610_v28 = vadd.f32 %v1790_v6, %v1733_v47  ;;  %v9424_v54 = vld [vmem:[%s9526_s16 + $0x2a0] sm:$0xff] }
 0x116   : > { %v10612_v51 = vadd.f32 %v1792_v10, %v1734_v41  ;;  %v10614_v40 = vadd.f32 %v1794_v24, %v1735_v33  ;;  %v10616_v48 = vadd.f32 %v1793_v58, %v1736_v61  ;;  %v10618_v44 = vadd.f32 %v1797_v37, %v1737_v17  ;;  %v9419_v61 = vld [vmem:[%s9526_s16 + $0x180] sm:$0xff] }
 0x117   : > { %v10620_v0 = vadd.f32 %v1799_v8, %v1738_v14  ;;  %v10622_v12 = vadd.f32 %v1801_v35, %v1739_v4  ;;  %v10624_v25 = vadd.f32 %v1800_v59, %v1740_v11  ;;  %v10626_v31 = vadd.f32 %v1804_v27, %v1741_v1  ;;  %v9420_v14 = vld [vmem:[%s9526_s16 + $0x1a0] sm:$0xff] }
 0x118   : > { %v10628_v47 = vadd.f32 %v1806_v2, %v1742_v3  ;;  %v10630_v41 = vadd.f32 %v1808_v15, %v1743_v29  ;;  %v10632_v33 = vadd.f32 %v1807_v50, %v1744_v18  ;;  %v1845_v17 = vmul.f32 %v9419_v61, %v15721_v26  ;;  %v9421_v11 = vld [vmem:[%s9526_s16 + $0x1c0] sm:$0xff] }
 0x119   : > { %v1846_v4 = vmul.f32 %v9420_v14, %v15721_v26  ;;  %v1847_v1 = vmul.f32 %v9421_v11, %v15721_v26  ;;  %v1848_v3 = vmul.f32 %v9422_v53, %v15721_v26  ;;  %v1849_v29 = vmul.f32 %v10407_v7, %v15721_v26  ;;  %v9426_v58 = vld [vmem:[%s9526_s16 + $0x2e0] sm:$0xff] }
 0x11a   : > { %v1850_v18 = vmul.f32 %v10414_v45, %v15721_v26  ;;  %v1851_v32 = vmul.f32 %v10417_v21, %v15721_v26  ;;  %v1852_v49 = vmul.f32 %v10420_v38, %v15721_v26  ;;  %v1853_v57 = vmul.f32 %v9423_v30, %v15721_v26 }
 0x11b   : > { %v1854_v22 = vmul.f32 %v9424_v54, %v15721_v26  ;;  %v1855_v60 = vmul.f32 %v9425_v34, %v15721_v26  ;;  %v1856_v43 = vmul.f32 %v9426_v58, %v15721_v26  ;;  %v1857_v19 = vmul.f32 %v15714_v9, %v15721_v26  ;;  %v10687_v58 = vld [vmem:[%s9526_s16 + $0x280] sm:$0xff] }
 0x11c   : > { %v1858_v5 = vmul.f32 %v15715_v62, %v15721_v26  ;;  %v1859_v39 = vmul.f32 %v15716_v55, %v15721_v26  ;;  %v1860_v6 = vmul.f32 %v15720_v36, %v15721_v26  ;;  %v1877_v10 = vrot.slane %v1845_v17, 4 }
 0x11d   : > { %v1878_v24 = vrot.slane %v1846_v4, 4  ;;  %v1880_v42 = vrot.slane %v1847_v1, 4  ;;  %v1882_v63 = vrot.slane %v1848_v3, 4  ;;  %v1884_v59 = vrot.slane %v1849_v29, 4 }
 0x11e   : > { %v1885_v56 = vrot.slane %v1850_v18, 4  ;;  %v1887_v13 = vrot.slane %v1851_v32, 4  ;;  %v1889_v37 = vrot.slane %v1852_v49, 4  ;;  %v1891_v35 = vrot.slane %v1853_v57, 4 }
 0x11f   : > { %v1879_v20 = vsel %vm556_vm3, %v1877_v10, %v1878_v24  ;;  %v1881_v50 = vsel %vm556_vm3, %v1878_v24, %v1880_v42  ;;  %v1883_v8 = vsel %vm556_vm3, %v1880_v42, %v1882_v63  ;;  %v1892_v61 = vrot.slane %v1854_v22, 4  ;;  %v15722_v10 = vld [vmem:[#allocation16_spill] sm:$0xff] }
 0x120   : > { %v1886_v27 = vsel %vm556_vm3, %v1884_v59, %v1885_v56  ;;  %v1888_v2 = vsel %vm556_vm3, %v1885_v56, %v1887_v13  ;;  %v1890_v15 = vsel %vm556_vm3, %v1887_v13, %v1889_v37  ;;  %v1894_v26 = vrot.slane %v1855_v60, 4 }
 0x121   : > { %v1896_v17 = vrot.slane %v1856_v43, 4  ;;  %v1898_v14 = vrot.slane %v1857_v19, 4  ;;  %v1899_v4 = vrot.slane %v1858_v5, 4  ;;  %v1893_v11 = vsel %vm556_vm3, %v1891_v35, %v1892_v61  ;;  %v10694_v19 = vld [vmem:[%s9526_s16 + $0x2a0] sm:$0xff] }
 0x122   : > { %v1901_v1 = vrot.slane %v1859_v39, 4  ;;  %v1903_v53 = vrot.slane %v1860_v6, 4  ;;  %v1921_v3 = vadd.f32 %v1879_v20, %v10597_v23  ;;  %v1895_v29 = vsel %vm556_vm3, %v1892_v61, %v1894_v26  ;;  %v10700_v5 = vld [vmem:[%s9526_s16 + $0x2e0] sm:$0xff] }
 0x123   : > { %v1897_v18 = vsel %vm556_vm3, %v1894_v26, %v1896_v17  ;;  %v1900_v32 = vsel %vm556_vm3, %v1898_v14, %v1899_v4  ;;  %v1922_v49 = vadd.f32 %v1881_v50, %v10602_v52  ;;  %v1923_v54 = vadd.f32 %v1883_v8, %v10606_v16  ;;  %v10707_v6 = vld [vmem:[%s9526_s16 + $0x380] sm:$0xff] }
 0x124   : > { %v1902_v30 = vsel %vm556_vm3, %v1899_v4, %v1901_v1  ;;  %v1904_v57 = vsel %vm556_vm3, %v1901_v1, %v1903_v53  ;;  %v1924_v22 = vadd.f32 %v1882_v63, %v10608_v46  ;;  %v1925_v23 = vadd.f32 %v1886_v27, %v10610_v28 }
 0x125   : > { %v1926_v34 = vadd.f32 %v1888_v2, %v10612_v51  ;;  %v1927_v60 = vadd.f32 %v1890_v15, %v10614_v40  ;;  %v1928_v52 = vadd.f32 %v1889_v37, %v10616_v48  ;;  %v1929_v43 = vadd.f32 %v1893_v11, %v10618_v44  ;;  %v10697_v51 = vld [vmem:[%s9526_s16 + $0x2c0] sm:$0xff] }
 0x126   : > { %v1930_v16 = vadd.f32 %v1895_v29, %v10620_v0  ;;  %v1931_v46 = vadd.f32 %v1897_v18, %v10622_v12  ;;  %v1932_v28 = vadd.f32 %v1896_v17, %v10624_v25  ;;  %v1933_v40 = vadd.f32 %v1900_v32, %v10626_v31  ;;  %v10710_v0 = vld [vmem:[%s9526_s16 + $0x3a0] sm:$0xff] }
 0x127   : > { %v1934_v48 = vadd.f32 %v1902_v30, %v10628_v47  ;;  %v1935_v39 = vadd.f32 %v1904_v57, %v10630_v41  ;;  %v1936_v44 = vadd.f32 %v1903_v53, %v10632_v33  ;;  %v10713_v12 = vld [vmem:[%s9526_s16 + $0x3c0] sm:$0xff]  ;;  %v1961_v24 = vmul.f32 %v10407_v7, %v15722_v10 }
 0x128   : > { %v10716_v25 = vld [vmem:[%s9526_s16 + $0x3e0] sm:$0xff]  ;;  %v1962_v31 = vmul.f32 %v10414_v45, %v15722_v10  ;;  %v1963_v47 = vmul.f32 %v10417_v21, %v15722_v10  ;;  %v1964_v41 = vmul.f32 %v10420_v38, %v15722_v10  ;;  %v1965_v33 = vmul.f32 %v10687_v58, %v15722_v10 }
 0x129   : > { %v1966_v42 = vmul.f32 %v10694_v19, %v15722_v10  ;;  %v1967_v63 = vmul.f32 %v10697_v51, %v15722_v10  ;;  %v1968_v59 = vmul.f32 %v10700_v5, %v15722_v10  ;;  %v1969_v56 = vmul.f32 %v15714_v9, %v15722_v10  ;;  %v10761_v17 = vld [vmem:[%s15437_s1 + $0x60] ss:$0 sm:$0xff] }
 0x12a   : > { %v1970_v13 = vmul.f32 %v15715_v62, %v15722_v10  ;;  %v1971_v37 = vmul.f32 %v15716_v55, %v15722_v10  ;;  %v1972_v20 = vmul.f32 %v15720_v36, %v15722_v10  ;;  %v1973_v50 = vmul.f32 %v10707_v6, %v15722_v10  ;;  %15723 = vst [vmem:[#allocation10_spill] sm:$0xff] %v10761_v17 }
 0x12b   : > { %v1974_v8 = vmul.f32 %v10710_v0, %v15722_v10  ;;  %v1975_v35 = vmul.f32 %v10713_v12, %v15722_v10  ;;  %v1976_v27 = vmul.f32 %v10716_v25, %v15722_v10  ;;  %v10750_v2 = vadd.f32 %v1961_v24, %v1921_v3 }
 0x12c   : > { %v10752_v15 = vadd.f32 %v1962_v31, %v1922_v49  ;;  %v10754_v61 = vadd.f32 %v1963_v47, %v1923_v54  ;;  %v10756_v26 = vadd.f32 %v1964_v41, %v1924_v22  ;;  %v10763_v14 = vadd.f32 %v1965_v33, %v1925_v23  ;;  %v15724_v54 = vld [vmem:[#allocation8_spill] sm:$0xff]  ;;  %v15725_v22 = vld [vmem:[#allocation2_spill] sm:$0xff] }
 0x12d   : > { %v10765_v4 = vadd.f32 %v1966_v42, %v1926_v34  ;;  %v10767_v11 = vadd.f32 %v1967_v63, %v1927_v60  ;;  %v10769_v1 = vadd.f32 %v1968_v59, %v1928_v52  ;;  %v10771_v53 = vadd.f32 %v1969_v56, %v1929_v43  ;;  %v15726_v34 = vld [vmem:[#allocation11_spill] sm:$0xff]  ;;  %v15727_v52 = vld [vmem:[#allocation12_spill] sm:$0xff] }
 0x12e   : > { %v10773_v3 = vadd.f32 %v1970_v13, %v1930_v16  ;;  %v10775_v29 = vadd.f32 %v1971_v37, %v1931_v46  ;;  %v10777_v18 = vadd.f32 %v1972_v20, %v1932_v28  ;;  %v10779_v32 = vadd.f32 %v1973_v50, %v1933_v40 }
 0x12f   : > { %v10781_v49 = vadd.f32 %v1974_v8, %v1934_v48  ;;  %v10783_v30 = vadd.f32 %v1975_v35, %v1935_v39  ;;  %v10785_v57 = vadd.f32 %v1976_v27, %v1936_v44  ;;  %v1996_v23 = vrot.slane %v15725_v22, %v15724_v54 }
 0x130   : > { %v10791_v60 = vrot.slane %v15725_v22, %v15726_v34  ;;  %v10795_v43 = vrot.slane %v15725_v22, %v15727_v52  ;;  %v10799_v16 = vmul.f32 %v10761_v17, %v10407_v7  ;;  %v10803_v46 = vmul.f32 %v10761_v17, %v10414_v45 }
 0x131   : > { %v10807_v28 = vmul.f32 %v10761_v17, %v10417_v21  ;;  %v10811_v40 = vmul.f32 %v10761_v17, %v10420_v38  ;;  %v10815_v48 = vmul.f32 %v10761_v17, %v10687_v58  ;;  %v1997_v39 = vmul.f32 %v10407_v7, %v1996_v23 }
 0x132   : > { %15728 = vst [vmem:[#allocation9_spill] sm:$0xff] %v10795_v43  ;;  %15729 = vst [vmem:[#allocation13_spill] sm:$0xff] %v10799_v16  ;;  %v1998_v44 = vmul.f32 %v10414_v45, %v1996_v23  ;;  %v1999_v10 = vmul.f32 %v10417_v21, %v1996_v23  ;;  %v2000_v24 = vmul.f32 %v10420_v38, %v1996_v23 }
 0x133   : > { %15730 = vst [vmem:[#allocation18_spill] sm:$0xff] %v10803_v46  ;;  %15731 = vst [vmem:[#allocation19_spill] sm:$0xff] %v10807_v28  ;;  %v2001_v31 = vmul.f32 %v10687_v58, %v1996_v23  ;;  %v2002_v47 = vmul.f32 %v10694_v19, %v1996_v23  ;;  %v2003_v41 = vmul.f32 %v10697_v51, %v1996_v23  ;;  %v2029_v8 = vrot.slane %v1997_v39, 1 }
 0x134   : > { %15732 = vst [vmem:[#allocation20_spill] sm:$0xff] %v10811_v40  ;;  %15733 = vst [vmem:[#allocation14_spill] sm:$0xff] %v10815_v48  ;;  %v2004_v33 = vmul.f32 %v10700_v5, %v1996_v23  ;;  %v2005_v42 = vmul.f32 %v15714_v9, %v1996_v23  ;;  %v2006_v63 = vmul.f32 %v15715_v62, %v1996_v23  ;;  %v2030_v35 = vrot.slane %v1998_v44, 1 }
 0x135   : > { %v2007_v59 = vmul.f32 %v15716_v55, %v1996_v23  ;;  %v2008_v56 = vmul.f32 %v15720_v36, %v1996_v23  ;;  %v2009_v13 = vmul.f32 %v10707_v6, %v1996_v23  ;;  %v2010_v37 = vmul.f32 %v10710_v0, %v1996_v23 }
 0x136   : > { %v2011_v20 = vmul.f32 %v10713_v12, %v1996_v23  ;;  %v2012_v50 = vmul.f32 %v10716_v25, %v1996_v23  ;;  %v2032_v27 = vrot.slane %v1999_v10, 1  ;;  %v2034_v22 = vrot.slane %v2000_v24, 1 }
 0x137   : > { %v2036_v52 = vrot.slane %v2001_v31, 1  ;;  %v2037_v34 = vrot.slane %v2002_v47, 1  ;;  %v2039_v54 = vrot.slane %v2003_v41, 1  ;;  %v2041_v48 = vrot.slane %v2004_v33, 1 }
 0x138   : > { %v2031_v40 = vsel %vm265_vm0, %v2029_v8, %v2030_v35  ;;  %v2033_v28 = vsel %vm265_vm0, %v2030_v35, %v2032_v27  ;;  %v2035_v46 = vsel %vm265_vm0, %v2032_v27, %v2034_v22  ;;  %v2043_v16 = vrot.slane %v2005_v42, 1 }
 0x139   : > { %v2038_v17 = vsel %vm265_vm0, %v2036_v52, %v2037_v34  ;;  %v2040_v43 = vsel %vm265_vm0, %v2037_v34, %v2039_v54  ;;  %v2042_v23 = vsel %vm265_vm0, %v2039_v54, %v2041_v48  ;;  %v2044_v39 = vrot.slane %v2006_v63, 1 }
 0x13a   : > { %v2046_v44 = vrot.slane %v2007_v59, 1  ;;  %v2048_v10 = vrot.slane %v2008_v56, 1  ;;  %v2050_v24 = vrot.slane %v2009_v13, 1  ;;  %v2051_v31 = vrot.slane %v2010_v37, 1 }
 0x13b   : > { %v2045_v47 = vsel %vm265_vm0, %v2043_v16, %v2044_v39  ;;  %v2053_v41 = vrot.slane %v2011_v20, 1  ;;  %v2055_v33 = vrot.slane %v2012_v50, 1  ;;  %v2073_v8 = vadd.f32 %v2031_v40, %v10750_v2 }
 0x13c   : > { %v2047_v35 = vsel %vm265_vm0, %v2044_v39, %v2046_v44  ;;  %v2049_v42 = vsel %vm265_vm0, %v2046_v44, %v2048_v10  ;;  %v2052_v52 = vsel %vm265_vm0, %v2050_v24, %v2051_v31  ;;  %v2074_v34 = vadd.f32 %v2033_v28, %v10752_v15 }
 0x13d   : > { %v2054_v54 = vsel %vm265_vm0, %v2051_v31, %v2053_v41  ;;  %v2056_v63 = vsel %vm265_vm0, %v2053_v41, %v2055_v33  ;;  %v2075_v59 = vadd.f32 %v2035_v46, %v10754_v61  ;;  %v2076_v16 = vadd.f32 %v2034_v22, %v10756_v26 }
 0x13e   : > { %v2077_v56 = vadd.f32 %v2038_v17, %v10763_v14  ;;  %v2078_v2 = vadd.f32 %v2040_v43, %v10765_v4  ;;  %v2079_v40 = vadd.f32 %v2042_v23, %v10767_v11  ;;  %v2080_v13 = vadd.f32 %v2041_v48, %v10769_v1 }
 0x13f   : > { %v2081_v37 = vadd.f32 %v2045_v47, %v10771_v53  ;;  %v2082_v15 = vadd.f32 %v2047_v35, %v10773_v3  ;;  %v2083_v28 = vadd.f32 %v2049_v42, %v10775_v29  ;;  %v2084_v20 = vadd.f32 %v2048_v10, %v10777_v18 }
 0x140   : > { %v2085_v61 = vadd.f32 %v2052_v52, %v10779_v32  ;;  %v2086_v26 = vadd.f32 %v2054_v54, %v10781_v49  ;;  %v2087_v17 = vadd.f32 %v2056_v63, %v10783_v30  ;;  %v2088_v14 = vadd.f32 %v2055_v33, %v10785_v57 }
 0x141   : > { %v2093_v4 = vmul.f32 %v10407_v7, %v10791_v60  ;;  %v2094_v11 = vmul.f32 %v10414_v45, %v10791_v60  ;;  %v2095_v1 = vmul.f32 %v10417_v21, %v10791_v60  ;;  %v2096_v53 = vmul.f32 %v10420_v38, %v10791_v60 }
 0x142   : > { %v2097_v3 = vmul.f32 %v10687_v58, %v10791_v60  ;;  %v2098_v29 = vmul.f32 %v10694_v19, %v10791_v60  ;;  %v2099_v18 = vmul.f32 %v10697_v51, %v10791_v60  ;;  %v2100_v32 = vmul.f32 %v10700_v5, %v10791_v60 }
 0x143   : > { %v2101_v49 = vmul.f32 %v15714_v9, %v10791_v60  ;;  %v2102_v30 = vmul.f32 %v15715_v62, %v10791_v60  ;;  %v2103_v57 = vmul.f32 %v15716_v55, %v10791_v60  ;;  %v2104_v43 = vmul.f32 %v15720_v36, %v10791_v60 }
 0x144   : > { %v2105_v46 = vmul.f32 %v10707_v6, %v10791_v60  ;;  %v2106_v48 = vmul.f32 %v10710_v0, %v10791_v60  ;;  %v2107_v50 = vmul.f32 %v10713_v12, %v10791_v60  ;;  %v2108_v27 = vmul.f32 %v10716_v25, %v10791_v60 }
 0x145   : > { %v2125_v22 = vrot.slane %v2093_v4, 2  ;;  %v2126_v23 = vrot.slane %v2094_v11, 2  ;;  %v2128_v39 = vrot.slane %v2095_v1, 2  ;;  %v2130_v44 = vrot.slane %v2096_v53, 2 }
 0x146   : > { %v2132_v10 = vrot.slane %v2097_v3, 2  ;;  %v2133_v24 = vrot.slane %v2098_v29, 2  ;;  %v2135_v31 = vrot.slane %v2099_v18, 2  ;;  %v2137_v47 = vrot.slane %v2100_v32, 2 }
 0x147   : > { %v2127_v41 = vsel %vm362_vm1, %v2125_v22, %v2126_v23  ;;  %v2129_v33 = vsel %vm362_vm1, %v2126_v23, %v2128_v39  ;;  %v2131_v35 = vsel %vm362_vm1, %v2128_v39, %v2130_v44  ;;  %v2139_v42 = vrot.slane %v2101_v49, 2 }
 0x148   : > { %v2134_v52 = vsel %vm362_vm1, %v2132_v10, %v2133_v24  ;;  %v2136_v54 = vsel %vm362_vm1, %v2133_v24, %v2135_v31  ;;  %v2138_v60 = vsel %vm362_vm1, %v2135_v31, %v2137_v47  ;;  %v2140_v63 = vrot.slane %v2102_v30, 2 }
 0x149   : > { %v2142_v4 = vrot.slane %v2103_v57, 2  ;;  %v2144_v11 = vrot.slane %v2104_v43, 2  ;;  %v2146_v1 = vrot.slane %v2105_v46, 2  ;;  %v2147_v53 = vrot.slane %v2106_v48, 2 }
 0x14a   : > { %v2141_v3 = vsel %vm362_vm1, %v2139_v42, %v2140_v63  ;;  %v2149_v29 = vrot.slane %v2107_v50, 2  ;;  %v2151_v18 = vrot.slane %v2108_v27, 2  ;;  %v2169_v32 = vadd.f32 %v2127_v41, %v2073_v8 }
 0x14b   : > { %v2143_v22 = vsel %vm362_vm1, %v2140_v63, %v2142_v4  ;;  %v2145_v49 = vsel %vm362_vm1, %v2142_v4, %v2144_v11  ;;  %v2148_v23 = vsel %vm362_vm1, %v2146_v1, %v2147_v53  ;;  %v2170_v39 = vadd.f32 %v2129_v33, %v2074_v34  ;;  %v15734_v34 = vld [vmem:[#allocation9_spill] sm:$0xff] }
 0x14c   : > { %v2150_v10 = vsel %vm362_vm1, %v2147_v53, %v2149_v29  ;;  %v2152_v30 = vsel %vm362_vm1, %v2149_v29, %v2151_v18  ;;  %v10905_v57 = vadd.f32 %v2131_v35, %v2075_v59  ;;  %v2172_v43 = vadd.f32 %v2130_v44, %v2076_v16 }
 0x14d   : > { %v2173_v46 = vadd.f32 %v2134_v52, %v2077_v56  ;;  %v2174_v48 = vadd.f32 %v2136_v54, %v2078_v2  ;;  %v2175_v24 = vadd.f32 %v2138_v60, %v2079_v40  ;;  %v2176_v50 = vadd.f32 %v2137_v47, %v2080_v13 }
 0x14e   : > { %v2177_v27 = vadd.f32 %v2141_v3, %v2081_v37  ;;  %v2178_v8 = vadd.f32 %v2143_v22, %v2082_v15  ;;  %v2179_v31 = vadd.f32 %v2145_v49, %v2083_v28  ;;  %v2180_v41 = vadd.f32 %v2144_v11, %v2084_v20 }
 0x14f   : > { %v2181_v42 = vadd.f32 %v2148_v23, %v2085_v61  ;;  %v2182_v63 = vadd.f32 %v2150_v10, %v2086_v26  ;;  %v2183_v4 = vadd.f32 %v2152_v30, %v2087_v17  ;;  %v2184_v1 = vadd.f32 %v2151_v18, %v2088_v14 }
 0x150   : > { %v2189_v33 = vmul.f32 %v10407_v7, %v15734_v34  ;;  %v2190_v59 = vmul.f32 %v10414_v45, %v15734_v34  ;;  %v2191_v16 = vmul.f32 %v10417_v21, %v15734_v34  ;;  %v2192_v56 = vmul.f32 %v10420_v38, %v15734_v34 }
 0x151   : > { %v2193_v2 = vmul.f32 %v10687_v58, %v15734_v34  ;;  %v2194_v40 = vmul.f32 %v10694_v19, %v15734_v34  ;;  %v2195_v13 = vmul.f32 %v10697_v51, %v15734_v34  ;;  %v2196_v7 = vmul.f32 %v10700_v5, %v15734_v34 }
 0x152   : > { %v2197_v45 = vmul.f32 %v15714_v9, %v15734_v34  ;;  %v2198_v21 = vmul.f32 %v15715_v62, %v15734_v34  ;;  %v2199_v38 = vmul.f32 %v15716_v55, %v15734_v34  ;;  %v2200_v58 = vmul.f32 %v15720_v36, %v15734_v34 }
 0x153   : > { %v2201_v37 = vmul.f32 %v10707_v6, %v15734_v34  ;;  %v2202_v15 = vmul.f32 %v10710_v0, %v15734_v34  ;;  %v2203_v28 = vmul.f32 %v10713_v12, %v15734_v34  ;;  %v2204_v20 = vmul.f32 %v10716_v25, %v15734_v34 }
 0x154   : > { %v2221_v61 = vrot.slane %v2189_v33, 3  ;;  %v2222_v26 = vrot.slane %v2190_v59, 3  ;;  %v2224_v17 = vrot.slane %v2191_v16, 3  ;;  %v2226_v14 = vrot.slane %v2192_v56, 3 }
 0x155   : > { %v2228_v44 = vrot.slane %v2193_v2, 3  ;;  %v2229_v47 = vrot.slane %v2194_v40, 3  ;;  %v2231_v35 = vrot.slane %v2195_v13, 3  ;;  %v2233_v52 = vrot.slane %v2196_v7, 3 }
 0x156   : > { %v2223_v54 = vsel %vm459_vm2, %v2221_v61, %v2222_v26  ;;  %v2225_v60 = vsel %vm459_vm2, %v2222_v26, %v2224_v17  ;;  %v2227_v11 = vsel %vm459_vm2, %v2224_v17, %v2226_v14  ;;  %v2235_v53 = vrot.slane %v2197_v45, 3 }
 0x157   : > { %v2230_v3 = vsel %vm459_vm2, %v2228_v44, %v2229_v47  ;;  %v2232_v29 = vsel %vm459_vm2, %v2229_v47, %v2231_v35  ;;  %v2234_v18 = vsel %vm459_vm2, %v2231_v35, %v2233_v52  ;;  %v2236_v22 = vrot.slane %v2198_v21, 3 }
 0x158   : > { %v2238_v49 = vrot.slane %v2199_v38, 3  ;;  %v2240_v23 = vrot.slane %v2200_v58, 3  ;;  %v2242_v10 = vrot.slane %v2201_v37, 3  ;;  %v2243_v30 = vrot.slane %v2202_v15, 3 }
 0x159   : > { %v2237_v34 = vsel %vm459_vm2, %v2235_v53, %v2236_v22  ;;  %v2245_v33 = vrot.slane %v2203_v28, 3  ;;  %v2247_v59 = vrot.slane %v2204_v20, 3  ;;  %v2265_v16 = vadd.f32 %v2223_v54, %v2169_v32 }
 0x15a   : > { %v2239_v56 = vsel %vm459_vm2, %v2236_v22, %v2238_v49  ;;  %v2241_v2 = vsel %vm459_vm2, %v2238_v49, %v2240_v23  ;;  %v2244_v40 = vsel %vm459_vm2, %v2242_v10, %v2243_v30  ;;  %v2266_v13 = vadd.f32 %v2225_v60, %v2170_v39 }
 0x15b   : > { %v2246_v7 = vsel %vm459_vm2, %v2243_v30, %v2245_v33  ;;  %v2248_v45 = vsel %vm459_vm2, %v2245_v33, %v2247_v59  ;;  %v2267_v32 = vadd.f32 %v2227_v11, %v10905_v57  ;;  %v2268_v21 = vadd.f32 %v2226_v14, %v2172_v43  ;;  %v15736_v57 = vld [vmem:[#allocation10_spill] sm:$0xff] }
 0x15c   : > { %v2269_v38 = vadd.f32 %v2230_v3, %v2173_v46  ;;  %v2270_v58 = vadd.f32 %v2232_v29, %v2174_v48  ;;  %v2271_v37 = vadd.f32 %v2234_v18, %v2175_v24  ;;  %v2272_v15 = vadd.f32 %v2233_v52, %v2176_v50 }
 0x15d   : > { %v2273_v28 = vadd.f32 %v2237_v34, %v2177_v27  ;;  %v2274_v39 = vadd.f32 %v2239_v56, %v2178_v8  ;;  %v2275_v20 = vadd.f32 %v2241_v2, %v2179_v31  ;;  %v2276_v61 = vadd.f32 %v2240_v23, %v2180_v41  ;;  %v15737_v31 = vld [vmem:[#allocation13_spill] sm:$0xff]  ;;  %v15738_v41 = vld [vmem:[#allocation18_spill] sm:$0xff] }
 0x15e   : > { %v2277_v26 = vadd.f32 %v2244_v40, %v2181_v42  ;;  %v10959_v17 = vadd.f32 %v2246_v7, %v2182_v63  ;;  %v10961_v44 = vadd.f32 %v2248_v45, %v2183_v4  ;;  %v10963_v47 = vadd.f32 %v2247_v59, %v2184_v1  ;;  %v15740_v4 = vld [vmem:[#allocation20_spill] sm:$0xff]  ;;  %v15741_v1 = vld [vmem:[#allocation14_spill] sm:$0xff] }
 0x15f   : > { %v2290_v43 = vmul.f32 %v15736_v57, %v10694_v19  ;;  %v2291_v46 = vmul.f32 %v15736_v57, %v10697_v51  ;;  %v2292_v48 = vmul.f32 %v15736_v57, %v10700_v5  ;;  %v2293_v24 = vmul.f32 %v15736_v57, %v15714_v9 }
 0x160   : > { %v2294_v50 = vmul.f32 %v15736_v57, %v15715_v62  ;;  %v2295_v27 = vmul.f32 %v15736_v57, %v15716_v55  ;;  %v2296_v8 = vmul.f32 %v15736_v57, %v15720_v36  ;;  %v2297_v19 = vmul.f32 %v15736_v57, %v10707_v6  ;;  %v15739_v55 = vld [vmem:[#allocation19_spill] sm:$0xff] }
 0x161   : > { %v2298_v51 = vmul.f32 %v15736_v57, %v10710_v0  ;;  %v2299_v5 = vmul.f32 %v15736_v57, %v10713_v12  ;;  %v2300_v9 = vmul.f32 %v15736_v57, %v10716_v25  ;;  %v2317_v62 = vrot.slane %v15737_v31, 4 }
 0x162   : > { %v2318_v42 = vrot.slane %v15738_v41, 4  ;;  %v2320_v63 = vrot.slane %v15739_v55, 4  ;;  %v2322_v36 = vrot.slane %v15740_v4, 4  ;;  %v2324_v14 = vrot.slane %v15741_v1, 4  ;;  %v11081_v55 = vld [vmem:[%s9526_s16 + $0x108] sm:$0xff] }
 0x163   : > { %v2325_v6 = vrot.slane %v2290_v43, 4  ;;  %v2327_v35 = vrot.slane %v2291_v46, 4  ;;  %v2329_v0 = vrot.slane %v2292_v48, 4  ;;  %v2331_v52 = vrot.slane %v2293_v24, 4 }
 0x164   : > { %v2319_v12 = vsel %vm556_vm3, %v2317_v62, %v2318_v42  ;;  %v2321_v54 = vsel %vm556_vm3, %v2318_v42, %v2320_v63  ;;  %v2323_v25 = vsel %vm556_vm3, %v2320_v63, %v2322_v36  ;;  %v2332_v60 = vrot.slane %v2294_v50, 4  ;;  %v11055_v50 = vld [vmem:[%s9526_s16 + $0xa8] sm:$0xff] }
 0x165   : > { %v2326_v11 = vsel %vm556_vm3, %v2324_v14, %v2325_v6  ;;  %v2328_v53 = vsel %vm556_vm3, %v2325_v6, %v2327_v35  ;;  %v2330_v3 = vsel %vm556_vm3, %v2327_v35, %v2329_v0  ;;  %v2334_v29 = vrot.slane %v2295_v27, 4  ;;  %v11058_v27 = vld [vmem:[%s9526_s16 + $0xc8] sm:$0xff] }
 0x166   : > { %v2333_v18 = vsel %vm556_vm3, %v2331_v52, %v2332_v60  ;;  %v2336_v22 = vrot.slane %v2296_v8, 4  ;;  %v2338_v49 = vrot.slane %v2297_v19, 4  ;;  %v2339_v23 = vrot.slane %v2298_v51, 4  ;;  %v15744_v8 = vld [vmem:[#allocation4_spill] sm:$0xff]  ;;  %v15745_v51 = vld [vmem:[#allocation5_spill] sm:$0xff]  ;;  %v15748_v62 = vld [vmem:[#allocation7_spill] sm:$0xff] }
 0x167   : > { %v2335_v10 = vsel %vm556_vm3, %v2332_v60, %v2334_v29  ;;  %v2341_v30 = vrot.slane %v2299_v5, 4  ;;  %v2343_v34 = vrot.slane %v2300_v9, 4  ;;  %v2361_v33 = vadd.f32 %v2319_v12, %v2265_v16  ;;  %v15746_v9 = vld [vmem:[#allocation6_spill] sm:$0xff]  ;;  %v11078_v42 = vld [vmem:[%s9526_s16 + $0xe8] sm:$0xff] }
 0x168   : > { %v2337_v59 = vsel %vm556_vm3, %v2334_v29, %v2336_v22  ;;  %v2340_v56 = vsel %vm556_vm3, %v2338_v49, %v2339_v23  ;;  %v2362_v2 = vadd.f32 %v2321_v54, %v2266_v13  ;;  %v2363_v40 = vadd.f32 %v2323_v25, %v2267_v32  ;;  %v11022_v13 = vld [vmem:[%s15437_s1 + $0x8] sm:$0xff] }
 0x169   : > { %v2342_v7 = vsel %vm556_vm3, %v2339_v23, %v2341_v30  ;;  %v2344_v45 = vsel %vm556_vm3, %v2341_v30, %v2343_v34  ;;  %v2364_v57 = vadd.f32 %v2322_v36, %v2268_v21  ;;  %v2365_v43 = vadd.f32 %v2326_v11, %v2269_v38  ;;  %2377 = vst [vmem:[%s11008_s30] sm:$0xff] %v2361_v33  ;;  %v11084_v63 = vld [vmem:[%s9526_s16 + $0x128] sm:$0xff] }
 0x16a   : > { %v2366_v46 = vadd.f32 %v2328_v53, %v2270_v58  ;;  %v2367_v48 = vadd.f32 %v2330_v3, %v2271_v37  ;;  %v2368_v16 = vadd.f32 %v2329_v0, %v2272_v15  ;;  %v2369_v24 = vadd.f32 %v2333_v18, %v2273_v28  ;;  %2378 = vst [vmem:[%s11008_s30 + $0x20] sm:$0xff] %v2362_v2  ;;  %v11027_v37 = vld [vmem:[%s9526_s16 + $0x8] sm:$0xff] }
 0x16b   : > { %2379 = vst [vmem:[%s11008_s30 + $0x40] sm:$0xff] %v2363_v40  ;;  %15742 = vst [vmem:[#allocation17_spill] sm:$0xff] %v11022_v13  ;;  %v2370_v32 = vadd.f32 %v2335_v10, %v2274_v39  ;;  %v2371_v21 = vadd.f32 %v2337_v59, %v2275_v20  ;;  %v2372_v38 = vadd.f32 %v2336_v22, %v2276_v61  ;;  %v11037_v20 = vld [vmem:[%s9526_s16 + $0x28] sm:$0xff] }
 0x16c   : > { %v2373_v58 = vadd.f32 %v2340_v56, %v2277_v26  ;;  %2380 = vst [vmem:[%s11008_s30 + $0x60] sm:$0xf] %v2364_v57  ;;  %2381 = vst [vmem:[%s11008_s30 + $0x80] sm:$0xff] %v2365_v43  ;;  %v2374_v15 = vadd.f32 %v2342_v7, %v10959_v17  ;;  %v2375_v28 = vadd.f32 %v2344_v45, %v10961_v44  ;;  %v11040_v61 = vld [vmem:[%s9526_s16 + $0x48] sm:$0xff] }
 0x16d   : > { %v2376_v39 = vadd.f32 %v2343_v34, %v10963_v47  ;;  %2382 = vst [vmem:[%s11008_s30 + $0xa0] sm:$0xff] %v2366_v46  ;;  %2383 = vst [vmem:[%s11008_s30 + $0xc0] sm:$0xff] %v2367_v48  ;;  %v11043_v26 = vld [vmem:[%s9526_s16 + $0x68] sm:$0xff]  ;;  %v2452_v19 = vrot.slane %v11022_v13, %v15744_v8  ;;  %v11064_v5 = vrot.slane %v11022_v13, %v15745_v51 }
 0x16e   : > { %2384 = vst [vmem:[%s11008_s30 + $0xe0] sm:$0xf] %v2368_v16  ;;  %2385 = vst [vmem:[%s11008_s30 + $0x100] sm:$0xff] %v2369_v24  ;;  %v15743_v17 = vld [vmem:[#allocation3_spill] sm:$0xff]  ;;  %v11068_v31 = vrot.slane %v11022_v13, %v15746_v9  ;;  %v11072_v41 = vrot.slane %v11022_v13, %v15748_v62 }
 0x16f   : > { %v2416_v44 = vrot.slane %v11022_v13, %v15743_v17  ;;  %2386 = vst [vmem:[%s11008_s30 + $0x120] sm:$0xff] %v2370_v32  ;;  %2387 = vst [vmem:[%s11008_s30 + $0x140] sm:$0xff] %v2371_v21  ;;  %v11052_v47 = vld [vmem:[%s9526_s16 + $0x88] sm:$0xff]  ;;  %v2453_v34 = vmul.f32 %v2452_v19, %v11027_v37  ;;  %v2454_v33 = vmul.f32 %v2452_v19, %v11037_v20 }
 0x170   : > { %2388 = vst [vmem:[%s11008_s30 + $0x160] sm:$0xf] %v2372_v38  ;;  %2389 = vst [vmem:[%s11008_s30 + $0x180] sm:$0xff] %v2373_v58  ;;  %v11097_v6 = vld [vmem:[%s9526_s16 + $0x148] sm:$0xff]  ;;  %v2455_v59 = vmul.f32 %v2452_v19, %v11040_v61  ;;  %v2456_v56 = vmul.f32 %v2452_v19, %v11043_v26  ;;  %v2457_v2 = vmul.f32 %v2452_v19, %v11052_v47 }
 0x171   : > { %15747 = vst [vmem:[#allocation15_spill] sm:$0xff] %v11068_v31  ;;  %15749 = vst [vmem:[#allocation16_spill] sm:$0xff] %v11072_v41  ;;  %v2417_v4 = vmul.f32 %v2416_v44, %v11027_v37  ;;  %v11088_v36 = vmul.f32 %v2416_v44, %v11037_v20  ;;  %v11091_v1 = vmul.f32 %v2416_v44, %v11040_v61  ;;  %v11100_v35 = vld [vmem:[%s9526_s16 + $0x168] sm:$0xff]  ;;  %v2485_v38 = vrot.slane %v2453_v34, 1 }
 0x172   : > { %2390 = vst [vmem:[%s11008_s30 + $0x1a0] sm:$0xff] %v2374_v15  ;;  %2391 = vst [vmem:[%s11008_s30 + $0x1c0] sm:$0xff] %v2375_v28  ;;  %v11094_v14 = vmul.f32 %v2416_v44, %v11043_v26  ;;  %v11103_v0 = vld [vmem:[%s9526_s16 + $0x188] sm:$0xff]  ;;  %v11106_v52 = vmul.f32 %v2416_v44, %v11052_v47  ;;  %v11109_v12 = vmul.f32 %v2416_v44, %v11055_v50  ;;  %v2486_v58 = vrot.slane %v2454_v33, 1 }
 0x173   : > { %2392 = vst [vmem:[%s11008_s30 + $0x1e0] sm:$0xf] %v2376_v39  ;;  %v11112_v54 = vmul.f32 %v2416_v44, %v11058_v27  ;;  %v11115_v25 = vmul.f32 %v2416_v44, %v11078_v42  ;;  %v11118_v60 = vld [vmem:[%s9526_s16 + $0x1a8] sm:$0xff]  ;;  %v2425_v3 = vmul.f32 %v2416_v44, %v11081_v55  ;;  %v2426_v29 = vmul.f32 %v2416_v44, %v11084_v63 }
 0x174   : > { %v11121_v11 = vld [vmem:[%s9526_s16 + $0x1c8] sm:$0xff]  ;;  %v2427_v18 = vmul.f32 %v2416_v44, %v11097_v6  ;;  %v2428_v22 = vmul.f32 %v2416_v44, %v11100_v35  ;;  %v2429_v49 = vmul.f32 %v2416_v44, %v11103_v0  ;;  %v2430_v23 = vmul.f32 %v2416_v44, %v11118_v60 }
 0x175   : > { %v11124_v53 = vld [vmem:[%s9526_s16 + $0x1e8] sm:$0xff]  ;;  %v2431_v10 = vmul.f32 %v2416_v44, %v11121_v11  ;;  %v2458_v40 = vmul.f32 %v2452_v19, %v11055_v50  ;;  %v2459_v7 = vmul.f32 %v2452_v19, %v11058_v27  ;;  %v2460_v45 = vmul.f32 %v2452_v19, %v11078_v42 }
 0x176   : > { %15750 = vst [vmem:[#allocation2_spill] sm:$0xff] %v11124_v53  ;;  %v2432_v30 = vmul.f32 %v2416_v44, %v11124_v53  ;;  %v2461_v57 = vmul.f32 %v2452_v19, %v11081_v55  ;;  %v2462_v43 = vmul.f32 %v2452_v19, %v11084_v63  ;;  %v2463_v46 = vmul.f32 %v2452_v19, %v11097_v6 }
 0x177   : > { %v2464_v48 = vmul.f32 %v2452_v19, %v11100_v35  ;;  %v2465_v16 = vmul.f32 %v2452_v19, %v11103_v0  ;;  %v2466_v24 = vmul.f32 %v2452_v19, %v11118_v60  ;;  %v2467_v32 = vmul.f32 %v2452_v19, %v11121_v11 }
 0x178   : > { %v2468_v21 = vmul.f32 %v2452_v19, %v11124_v53  ;;  %v2488_v15 = vrot.slane %v2455_v59, 1  ;;  %v2490_v28 = vrot.slane %v2456_v56, 1  ;;  %v2492_v39 = vrot.slane %v2457_v2, 1 }
 0x179   : > { %v2493_v44 = vrot.slane %v2458_v40, 1  ;;  %v2495_v62 = vrot.slane %v2459_v7, 1  ;;  %v2497_v9 = vrot.slane %v2460_v45, 1  ;;  %v2487_v51 = vsel %vm265_vm0, %v2485_v38, %v2486_v58 }
 0x17a   : > { %v2489_v8 = vsel %vm265_vm0, %v2486_v58, %v2488_v15  ;;  %v2491_v17 = vsel %vm265_vm0, %v2488_v15, %v2490_v28  ;;  %v2499_v13 = vrot.slane %v2461_v57, 1  ;;  %v2500_v34 = vrot.slane %v2462_v43, 1 }
 0x17b   : > { %v2494_v41 = vsel %vm265_vm0, %v2492_v39, %v2493_v44  ;;  %v2496_v31 = vsel %vm265_vm0, %v2493_v44, %v2495_v62  ;;  %v2498_v19 = vsel %vm265_vm0, %v2495_v62, %v2497_v9  ;;  %v2502_v33 = vrot.slane %v2463_v46, 1 }
 0x17c   : > { %v2504_v59 = vrot.slane %v2464_v48, 1  ;;  %v2506_v56 = vrot.slane %v2465_v16, 1  ;;  %v2507_v2 = vrot.slane %v2466_v24, 1  ;;  %v2501_v40 = vsel %vm265_vm0, %v2499_v13, %v2500_v34 }
 0x17d   : > { %v2509_v7 = vrot.slane %v2467_v32, 1  ;;  %v2511_v45 = vrot.slane %v2468_v21, 1  ;;  %v2529_v38 = vadd.f32 %v2487_v51, %v2417_v4  ;;  %v2503_v58 = vsel %vm265_vm0, %v2500_v34, %v2502_v33 }
 0x17e   : > { %v2505_v57 = vsel %vm265_vm0, %v2502_v33, %v2504_v59  ;;  %v2508_v15 = vsel %vm265_vm0, %v2506_v56, %v2507_v2  ;;  %v2530_v39 = vadd.f32 %v2489_v8, %v11088_v36  ;;  %v2531_v46 = vadd.f32 %v2491_v17, %v11091_v1 }
 0x17f   : > { %v2510_v62 = vsel %vm265_vm0, %v2507_v2, %v2509_v7  ;;  %v2512_v43 = vsel %vm265_vm0, %v2509_v7, %v2511_v45  ;;  %v2532_v48 = vadd.f32 %v2490_v28, %v11094_v14  ;;  %v2533_v13 = vadd.f32 %v2494_v41, %v11106_v52 }
 0x180   : > { %v2534_v51 = vadd.f32 %v2496_v31, %v11109_v12  ;;  %v2535_v4 = vadd.f32 %v2498_v19, %v11112_v54  ;;  %v2536_v16 = vadd.f32 %v2497_v9, %v11115_v25  ;;  %v2537_v24 = vadd.f32 %v2501_v40, %v2425_v3 }
 0x181   : > { %v2538_v32 = vadd.f32 %v2503_v58, %v2426_v29  ;;  %v2539_v21 = vadd.f32 %v2505_v57, %v2427_v18  ;;  %v2540_v8 = vadd.f32 %v2504_v59, %v2428_v22  ;;  %v2541_v36 = vadd.f32 %v2508_v15, %v2429_v49 }
 0x182   : > { %v2542_v44 = vadd.f32 %v2510_v62, %v2430_v23  ;;  %v2543_v34 = vadd.f32 %v2512_v43, %v2431_v10  ;;  %v2544_v33 = vadd.f32 %v2511_v45, %v2432_v30  ;;  %v2549_v17 = vmul.f32 %v11064_v5, %v11027_v37 }
 0x183   : > { %v2550_v41 = vmul.f32 %v11064_v5, %v11037_v20  ;;  %v2551_v31 = vmul.f32 %v11064_v5, %v11040_v61  ;;  %v2552_v9 = vmul.f32 %v11064_v5, %v11043_v26  ;;  %v2553_v1 = vmul.f32 %v11064_v5, %v11052_v47 }
 0x184   : > { %v2554_v14 = vmul.f32 %v11064_v5, %v11055_v50  ;;  %v2555_v52 = vmul.f32 %v11064_v5, %v11058_v27  ;;  %v2556_v12 = vmul.f32 %v11064_v5, %v11078_v42  ;;  %v2557_v54 = vmul.f32 %v11064_v5, %v11081_v55 }
 0x185   : > { %v2558_v25 = vmul.f32 %v11064_v5, %v11084_v63  ;;  %v2559_v3 = vmul.f32 %v11064_v5, %v11097_v6  ;;  %v2560_v29 = vmul.f32 %v11064_v5, %v11100_v35  ;;  %v2561_v18 = vmul.f32 %v11064_v5, %v11103_v0 }
 0x186   : > { %v2562_v22 = vmul.f32 %v11064_v5, %v11118_v60  ;;  %v2563_v49 = vmul.f32 %v11064_v5, %v11121_v11  ;;  %v2564_v23 = vmul.f32 %v11064_v5, %v11124_v53  ;;  %v2581_v10 = vrot.slane %v2549_v17, 2 }
 0x187   : > { %v2582_v30 = vrot.slane %v2550_v41, 2  ;;  %v2584_v28 = vrot.slane %v2551_v31, 2  ;;  %v2586_v19 = vrot.slane %v2552_v9, 2  ;;  %v2588_v59 = vrot.slane %v2553_v1, 2 }
 0x188   : > { %v2589_v56 = vrot.slane %v2554_v14, 2  ;;  %v2591_v2 = vrot.slane %v2555_v52, 2  ;;  %v2593_v40 = vrot.slane %v2556_v12, 2  ;;  %v2595_v57 = vrot.slane %v2557_v54, 2 }
 0x189   : > { %v2583_v7 = vsel %vm362_vm1, %v2581_v10, %v2582_v30  ;;  %v2585_v45 = vsel %vm362_vm1, %v2582_v30, %v2584_v28  ;;  %v2587_v58 = vsel %vm362_vm1, %v2584_v28, %v2586_v19  ;;  %v2596_v43 = vrot.slane %v2558_v25, 2 }
 0x18a   : > { %v2590_v15 = vsel %vm362_vm1, %v2588_v59, %v2589_v56  ;;  %v2592_v62 = vsel %vm362_vm1, %v2589_v56, %v2591_v2  ;;  %v2594_v5 = vsel %vm362_vm1, %v2591_v2, %v2593_v40  ;;  %v2598_v17 = vrot.slane %v2559_v3, 2 }
 0x18b   : > { %v2600_v41 = vrot.slane %v2560_v29, 2  ;;  %v2602_v31 = vrot.slane %v2561_v18, 2  ;;  %v2603_v9 = vrot.slane %v2562_v22, 2  ;;  %v2597_v1 = vsel %vm362_vm1, %v2595_v57, %v2596_v43 }
 0x18c   : > { %v2605_v14 = vrot.slane %v2563_v49, 2  ;;  %v2607_v52 = vrot.slane %v2564_v23, 2  ;;  %v2625_v12 = vadd.f32 %v2583_v7, %v2529_v38  ;;  %v2599_v10 = vsel %vm362_vm1, %v2596_v43, %v2598_v17 }
 0x18d   : > { %v2601_v54 = vsel %vm362_vm1, %v2598_v17, %v2600_v41  ;;  %v2604_v30 = vsel %vm362_vm1, %v2602_v31, %v2603_v9  ;;  %v2626_v28 = vadd.f32 %v2585_v45, %v2530_v39  ;;  %v2627_v3 = vadd.f32 %v2587_v58, %v2531_v46  ;;  %v15751_v39 = vld [vmem:[#allocation15_spill] sm:$0xff] }
 0x18e   : > { %v2606_v59 = vsel %vm362_vm1, %v2603_v9, %v2605_v14  ;;  %v2608_v25 = vsel %vm362_vm1, %v2605_v14, %v2607_v52  ;;  %v2628_v29 = vadd.f32 %v2586_v19, %v2532_v48  ;;  %v2629_v18 = vadd.f32 %v2590_v15, %v2533_v13 }
 0x18f   : > { %v2630_v22 = vadd.f32 %v2592_v62, %v2534_v51  ;;  %v2631_v56 = vadd.f32 %v2594_v5, %v2535_v4  ;;  %v2632_v2 = vadd.f32 %v2593_v40, %v2536_v16  ;;  %v2633_v49 = vadd.f32 %v2597_v1, %v2537_v24 }
 0x190   : > { %v2634_v23 = vadd.f32 %v2599_v10, %v2538_v32  ;;  %v2635_v38 = vadd.f32 %v2601_v54, %v2539_v21  ;;  %v2636_v7 = vadd.f32 %v2600_v41, %v2540_v8  ;;  %v2637_v57 = vadd.f32 %v2604_v30, %v2541_v36 }
 0x191   : > { %v2638_v43 = vadd.f32 %v2606_v59, %v2542_v44  ;;  %v2639_v17 = vadd.f32 %v2608_v25, %v2543_v34  ;;  %v2640_v53 = vadd.f32 %v2607_v52, %v2544_v33  ;;  %v2645_v45 = vmul.f32 %v15751_v39, %v11027_v37  ;;  %v15752_v33 = vld [vmem:[#allocation2_spill] sm:$0xff] }
 0x192   : > { %v2646_v31 = vmul.f32 %v15751_v39, %v11037_v20  ;;  %v2647_v46 = vmul.f32 %v15751_v39, %v11040_v61  ;;  %v2648_v48 = vmul.f32 %v15751_v39, %v11043_v26  ;;  %v2649_v13 = vmul.f32 %v15751_v39, %v11052_v47 }
 0x193   : > { %v2650_v51 = vmul.f32 %v15751_v39, %v11055_v50  ;;  %v2651_v4 = vmul.f32 %v15751_v39, %v11058_v27  ;;  %v2652_v16 = vmul.f32 %v15751_v39, %v11078_v42  ;;  %v2653_v24 = vmul.f32 %v15751_v39, %v11081_v55 }
 0x194   : > { %v2654_v32 = vmul.f32 %v15751_v39, %v11084_v63  ;;  %v2655_v21 = vmul.f32 %v15751_v39, %v11097_v6  ;;  %v2656_v8 = vmul.f32 %v15751_v39, %v11100_v35  ;;  %v2657_v36 = vmul.f32 %v15751_v39, %v11103_v0 }
 0x195   : > { %v2658_v44 = vmul.f32 %v15751_v39, %v11118_v60  ;;  %v2659_v34 = vmul.f32 %v15751_v39, %v11121_v11  ;;  %v2660_v19 = vmul.f32 %v15751_v39, %v15752_v33  ;;  %v2677_v40 = vrot.slane %v2645_v45, 3 }
 0x196   : > { %v2678_v58 = vrot.slane %v2646_v31, 3  ;;  %v2680_v15 = vrot.slane %v2647_v46, 3  ;;  %v2682_v62 = vrot.slane %v2648_v48, 3  ;;  %v2684_v5 = vrot.slane %v2649_v13, 3 }
 0x197   : > { %v2685_v41 = vrot.slane %v2650_v51, 3  ;;  %v2687_v9 = vrot.slane %v2651_v4, 3  ;;  %v2689_v1 = vrot.slane %v2652_v16, 3  ;;  %v2691_v54 = vrot.slane %v2653_v24, 3 }
 0x198   : > { %v2679_v14 = vsel %vm459_vm2, %v2677_v40, %v2678_v58  ;;  %v2681_v52 = vsel %vm459_vm2, %v2678_v58, %v2680_v15  ;;  %v2683_v10 = vsel %vm459_vm2, %v2680_v15, %v2682_v62  ;;  %v2692_v39 = vrot.slane %v2654_v32, 3 }
 0x199   : > { %v2686_v30 = vsel %vm459_vm2, %v2684_v5, %v2685_v41  ;;  %v2688_v59 = vsel %vm459_vm2, %v2685_v41, %v2687_v9  ;;  %v2690_v25 = vsel %vm459_vm2, %v2687_v9, %v2689_v1  ;;  %v2694_v45 = vrot.slane %v2655_v21, 3 }
 0x19a   : > { %v2696_v31 = vrot.slane %v2656_v8, 3  ;;  %v2698_v46 = vrot.slane %v2657_v36, 3  ;;  %v2699_v48 = vrot.slane %v2658_v44, 3  ;;  %v2693_v13 = vsel %vm459_vm2, %v2691_v54, %v2692_v39 }
 0x19b   : > { %v2701_v51 = vrot.slane %v2659_v34, 3  ;;  %v2703_v4 = vrot.slane %v2660_v19, 3  ;;  %v2721_v16 = vadd.f32 %v2679_v14, %v2625_v12  ;;  %v2695_v40 = vsel %vm459_vm2, %v2692_v39, %v2694_v45 }
 0x19c   : > { %v2697_v24 = vsel %vm459_vm2, %v2694_v45, %v2696_v31  ;;  %v2700_v58 = vsel %vm459_vm2, %v2698_v46, %v2699_v48  ;;  %v2722_v15 = vadd.f32 %v2681_v52, %v2626_v28  ;;  %v2723_v21 = vadd.f32 %v2683_v10, %v2627_v3  ;;  %v15753_v28 = vld [vmem:[#allocation16_spill] sm:$0xff] }
 0x19d   : > { %v2702_v5 = vsel %vm459_vm2, %v2699_v48, %v2701_v51  ;;  %v2704_v32 = vsel %vm459_vm2, %v2701_v51, %v2703_v4  ;;  %v2724_v8 = vadd.f32 %v2682_v62, %v2628_v29  ;;  %v2725_v36 = vadd.f32 %v2686_v30, %v2629_v18 }
 0x19e   : > { %v2726_v44 = vadd.f32 %v2688_v59, %v2630_v22  ;;  %v2727_v41 = vadd.f32 %v2690_v25, %v2631_v56  ;;  %v2728_v9 = vadd.f32 %v2689_v1, %v2632_v2  ;;  %v2729_v34 = vadd.f32 %v2693_v13, %v2633_v49 }
 0x19f   : > { %v2730_v19 = vadd.f32 %v2695_v40, %v2634_v23  ;;  %v2731_v12 = vadd.f32 %v2697_v24, %v2635_v38  ;;  %v2732_v14 = vadd.f32 %v2696_v31, %v2636_v7  ;;  %v2733_v54 = vadd.f32 %v2700_v58, %v2637_v57  ;;  %v15754_v38 = vld [vmem:[#allocation2_spill] sm:$0xff] }
 0x1a0   : > { %v2734_v39 = vadd.f32 %v2702_v5, %v2638_v43  ;;  %v2735_v45 = vadd.f32 %v2704_v32, %v2639_v17  ;;  %v2736_v33 = vadd.f32 %v2703_v4, %v2640_v53  ;;  %v2741_v52 = vmul.f32 %v15753_v28, %v11027_v37 }
 0x1a1   : > { %v2742_v46 = vmul.f32 %v15753_v28, %v11037_v20  ;;  %v2743_v3 = vmul.f32 %v15753_v28, %v11040_v61  ;;  %v2744_v29 = vmul.f32 %v15753_v28, %v11043_v26  ;;  %v2745_v18 = vmul.f32 %v15753_v28, %v11052_v47 }
 0x1a2   : > { %v2746_v22 = vmul.f32 %v15753_v28, %v11055_v50  ;;  %v2747_v53 = vmul.f32 %v15753_v28, %v11058_v27  ;;  %v2748_v37 = vmul.f32 %v15753_v28, %v11078_v42  ;;  %v2749_v20 = vmul.f32 %v15753_v28, %v11081_v55 }
 0x1a3   : > { %v2750_v61 = vmul.f32 %v15753_v28, %v11084_v63  ;;  %v2751_v26 = vmul.f32 %v15753_v28, %v11097_v6  ;;  %v2752_v56 = vmul.f32 %v15753_v28, %v11100_v35  ;;  %v2753_v2 = vmul.f32 %v15753_v28, %v11103_v0 }
 0x1a4   : > { %v2754_v49 = vmul.f32 %v15753_v28, %v11118_v60  ;;  %v2755_v23 = vmul.f32 %v15753_v28, %v11121_v11  ;;  %v2756_v7 = vmul.f32 %v15753_v28, %v15754_v38  ;;  %v2773_v57 = vrot.slane %v2741_v52, 4 }
 0x1a5   : > { %v2774_v43 = vrot.slane %v2742_v46, 4  ;;  %v2776_v17 = vrot.slane %v2743_v3, 4  ;;  %v2778_v62 = vrot.slane %v2744_v29, 4  ;;  %v2780_v1 = vrot.slane %v2745_v18, 4 }
 0x1a6   : > { %v2781_v10 = vrot.slane %v2746_v22, 4  ;;  %v2783_v30 = vrot.slane %v2747_v53, 4  ;;  %v2785_v59 = vrot.slane %v2748_v37, 4  ;;  %v2787_v13 = vrot.slane %v2749_v20, 4 }
 0x1a7   : > { %v2775_v25 = vsel %vm556_vm3, %v2773_v57, %v2774_v43  ;;  %v2777_v31 = vsel %vm556_vm3, %v2774_v43, %v2776_v17  ;;  %v2779_v48 = vsel %vm556_vm3, %v2776_v17, %v2778_v62  ;;  %v2788_v24 = vrot.slane %v2750_v61, 4 }
 0x1a8   : > { %v2782_v51 = vsel %vm556_vm3, %v2780_v1, %v2781_v10  ;;  %v2784_v4 = vsel %vm556_vm3, %v2781_v10, %v2783_v30  ;;  %v2786_v40 = vsel %vm556_vm3, %v2783_v30, %v2785_v59  ;;  %v2790_v58 = vrot.slane %v2751_v26, 4  ;;  %v15756_v10 = vld [vmem:[#allocation8_spill] sm:$0xff]  ;;  %v15757_v30 = vld [vmem:[#allocation17_spill] sm:$0xff] }
 0x1a9   : > { %v2792_v5 = vrot.slane %v2752_v56, 4  ;;  %v2794_v32 = vrot.slane %v2753_v2, 4  ;;  %v2795_v28 = vrot.slane %v2754_v49, 4  ;;  %v2789_v52 = vsel %vm556_vm3, %v2787_v13, %v2788_v24  ;;  %v11304_v2 = vld [vmem:[%s15437_s1 + $0x28] sm:$0xff] }
 0x1aa   : > { %v2797_v46 = vrot.slane %v2755_v23, 4  ;;  %v2799_v3 = vrot.slane %v2756_v7, 4  ;;  %v2817_v29 = vadd.f32 %v2775_v25, %v2721_v16  ;;  %v2791_v18 = vsel %vm556_vm3, %v2788_v24, %v2790_v58  ;;  %15755 = vst [vmem:[#allocation9_spill] sm:$0xff] %v11304_v2  ;;  %v11338_v13 = vld [vmem:[%s9526_s16 + $0x228] sm:$0xff] }
 0x1ab   : > { %v2793_v22 = vsel %vm556_vm3, %v2790_v58, %v2792_v5  ;;  %v2796_v53 = vsel %vm556_vm3, %v2794_v32, %v2795_v28  ;;  %v2818_v37 = vadd.f32 %v2777_v31, %v2722_v15  ;;  %v2819_v26 = vadd.f32 %v2779_v48, %v2723_v21  ;;  %v15758_v31 = vld [vmem:[#allocation11_spill] sm:$0xff]  ;;  %15772 = vst [vmem:[#allocation16_spill] sm:$0xff] %v11338_v13 }
 0x1ac   : > { %v2798_v20 = vsel %vm556_vm3, %v2795_v28, %v2797_v46  ;;  %v2800_v61 = vsel %vm556_vm3, %v2797_v46, %v2799_v3  ;;  %v2820_v56 = vadd.f32 %v2778_v62, %v2724_v8  ;;  %v2821_v49 = vadd.f32 %v2782_v51, %v2725_v36  ;;  %v11341_v51 = vld [vmem:[%s9526_s16 + $0x248] sm:$0xff] }
 0x1ad   : > { %v2822_v16 = vadd.f32 %v2784_v4, %v2726_v44  ;;  %v2823_v23 = vadd.f32 %v2786_v40, %v2727_v41  ;;  %v2824_v7 = vadd.f32 %v2785_v59, %v2728_v9  ;;  %v2825_v57 = vadd.f32 %v2789_v52, %v2729_v34  ;;  %v15759_v44 = vld [vmem:[#allocation12_spill] sm:$0xff]  ;;  %v15761_v9 = vld [vmem:[#allocation3_spill] sm:$0xff]  ;;  %15773 = vst [vmem:[#allocation2_spill] sm:$0xff] %v11341_v51 }
 0x1ae   : > { %v2826_v43 = vadd.f32 %v2791_v18, %v2730_v19  ;;  %v2827_v15 = vadd.f32 %v2793_v22, %v2731_v12  ;;  %v2828_v17 = vadd.f32 %v2792_v5, %v2732_v14  ;;  %v2829_v1 = vadd.f32 %v2796_v53, %v2733_v54  ;;  %v11319_v19 = vld [vmem:[%s9526_s16 + $0x208] sm:$0xff]  ;;  %v15764_v12 = vld [vmem:[#allocation4_spill] sm:$0xff] }
 0x1af   : > { %v2830_v21 = vadd.f32 %v2798_v20, %v2734_v39  ;;  %v2831_v8 = vadd.f32 %v2800_v61, %v2735_v45  ;;  %v2832_v62 = vadd.f32 %v2799_v3, %v2736_v33  ;;  %v2852_v25 = vrot.slane %v15757_v30, %v15756_v10  ;;  %15763 = vst [vmem:[#allocation18_spill] sm:$0xff] %v11319_v19  ;;  %v15766_v33 = vld [vmem:[#allocation5_spill] sm:$0xff]  ;;  %v15768_v39 = vld [vmem:[#allocation6_spill] sm:$0xff]  ;;  %v15770_v59 = vld [vmem:[#allocation7_spill] sm:$0xff] }
 0x1b0   : > { %v2888_v36 = vrot.slane %v15757_v30, %v15758_v31  ;;  %v11312_v41 = vrot.slane %v15757_v30, %v15759_v44  ;;  %v11316_v34 = vrot.slane %v11304_v2, %v15761_v9  ;;  %v11323_v14 = vrot.slane %v11304_v2, %v15764_v12  ;;  %v11344_v4 = vld [vmem:[%s9526_s16 + $0x268] sm:$0xff] }
 0x1b1   : > { %v11327_v54 = vrot.slane %v11304_v2, %v15766_v33  ;;  %v11331_v45 = vrot.slane %v11304_v2, %v15768_v39  ;;  %v11335_v48 = vrot.slane %v11304_v2, %v15770_v59  ;;  %15774 = vst [vmem:[#allocation17_spill] sm:$0xff] %v11344_v4  ;;  %v2853_v40 = vmul.f32 %v2852_v25, %v11052_v47 }
 0x1b2   : > { %15760 = vst [vmem:[#allocation10_spill] sm:$0xff] %v11312_v41  ;;  %15762 = vst [vmem:[#allocation13_spill] sm:$0xff] %v11316_v34  ;;  %v2854_v24 = vmul.f32 %v2852_v25, %v11055_v50  ;;  %v2855_v58 = vmul.f32 %v2852_v25, %v11058_v27  ;;  %v2856_v5 = vmul.f32 %v2852_v25, %v11078_v42 }
 0x1b3   : > { %15765 = vst [vmem:[#allocation19_spill] sm:$0xff] %v11323_v14  ;;  %15767 = vst [vmem:[#allocation20_spill] sm:$0xff] %v11327_v54  ;;  %v2857_v32 = vmul.f32 %v2852_v25, %v11081_v55  ;;  %v2858_v28 = vmul.f32 %v2852_v25, %v11084_v63  ;;  %v2859_v52 = vmul.f32 %v2852_v25, %v11097_v6 }
 0x1b4   : > { %15769 = vst [vmem:[#allocation14_spill] sm:$0xff] %v11331_v45  ;;  %15771 = vst [vmem:[#allocation15_spill] sm:$0xff] %v11335_v48  ;;  %v2860_v46 = vmul.f32 %v2852_v25, %v11100_v35  ;;  %v2861_v3 = vmul.f32 %v2852_v25, %v11103_v0  ;;  %v2862_v18 = vmul.f32 %v2852_v25, %v11118_v60 }
 0x1b5   : > { %v2863_v22 = vmul.f32 %v2852_v25, %v11121_v11  ;;  %v2864_v53 = vmul.f32 %v2852_v25, %v15754_v38  ;;  %v2865_v20 = vmul.f32 %v11319_v19, %v2852_v25  ;;  %v2866_v61 = vmul.f32 %v11338_v13, %v2852_v25 }
 0x1b6   : > { %v2867_v30 = vmul.f32 %v11341_v51, %v2852_v25  ;;  %v2868_v59 = vmul.f32 %v11344_v4, %v2852_v25  ;;  %v2869_v39 = vadd.f32 %v2853_v40, %v2817_v29  ;;  %v2870_v33 = vadd.f32 %v2854_v24, %v2818_v37 }
 0x1b7   : > { %v2871_v12 = vadd.f32 %v2855_v58, %v2819_v26  ;;  %v2872_v9 = vadd.f32 %v2856_v5, %v2820_v56  ;;  %v2873_v44 = vadd.f32 %v2857_v32, %v2821_v49  ;;  %v2874_v31 = vadd.f32 %v2858_v28, %v2822_v16 }
 0x1b8   : > { %v2875_v2 = vadd.f32 %v2859_v52, %v2823_v23  ;;  %v2876_v10 = vadd.f32 %v2860_v46, %v2824_v7  ;;  %v2877_v48 = vadd.f32 %v2861_v3, %v2825_v57  ;;  %v2878_v45 = vadd.f32 %v2862_v18, %v2826_v43 }
 0x1b9   : > { %v2879_v54 = vadd.f32 %v2863_v22, %v2827_v15  ;;  %v2880_v14 = vadd.f32 %v2864_v53, %v2828_v17  ;;  %v2881_v34 = vadd.f32 %v2865_v20, %v2829_v1  ;;  %v2882_v41 = vadd.f32 %v2866_v61, %v2830_v21  ;;  %v15775_v15 = vld [vmem:[#allocation18_spill] sm:$0xff]  ;;  %v15776_v1 = vld [vmem:[#allocation16_spill] sm:$0xff] }
 0x1ba   : > { %v2883_v19 = vadd.f32 %v2867_v30, %v2831_v8  ;;  %v2884_v13 = vadd.f32 %v2868_v59, %v2832_v62  ;;  %v2889_v51 = vmul.f32 %v2888_v36, %v11052_v47  ;;  %v2890_v25 = vmul.f32 %v2888_v36, %v11055_v50  ;;  %v15777_v8 = vld [vmem:[#allocation2_spill] sm:$0xff] }
 0x1bb   : > { %v2891_v29 = vmul.f32 %v2888_v36, %v11058_v27  ;;  %v2892_v37 = vmul.f32 %v2888_v36, %v11078_v42  ;;  %v2893_v26 = vmul.f32 %v2888_v36, %v11081_v55  ;;  %v2894_v56 = vmul.f32 %v2888_v36, %v11084_v63 }
 0x1bc   : > { %v2895_v49 = vmul.f32 %v2888_v36, %v11097_v6  ;;  %v2896_v16 = vmul.f32 %v2888_v36, %v11100_v35  ;;  %v2897_v23 = vmul.f32 %v2888_v36, %v11103_v0  ;;  %v2898_v7 = vmul.f32 %v2888_v36, %v11118_v60 }
 0x1bd   : > { %v2899_v57 = vmul.f32 %v2888_v36, %v11121_v11  ;;  %v2900_v43 = vmul.f32 %v2888_v36, %v15754_v38  ;;  %v2901_v17 = vmul.f32 %v15775_v15, %v2888_v36  ;;  %v2902_v21 = vmul.f32 %v15776_v1, %v2888_v36 }
 0x1be   : > { %v2903_v62 = vmul.f32 %v15777_v8, %v2888_v36  ;;  %v2904_v59 = vmul.f32 %v11344_v4, %v2888_v36  ;;  %v2921_v40 = vrot.slane %v2889_v51, 1  ;;  %v2922_v24 = vrot.slane %v2890_v25, 1 }
 0x1bf   : > { %v2924_v58 = vrot.slane %v2891_v29, 1  ;;  %v2926_v5 = vrot.slane %v2892_v37, 1  ;;  %v2928_v32 = vrot.slane %v2893_v26, 1  ;;  %v2929_v28 = vrot.slane %v2894_v56, 1 }
 0x1c0   : > { %v2931_v52 = vrot.slane %v2895_v49, 1  ;;  %v2933_v46 = vrot.slane %v2896_v16, 1  ;;  %v2923_v3 = vsel %vm265_vm0, %v2921_v40, %v2922_v24  ;;  %v2935_v53 = vrot.slane %v2897_v23, 1 }
 0x1c1   : > { %v2925_v18 = vsel %vm265_vm0, %v2922_v24, %v2924_v58  ;;  %v2927_v22 = vsel %vm265_vm0, %v2924_v58, %v2926_v5  ;;  %v2930_v20 = vsel %vm265_vm0, %v2928_v32, %v2929_v28  ;;  %v2936_v51 = vrot.slane %v2898_v7, 1 }
 0x1c2   : > { %v2932_v61 = vsel %vm265_vm0, %v2929_v28, %v2931_v52  ;;  %v2934_v36 = vsel %vm265_vm0, %v2931_v52, %v2933_v46  ;;  %v2938_v30 = vrot.slane %v2899_v57, 1  ;;  %v2940_v25 = vrot.slane %v2900_v43, 1 }
 0x1c3   : > { %v2942_v29 = vrot.slane %v2901_v17, 1  ;;  %v2943_v37 = vrot.slane %v2902_v21, 1  ;;  %v2937_v26 = vsel %vm265_vm0, %v2935_v53, %v2936_v51  ;;  %v2945_v56 = vrot.slane %v2903_v62, 1 }
 0x1c4   : > { %v2947_v49 = vrot.slane %v2904_v59, 1  ;;  %v2965_v16 = vadd.f32 %v2923_v3, %v2869_v39  ;;  %v2939_v40 = vsel %vm265_vm0, %v2936_v51, %v2938_v30  ;;  %v2941_v23 = vsel %vm265_vm0, %v2938_v30, %v2940_v25 }
 0x1c5   : > { %v2944_v24 = vsel %vm265_vm0, %v2942_v29, %v2943_v37  ;;  %v2966_v58 = vadd.f32 %v2925_v18, %v2870_v33  ;;  %v2946_v32 = vsel %vm265_vm0, %v2943_v37, %v2945_v56  ;;  %v2967_v57 = vadd.f32 %v2927_v22, %v2871_v12  ;;  %v15778_v33 = vld [vmem:[#allocation10_spill] sm:$0xff] }
 0x1c6   : > { %v2948_v7 = vsel %vm265_vm0, %v2945_v56, %v2947_v49  ;;  %v2968_v43 = vadd.f32 %v2926_v5, %v2872_v9  ;;  %v2969_v17 = vadd.f32 %v2930_v20, %v2873_v44  ;;  %v2970_v21 = vadd.f32 %v2932_v61, %v2874_v31 }
 0x1c7   : > { %v2971_v28 = vadd.f32 %v2934_v36, %v2875_v2  ;;  %v2972_v52 = vadd.f32 %v2933_v46, %v2876_v10  ;;  %v2973_v62 = vadd.f32 %v2937_v26, %v2877_v48  ;;  %v2974_v59 = vadd.f32 %v2939_v40, %v2878_v45 }
 0x1c8   : > { %v2975_v39 = vadd.f32 %v2941_v23, %v2879_v54  ;;  %v2976_v3 = vadd.f32 %v2940_v25, %v2880_v14  ;;  %v2977_v53 = vadd.f32 %v2944_v24, %v2881_v34  ;;  %v2978_v51 = vadd.f32 %v2946_v32, %v2882_v41 }
 0x1c9   : > { %v2979_v30 = vadd.f32 %v2948_v7, %v2883_v19  ;;  %v2980_v4 = vadd.f32 %v2947_v49, %v2884_v13  ;;  %v2985_v18 = vmul.f32 %v15778_v33, %v11052_v47  ;;  %v2986_v29 = vmul.f32 %v15778_v33, %v11055_v50  ;;  %v15779_v13 = vld [vmem:[#allocation17_spill] sm:$0xff] }
 0x1ca   : > { %v2987_v44 = vmul.f32 %v15778_v33, %v11058_v27  ;;  %v2988_v2 = vmul.f32 %v15778_v33, %v11078_v42  ;;  %v2989_v10 = vmul.f32 %v15778_v33, %v11081_v55  ;;  %v2990_v31 = vmul.f32 %v15778_v33, %v11084_v63 }
 0x1cb   : > { %v2991_v41 = vmul.f32 %v15778_v33, %v11097_v6  ;;  %v2992_v9 = vmul.f32 %v15778_v33, %v11100_v35  ;;  %v2993_v34 = vmul.f32 %v15778_v33, %v11103_v0  ;;  %v2994_v19 = vmul.f32 %v15778_v33, %v11118_v60 }
 0x1cc   : > { %v2995_v12 = vmul.f32 %v15778_v33, %v11121_v11  ;;  %v2996_v14 = vmul.f32 %v15778_v33, %v15754_v38  ;;  %v2997_v54 = vmul.f32 %v15775_v15, %v15778_v33  ;;  %v2998_v45 = vmul.f32 %v15776_v1, %v15778_v33 }
 0x1cd   : > { %v2999_v48 = vmul.f32 %v15777_v8, %v15778_v33  ;;  %v3000_v5 = vmul.f32 %v15779_v13, %v15778_v33  ;;  %v3017_v46 = vrot.slane %v2985_v18, 2  ;;  %v3018_v22 = vrot.slane %v2986_v29, 2 }
 0x1ce   : > { %v3020_v20 = vrot.slane %v2987_v44, 2  ;;  %v3022_v61 = vrot.slane %v2988_v2, 2  ;;  %v3024_v36 = vrot.slane %v2989_v10, 2  ;;  %v3025_v25 = vrot.slane %v2990_v31, 2 }
 0x1cf   : > { %v3027_v37 = vrot.slane %v2991_v41, 2  ;;  %v3029_v26 = vrot.slane %v2992_v9, 2  ;;  %v3019_v56 = vsel %vm362_vm1, %v3017_v46, %v3018_v22  ;;  %v3031_v23 = vrot.slane %v2993_v34, 2 }
 0x1d0   : > { %v3021_v49 = vsel %vm362_vm1, %v3018_v22, %v3020_v20  ;;  %v3023_v40 = vsel %vm362_vm1, %v3020_v20, %v3022_v61  ;;  %v3026_v24 = vsel %vm362_vm1, %v3024_v36, %v3025_v25  ;;  %v3032_v33 = vrot.slane %v2994_v19, 2 }
 0x1d1   : > { %v3028_v32 = vsel %vm362_vm1, %v3025_v25, %v3027_v37  ;;  %v3030_v7 = vsel %vm362_vm1, %v3027_v37, %v3029_v26  ;;  %v3034_v18 = vrot.slane %v2995_v12, 2  ;;  %v3036_v29 = vrot.slane %v2996_v14, 2 }
 0x1d2   : > { %v3038_v44 = vrot.slane %v2997_v54, 2  ;;  %v3039_v2 = vrot.slane %v2998_v45, 2  ;;  %v3033_v10 = vsel %vm362_vm1, %v3031_v23, %v3032_v33  ;;  %v3041_v31 = vrot.slane %v2999_v48, 2 }
 0x1d3   : > { %v3043_v41 = vrot.slane %v3000_v5, 2  ;;  %v3061_v9 = vadd.f32 %v3019_v56, %v2965_v16  ;;  %v3035_v46 = vsel %vm362_vm1, %v3032_v33, %v3034_v18  ;;  %v3037_v34 = vsel %vm362_vm1, %v3034_v18, %v3036_v29 }
 0x1d4   : > { %v3040_v22 = vsel %vm362_vm1, %v3038_v44, %v3039_v2  ;;  %v3062_v20 = vadd.f32 %v3021_v49, %v2966_v58  ;;  %v3042_v36 = vsel %vm362_vm1, %v3039_v2, %v3041_v31  ;;  %v3063_v12 = vadd.f32 %v3023_v40, %v2967_v57  ;;  %v15780_v58 = vld [vmem:[#allocation13_spill] sm:$0xff] }
 0x1d5   : > { %v3044_v19 = vsel %vm362_vm1, %v3041_v31, %v3043_v41  ;;  %v3064_v14 = vadd.f32 %v3022_v61, %v2968_v43  ;;  %v3065_v54 = vadd.f32 %v3026_v24, %v2969_v17  ;;  %v3066_v45 = vadd.f32 %v3028_v32, %v2970_v21 }
 0x1d6   : > { %v3067_v25 = vadd.f32 %v3030_v7, %v2971_v28  ;;  %v3068_v37 = vadd.f32 %v3029_v26, %v2972_v52  ;;  %v3069_v48 = vadd.f32 %v3033_v10, %v2973_v62  ;;  %v3070_v5 = vadd.f32 %v3035_v46, %v2974_v59 }
 0x1d7   : > { %v3071_v16 = vadd.f32 %v3037_v34, %v2975_v39  ;;  %v3072_v56 = vadd.f32 %v3036_v29, %v2976_v3  ;;  %v3073_v23 = vadd.f32 %v3040_v22, %v2977_v53  ;;  %v3074_v33 = vadd.f32 %v3042_v36, %v2978_v51 }
 0x1d8   : > { %v3075_v18 = vadd.f32 %v3044_v19, %v2979_v30  ;;  %v3076_v13 = vadd.f32 %v3043_v41, %v2980_v4  ;;  %v3081_v49 = vmul.f32 %v15780_v58, %v11052_v47  ;;  %v3082_v44 = vmul.f32 %v15780_v58, %v11055_v50  ;;  %v15781_v30 = vld [vmem:[#allocation17_spill] sm:$0xff] }
 0x1d9   : > { %v3083_v57 = vmul.f32 %v15780_v58, %v11058_v27  ;;  %v3084_v43 = vmul.f32 %v15780_v58, %v11078_v42  ;;  %v3085_v17 = vmul.f32 %v15780_v58, %v11081_v55  ;;  %v3086_v21 = vmul.f32 %v15780_v58, %v11084_v63 }
 0x1da   : > { %v3087_v4 = vmul.f32 %v15780_v58, %v11097_v6  ;;  %v3088_v28 = vmul.f32 %v15780_v58, %v11100_v35  ;;  %v3089_v52 = vmul.f32 %v15780_v58, %v11103_v0  ;;  %v3090_v62 = vmul.f32 %v15780_v58, %v11118_v60 }
 0x1db   : > { %v3091_v59 = vmul.f32 %v15780_v58, %v11121_v11  ;;  %v3092_v39 = vmul.f32 %v15780_v58, %v15754_v38  ;;  %v3093_v3 = vmul.f32 %v15775_v15, %v15780_v58  ;;  %v3094_v53 = vmul.f32 %v15776_v1, %v15780_v58 }
 0x1dc   : > { %v3095_v51 = vmul.f32 %v15777_v8, %v15780_v58  ;;  %v3096_v61 = vmul.f32 %v15781_v30, %v15780_v58  ;;  %v3113_v26 = vrot.slane %v3081_v49, 3  ;;  %v3114_v40 = vrot.slane %v3082_v44, 3 }
 0x1dd   : > { %v3116_v24 = vrot.slane %v3083_v57, 3  ;;  %v3118_v32 = vrot.slane %v3084_v43, 3  ;;  %v3120_v7 = vrot.slane %v3085_v17, 3  ;;  %v3121_v29 = vrot.slane %v3086_v21, 3 }
 0x1de   : > { %v3123_v2 = vrot.slane %v3087_v4, 3  ;;  %v3125_v10 = vrot.slane %v3088_v28, 3  ;;  %v3115_v31 = vsel %vm459_vm2, %v3113_v26, %v3114_v40  ;;  %v3127_v34 = vrot.slane %v3089_v52, 3 }
 0x1df   : > { %v3117_v41 = vsel %vm459_vm2, %v3114_v40, %v3116_v24  ;;  %v3119_v46 = vsel %vm459_vm2, %v3116_v24, %v3118_v32  ;;  %v3122_v22 = vsel %vm459_vm2, %v3120_v7, %v3121_v29  ;;  %v3128_v58 = vrot.slane %v3090_v62, 3 }
 0x1e0   : > { %v3124_v36 = vsel %vm459_vm2, %v3121_v29, %v3123_v2  ;;  %v3126_v19 = vsel %vm459_vm2, %v3123_v2, %v3125_v10  ;;  %v3130_v49 = vrot.slane %v3091_v59, 3  ;;  %v3132_v44 = vrot.slane %v3092_v39, 3 }
 0x1e1   : > { %v3134_v57 = vrot.slane %v3093_v3, 3  ;;  %v3135_v43 = vrot.slane %v3094_v53, 3  ;;  %v3129_v17 = vsel %vm459_vm2, %v3127_v34, %v3128_v58  ;;  %v3137_v21 = vrot.slane %v3095_v51, 3 }
 0x1e2   : > { %v3139_v4 = vrot.slane %v3096_v61, 3  ;;  %v3157_v28 = vadd.f32 %v3115_v31, %v3061_v9  ;;  %v3131_v26 = vsel %vm459_vm2, %v3128_v58, %v3130_v49  ;;  %v3133_v52 = vsel %vm459_vm2, %v3130_v49, %v3132_v44 }
 0x1e3   : > { %v3136_v40 = vsel %vm459_vm2, %v3134_v57, %v3135_v43  ;;  %v3158_v24 = vadd.f32 %v3117_v41, %v3062_v20  ;;  %v3138_v7 = vsel %vm459_vm2, %v3135_v43, %v3137_v21  ;;  %v3159_v59 = vadd.f32 %v3119_v46, %v3063_v12 }
 0x1e4   : > { %v3140_v62 = vsel %vm459_vm2, %v3137_v21, %v3139_v4  ;;  %v3160_v39 = vadd.f32 %v3118_v32, %v3064_v14  ;;  %v3161_v3 = vadd.f32 %v3122_v22, %v3065_v54  ;;  %v3162_v53 = vadd.f32 %v3124_v36, %v3066_v45  ;;  %v15782_v14 = vld [vmem:[#allocation19_spill] sm:$0xff] }
 0x1e5   : > { %v3163_v29 = vadd.f32 %v3126_v19, %v3067_v25  ;;  %v3164_v2 = vadd.f32 %v3125_v10, %v3068_v37  ;;  %v11478_v51 = vadd.f32 %v3129_v17, %v3069_v48  ;;  %v11480_v9 = vadd.f32 %v3131_v26, %v3070_v5 }
 0x1e6   : > { %v11482_v61 = vadd.f32 %v3133_v52, %v3071_v16  ;;  %v11484_v31 = vadd.f32 %v3132_v44, %v3072_v56  ;;  %v11486_v34 = vadd.f32 %v3136_v40, %v3073_v23  ;;  %v11488_v20 = vadd.f32 %v3138_v7, %v3074_v33 }
 0x1e7   : > { %v11490_v41 = vadd.f32 %v3140_v62, %v3075_v18  ;;  %v11492_v12 = vadd.f32 %v3139_v4, %v3076_v13  ;;  %v3177_v54 = vmul.f32 %v15782_v14, %v11052_v47  ;;  %v3178_v45 = vmul.f32 %v15782_v14, %v11055_v50 }
 0x1e8   : > { %v3179_v25 = vmul.f32 %v15782_v14, %v11058_v27  ;;  %v3180_v37 = vmul.f32 %v15782_v14, %v11078_v42  ;;  %v3181_v48 = vmul.f32 %v15782_v14, %v11081_v55  ;;  %v3182_v5 = vmul.f32 %v15782_v14, %v11084_v63 }
 0x1e9   : > { %v3183_v13 = vmul.f32 %v15782_v14, %v11097_v6  ;;  %v3184_v47 = vmul.f32 %v15782_v14, %v11100_v35  ;;  %v3185_v50 = vmul.f32 %v15782_v14, %v11103_v0  ;;  %v3186_v27 = vmul.f32 %v15782_v14, %v11118_v60 }
 0x1ea   : > { %v3187_v42 = vmul.f32 %v15782_v14, %v11121_v11  ;;  %v3188_v55 = vmul.f32 %v15782_v14, %v15754_v38  ;;  %v3189_v63 = vmul.f32 %v15775_v15, %v15782_v14  ;;  %v3190_v6 = vmul.f32 %v15776_v1, %v15782_v14 }
 0x1eb   : > { %v3191_v35 = vmul.f32 %v15777_v8, %v15782_v14  ;;  %v3192_v0 = vmul.f32 %v15781_v30, %v15782_v14  ;;  %v3209_v16 = vrot.slane %v3177_v54, 4  ;;  %v3210_v60 = vrot.slane %v3178_v45, 4 }
 0x1ec   : > { %v3212_v56 = vrot.slane %v3179_v25, 4  ;;  %v3214_v23 = vrot.slane %v3180_v37, 4  ;;  %v3216_v11 = vrot.slane %v3181_v48, 4  ;;  %v3217_v33 = vrot.slane %v3182_v5, 4  ;;  %v11539_v48 = vld [vmem:[%s9526_s16 + $0x108] sm:$0xff] }
 0x1ed   : > { %v3219_v18 = vrot.slane %v3183_v13, 4  ;;  %v3221_v38 = vrot.slane %v3184_v47, 4  ;;  %v3211_v32 = vsel %vm556_vm3, %v3209_v16, %v3210_v60  ;;  %v3223_v22 = vrot.slane %v3185_v50, 4  ;;  %v15787_v16 = vld [vmem:[#allocation20_spill] sm:$0xff] }
 0x1ee   : > { %v3213_v10 = vsel %vm556_vm3, %v3210_v60, %v3212_v56  ;;  %v3215_v46 = vsel %vm556_vm3, %v3212_v56, %v3214_v23  ;;  %v3218_v36 = vsel %vm556_vm3, %v3216_v11, %v3217_v33  ;;  %v3224_v49 = vrot.slane %v3186_v27, 4  ;;  %v11548_v27 = vld [vmem:[%s9526_s16 + $0x168] sm:$0xff] }
 0x1ef   : > { %v3220_v19 = vsel %vm556_vm3, %v3217_v33, %v3219_v18  ;;  %v3222_v58 = vsel %vm556_vm3, %v3219_v18, %v3221_v38  ;;  %v3226_v44 = vrot.slane %v3187_v42, 4  ;;  %v3228_v57 = vrot.slane %v3188_v55, 4 }
 0x1f0   : > { %v3230_v43 = vrot.slane %v3189_v63, 4  ;;  %v3231_v17 = vrot.slane %v3190_v6, 4  ;;  %v3225_v21 = vsel %vm556_vm3, %v3223_v22, %v3224_v49  ;;  %v3233_v4 = vrot.slane %v3191_v35, 4 }
 0x1f1   : > { %v3235_v26 = vrot.slane %v3192_v0, 4  ;;  %v3253_v52 = vadd.f32 %v3211_v32, %v3157_v28  ;;  %v3227_v40 = vsel %vm556_vm3, %v3224_v49, %v3226_v44  ;;  %v3229_v7 = vsel %vm556_vm3, %v3226_v44, %v3228_v57  ;;  %v11542_v28 = vld [vmem:[%s9526_s16 + $0x128] sm:$0xff] }
 0x1f2   : > { %v3232_v62 = vsel %vm556_vm3, %v3230_v43, %v3231_v17  ;;  %v3254_v14 = vadd.f32 %v3213_v10, %v3158_v24  ;;  %v3234_v54 = vsel %vm556_vm3, %v3231_v17, %v3233_v4  ;;  %v3255_v25 = vadd.f32 %v3215_v46, %v3159_v59  ;;  %v11545_v24 = vld [vmem:[%s9526_s16 + $0x148] sm:$0xff] }
 0x1f3   : > { %v3236_v45 = vsel %vm556_vm3, %v3233_v4, %v3235_v26  ;;  %v3256_v37 = vadd.f32 %v3214_v23, %v3160_v39  ;;  %v3257_v5 = vadd.f32 %v3218_v36, %v3161_v3  ;;  %v3258_v13 = vadd.f32 %v3220_v19, %v3162_v53  ;;  %v11551_v59 = vld [vmem:[%s9526_s16 + $0x188] sm:$0xff] }
 0x1f4   : > { %v3259_v47 = vadd.f32 %v3222_v58, %v3163_v29  ;;  %v3260_v50 = vadd.f32 %v3221_v38, %v3164_v2  ;;  %v3261_v39 = vadd.f32 %v3225_v21, %v11478_v51  ;;  %v3262_v42 = vadd.f32 %v3227_v40, %v11480_v9  ;;  %v11558_v53 = vld [vmem:[%s9526_s16 + $0x1a8] sm:$0xff] }
 0x1f5   : > { %v3263_v55 = vadd.f32 %v3229_v7, %v11482_v61  ;;  %v3264_v3 = vadd.f32 %v3228_v57, %v11484_v31  ;;  %v11561_v29 = vld [vmem:[%s9526_s16 + $0x1c8] sm:$0xff]  ;;  %v3265_v63 = vadd.f32 %v3232_v62, %v11486_v34  ;;  %v3266_v6 = vadd.f32 %v3234_v54, %v11488_v20 }
 0x1f6   : > { %v11564_v2 = vld [vmem:[%s9526_s16 + $0x1e8] sm:$0xff]  ;;  %v3267_v35 = vadd.f32 %v3236_v45, %v11490_v41  ;;  %v3268_v51 = vadd.f32 %v3235_v26, %v11492_v12  ;;  %v3289_v60 = vmul.f32 %v11539_v48, %v15787_v16  ;;  %v3290_v34 = vmul.f32 %v11542_v28, %v15787_v16 }
 0x1f7   : > { %v11571_v0 = vld [vmem:[%s9526_s16 + $0x288] sm:$0xff]  ;;  %v3291_v20 = vmul.f32 %v11545_v24, %v15787_v16  ;;  %v3292_v41 = vmul.f32 %v11548_v27, %v15787_v16  ;;  %v3293_v12 = vmul.f32 %v11551_v59, %v15787_v16  ;;  %v3294_v56 = vmul.f32 %v11558_v53, %v15787_v16 }
 0x1f8   : > { %15783 = vst [vmem:[#allocation18_spill] sm:$0xff] %v11571_v0  ;;  %v11574_v9 = vld [vmem:[%s9526_s16 + $0x2a8] sm:$0xff]  ;;  %v3295_v23 = vmul.f32 %v11561_v29, %v15787_v16  ;;  %v3296_v11 = vmul.f32 %v11564_v2, %v15787_v16  ;;  %v3297_v33 = vmul.f32 %v15775_v15, %v15787_v16  ;;  %v3298_v18 = vmul.f32 %v15776_v1, %v15787_v16 }
 0x1f9   : > { %15784 = vst [vmem:[#allocation16_spill] sm:$0xff] %v11574_v9  ;;  %v11577_v61 = vld [vmem:[%s9526_s16 + $0x2c8] sm:$0xff]  ;;  %v3299_v38 = vmul.f32 %v15777_v8, %v15787_v16  ;;  %v3300_v32 = vmul.f32 %v15781_v30, %v15787_v16  ;;  %v3301_v10 = vmul.f32 %v11571_v0, %v15787_v16  ;;  %v3302_v46 = vmul.f32 %v11574_v9, %v15787_v16 }
 0x1fa   : > { %15785 = vst [vmem:[#allocation2_spill] sm:$0xff] %v11577_v61  ;;  %v11580_v31 = vld [vmem:[%s9526_s16 + $0x2e8] sm:$0xff]  ;;  %v3303_v22 = vmul.f32 %v11577_v61, %v15787_v16  ;;  %v3305_v19 = vadd.f32 %v3289_v60, %v3253_v52  ;;  %v3306_v58 = vadd.f32 %v3290_v34, %v3254_v14  ;;  %v3307_v49 = vadd.f32 %v3291_v20, %v3255_v25  ;;  %v15788_v61 = vld [vmem:[#allocation14_spill] sm:$0xff] }
 0x1fb   : > { %15786 = vst [vmem:[#allocation10_spill] sm:$0xff] %v11580_v31  ;;  %v3304_v36 = vmul.f32 %v11580_v31, %v15787_v16  ;;  %v3308_v44 = vadd.f32 %v3292_v41, %v3256_v37  ;;  %v3309_v57 = vadd.f32 %v3293_v12, %v3257_v5  ;;  %v3310_v43 = vadd.f32 %v3294_v56, %v3258_v13 }
 0x1fc   : > { %v3311_v17 = vadd.f32 %v3295_v23, %v3259_v47  ;;  %v3312_v21 = vadd.f32 %v3296_v11, %v3260_v50  ;;  %v3313_v4 = vadd.f32 %v3297_v33, %v3261_v39  ;;  %v3314_v26 = vadd.f32 %v3298_v18, %v3262_v42 }
 0x1fd   : > { %v3315_v40 = vadd.f32 %v3299_v38, %v3263_v55  ;;  %v3316_v7 = vadd.f32 %v3300_v32, %v3264_v3  ;;  %v3317_v62 = vadd.f32 %v3301_v10, %v3265_v63  ;;  %v3318_v54 = vadd.f32 %v3302_v46, %v3266_v6 }
 0x1fe   : > { %v3319_v45 = vadd.f32 %v3303_v22, %v3267_v35  ;;  %v3320_v9 = vadd.f32 %v3304_v36, %v3268_v51  ;;  %v3325_v0 = vmul.f32 %v11539_v48, %v15788_v61  ;;  %v3326_v52 = vmul.f32 %v11542_v28, %v15788_v61 }
 0x1ff   : > { %v3327_v14 = vmul.f32 %v11545_v24, %v15788_v61  ;;  %v3328_v25 = vmul.f32 %v11548_v27, %v15788_v61  ;;  %v3329_v37 = vmul.f32 %v11551_v59, %v15788_v61  ;;  %v3330_v5 = vmul.f32 %v11558_v53, %v15788_v61  ;;  %v15789_v3 = vld [vmem:[#allocation18_spill] sm:$0xff] }
 0x200   : > { %v3331_v13 = vmul.f32 %v11561_v29, %v15788_v61  ;;  %v3332_v47 = vmul.f32 %v11564_v2, %v15788_v61  ;;  %v3333_v50 = vmul.f32 %v15775_v15, %v15788_v61  ;;  %v3334_v39 = vmul.f32 %v15776_v1, %v15788_v61  ;;  %v15790_v6 = vld [vmem:[#allocation16_spill] sm:$0xff] }
 0x201   : > { %v3335_v42 = vmul.f32 %v15777_v8, %v15788_v61  ;;  %v3336_v55 = vmul.f32 %v15781_v30, %v15788_v61  ;;  %v3337_v63 = vmul.f32 %v15789_v3, %v15788_v61  ;;  %v3338_v35 = vmul.f32 %v15790_v6, %v15788_v61  ;;  %v15791_v51 = vld [vmem:[#allocation2_spill] sm:$0xff] }
 0x202   : > { %v3339_v16 = vmul.f32 %v15791_v51, %v15788_v61  ;;  %v3340_v60 = vmul.f32 %v11580_v31, %v15788_v61  ;;  %v3357_v34 = vrot.slane %v3325_v0, 1  ;;  %v3358_v20 = vrot.slane %v3326_v52, 1 }
 0x203   : > { %v3360_v41 = vrot.slane %v3327_v14, 1  ;;  %v3362_v12 = vrot.slane %v3328_v25, 1  ;;  %v3364_v56 = vrot.slane %v3329_v37, 1  ;;  %v3365_v23 = vrot.slane %v3330_v5, 1 }
 0x204   : > { %v3367_v11 = vrot.slane %v3331_v13, 1  ;;  %v3369_v33 = vrot.slane %v3332_v47, 1  ;;  %v3359_v18 = vsel %vm265_vm0, %v3357_v34, %v3358_v20  ;;  %v3371_v10 = vrot.slane %v3333_v50, 1 }
 0x205   : > { %v3361_v38 = vsel %vm265_vm0, %v3358_v20, %v3360_v41  ;;  %v3363_v32 = vsel %vm265_vm0, %v3360_v41, %v3362_v12  ;;  %v3366_v46 = vsel %vm265_vm0, %v3364_v56, %v3365_v23  ;;  %v3372_v61 = vrot.slane %v3334_v39, 1 }
 0x206   : > { %v3368_v22 = vsel %vm265_vm0, %v3365_v23, %v3367_v11  ;;  %v3370_v0 = vsel %vm265_vm0, %v3367_v11, %v3369_v33  ;;  %v3374_v36 = vrot.slane %v3335_v42, 1  ;;  %v3376_v52 = vrot.slane %v3336_v55, 1 }
 0x207   : > { %v3378_v14 = vrot.slane %v3337_v63, 1  ;;  %v3379_v25 = vrot.slane %v3338_v35, 1  ;;  %v3373_v37 = vsel %vm265_vm0, %v3371_v10, %v3372_v61  ;;  %v3381_v5 = vrot.slane %v3339_v16, 1 }
 0x208   : > { %v3383_v13 = vrot.slane %v3340_v60, 1  ;;  %v3401_v47 = vadd.f32 %v3359_v18, %v3305_v19  ;;  %v3375_v34 = vsel %vm265_vm0, %v3372_v61, %v3374_v36  ;;  %v3377_v50 = vsel %vm265_vm0, %v3374_v36, %v3376_v52 }
 0x209   : > { %v3380_v20 = vsel %vm265_vm0, %v3378_v14, %v3379_v25  ;;  %v3402_v41 = vadd.f32 %v3361_v38, %v3306_v58  ;;  %v3382_v56 = vsel %vm265_vm0, %v3379_v25, %v3381_v5  ;;  %v3403_v42 = vadd.f32 %v3363_v32, %v3307_v49  ;;  %v15792_v14 = vld [vmem:[#allocation15_spill] sm:$0xff] }
 0x20a   : > { %v3384_v39 = vsel %vm265_vm0, %v3381_v5, %v3383_v13  ;;  %v3404_v55 = vadd.f32 %v3362_v12, %v3308_v44  ;;  %v3405_v63 = vadd.f32 %v3366_v46, %v3309_v57  ;;  %v3406_v35 = vadd.f32 %v3368_v22, %v3310_v43 }
 0x20b   : > { %v3407_v23 = vadd.f32 %v3370_v0, %v3311_v17  ;;  %v3408_v11 = vadd.f32 %v3369_v33, %v3312_v21  ;;  %v3409_v16 = vadd.f32 %v3373_v37, %v3313_v4  ;;  %v3410_v60 = vadd.f32 %v3375_v34, %v3314_v26 }
 0x20c   : > { %v3411_v19 = vadd.f32 %v3377_v50, %v3315_v40  ;;  %v3412_v18 = vadd.f32 %v3376_v52, %v3316_v7  ;;  %v3413_v10 = vadd.f32 %v3380_v20, %v3317_v62  ;;  %v3414_v61 = vadd.f32 %v3382_v56, %v3318_v54 }
 0x20d   : > { %v3415_v36 = vadd.f32 %v3384_v39, %v3319_v45  ;;  %v3416_v31 = vadd.f32 %v3383_v13, %v3320_v9  ;;  %v3421_v58 = vmul.f32 %v11539_v48, %v15792_v14  ;;  %v3422_v38 = vmul.f32 %v11542_v28, %v15792_v14  ;;  %v15793_v45 = vld [vmem:[#allocation10_spill] sm:$0xff] }
 0x20e   : > { %v3423_v49 = vmul.f32 %v11545_v24, %v15792_v14  ;;  %v3424_v44 = vmul.f32 %v11548_v27, %v15792_v14  ;;  %v3425_v57 = vmul.f32 %v11551_v59, %v15792_v14  ;;  %v3426_v43 = vmul.f32 %v11558_v53, %v15792_v14 }
 0x20f   : > { %v3427_v9 = vmul.f32 %v11561_v29, %v15792_v14  ;;  %v3428_v17 = vmul.f32 %v11564_v2, %v15792_v14  ;;  %v3429_v21 = vmul.f32 %v15775_v15, %v15792_v14  ;;  %v3430_v4 = vmul.f32 %v15776_v1, %v15792_v14 }
 0x210   : > { %v3431_v26 = vmul.f32 %v15777_v8, %v15792_v14  ;;  %v3432_v40 = vmul.f32 %v15781_v30, %v15792_v14  ;;  %v3433_v7 = vmul.f32 %v15789_v3, %v15792_v14  ;;  %v3434_v62 = vmul.f32 %v15790_v6, %v15792_v14 }
 0x211   : > { %v3435_v54 = vmul.f32 %v15791_v51, %v15792_v14  ;;  %v3436_v12 = vmul.f32 %v15793_v45, %v15792_v14  ;;  %v3453_v33 = vrot.slane %v3421_v58, 2  ;;  %v3454_v32 = vrot.slane %v3422_v38, 2 }
 0x212   : > { %v3456_v46 = vrot.slane %v3423_v49, 2  ;;  %v3458_v22 = vrot.slane %v3424_v44, 2  ;;  %v3460_v0 = vrot.slane %v3425_v57, 2  ;;  %v3461_v52 = vrot.slane %v3426_v43, 2 }
 0x213   : > { %v3463_v25 = vrot.slane %v3427_v9, 2  ;;  %v3465_v37 = vrot.slane %v3428_v17, 2  ;;  %v3455_v5 = vsel %vm362_vm1, %v3453_v33, %v3454_v32  ;;  %v3467_v50 = vrot.slane %v3429_v21, 2 }
 0x214   : > { %v3457_v13 = vsel %vm362_vm1, %v3454_v32, %v3456_v46  ;;  %v3459_v34 = vsel %vm362_vm1, %v3456_v46, %v3458_v22  ;;  %v3462_v20 = vsel %vm362_vm1, %v3460_v0, %v3461_v52  ;;  %v3468_v14 = vrot.slane %v3430_v4, 2 }
 0x215   : > { %v3464_v56 = vsel %vm362_vm1, %v3461_v52, %v3463_v25  ;;  %v3466_v39 = vsel %vm362_vm1, %v3463_v25, %v3465_v37  ;;  %v3470_v58 = vrot.slane %v3431_v26, 2  ;;  %v3472_v38 = vrot.slane %v3432_v40, 2 }
 0x216   : > { %v3474_v49 = vrot.slane %v3433_v7, 2  ;;  %v3475_v44 = vrot.slane %v3434_v62, 2  ;;  %v3469_v57 = vsel %vm362_vm1, %v3467_v50, %v3468_v14  ;;  %v3477_v43 = vrot.slane %v3435_v54, 2 }
 0x217   : > { %v3479_v9 = vrot.slane %v3436_v12, 2  ;;  %v11697_v17 = vadd.f32 %v3455_v5, %v3401_v47  ;;  %v3471_v33 = vsel %vm362_vm1, %v3468_v14, %v3470_v58  ;;  %v3473_v21 = vsel %vm362_vm1, %v3470_v58, %v3472_v38  ;;  %v11713_v47 = vld [vmem:[%s15437_s1 + $0x48] sm:$0xff]  ;;  %v15796_v5 = vld [vmem:[#allocation9_spill] sm:$0xff] }
 0x218   : > { %v3476_v32 = vsel %vm362_vm1, %v3474_v49, %v3475_v44  ;;  %v11702_v46 = vadd.f32 %v3457_v13, %v3402_v41  ;;  %v3478_v4 = vsel %vm362_vm1, %v3475_v44, %v3477_v43  ;;  %v11706_v40 = vadd.f32 %v3459_v34, %v3403_v42  ;;  %15794 = vst [vmem:[#allocation13_spill] sm:$0xff] %v11713_v47  ;;  %v15804_v34 = vld [vmem:[#allocation6_spill] sm:$0xff] }
 0x219   : > { %v3480_v26 = vsel %vm362_vm1, %v3477_v43, %v3479_v9  ;;  %v11708_v7 = vadd.f32 %v3458_v22, %v3404_v55  ;;  %v11715_v62 = vadd.f32 %v3462_v20, %v3405_v63  ;;  %v11717_v54 = vadd.f32 %v3464_v56, %v3406_v35  ;;  %v15806_v20 = vld [vmem:[#allocation7_spill] sm:$0xff] }
 0x21a   : > { %v11719_v12 = vadd.f32 %v3466_v39, %v3407_v23  ;;  %v11721_v41 = vadd.f32 %v3465_v37, %v3408_v11  ;;  %v11723_v0 = vadd.f32 %v3469_v57, %v3409_v16  ;;  %v11725_v52 = vadd.f32 %v3471_v33, %v3410_v60  ;;  %v15795_v23 = vld [vmem:[#allocation8_spill] sm:$0xff]  ;;  %v15797_v37 = vld [vmem:[#allocation11_spill] sm:$0xff] }
 0x21b   : > { %v11727_v42 = vadd.f32 %v3473_v21, %v3411_v19  ;;  %v11729_v55 = vadd.f32 %v3472_v38, %v3412_v18  ;;  %v11731_v22 = vadd.f32 %v3476_v32, %v3413_v10  ;;  %v11733_v25 = vadd.f32 %v3478_v4, %v3414_v61  ;;  %v15798_v60 = vld [vmem:[#allocation12_spill] sm:$0xff]  ;;  %v15799_v18 = vld [vmem:[#allocation3_spill] sm:$0xff] }
 0x21c   : > { %v11735_v63 = vadd.f32 %v3480_v26, %v3415_v36  ;;  %v11737_v35 = vadd.f32 %v3479_v9, %v3416_v31  ;;  %v3516_v11 = vrot.slane %v15796_v5, %v15795_v23  ;;  %v11743_v16 = vrot.slane %v15796_v5, %v15797_v37  ;;  %v15800_v61 = vld [vmem:[#allocation4_spill] sm:$0xff]  ;;  %v15802_v31 = vld [vmem:[#allocation5_spill] sm:$0xff] }
 0x21d   : > { %v11747_v19 = vrot.slane %v15796_v5, %v15798_v60  ;;  %v11751_v10 = vrot.slane %v11713_v47, %v15799_v18  ;;  %v11755_v36 = vrot.slane %v11713_v47, %v15800_v61  ;;  %v11759_v13 = vrot.slane %v11713_v47, %v15802_v31 }
 0x21e   : > { %v11763_v50 = vrot.slane %v11713_v47, %v15804_v34  ;;  %v11767_v56 = vrot.slane %v11713_v47, %v15806_v20  ;;  %v3517_v39 = vmul.f32 %v11539_v48, %v3516_v11  ;;  %v3518_v14 = vmul.f32 %v11542_v28, %v3516_v11 }
 0x21f   : > { %15801 = vst [vmem:[#allocation17_spill] sm:$0xff] %v11755_v36  ;;  %15803 = vst [vmem:[#allocation19_spill] sm:$0xff] %v11759_v13  ;;  %v3519_v58 = vmul.f32 %v11545_v24, %v3516_v11  ;;  %v3520_v38 = vmul.f32 %v11548_v27, %v3516_v11  ;;  %v3521_v49 = vmul.f32 %v11551_v59, %v3516_v11 }
 0x220   : > { %15805 = vst [vmem:[#allocation20_spill] sm:$0xff] %v11763_v50  ;;  %15807 = vst [vmem:[#allocation14_spill] sm:$0xff] %v11767_v56  ;;  %v3522_v44 = vmul.f32 %v11558_v53, %v3516_v11  ;;  %v3523_v57 = vmul.f32 %v11561_v29, %v3516_v11  ;;  %v3524_v43 = vmul.f32 %v11564_v2, %v3516_v11  ;;  %v3549_v34 = vrot.slane %v3517_v39, 3 }
 0x221   : > { %v3525_v9 = vmul.f32 %v15775_v15, %v3516_v11  ;;  %v3526_v33 = vmul.f32 %v15776_v1, %v3516_v11  ;;  %v3527_v21 = vmul.f32 %v15777_v8, %v3516_v11  ;;  %v3528_v32 = vmul.f32 %v15781_v30, %v3516_v11 }
 0x222   : > { %v3529_v4 = vmul.f32 %v15789_v3, %v3516_v11  ;;  %v3530_v26 = vmul.f32 %v15790_v6, %v3516_v11  ;;  %v3531_v5 = vmul.f32 %v15791_v51, %v3516_v11  ;;  %v3532_v20 = vmul.f32 %v15793_v45, %v3516_v11 }
 0x223   : > { %v3550_v31 = vrot.slane %v3518_v14, 3  ;;  %v3552_v61 = vrot.slane %v3519_v58, 3  ;;  %v3554_v18 = vrot.slane %v3520_v38, 3  ;;  %v3556_v60 = vrot.slane %v3521_v49, 3 }
 0x224   : > { %v3557_v15 = vrot.slane %v3522_v44, 3  ;;  %v3559_v37 = vrot.slane %v3523_v57, 3  ;;  %v3561_v1 = vrot.slane %v3524_v43, 3  ;;  %v3563_v23 = vrot.slane %v3525_v9, 3 }
 0x225   : > { %v3551_v8 = vsel %vm459_vm2, %v3549_v34, %v3550_v31  ;;  %v3553_v30 = vsel %vm459_vm2, %v3550_v31, %v3552_v61  ;;  %v3555_v47 = vsel %vm459_vm2, %v3552_v61, %v3554_v18  ;;  %v3564_v39 = vrot.slane %v3526_v33, 3 }
 0x226   : > { %v3558_v56 = vsel %vm459_vm2, %v3556_v60, %v3557_v15  ;;  %v3560_v50 = vsel %vm459_vm2, %v3557_v15, %v3559_v37  ;;  %v3562_v11 = vsel %vm459_vm2, %v3559_v37, %v3561_v1  ;;  %v3566_v14 = vrot.slane %v3527_v21, 3 }
 0x227   : > { %v3568_v58 = vrot.slane %v3528_v32, 3  ;;  %v3570_v38 = vrot.slane %v3529_v4, 3  ;;  %v3571_v49 = vrot.slane %v3530_v26, 3  ;;  %v3565_v44 = vsel %vm459_vm2, %v3563_v23, %v3564_v39 }
 0x228   : > { %v3573_v57 = vrot.slane %v3531_v5, 3  ;;  %v3575_v34 = vrot.slane %v3532_v20, 3  ;;  %v11793_v31 = vadd.f32 %v3551_v8, %v11697_v17  ;;  %v3567_v61 = vsel %vm459_vm2, %v3564_v39, %v3566_v14 }
 0x229   : > { %v3569_v60 = vsel %vm459_vm2, %v3566_v14, %v3568_v58  ;;  %v3572_v43 = vsel %vm459_vm2, %v3570_v38, %v3571_v49  ;;  %v11799_v37 = vadd.f32 %v3553_v30, %v11702_v46  ;;  %v11804_v23 = vadd.f32 %v3555_v47, %v11706_v40 }
 0x22a   : > { %v3574_v9 = vsel %vm459_vm2, %v3571_v49, %v3573_v57  ;;  %v3576_v33 = vsel %vm459_vm2, %v3573_v57, %v3575_v34  ;;  %v11807_v20 = vadd.f32 %v3554_v18, %v11708_v7  ;;  %v11810_v17 = vadd.f32 %v3558_v56, %v11715_v62  ;;  %v9428_v18 = vld [vmem:[%s9526_s16 + $0x228] sm:$0xff] }
 0x22b   : > { %v11813_v21 = vadd.f32 %v3560_v50, %v11717_v54  ;;  %v11816_v32 = vadd.f32 %v3562_v11, %v11719_v12  ;;  %v11819_v46 = vadd.f32 %v3561_v1, %v11721_v41  ;;  %v11822_v4 = vadd.f32 %v3565_v44, %v11723_v0  ;;  %v9429_v50 = vld [vmem:[%s9526_s16 + $0x248] sm:$0xff] }
 0x22c   : > { %v11825_v40 = vadd.f32 %v3567_v61, %v11725_v52  ;;  %v11828_v7 = vadd.f32 %v3569_v60, %v11727_v42  ;;  %v11831_v47 = vadd.f32 %v3568_v58, %v11729_v55  ;;  %v11834_v62 = vadd.f32 %v3572_v43, %v11731_v22  ;;  %v9430_v56 = vld [vmem:[%s9526_s16 + $0x268] sm:$0xff] }
 0x22d   : > { %v11837_v54 = vadd.f32 %v3574_v9, %v11733_v25  ;;  %v11840_v12 = vadd.f32 %v3576_v33, %v11735_v63  ;;  %v11843_v41 = vadd.f32 %v3575_v34, %v11737_v35  ;;  %v3613_v0 = vmul.f32 %v11539_v48, %v11743_v16  ;;  %v9427_v35 = vld [vmem:[%s9526_s16 + $0x208] sm:$0xff] }
 0x22e   : > { %v3614_v52 = vmul.f32 %v11542_v28, %v11743_v16  ;;  %v3615_v42 = vmul.f32 %v11545_v24, %v11743_v16  ;;  %v3616_v55 = vmul.f32 %v11548_v27, %v11743_v16  ;;  %v3617_v22 = vmul.f32 %v11551_v59, %v11743_v16 }
 0x22f   : > { %v3618_v25 = vmul.f32 %v11558_v53, %v11743_v16  ;;  %v3619_v63 = vmul.f32 %v11561_v29, %v11743_v16  ;;  %v3620_v48 = vmul.f32 %v11564_v2, %v11743_v16  ;;  %v3621_v28 = vmul.f32 %v9427_v35, %v11743_v16 }
 0x230   : > { %v3622_v24 = vmul.f32 %v9428_v18, %v11743_v16  ;;  %v3623_v27 = vmul.f32 %v9429_v50, %v11743_v16  ;;  %v3624_v26 = vmul.f32 %v9430_v56, %v11743_v16  ;;  %v3625_v5 = vmul.f32 %v15789_v3, %v11743_v16 }
 0x231   : > { %v3626_v15 = vmul.f32 %v15790_v6, %v11743_v16  ;;  %v3627_v1 = vmul.f32 %v15791_v51, %v11743_v16  ;;  %v3628_v8 = vmul.f32 %v15793_v45, %v11743_v16  ;;  %v3645_v30 = vrot.slane %v3613_v0, 4 }
 0x232   : > { %v3646_v11 = vrot.slane %v3614_v52, 4  ;;  %v3648_v39 = vrot.slane %v3615_v42, 4  ;;  %v3650_v14 = vrot.slane %v3616_v55, 4  ;;  %v3652_v58 = vrot.slane %v3617_v22, 4 }
 0x233   : > { %v3653_v38 = vrot.slane %v3618_v25, 4  ;;  %v3655_v49 = vrot.slane %v3619_v63, 4  ;;  %v3657_v44 = vrot.slane %v3620_v48, 4  ;;  %v3659_v60 = vrot.slane %v3621_v28, 4 }
 0x234   : > { %v3647_v57 = vsel %vm556_vm3, %v3645_v30, %v3646_v11  ;;  %v3649_v34 = vsel %vm556_vm3, %v3646_v11, %v3648_v39  ;;  %v3651_v61 = vsel %vm556_vm3, %v3648_v39, %v3650_v14  ;;  %v3660_v33 = vrot.slane %v3622_v24, 4  ;;  %v11905_v30 = vld [vmem:[%s9526_s16 + $0x228] sm:$0xff] }
 0x235   : > { %v3654_v43 = vsel %vm556_vm3, %v3652_v58, %v3653_v38  ;;  %v3656_v9 = vsel %vm556_vm3, %v3653_v38, %v3655_v49  ;;  %v3658_v16 = vsel %vm556_vm3, %v3655_v49, %v3657_v44  ;;  %v3662_v0 = vrot.slane %v3623_v27, 4  ;;  %v11911_v11 = vld [vmem:[%s9526_s16 + $0x268] sm:$0xff] }
 0x236   : > { %v3664_v52 = vrot.slane %v3624_v26, 4  ;;  %v3666_v42 = vrot.slane %v3625_v5, 4  ;;  %v3667_v55 = vrot.slane %v3626_v15, 4  ;;  %v3661_v22 = vsel %vm556_vm3, %v3659_v60, %v3660_v33 }
 0x237   : > { %v3669_v25 = vrot.slane %v3627_v1, 4  ;;  %v3671_v63 = vrot.slane %v3628_v8, 4  ;;  %v3689_v48 = vadd.f32 %v3647_v57, %v11793_v31  ;;  %v3663_v35 = vsel %vm556_vm3, %v3660_v33, %v3662_v0  ;;  %v11898_v1 = vld [vmem:[%s9526_s16 + $0x208] sm:$0xff] }
 0x238   : > { %v3665_v28 = vsel %vm556_vm3, %v3662_v0, %v3664_v52  ;;  %v3668_v18 = vsel %vm556_vm3, %v3666_v42, %v3667_v55  ;;  %v3690_v24 = vadd.f32 %v3649_v34, %v11799_v37  ;;  %v3691_v56 = vadd.f32 %v3651_v61, %v11804_v23 }
 0x239   : > { %v3670_v50 = vsel %vm556_vm3, %v3667_v55, %v3669_v25  ;;  %v3672_v27 = vsel %vm556_vm3, %v3669_v25, %v3671_v63  ;;  %v3692_v26 = vadd.f32 %v3650_v14, %v11807_v20  ;;  %v3693_v31 = vadd.f32 %v3654_v43, %v11810_v17  ;;  %v11918_v14 = vld [vmem:[%s9526_s16 + $0x308] sm:$0xff] }
 0x23a   : > { %v3694_v5 = vadd.f32 %v3656_v9, %v11813_v21  ;;  %v3695_v15 = vadd.f32 %v3658_v16, %v11816_v32  ;;  %v3696_v37 = vadd.f32 %v3657_v44, %v11819_v46  ;;  %v3697_v8 = vadd.f32 %v3661_v22, %v11822_v4  ;;  %v11908_v21 = vld [vmem:[%s9526_s16 + $0x248] sm:$0xff]  ;;  %15808 = vst [vmem:[#allocation18_spill] sm:$0xff] %v11918_v14 }
 0x23b   : > { %v3698_v23 = vadd.f32 %v3663_v35, %v11825_v40  ;;  %v3699_v20 = vadd.f32 %v3665_v28, %v11828_v7  ;;  %v3700_v17 = vadd.f32 %v3664_v52, %v11831_v47  ;;  %v3701_v32 = vadd.f32 %v3668_v18, %v11834_v62  ;;  %v11921_v40 = vld [vmem:[%s9526_s16 + $0x328] sm:$0xff] }
 0x23c   : > { %v3702_v46 = vadd.f32 %v3670_v50, %v11837_v54  ;;  %v3703_v39 = vadd.f32 %v3672_v27, %v11840_v12  ;;  %v3704_v4 = vadd.f32 %v3671_v63, %v11843_v41  ;;  %15809 = vst [vmem:[#allocation16_spill] sm:$0xff] %v11921_v40  ;;  %v11924_v7 = vld [vmem:[%s9526_s16 + $0x348] sm:$0xff]  ;;  %v3725_v58 = vmul.f32 %v11551_v59, %v11747_v19 }
 0x23d   : > { %15810 = vst [vmem:[#allocation2_spill] sm:$0xff] %v11924_v7  ;;  %v11927_v47 = vld [vmem:[%s9526_s16 + $0x368] sm:$0xff]  ;;  %v3726_v62 = vmul.f32 %v11558_v53, %v11747_v19  ;;  %v3727_v54 = vmul.f32 %v11561_v29, %v11747_v19  ;;  %v3728_v12 = vmul.f32 %v11564_v2, %v11747_v19  ;;  %v3729_v41 = vmul.f32 %v11898_v1, %v11747_v19 }
 0x23e   : > { %15811 = vst [vmem:[#allocation15_spill] sm:$0xff] %v11927_v47  ;;  %v3730_v38 = vmul.f32 %v11905_v30, %v11747_v19  ;;  %v3731_v49 = vmul.f32 %v11908_v21, %v11747_v19  ;;  %v3732_v44 = vmul.f32 %v11911_v11, %v11747_v19  ;;  %v3733_v57 = vmul.f32 %v15789_v3, %v11747_v19 }
 0x23f   : > { %v3734_v34 = vmul.f32 %v15790_v6, %v11747_v19  ;;  %v3735_v61 = vmul.f32 %v15791_v51, %v11747_v19  ;;  %v3736_v60 = vmul.f32 %v15793_v45, %v11747_v19  ;;  %v3737_v43 = vmul.f32 %v11918_v14, %v11747_v19 }
 0x240   : > { %v3738_v9 = vmul.f32 %v11921_v40, %v11747_v19  ;;  %v3739_v16 = vmul.f32 %v11924_v7, %v11747_v19  ;;  %v3740_v33 = vmul.f32 %v11927_v47, %v11747_v19  ;;  %v3741_v0 = vadd.f32 %v3725_v58, %v3689_v48 }
 0x241   : > { %v3742_v52 = vadd.f32 %v3726_v62, %v3690_v24  ;;  %v3743_v42 = vadd.f32 %v3727_v54, %v3691_v56  ;;  %v3744_v55 = vadd.f32 %v3728_v12, %v3692_v26  ;;  %v3745_v22 = vadd.f32 %v3729_v41, %v3693_v31 }
 0x242   : > { %v3746_v25 = vadd.f32 %v3730_v38, %v3694_v5  ;;  %v3747_v63 = vadd.f32 %v3731_v49, %v3695_v15  ;;  %v3748_v35 = vadd.f32 %v3732_v44, %v3696_v37  ;;  %v3749_v28 = vadd.f32 %v3733_v57, %v3697_v8 }
 0x243   : > { %v3750_v18 = vadd.f32 %v3734_v34, %v3698_v23  ;;  %v3751_v50 = vadd.f32 %v3735_v61, %v3699_v20  ;;  %v3752_v27 = vadd.f32 %v3736_v60, %v3700_v17  ;;  %v3753_v13 = vadd.f32 %v3737_v43, %v3701_v32  ;;  %v15812_v20 = vld [vmem:[#allocation18_spill] sm:$0xff]  ;;  %v15813_v32 = vld [vmem:[#allocation16_spill] sm:$0xff] }
 0x244   : > { %v3754_v36 = vadd.f32 %v3738_v9, %v3702_v46  ;;  %v3755_v40 = vadd.f32 %v3739_v16, %v3703_v39  ;;  %v3756_v14 = vadd.f32 %v3740_v33, %v3704_v4  ;;  %v3761_v7 = vmul.f32 %v11551_v59, %v11751_v10  ;;  %v15814_v39 = vld [vmem:[#allocation2_spill] sm:$0xff] }
 0x245   : > { %v3762_v19 = vmul.f32 %v11558_v53, %v11751_v10  ;;  %v3763_v48 = vmul.f32 %v11561_v29, %v11751_v10  ;;  %v3764_v24 = vmul.f32 %v11564_v2, %v11751_v10  ;;  %v3765_v56 = vmul.f32 %v11898_v1, %v11751_v10 }
 0x246   : > { %v3766_v26 = vmul.f32 %v11905_v30, %v11751_v10  ;;  %v3767_v31 = vmul.f32 %v11908_v21, %v11751_v10  ;;  %v3768_v5 = vmul.f32 %v11911_v11, %v11751_v10  ;;  %v3769_v15 = vmul.f32 %v15789_v3, %v11751_v10 }
 0x247   : > { %v3770_v37 = vmul.f32 %v15790_v6, %v11751_v10  ;;  %v3771_v8 = vmul.f32 %v15791_v51, %v11751_v10  ;;  %v3772_v23 = vmul.f32 %v15793_v45, %v11751_v10  ;;  %v3773_v17 = vmul.f32 %v15812_v20, %v11751_v10 }
 0x248   : > { %v3774_v46 = vmul.f32 %v15813_v32, %v11751_v10  ;;  %v3775_v4 = vmul.f32 %v15814_v39, %v11751_v10  ;;  %v3776_v58 = vmul.f32 %v11927_v47, %v11751_v10  ;;  %v3793_v62 = vrot.slane %v3761_v7, 1 }
 0x249   : > { %v3794_v54 = vrot.slane %v3762_v19, 1  ;;  %v3796_v12 = vrot.slane %v3763_v48, 1  ;;  %v3798_v41 = vrot.slane %v3764_v24, 1  ;;  %v3800_v38 = vrot.slane %v3765_v56, 1 }
 0x24a   : > { %v3801_v49 = vrot.slane %v3766_v26, 1  ;;  %v3803_v44 = vrot.slane %v3767_v31, 1  ;;  %v3805_v57 = vrot.slane %v3768_v5, 1  ;;  %v3807_v43 = vrot.slane %v3769_v15, 1 }
 0x24b   : > { %v3795_v34 = vsel %vm265_vm0, %v3793_v62, %v3794_v54  ;;  %v3797_v61 = vsel %vm265_vm0, %v3794_v54, %v3796_v12  ;;  %v3799_v60 = vsel %vm265_vm0, %v3796_v12, %v3798_v41  ;;  %v3808_v7 = vrot.slane %v3770_v37, 1 }
 0x24c   : > { %v3802_v9 = vsel %vm265_vm0, %v3800_v38, %v3801_v49  ;;  %v3804_v16 = vsel %vm265_vm0, %v3801_v49, %v3803_v44  ;;  %v3806_v10 = vsel %vm265_vm0, %v3803_v44, %v3805_v57  ;;  %v3810_v33 = vrot.slane %v3771_v8, 1 }
 0x24d   : > { %v3812_v19 = vrot.slane %v3772_v23, 1  ;;  %v3814_v48 = vrot.slane %v3773_v17, 1  ;;  %v3815_v24 = vrot.slane %v3774_v46, 1  ;;  %v3809_v56 = vsel %vm265_vm0, %v3807_v43, %v3808_v7 }
 0x24e   : > { %v3817_v26 = vrot.slane %v3775_v4, 1  ;;  %v3819_v31 = vrot.slane %v3776_v58, 1  ;;  %v3837_v5 = vadd.f32 %v3795_v34, %v3741_v0  ;;  %v3811_v62 = vsel %vm265_vm0, %v3808_v7, %v3810_v33 }
 0x24f   : > { %v3813_v15 = vsel %vm265_vm0, %v3810_v33, %v3812_v19  ;;  %v3816_v54 = vsel %vm265_vm0, %v3814_v48, %v3815_v24  ;;  %v3838_v12 = vadd.f32 %v3797_v61, %v3742_v52  ;;  %v3839_v8 = vadd.f32 %v3799_v60, %v3743_v42  ;;  %v15815_v48 = vld [vmem:[#allocation17_spill] sm:$0xff] }
 0x250   : > { %v3818_v38 = vsel %vm265_vm0, %v3815_v24, %v3817_v26  ;;  %v3820_v37 = vsel %vm265_vm0, %v3817_v26, %v3819_v31  ;;  %v3840_v23 = vadd.f32 %v3798_v41, %v3744_v55  ;;  %v3841_v17 = vadd.f32 %v3802_v9, %v3745_v22 }
 0x251   : > { %v3842_v46 = vadd.f32 %v3804_v16, %v3746_v25  ;;  %v3843_v49 = vadd.f32 %v3806_v10, %v3747_v63  ;;  %v3844_v44 = vadd.f32 %v3805_v57, %v3748_v35  ;;  %v3845_v4 = vadd.f32 %v3809_v56, %v3749_v28 }
 0x252   : > { %v3846_v58 = vadd.f32 %v3811_v62, %v3750_v18  ;;  %v3847_v0 = vadd.f32 %v3813_v15, %v3751_v50  ;;  %v3848_v34 = vadd.f32 %v3812_v19, %v3752_v27  ;;  %v3849_v43 = vadd.f32 %v3816_v54, %v3753_v13  ;;  %v15816_v27 = vld [vmem:[#allocation15_spill] sm:$0xff] }
 0x253   : > { %v3850_v7 = vadd.f32 %v3818_v38, %v3754_v36  ;;  %v3851_v33 = vadd.f32 %v3820_v37, %v3755_v40  ;;  %v3852_v47 = vadd.f32 %v3819_v31, %v3756_v14  ;;  %v3857_v52 = vmul.f32 %v11551_v59, %v15815_v48 }
 0x254   : > { %v3858_v61 = vmul.f32 %v11558_v53, %v15815_v48  ;;  %v3859_v42 = vmul.f32 %v11561_v29, %v15815_v48  ;;  %v3860_v55 = vmul.f32 %v11564_v2, %v15815_v48  ;;  %v3861_v22 = vmul.f32 %v11898_v1, %v15815_v48 }
 0x255   : > { %v3862_v36 = vmul.f32 %v11905_v30, %v15815_v48  ;;  %v3863_v13 = vmul.f32 %v11908_v21, %v15815_v48  ;;  %v3864_v14 = vmul.f32 %v11911_v11, %v15815_v48  ;;  %v3865_v40 = vmul.f32 %v15789_v3, %v15815_v48 }
 0x256   : > { %v3866_v25 = vmul.f32 %v15790_v6, %v15815_v48  ;;  %v3867_v63 = vmul.f32 %v15791_v51, %v15815_v48  ;;  %v3868_v35 = vmul.f32 %v15793_v45, %v15815_v48  ;;  %v3869_v28 = vmul.f32 %v15812_v20, %v15815_v48 }
 0x257   : > { %v3870_v18 = vmul.f32 %v15813_v32, %v15815_v48  ;;  %v3871_v50 = vmul.f32 %v15814_v39, %v15815_v48  ;;  %v3872_v41 = vmul.f32 %v15816_v27, %v15815_v48  ;;  %v3889_v57 = vrot.slane %v3857_v52, 2 }
 0x258   : > { %v3890_v60 = vrot.slane %v3858_v61, 2  ;;  %v3892_v9 = vrot.slane %v3859_v42, 2  ;;  %v3894_v16 = vrot.slane %v3860_v55, 2  ;;  %v3896_v10 = vrot.slane %v3861_v22, 2 }
 0x259   : > { %v3897_v19 = vrot.slane %v3862_v36, 2  ;;  %v3899_v24 = vrot.slane %v3863_v13, 2  ;;  %v3901_v56 = vrot.slane %v3864_v14, 2  ;;  %v3903_v15 = vrot.slane %v3865_v40, 2 }
 0x25a   : > { %v3891_v26 = vsel %vm362_vm1, %v3889_v57, %v3890_v60  ;;  %v3893_v31 = vsel %vm362_vm1, %v3890_v60, %v3892_v9  ;;  %v3895_v62 = vsel %vm362_vm1, %v3892_v9, %v3894_v16  ;;  %v3904_v48 = vrot.slane %v3866_v25, 2 }
 0x25b   : > { %v3898_v54 = vsel %vm362_vm1, %v3896_v10, %v3897_v19  ;;  %v3900_v38 = vsel %vm362_vm1, %v3897_v19, %v3899_v24  ;;  %v3902_v37 = vsel %vm362_vm1, %v3899_v24, %v3901_v56  ;;  %v3906_v52 = vrot.slane %v3867_v63, 2 }
 0x25c   : > { %v3908_v61 = vrot.slane %v3868_v35, 2  ;;  %v3910_v42 = vrot.slane %v3869_v28, 2  ;;  %v3911_v55 = vrot.slane %v3870_v18, 2  ;;  %v3905_v22 = vsel %vm362_vm1, %v3903_v15, %v3904_v48 }
 0x25d   : > { %v3913_v36 = vrot.slane %v3871_v50, 2  ;;  %v3915_v13 = vrot.slane %v3872_v41, 2  ;;  %v3933_v14 = vadd.f32 %v3891_v26, %v3837_v5  ;;  %v3907_v57 = vsel %vm362_vm1, %v3904_v48, %v3906_v52 }
 0x25e   : > { %v3909_v40 = vsel %vm362_vm1, %v3906_v52, %v3908_v61  ;;  %v3912_v60 = vsel %vm362_vm1, %v3910_v42, %v3911_v55  ;;  %v3934_v9 = vadd.f32 %v3893_v31, %v3838_v12  ;;  %v3935_v63 = vadd.f32 %v3895_v62, %v3839_v8  ;;  %v15817_v42 = vld [vmem:[#allocation19_spill] sm:$0xff] }
 0x25f   : > { %v3914_v10 = vsel %vm362_vm1, %v3911_v55, %v3913_v36  ;;  %v3916_v25 = vsel %vm362_vm1, %v3913_v36, %v3915_v13  ;;  %v3936_v35 = vadd.f32 %v3894_v16, %v3840_v23  ;;  %v3937_v28 = vadd.f32 %v3898_v54, %v3841_v17 }
 0x260   : > { %v3938_v18 = vadd.f32 %v3900_v38, %v3842_v46  ;;  %v3939_v19 = vadd.f32 %v3902_v37, %v3843_v49  ;;  %v3940_v24 = vadd.f32 %v3901_v56, %v3844_v44  ;;  %v3941_v50 = vadd.f32 %v3905_v22, %v3845_v4 }
 0x261   : > { %v3942_v41 = vadd.f32 %v3907_v57, %v3846_v58  ;;  %v3943_v5 = vadd.f32 %v3909_v40, %v3847_v0  ;;  %v3944_v26 = vadd.f32 %v3908_v61, %v3848_v34  ;;  %v3945_v15 = vadd.f32 %v3912_v60, %v3849_v43 }
 0x262   : > { %v3946_v48 = vadd.f32 %v3914_v10, %v3850_v7  ;;  %v3947_v52 = vadd.f32 %v3916_v25, %v3851_v33  ;;  %v3948_v27 = vadd.f32 %v3915_v13, %v3852_v47  ;;  %v3953_v12 = vmul.f32 %v11551_v59, %v15817_v42 }
 0x263   : > { %v3954_v31 = vmul.f32 %v11558_v53, %v15817_v42  ;;  %v3955_v8 = vmul.f32 %v11561_v29, %v15817_v42  ;;  %v3956_v23 = vmul.f32 %v11564_v2, %v15817_v42  ;;  %v3957_v17 = vmul.f32 %v11898_v1, %v15817_v42 }
 0x264   : > { %v3958_v46 = vmul.f32 %v11905_v30, %v15817_v42  ;;  %v3959_v47 = vmul.f32 %v11908_v21, %v15817_v42  ;;  %v3960_v59 = vmul.f32 %v11911_v11, %v15817_v42  ;;  %v3961_v53 = vmul.f32 %v15789_v3, %v15817_v42  ;;  %v15818_v3 = vld [vmem:[#allocation15_spill] sm:$0xff] }
 0x265   : > { %v3962_v29 = vmul.f32 %v15790_v6, %v15817_v42  ;;  %v3963_v2 = vmul.f32 %v15791_v51, %v15817_v42  ;;  %v3964_v49 = vmul.f32 %v15793_v45, %v15817_v42  ;;  %v3965_v44 = vmul.f32 %v15812_v20, %v15817_v42 }
 0x266   : > { %v3966_v4 = vmul.f32 %v15813_v32, %v15817_v42  ;;  %v3967_v58 = vmul.f32 %v15814_v39, %v15817_v42  ;;  %v3968_v0 = vmul.f32 %v15818_v3, %v15817_v42  ;;  %v3985_v34 = vrot.slane %v3953_v12, 3 }
 0x267   : > { %v3986_v6 = vrot.slane %v3954_v31, 3  ;;  %v3988_v43 = vrot.slane %v3955_v8, 3  ;;  %v3990_v7 = vrot.slane %v3956_v23, 3  ;;  %v3992_v51 = vrot.slane %v3957_v17, 3 }
 0x268   : > { %v3993_v33 = vrot.slane %v3958_v46, 3  ;;  %v3995_v16 = vrot.slane %v3959_v47, 3  ;;  %v3997_v45 = vrot.slane %v3960_v59, 3  ;;  %v3999_v38 = vrot.slane %v3961_v53, 3 }
 0x269   : > { %v3987_v56 = vsel %vm459_vm2, %v3985_v34, %v3986_v6  ;;  %v3989_v62 = vsel %vm459_vm2, %v3986_v6, %v3988_v43  ;;  %v3991_v54 = vsel %vm459_vm2, %v3988_v43, %v3990_v7  ;;  %v4000_v22 = vrot.slane %v3962_v29, 3  ;;  %v9435_v6 = vld [vmem:[%s9526_s16 + $0x288] sm:$0xff] }
 0x26a   : > { %v3994_v37 = vsel %vm459_vm2, %v3992_v51, %v3993_v33  ;;  %v3996_v61 = vsel %vm459_vm2, %v3993_v33, %v3995_v16  ;;  %v3998_v55 = vsel %vm459_vm2, %v3995_v16, %v3997_v45  ;;  %v4002_v36 = vrot.slane %v3963_v2, 3  ;;  %v9437_v33 = vld [vmem:[%s9526_s16 + $0x2c8] sm:$0xff] }
 0x26b   : > { %v4004_v13 = vrot.slane %v3964_v49, 3  ;;  %v4006_v57 = vrot.slane %v3965_v44, 3  ;;  %v4007_v40 = vrot.slane %v3966_v4, 3  ;;  %v4001_v60 = vsel %vm459_vm2, %v3999_v38, %v4000_v22  ;;  %v15819_v4 = vld [vmem:[#allocation20_spill] sm:$0xff] }
 0x26c   : > { %v4009_v10 = vrot.slane %v3967_v58, 3  ;;  %v4011_v25 = vrot.slane %v3968_v0, 3  ;;  %v12088_v42 = vadd.f32 %v3987_v56, %v3933_v14  ;;  %v4003_v12 = vsel %vm459_vm2, %v4000_v22, %v4002_v36  ;;  %v9434_v58 = vld [vmem:[%s9526_s16 + $0x1e8] sm:$0xff] }
 0x26d   : > { %v4005_v31 = vsel %vm459_vm2, %v4002_v36, %v4004_v13  ;;  %v4008_v8 = vsel %vm459_vm2, %v4006_v57, %v4007_v40  ;;  %v12093_v23 = vadd.f32 %v3989_v62, %v3934_v9  ;;  %v12097_v47 = vadd.f32 %v3991_v54, %v3935_v63 }
 0x26e   : > { %v4010_v17 = vsel %vm459_vm2, %v4007_v40, %v4009_v10  ;;  %v4012_v46 = vsel %vm459_vm2, %v4009_v10, %v4011_v25  ;;  %v12099_v59 = vadd.f32 %v3990_v7, %v3936_v35  ;;  %v12101_v14 = vadd.f32 %v3994_v37, %v3937_v28  ;;  %v9436_v7 = vld [vmem:[%s9526_s16 + $0x2a8] sm:$0xff] }
 0x26f   : > { %v12103_v53 = vadd.f32 %v3996_v61, %v3938_v18  ;;  %v12105_v29 = vadd.f32 %v3998_v55, %v3939_v19  ;;  %v12107_v9 = vadd.f32 %v3997_v45, %v3940_v24  ;;  %v12109_v2 = vadd.f32 %v4001_v60, %v3941_v50  ;;  %v9431_v24 = vld [vmem:[%s9526_s16 + $0x188] sm:$0xff] }
 0x270   : > { %v12111_v49 = vadd.f32 %v4003_v12, %v3942_v41  ;;  %v12113_v44 = vadd.f32 %v4005_v31, %v3943_v5  ;;  %v12115_v63 = vadd.f32 %v4004_v13, %v3944_v26  ;;  %v12117_v35 = vadd.f32 %v4008_v8, %v3945_v15  ;;  %v9432_v41 = vld [vmem:[%s9526_s16 + $0x1a8] sm:$0xff] }
 0x271   : > { %v12119_v28 = vadd.f32 %v4010_v17, %v3946_v48  ;;  %v12121_v18 = vadd.f32 %v4012_v46, %v3947_v52  ;;  %v12123_v19 = vadd.f32 %v4011_v25, %v3948_v27  ;;  %v4049_v50 = vmul.f32 %v9431_v24, %v15819_v4  ;;  %v9433_v26 = vld [vmem:[%s9526_s16 + $0x1c8] sm:$0xff] }
 0x272   : > { %v4050_v5 = vmul.f32 %v9432_v41, %v15819_v4  ;;  %v4051_v15 = vmul.f32 %v9433_v26, %v15819_v4  ;;  %v4052_v48 = vmul.f32 %v9434_v58, %v15819_v4  ;;  %v4053_v52 = vmul.f32 %v11898_v1, %v15819_v4  ;;  %v9438_v45 = vld [vmem:[%s9526_s16 + $0x2e8] sm:$0xff] }
 0x273   : > { %v4054_v27 = vmul.f32 %v11905_v30, %v15819_v4  ;;  %v4055_v0 = vmul.f32 %v11908_v21, %v15819_v4  ;;  %v4056_v34 = vmul.f32 %v11911_v11, %v15819_v4  ;;  %v4057_v43 = vmul.f32 %v9435_v6, %v15819_v4 }
 0x274   : > { %v4058_v51 = vmul.f32 %v9436_v7, %v15819_v4  ;;  %v4059_v16 = vmul.f32 %v9437_v33, %v15819_v4  ;;  %v4060_v56 = vmul.f32 %v9438_v45, %v15819_v4  ;;  %v4061_v62 = vmul.f32 %v15812_v20, %v15819_v4  ;;  %v12178_v45 = vld [vmem:[%s9526_s16 + $0x288] sm:$0xff] }
 0x275   : > { %v4062_v54 = vmul.f32 %v15813_v32, %v15819_v4  ;;  %v4063_v38 = vmul.f32 %v15814_v39, %v15819_v4  ;;  %v4064_v37 = vmul.f32 %v15818_v3, %v15819_v4  ;;  %v4081_v61 = vrot.slane %v4049_v50, 4 }
 0x276   : > { %v4082_v55 = vrot.slane %v4050_v5, 4  ;;  %v4084_v22 = vrot.slane %v4051_v15, 4  ;;  %v4086_v36 = vrot.slane %v4052_v48, 4  ;;  %v4088_v13 = vrot.slane %v4053_v52, 4 }
 0x277   : > { %v4089_v57 = vrot.slane %v4054_v27, 4  ;;  %v4091_v40 = vrot.slane %v4055_v0, 4  ;;  %v4093_v60 = vrot.slane %v4056_v34, 4  ;;  %v4095_v31 = vrot.slane %v4057_v43, 4 }
 0x278   : > { %v4083_v10 = vsel %vm556_vm3, %v4081_v61, %v4082_v55  ;;  %v4085_v25 = vsel %vm556_vm3, %v4082_v55, %v4084_v22  ;;  %v4087_v12 = vsel %vm556_vm3, %v4084_v22, %v4086_v36  ;;  %v4096_v24 = vrot.slane %v4058_v51, 4  ;;  %v15821_v61 = vld [vmem:[#allocation14_spill] sm:$0xff] }
 0x279   : > { %v4090_v8 = vsel %vm556_vm3, %v4088_v13, %v4089_v57  ;;  %v4092_v17 = vsel %vm556_vm3, %v4089_v57, %v4091_v40  ;;  %v4094_v46 = vsel %vm556_vm3, %v4091_v40, %v4093_v60  ;;  %v4098_v4 = vrot.slane %v4059_v16, 4 }
 0x27a   : > { %v4100_v50 = vrot.slane %v4060_v56, 4  ;;  %v4102_v41 = vrot.slane %v4061_v62, 4  ;;  %v4103_v5 = vrot.slane %v4062_v54, 4  ;;  %v4097_v26 = vsel %vm556_vm3, %v4095_v31, %v4096_v24  ;;  %v12185_v62 = vld [vmem:[%s9526_s16 + $0x2a8] sm:$0xff] }
 0x27b   : > { %v4105_v15 = vrot.slane %v4063_v38, 4  ;;  %v4107_v58 = vrot.slane %v4064_v37, 4  ;;  %v4125_v48 = vadd.f32 %v4083_v10, %v12088_v42  ;;  %v4099_v52 = vsel %vm556_vm3, %v4096_v24, %v4098_v4  ;;  %v12191_v54 = vld [vmem:[%s9526_s16 + $0x2e8] sm:$0xff] }
 0x27c   : > { %v4101_v27 = vsel %vm556_vm3, %v4098_v4, %v4100_v50  ;;  %v4104_v0 = vsel %vm556_vm3, %v4102_v41, %v4103_v5  ;;  %v4126_v34 = vadd.f32 %v4085_v25, %v12093_v23  ;;  %v4127_v7 = vadd.f32 %v4087_v12, %v12097_v47  ;;  %v12198_v37 = vld [vmem:[%s9526_s16 + $0x388] sm:$0xff] }
 0x27d   : > { %v4106_v6 = vsel %vm556_vm3, %v4103_v5, %v4105_v15  ;;  %v4108_v43 = vsel %vm556_vm3, %v4105_v15, %v4107_v58  ;;  %v4128_v51 = vadd.f32 %v4086_v36, %v12099_v59  ;;  %v4129_v42 = vadd.f32 %v4090_v8, %v12101_v14 }
 0x27e   : > { %v4130_v33 = vadd.f32 %v4092_v17, %v12103_v53  ;;  %v4131_v16 = vadd.f32 %v4094_v46, %v12105_v29  ;;  %v4132_v23 = vadd.f32 %v4093_v60, %v12107_v9  ;;  %v4133_v56 = vadd.f32 %v4097_v26, %v12109_v2  ;;  %v12188_v53 = vld [vmem:[%s9526_s16 + $0x2c8] sm:$0xff] }
 0x27f   : > { %v4134_v47 = vadd.f32 %v4099_v52, %v12111_v49  ;;  %v4135_v59 = vadd.f32 %v4101_v27, %v12113_v44  ;;  %v4136_v14 = vadd.f32 %v4100_v50, %v12115_v63  ;;  %v4137_v29 = vadd.f32 %v4104_v0, %v12117_v35  ;;  %v12201_v49 = vld [vmem:[%s9526_s16 + $0x3a8] sm:$0xff] }
 0x280   : > { %v4138_v9 = vadd.f32 %v4106_v6, %v12119_v28  ;;  %v4139_v38 = vadd.f32 %v4108_v43, %v12121_v18  ;;  %v4140_v2 = vadd.f32 %v4107_v58, %v12123_v19  ;;  %v12204_v44 = vld [vmem:[%s9526_s16 + $0x3c8] sm:$0xff]  ;;  %v4161_v55 = vmul.f32 %v11898_v1, %v15821_v61 }
 0x281   : > { %v12207_v63 = vld [vmem:[%s9526_s16 + $0x3e8] sm:$0xff]  ;;  %v4162_v35 = vmul.f32 %v11905_v30, %v15821_v61  ;;  %v4163_v28 = vmul.f32 %v11908_v21, %v15821_v61  ;;  %v4164_v18 = vmul.f32 %v11911_v11, %v15821_v61  ;;  %v4165_v19 = vmul.f32 %v12178_v45, %v15821_v61 }
 0x282   : > { %15820 = vst [vmem:[#allocation10_spill] sm:$0xff] %v12207_v63  ;;  %v4166_v22 = vmul.f32 %v12185_v62, %v15821_v61  ;;  %v4167_v36 = vmul.f32 %v12188_v53, %v15821_v61  ;;  %v4168_v13 = vmul.f32 %v12191_v54, %v15821_v61  ;;  %v4169_v57 = vmul.f32 %v15812_v20, %v15821_v61  ;;  %v12252_v50 = vld [vmem:[%s15437_s1 + $0x68] ss:$0 sm:$0xff] }
 0x283   : > { %v4170_v40 = vmul.f32 %v15813_v32, %v15821_v61  ;;  %v4171_v60 = vmul.f32 %v15814_v39, %v15821_v61  ;;  %v4172_v10 = vmul.f32 %v15818_v3, %v15821_v61  ;;  %v4173_v25 = vmul.f32 %v12198_v37, %v15821_v61  ;;  %15822 = vst [vmem:[#allocation9_spill] sm:$0xff] %v12252_v50 }
 0x284   : > { %v4174_v12 = vmul.f32 %v12201_v49, %v15821_v61  ;;  %v4175_v31 = vmul.f32 %v12204_v44, %v15821_v61  ;;  %v4176_v8 = vmul.f32 %v12207_v63, %v15821_v61  ;;  %v12241_v17 = vadd.f32 %v4161_v55, %v4125_v48 }
 0x285   : > { %v12243_v46 = vadd.f32 %v4162_v35, %v4126_v34  ;;  %v12245_v24 = vadd.f32 %v4163_v28, %v4127_v7  ;;  %v12247_v4 = vadd.f32 %v4164_v18, %v4128_v51  ;;  %v12254_v41 = vadd.f32 %v4165_v19, %v4129_v42  ;;  %v15823_v7 = vld [vmem:[#allocation8_spill] sm:$0xff]  ;;  %v15824_v51 = vld [vmem:[#allocation13_spill] sm:$0xff] }
 0x286   : > { %v12256_v5 = vadd.f32 %v4166_v22, %v4130_v33  ;;  %v12258_v26 = vadd.f32 %v4167_v36, %v4131_v16  ;;  %v12260_v15 = vadd.f32 %v4168_v13, %v4132_v23  ;;  %v12262_v58 = vadd.f32 %v4169_v57, %v4133_v56  ;;  %v15825_v33 = vld [vmem:[#allocation11_spill] sm:$0xff]  ;;  %v15826_v23 = vld [vmem:[#allocation12_spill] sm:$0xff] }
 0x287   : > { %v12264_v48 = vadd.f32 %v4170_v40, %v4134_v47  ;;  %v12266_v52 = vadd.f32 %v4171_v60, %v4135_v59  ;;  %v12268_v27 = vadd.f32 %v4172_v10, %v4136_v14  ;;  %v12270_v0 = vadd.f32 %v4173_v25, %v4137_v29 }
 0x288   : > { %v12272_v34 = vadd.f32 %v4174_v12, %v4138_v9  ;;  %v12274_v6 = vadd.f32 %v4175_v31, %v4139_v38  ;;  %v12276_v43 = vadd.f32 %v4176_v8, %v4140_v2  ;;  %v4196_v42 = vrot.slane %v15824_v51, %v15823_v7 }
 0x289   : > { %v12282_v16 = vrot.slane %v15824_v51, %v15825_v33  ;;  %v12286_v56 = vrot.slane %v15824_v51, %v15826_v23  ;;  %v12290_v47 = vmul.f32 %v12252_v50, %v11898_v1  ;;  %v12294_v59 = vmul.f32 %v12252_v50, %v11905_v30 }
 0x28a   : > { %v12298_v14 = vmul.f32 %v12252_v50, %v11908_v21  ;;  %v12302_v29 = vmul.f32 %v12252_v50, %v11911_v11  ;;  %v12306_v9 = vmul.f32 %v12252_v50, %v12178_v45  ;;  %v4197_v38 = vmul.f32 %v11898_v1, %v4196_v42 }
 0x28b   : > { %15827 = vst [vmem:[#allocation18_spill] sm:$0xff] %v12286_v56  ;;  %15828 = vst [vmem:[#allocation16_spill] sm:$0xff] %v12290_v47  ;;  %v4198_v2 = vmul.f32 %v11905_v30, %v4196_v42  ;;  %v4199_v61 = vmul.f32 %v11908_v21, %v4196_v42  ;;  %v4200_v55 = vmul.f32 %v11911_v11, %v4196_v42 }
 0x28c   : > { %15829 = vst [vmem:[#allocation2_spill] sm:$0xff] %v12294_v59  ;;  %15830 = vst [vmem:[#allocation17_spill] sm:$0xff] %v12298_v14  ;;  %v4201_v35 = vmul.f32 %v12178_v45, %v4196_v42  ;;  %v4202_v28 = vmul.f32 %v12185_v62, %v4196_v42  ;;  %v4203_v18 = vmul.f32 %v12188_v53, %v4196_v42  ;;  %v4229_v12 = vrot.slane %v4197_v38, 1 }
 0x28d   : > { %15831 = vst [vmem:[#allocation19_spill] sm:$0xff] %v12302_v29  ;;  %15832 = vst [vmem:[#allocation15_spill] sm:$0xff] %v12306_v9  ;;  %v4204_v19 = vmul.f32 %v12191_v54, %v4196_v42  ;;  %v4205_v22 = vmul.f32 %v15812_v20, %v4196_v42  ;;  %v4206_v36 = vmul.f32 %v15813_v32, %v4196_v42  ;;  %v4230_v31 = vrot.slane %v4198_v2, 1 }
 0x28e   : > { %v4207_v13 = vmul.f32 %v15814_v39, %v4196_v42  ;;  %v4208_v57 = vmul.f32 %v15818_v3, %v4196_v42  ;;  %v4209_v40 = vmul.f32 %v12198_v37, %v4196_v42  ;;  %v4210_v60 = vmul.f32 %v12201_v49, %v4196_v42 }
 0x28f   : > { %v4211_v10 = vmul.f32 %v12204_v44, %v4196_v42  ;;  %v4212_v25 = vmul.f32 %v12207_v63, %v4196_v42  ;;  %v4232_v8 = vrot.slane %v4199_v61, 1  ;;  %v4234_v51 = vrot.slane %v4200_v55, 1 }
 0x290   : > { %v4236_v23 = vrot.slane %v4201_v35, 1  ;;  %v4237_v33 = vrot.slane %v4202_v28, 1  ;;  %v4239_v7 = vrot.slane %v4203_v18, 1  ;;  %v4241_v9 = vrot.slane %v4204_v19, 1 }
 0x291   : > { %v4231_v29 = vsel %vm265_vm0, %v4229_v12, %v4230_v31  ;;  %v4233_v14 = vsel %vm265_vm0, %v4230_v31, %v4232_v8  ;;  %v4235_v59 = vsel %vm265_vm0, %v4232_v8, %v4234_v51  ;;  %v4243_v47 = vrot.slane %v4205_v22, 1 }
 0x292   : > { %v4238_v50 = vsel %vm265_vm0, %v4236_v23, %v4237_v33  ;;  %v4240_v56 = vsel %vm265_vm0, %v4237_v33, %v4239_v7  ;;  %v4242_v42 = vsel %vm265_vm0, %v4239_v7, %v4241_v9  ;;  %v4244_v38 = vrot.slane %v4206_v36, 1 }
 0x293   : > { %v4246_v2 = vrot.slane %v4207_v13, 1  ;;  %v4248_v61 = vrot.slane %v4208_v57, 1  ;;  %v4250_v55 = vrot.slane %v4209_v40, 1  ;;  %v4251_v35 = vrot.slane %v4210_v60, 1 }
 0x294   : > { %v4245_v28 = vsel %vm265_vm0, %v4243_v47, %v4244_v38  ;;  %v4253_v18 = vrot.slane %v4211_v10, 1  ;;  %v4255_v19 = vrot.slane %v4212_v25, 1  ;;  %v4273_v12 = vadd.f32 %v4231_v29, %v12241_v17 }
 0x295   : > { %v4247_v31 = vsel %vm265_vm0, %v4244_v38, %v4246_v2  ;;  %v4249_v22 = vsel %vm265_vm0, %v4246_v2, %v4248_v61  ;;  %v4252_v23 = vsel %vm265_vm0, %v4250_v55, %v4251_v35  ;;  %v4274_v33 = vadd.f32 %v4233_v14, %v12243_v46 }
 0x296   : > { %v4254_v7 = vsel %vm265_vm0, %v4251_v35, %v4253_v18  ;;  %v4256_v36 = vsel %vm265_vm0, %v4253_v18, %v4255_v19  ;;  %v4275_v13 = vadd.f32 %v4235_v59, %v12245_v24  ;;  %v4276_v47 = vadd.f32 %v4234_v51, %v12247_v4 }
 0x297   : > { %v4277_v57 = vadd.f32 %v4238_v50, %v12254_v41  ;;  %v4278_v17 = vadd.f32 %v4240_v56, %v12256_v5  ;;  %v4279_v29 = vadd.f32 %v4242_v42, %v12258_v26  ;;  %v4280_v40 = vadd.f32 %v4241_v9, %v12260_v15 }
 0x298   : > { %v4281_v60 = vadd.f32 %v4245_v28, %v12262_v58  ;;  %v4282_v46 = vadd.f32 %v4247_v31, %v12264_v48  ;;  %v4283_v14 = vadd.f32 %v4249_v22, %v12266_v52  ;;  %v4284_v10 = vadd.f32 %v4248_v61, %v12268_v27 }
 0x299   : > { %v4285_v24 = vadd.f32 %v4252_v23, %v12270_v0  ;;  %v4286_v4 = vadd.f32 %v4254_v7, %v12272_v34  ;;  %v4287_v50 = vadd.f32 %v4256_v36, %v12274_v6  ;;  %v4288_v41 = vadd.f32 %v4255_v19, %v12276_v43 }
 0x29a   : > { %v4293_v5 = vmul.f32 %v11898_v1, %v12282_v16  ;;  %v4294_v26 = vmul.f32 %v11905_v30, %v12282_v16  ;;  %v4295_v15 = vmul.f32 %v11908_v21, %v12282_v16  ;;  %v4296_v58 = vmul.f32 %v11911_v11, %v12282_v16 }
 0x29b   : > { %v4297_v48 = vmul.f32 %v12178_v45, %v12282_v16  ;;  %v4298_v52 = vmul.f32 %v12185_v62, %v12282_v16  ;;  %v4299_v27 = vmul.f32 %v12188_v53, %v12282_v16  ;;  %v4300_v0 = vmul.f32 %v12191_v54, %v12282_v16 }
 0x29c   : > { %v4301_v34 = vmul.f32 %v15812_v20, %v12282_v16  ;;  %v4302_v6 = vmul.f32 %v15813_v32, %v12282_v16  ;;  %v4303_v43 = vmul.f32 %v15814_v39, %v12282_v16  ;;  %v4304_v56 = vmul.f32 %v15818_v3, %v12282_v16 }
 0x29d   : > { %v4305_v59 = vmul.f32 %v12198_v37, %v12282_v16  ;;  %v4306_v9 = vmul.f32 %v12201_v49, %v12282_v16  ;;  %v4307_v25 = vmul.f32 %v12204_v44, %v12282_v16  ;;  %v4308_v8 = vmul.f32 %v12207_v63, %v12282_v16 }
 0x29e   : > { %v4325_v51 = vrot.slane %v4293_v5, 2  ;;  %v4326_v42 = vrot.slane %v4294_v26, 2  ;;  %v4328_v38 = vrot.slane %v4295_v15, 2  ;;  %v4330_v2 = vrot.slane %v4296_v58, 2 }
 0x29f   : > { %v4332_v61 = vrot.slane %v4297_v48, 2  ;;  %v4333_v55 = vrot.slane %v4298_v52, 2  ;;  %v4335_v35 = vrot.slane %v4299_v27, 2  ;;  %v4337_v28 = vrot.slane %v4300_v0, 2 }
 0x2a0   : > { %v4327_v18 = vsel %vm362_vm1, %v4325_v51, %v4326_v42  ;;  %v4329_v19 = vsel %vm362_vm1, %v4326_v42, %v4328_v38  ;;  %v4331_v31 = vsel %vm362_vm1, %v4328_v38, %v4330_v2  ;;  %v4339_v22 = vrot.slane %v4301_v34, 2 }
 0x2a1   : > { %v4334_v23 = vsel %vm362_vm1, %v4332_v61, %v4333_v55  ;;  %v4336_v7 = vsel %vm362_vm1, %v4333_v55, %v4335_v35  ;;  %v4338_v16 = vsel %vm362_vm1, %v4335_v35, %v4337_v28  ;;  %v4340_v36 = vrot.slane %v4302_v6, 2 }
 0x2a2   : > { %v4342_v5 = vrot.slane %v4303_v43, 2  ;;  %v4344_v26 = vrot.slane %v4304_v56, 2  ;;  %v4346_v15 = vrot.slane %v4305_v59, 2  ;;  %v4347_v58 = vrot.slane %v4306_v9, 2 }
 0x2a3   : > { %v4341_v48 = vsel %vm362_vm1, %v4339_v22, %v4340_v36  ;;  %v4349_v52 = vrot.slane %v4307_v25, 2  ;;  %v4351_v27 = vrot.slane %v4308_v8, 2  ;;  %v4369_v0 = vadd.f32 %v4327_v18, %v4273_v12 }
 0x2a4   : > { %v4343_v51 = vsel %vm362_vm1, %v4340_v36, %v4342_v5  ;;  %v4345_v34 = vsel %vm362_vm1, %v4342_v5, %v4344_v26  ;;  %v4348_v42 = vsel %vm362_vm1, %v4346_v15, %v4347_v58  ;;  %v4370_v38 = vadd.f32 %v4329_v19, %v4274_v33  ;;  %v15833_v15 = vld [vmem:[#allocation18_spill] sm:$0xff] }
 0x2a5   : > { %v4350_v61 = vsel %vm362_vm1, %v4347_v58, %v4349_v52  ;;  %v4352_v6 = vsel %vm362_vm1, %v4349_v52, %v4351_v27  ;;  %v4371_v43 = vadd.f32 %v4331_v31, %v4275_v13  ;;  %v4372_v56 = vadd.f32 %v4330_v2, %v4276_v47 }
 0x2a6   : > { %v4373_v59 = vadd.f32 %v4334_v23, %v4277_v57  ;;  %v4374_v9 = vadd.f32 %v4336_v7, %v4278_v17  ;;  %v4375_v55 = vadd.f32 %v4338_v16, %v4279_v29  ;;  %v4376_v35 = vadd.f32 %v4337_v28, %v4280_v40 }
 0x2a7   : > { %v4377_v25 = vadd.f32 %v4341_v48, %v4281_v60  ;;  %v4378_v8 = vadd.f32 %v4343_v51, %v4282_v46  ;;  %v4379_v12 = vadd.f32 %v4345_v34, %v4283_v14  ;;  %v4380_v18 = vadd.f32 %v4344_v26, %v4284_v10  ;;  %v15834_v14 = vld [vmem:[#allocation10_spill] sm:$0xff] }
 0x2a8   : > { %v4381_v22 = vadd.f32 %v4348_v42, %v4285_v24  ;;  %v4382_v36 = vadd.f32 %v4350_v61, %v4286_v4  ;;  %v4383_v5 = vadd.f32 %v4352_v6, %v4287_v50  ;;  %v4384_v63 = vadd.f32 %v4351_v27, %v4288_v41 }
 0x2a9   : > { %v4389_v33 = vmul.f32 %v11898_v1, %v15833_v15  ;;  %v4390_v19 = vmul.f32 %v11905_v30, %v15833_v15  ;;  %v4391_v13 = vmul.f32 %v11908_v21, %v15833_v15  ;;  %v4392_v47 = vmul.f32 %v11911_v11, %v15833_v15 }
 0x2aa   : > { %v4393_v57 = vmul.f32 %v12178_v45, %v15833_v15  ;;  %v4394_v17 = vmul.f32 %v12185_v62, %v15833_v15  ;;  %v4395_v29 = vmul.f32 %v12188_v53, %v15833_v15  ;;  %v4396_v1 = vmul.f32 %v12191_v54, %v15833_v15 }
 0x2ab   : > { %v4397_v30 = vmul.f32 %v15812_v20, %v15833_v15  ;;  %v4398_v21 = vmul.f32 %v15813_v32, %v15833_v15  ;;  %v4399_v11 = vmul.f32 %v15814_v39, %v15833_v15  ;;  %v4400_v45 = vmul.f32 %v15818_v3, %v15833_v15 }
 0x2ac   : > { %v4401_v40 = vmul.f32 %v12198_v37, %v15833_v15  ;;  %v4402_v60 = vmul.f32 %v12201_v49, %v15833_v15  ;;  %v4403_v46 = vmul.f32 %v12204_v44, %v15833_v15  ;;  %v4404_v10 = vmul.f32 %v15834_v14, %v15833_v15 }
 0x2ad   : > { %v4421_v24 = vrot.slane %v4389_v33, 3  ;;  %v4422_v4 = vrot.slane %v4390_v19, 3  ;;  %v4424_v50 = vrot.slane %v4391_v13, 3  ;;  %v4426_v41 = vrot.slane %v4392_v47, 3 }
 0x2ae   : > { %v4428_v2 = vrot.slane %v4393_v57, 3  ;;  %v4429_v28 = vrot.slane %v4394_v17, 3  ;;  %v4431_v31 = vrot.slane %v4395_v29, 3  ;;  %v4433_v23 = vrot.slane %v4396_v1, 3 }
 0x2af   : > { %v4423_v7 = vsel %vm459_vm2, %v4421_v24, %v4422_v4  ;;  %v4425_v16 = vsel %vm459_vm2, %v4422_v4, %v4424_v50  ;;  %v4427_v26 = vsel %vm459_vm2, %v4424_v50, %v4426_v41  ;;  %v4435_v58 = vrot.slane %v4397_v30, 3 }
 0x2b0   : > { %v4430_v48 = vsel %vm459_vm2, %v4428_v2, %v4429_v28  ;;  %v4432_v52 = vsel %vm459_vm2, %v4429_v28, %v4431_v31  ;;  %v4434_v27 = vsel %vm459_vm2, %v4431_v31, %v4433_v23  ;;  %v4436_v51 = vrot.slane %v4398_v21, 3 }
 0x2b1   : > { %v4438_v34 = vrot.slane %v4399_v11, 3  ;;  %v4440_v42 = vrot.slane %v4400_v45, 3  ;;  %v4442_v61 = vrot.slane %v4401_v40, 3  ;;  %v4443_v6 = vrot.slane %v4402_v60, 3 }
 0x2b2   : > { %v4437_v15 = vsel %vm459_vm2, %v4435_v58, %v4436_v51  ;;  %v4445_v33 = vrot.slane %v4403_v46, 3  ;;  %v4447_v19 = vrot.slane %v4404_v10, 3  ;;  %v4465_v13 = vadd.f32 %v4423_v7, %v4369_v0 }
 0x2b3   : > { %v4439_v47 = vsel %vm459_vm2, %v4436_v51, %v4438_v34  ;;  %v4441_v57 = vsel %vm459_vm2, %v4438_v34, %v4440_v42  ;;  %v4444_v17 = vsel %vm459_vm2, %v4442_v61, %v4443_v6  ;;  %v4466_v29 = vadd.f32 %v4425_v16, %v4370_v38  ;;  %v15835_v38 = vld [vmem:[#allocation9_spill] sm:$0xff] }
 0x2b4   : > { %v4446_v1 = vsel %vm459_vm2, %v4443_v6, %v4445_v33  ;;  %v4448_v30 = vsel %vm459_vm2, %v4445_v33, %v4447_v19  ;;  %v4467_v21 = vadd.f32 %v4427_v26, %v4371_v43  ;;  %v4468_v11 = vadd.f32 %v4426_v41, %v4372_v56 }
 0x2b5   : > { %v4469_v45 = vadd.f32 %v4430_v48, %v4373_v59  ;;  %v4470_v40 = vadd.f32 %v4432_v52, %v4374_v9  ;;  %v4471_v60 = vadd.f32 %v4434_v27, %v4375_v55  ;;  %v4472_v24 = vadd.f32 %v4433_v23, %v4376_v35  ;;  %v15836_v55 = vld [vmem:[#allocation16_spill] sm:$0xff]  ;;  %v15837_v35 = vld [vmem:[#allocation2_spill] sm:$0xff] }
 0x2b6   : > { %v4473_v46 = vadd.f32 %v4437_v15, %v4377_v25  ;;  %v4474_v10 = vadd.f32 %v4439_v47, %v4378_v8  ;;  %v4475_v0 = vadd.f32 %v4441_v57, %v4379_v12  ;;  %v4476_v4 = vadd.f32 %v4440_v42, %v4380_v18  ;;  %v15839_v12 = vld [vmem:[#allocation19_spill] sm:$0xff] }
 0x2b7   : > { %v4477_v50 = vadd.f32 %v4444_v17, %v4381_v22  ;;  %v4478_v2 = vadd.f32 %v4446_v1, %v4382_v36  ;;  %v4479_v28 = vadd.f32 %v4448_v30, %v4383_v5  ;;  %v4480_v31 = vadd.f32 %v4447_v19, %v4384_v63  ;;  %v15840_v18 = vld [vmem:[#allocation15_spill] sm:$0xff] }
 0x2b8   : > { %v4490_v7 = vmul.f32 %v15835_v38, %v12185_v62  ;;  %v4491_v16 = vmul.f32 %v15835_v38, %v12188_v53  ;;  %v4492_v43 = vmul.f32 %v15835_v38, %v12191_v54  ;;  %v4493_v56 = vmul.f32 %v15835_v38, %v15812_v20 }
 0x2b9   : > { %v4494_v59 = vmul.f32 %v15835_v38, %v15813_v32  ;;  %v4495_v9 = vmul.f32 %v15835_v38, %v15814_v39  ;;  %v4496_v63 = vmul.f32 %v15835_v38, %v15818_v3  ;;  %v4497_v62 = vmul.f32 %v15835_v38, %v12198_v37  ;;  %v15838_v39 = vld [vmem:[#allocation17_spill] sm:$0xff] }
 0x2ba   : > { %v4498_v53 = vmul.f32 %v15835_v38, %v12201_v49  ;;  %v4499_v54 = vmul.f32 %v15835_v38, %v12204_v44  ;;  %v4500_v20 = vmul.f32 %v15835_v38, %v15834_v14  ;;  %v4517_v32 = vrot.slane %v15836_v55, 4 }
 0x2bb   : > { %v4518_v25 = vrot.slane %v15837_v35, 4  ;;  %v4520_v8 = vrot.slane %v15838_v39, 4  ;;  %v4522_v3 = vrot.slane %v15839_v12, 4  ;;  %v4524_v22 = vrot.slane %v15840_v18, 4  ;;  %v12541_v39 = vld [vmem:[%s9526_s16 + $0x110] sm:$0xff] }
 0x2bc   : > { %v4525_v37 = vrot.slane %v4490_v7, 4  ;;  %v4527_v36 = vrot.slane %v4491_v16, 4  ;;  %v4529_v5 = vrot.slane %v4492_v43, 4  ;;  %v4531_v49 = vrot.slane %v4493_v56, 4 }
 0x2bd   : > { %v4519_v41 = vsel %vm556_vm3, %v4517_v32, %v4518_v25  ;;  %v4521_v44 = vsel %vm556_vm3, %v4518_v25, %v4520_v8  ;;  %v4523_v14 = vsel %vm556_vm3, %v4520_v8, %v4522_v3  ;;  %v4532_v23 = vrot.slane %v4494_v59, 4  ;;  %v15847_v32 = vld [vmem:[#allocation7_spill] sm:$0xff]  ;;  %v12538_v25 = vld [vmem:[%s9526_s16 + $0xf0] sm:$0xff] }
 0x2be   : > { %v4526_v26 = vsel %vm556_vm3, %v4524_v22, %v4525_v37  ;;  %v4528_v58 = vsel %vm556_vm3, %v4525_v37, %v4527_v36  ;;  %v4530_v48 = vsel %vm556_vm3, %v4527_v36, %v4529_v5  ;;  %v4534_v52 = vrot.slane %v4495_v9, 4  ;;  %v12518_v9 = vld [vmem:[%s9526_s16 + $0xd0] sm:$0xff] }
 0x2bf   : > { %v4533_v27 = vsel %vm556_vm3, %v4531_v49, %v4532_v23  ;;  %v4536_v51 = vrot.slane %v4496_v63, 4  ;;  %v4538_v34 = vrot.slane %v4497_v62, 4  ;;  %v4539_v42 = vrot.slane %v4498_v53, 4  ;;  %v15843_v63 = vld [vmem:[#allocation4_spill] sm:$0xff]  ;;  %v15844_v53 = vld [vmem:[#allocation5_spill] sm:$0xff] }
 0x2c0   : > { %v4535_v61 = vsel %vm556_vm3, %v4532_v23, %v4534_v52  ;;  %v4541_v6 = vrot.slane %v4499_v54, 4  ;;  %v4543_v15 = vrot.slane %v4500_v20, 4  ;;  %v4561_v33 = vadd.f32 %v4519_v41, %v4465_v13  ;;  %v15845_v20 = vld [vmem:[#allocation6_spill] sm:$0xff]  ;;  %v12544_v8 = vld [vmem:[%s9526_s16 + $0x130] sm:$0xff] }
 0x2c1   : > { %v4537_v19 = vsel %vm556_vm3, %v4534_v52, %v4536_v51  ;;  %v4540_v47 = vsel %vm556_vm3, %v4538_v34, %v4539_v42  ;;  %v4562_v57 = vadd.f32 %v4521_v44, %v4466_v29  ;;  %v4563_v17 = vadd.f32 %v4523_v14, %v4467_v21  ;;  %v12485_v29 = vld [vmem:[%s15437_s1 + $0x10] sm:$0xff] }
 0x2c2   : > { %v4542_v1 = vsel %vm556_vm3, %v4539_v42, %v4541_v6  ;;  %v4544_v30 = vsel %vm556_vm3, %v4541_v6, %v4543_v15  ;;  %v4564_v38 = vadd.f32 %v4522_v3, %v4468_v11  ;;  %v4565_v7 = vadd.f32 %v4526_v26, %v4469_v45  ;;  %4577 = vst [vmem:[%s11008_s30 + $0x8] sm:$0xff] %v4561_v33  ;;  %v12557_v37 = vld [vmem:[%s9526_s16 + $0x150] sm:$0xff] }
 0x2c3   : > { %v4566_v16 = vadd.f32 %v4528_v58, %v4470_v40  ;;  %v4567_v43 = vadd.f32 %v4530_v48, %v4471_v60  ;;  %v4568_v13 = vadd.f32 %v4529_v5, %v4472_v24  ;;  %v4569_v56 = vadd.f32 %v4533_v27, %v4473_v46  ;;  %4578 = vst [vmem:[%s11008_s30 + $0x28] sm:$0xff] %v4562_v57  ;;  %v12490_v60 = vld [vmem:[%s9526_s16 + $0x10] sm:$0xff] }
 0x2c4   : > { %4579 = vst [vmem:[%s11008_s30 + $0x48] sm:$0xff] %v4563_v17  ;;  %15841 = vst [vmem:[#allocation20_spill] sm:$0xff] %v12485_v29  ;;  %v4570_v21 = vadd.f32 %v4535_v61, %v4474_v10  ;;  %v4571_v11 = vadd.f32 %v4537_v19, %v4475_v0  ;;  %v4572_v45 = vadd.f32 %v4536_v51, %v4476_v4  ;;  %v12497_v10 = vld [vmem:[%s9526_s16 + $0x30] sm:$0xff] }
 0x2c5   : > { %v4573_v40 = vadd.f32 %v4540_v47, %v4477_v50  ;;  %4580 = vst [vmem:[%s11008_s30 + $0x68] sm:$0xf] %v4564_v38  ;;  %4581 = vst [vmem:[%s11008_s30 + $0x88] sm:$0xff] %v4565_v7  ;;  %v4574_v24 = vadd.f32 %v4542_v1, %v4478_v2  ;;  %v4575_v46 = vadd.f32 %v4544_v30, %v4479_v28  ;;  %v12500_v0 = vld [vmem:[%s9526_s16 + $0x50] sm:$0xff]  ;;  %v15842_v50 = vld [vmem:[#allocation3_spill] sm:$0xff] }
 0x2c6   : > { %v4576_v59 = vadd.f32 %v4543_v15, %v4480_v31  ;;  %4582 = vst [vmem:[%s11008_s30 + $0xa8] sm:$0xff] %v4566_v16  ;;  %4583 = vst [vmem:[%s11008_s30 + $0xc8] sm:$0xff] %v4567_v43  ;;  %v12503_v4 = vld [vmem:[%s9526_s16 + $0x70] sm:$0xff]  ;;  %v4616_v2 = vrot.slane %v12485_v29, %v15842_v50  ;;  %v4652_v62 = vrot.slane %v12485_v29, %v15843_v63 }
 0x2c7   : > { %4584 = vst [vmem:[%s11008_s30 + $0xe8] sm:$0xf] %v4568_v13  ;;  %4585 = vst [vmem:[%s11008_s30 + $0x108] sm:$0xff] %v4569_v56  ;;  %v12512_v28 = vld [vmem:[%s9526_s16 + $0x90] sm:$0xff]  ;;  %v12524_v54 = vrot.slane %v12485_v29, %v15844_v53  ;;  %v12528_v55 = vrot.slane %v12485_v29, %v15845_v20  ;;  %v12532_v35 = vrot.slane %v12485_v29, %v15847_v32 }
 0x2c8   : > { %4586 = vst [vmem:[%s11008_s30 + $0x128] sm:$0xff] %v4570_v21  ;;  %4587 = vst [vmem:[%s11008_s30 + $0x148] sm:$0xff] %v4571_v11  ;;  %v12515_v31 = vld [vmem:[%s9526_s16 + $0xb0] sm:$0xff]  ;;  %v4617_v12 = vmul.f32 %v4616_v2, %v12490_v60  ;;  %v12548_v3 = vmul.f32 %v4616_v2, %v12497_v10  ;;  %v12551_v18 = vmul.f32 %v4616_v2, %v12500_v0 }
 0x2c9   : > { %4588 = vst [vmem:[%s11008_s30 + $0x168] sm:$0xf] %v4572_v45  ;;  %4589 = vst [vmem:[%s11008_s30 + $0x188] sm:$0xff] %v4573_v40  ;;  %v12554_v22 = vmul.f32 %v4616_v2, %v12503_v4  ;;  %v12560_v36 = vld [vmem:[%s9526_s16 + $0x170] sm:$0xff]  ;;  %v12566_v49 = vmul.f32 %v4616_v2, %v12512_v28  ;;  %v12569_v41 = vmul.f32 %v4616_v2, %v12515_v31 }
 0x2ca   : > { %15846 = vst [vmem:[#allocation14_spill] sm:$0xff] %v12528_v55  ;;  %15848 = vst [vmem:[#allocation13_spill] sm:$0xff] %v12532_v35  ;;  %v12563_v5 = vld [vmem:[%s9526_s16 + $0x190] sm:$0xff]  ;;  %v12572_v44 = vmul.f32 %v4616_v2, %v12518_v9  ;;  %v12575_v14 = vmul.f32 %v4616_v2, %v12538_v25  ;;  %v4625_v48 = vmul.f32 %v4616_v2, %v12541_v39 }
 0x2cb   : > { %4590 = vst [vmem:[%s11008_s30 + $0x1a8] sm:$0xff] %v4574_v24  ;;  %4591 = vst [vmem:[%s11008_s30 + $0x1c8] sm:$0xff] %v4575_v46  ;;  %v12578_v23 = vld [vmem:[%s9526_s16 + $0x1b0] sm:$0xff]  ;;  %v4626_v52 = vmul.f32 %v4616_v2, %v12544_v8  ;;  %v4627_v27 = vmul.f32 %v4616_v2, %v12557_v37  ;;  %v4628_v51 = vmul.f32 %v4616_v2, %v12560_v36 }
 0x2cc   : > { %4592 = vst [vmem:[%s11008_s30 + $0x1e8] sm:$0xf] %v4576_v59  ;;  %v12581_v26 = vld [vmem:[%s9526_s16 + $0x1d0] sm:$0xff]  ;;  %v4629_v34 = vmul.f32 %v4616_v2, %v12563_v5  ;;  %v4630_v42 = vmul.f32 %v4616_v2, %v12578_v23  ;;  %v4653_v15 = vmul.f32 %v4652_v62, %v12490_v60  ;;  %v4654_v33 = vmul.f32 %v4652_v62, %v12497_v10 }
 0x2cd   : > { %v12584_v58 = vld [vmem:[%s9526_s16 + $0x1f0] sm:$0xff]  ;;  %v4631_v61 = vmul.f32 %v4616_v2, %v12581_v26  ;;  %v4655_v19 = vmul.f32 %v4652_v62, %v12500_v0  ;;  %v4656_v47 = vmul.f32 %v4652_v62, %v12503_v4  ;;  %v4657_v57 = vmul.f32 %v4652_v62, %v12512_v28 }
 0x2ce   : > { %15849 = vst [vmem:[#allocation18_spill] sm:$0xff] %v12584_v58  ;;  %v4632_v6 = vmul.f32 %v4616_v2, %v12584_v58  ;;  %v4658_v17 = vmul.f32 %v4652_v62, %v12515_v31  ;;  %v4659_v1 = vmul.f32 %v4652_v62, %v12518_v9  ;;  %v4660_v30 = vmul.f32 %v4652_v62, %v12538_v25 }
 0x2cf   : > { %v4661_v38 = vmul.f32 %v4652_v62, %v12541_v39  ;;  %v4662_v7 = vmul.f32 %v4652_v62, %v12544_v8  ;;  %v4663_v16 = vmul.f32 %v4652_v62, %v12557_v37  ;;  %v4664_v43 = vmul.f32 %v4652_v62, %v12560_v36 }
 0x2d0   : > { %v4665_v13 = vmul.f32 %v4652_v62, %v12563_v5  ;;  %v4666_v56 = vmul.f32 %v4652_v62, %v12578_v23  ;;  %v4667_v21 = vmul.f32 %v4652_v62, %v12581_v26  ;;  %v4668_v11 = vmul.f32 %v4652_v62, %v12584_v58 }
 0x2d1   : > { %v4685_v45 = vrot.slane %v4653_v15, 1  ;;  %v4686_v40 = vrot.slane %v4654_v33, 1  ;;  %v4688_v24 = vrot.slane %v4655_v19, 1  ;;  %v4690_v46 = vrot.slane %v4656_v47, 1 }
 0x2d2   : > { %v4692_v59 = vrot.slane %v4657_v57, 1  ;;  %v4693_v2 = vrot.slane %v4658_v17, 1  ;;  %v4695_v32 = vrot.slane %v4659_v1, 1  ;;  %v4697_v20 = vrot.slane %v4660_v30, 1 }
 0x2d3   : > { %v4687_v53 = vsel %vm265_vm0, %v4685_v45, %v4686_v40  ;;  %v4689_v63 = vsel %vm265_vm0, %v4686_v40, %v4688_v24  ;;  %v4691_v50 = vsel %vm265_vm0, %v4688_v24, %v4690_v46  ;;  %v4699_v29 = vrot.slane %v4661_v38, 1 }
 0x2d4   : > { %v4694_v35 = vsel %vm265_vm0, %v4692_v59, %v4693_v2  ;;  %v4696_v55 = vsel %vm265_vm0, %v4693_v2, %v4695_v32  ;;  %v4698_v62 = vsel %vm265_vm0, %v4695_v32, %v4697_v20  ;;  %v4700_v15 = vrot.slane %v4662_v7, 1 }
 0x2d5   : > { %v4702_v33 = vrot.slane %v4663_v16, 1  ;;  %v4704_v19 = vrot.slane %v4664_v43, 1  ;;  %v4706_v47 = vrot.slane %v4665_v13, 1  ;;  %v4707_v57 = vrot.slane %v4666_v56, 1 }
 0x2d6   : > { %v4701_v17 = vsel %vm265_vm0, %v4699_v29, %v4700_v15  ;;  %v4709_v1 = vrot.slane %v4667_v21, 1  ;;  %v4711_v30 = vrot.slane %v4668_v11, 1  ;;  %v4729_v45 = vadd.f32 %v4687_v53, %v4617_v12 }
 0x2d7   : > { %v4703_v40 = vsel %vm265_vm0, %v4700_v15, %v4702_v33  ;;  %v4705_v38 = vsel %vm265_vm0, %v4702_v33, %v4704_v19  ;;  %v4708_v24 = vsel %vm265_vm0, %v4706_v47, %v4707_v57  ;;  %v4730_v59 = vadd.f32 %v4689_v63, %v12548_v3 }
 0x2d8   : > { %v4710_v32 = vsel %vm265_vm0, %v4707_v57, %v4709_v1  ;;  %v4712_v7 = vsel %vm265_vm0, %v4709_v1, %v4711_v30  ;;  %v4731_v16 = vadd.f32 %v4691_v50, %v12551_v18  ;;  %v4732_v43 = vadd.f32 %v4690_v46, %v12554_v22 }
 0x2d9   : > { %v4733_v29 = vadd.f32 %v4694_v35, %v12566_v49  ;;  %v4734_v53 = vadd.f32 %v4696_v55, %v12569_v41  ;;  %v4735_v12 = vadd.f32 %v4698_v62, %v12572_v44  ;;  %v4736_v13 = vadd.f32 %v4697_v20, %v12575_v14 }
 0x2da   : > { %v4737_v56 = vadd.f32 %v4701_v17, %v4625_v48  ;;  %v4738_v21 = vadd.f32 %v4703_v40, %v4626_v52  ;;  %v4739_v11 = vadd.f32 %v4705_v38, %v4627_v27  ;;  %v4740_v63 = vadd.f32 %v4704_v19, %v4628_v51 }
 0x2db   : > { %v4741_v3 = vadd.f32 %v4708_v24, %v4629_v34  ;;  %v4742_v2 = vadd.f32 %v4710_v32, %v4630_v42  ;;  %v4743_v15 = vadd.f32 %v4712_v7, %v4631_v61  ;;  %v4744_v33 = vadd.f32 %v4711_v30, %v4632_v6 }
 0x2dc   : > { %v4749_v50 = vmul.f32 %v12524_v54, %v12490_v60  ;;  %v4750_v35 = vmul.f32 %v12524_v54, %v12497_v10  ;;  %v4751_v55 = vmul.f32 %v12524_v54, %v12500_v0  ;;  %v4752_v20 = vmul.f32 %v12524_v54, %v12503_v4 }
 0x2dd   : > { %v4753_v18 = vmul.f32 %v12524_v54, %v12512_v28  ;;  %v4754_v22 = vmul.f32 %v12524_v54, %v12515_v31  ;;  %v4755_v49 = vmul.f32 %v12524_v54, %v12518_v9  ;;  %v4756_v41 = vmul.f32 %v12524_v54, %v12538_v25 }
 0x2de   : > { %v4757_v44 = vmul.f32 %v12524_v54, %v12541_v39  ;;  %v4758_v14 = vmul.f32 %v12524_v54, %v12544_v8  ;;  %v4759_v48 = vmul.f32 %v12524_v54, %v12557_v37  ;;  %v4760_v52 = vmul.f32 %v12524_v54, %v12560_v36 }
 0x2df   : > { %v4761_v27 = vmul.f32 %v12524_v54, %v12563_v5  ;;  %v4762_v51 = vmul.f32 %v12524_v54, %v12578_v23  ;;  %v4763_v34 = vmul.f32 %v12524_v54, %v12581_v26  ;;  %v4764_v42 = vmul.f32 %v12524_v54, %v12584_v58 }
 0x2e0   : > { %v4781_v61 = vrot.slane %v4749_v50, 2  ;;  %v4782_v6 = vrot.slane %v4750_v35, 2  ;;  %v4784_v46 = vrot.slane %v4751_v55, 2  ;;  %v4786_v62 = vrot.slane %v4752_v20, 2 }
 0x2e1   : > { %v4788_v19 = vrot.slane %v4753_v18, 2  ;;  %v4789_v47 = vrot.slane %v4754_v22, 2  ;;  %v4791_v57 = vrot.slane %v4755_v49, 2  ;;  %v4793_v17 = vrot.slane %v4756_v41, 2 }
 0x2e2   : > { %v4783_v1 = vsel %vm362_vm1, %v4781_v61, %v4782_v6  ;;  %v4785_v30 = vsel %vm362_vm1, %v4782_v6, %v4784_v46  ;;  %v4787_v40 = vsel %vm362_vm1, %v4784_v46, %v4786_v62  ;;  %v4795_v38 = vrot.slane %v4757_v44, 2 }
 0x2e3   : > { %v4790_v24 = vsel %vm362_vm1, %v4788_v19, %v4789_v47  ;;  %v4792_v32 = vsel %vm362_vm1, %v4789_v47, %v4791_v57  ;;  %v4794_v54 = vsel %vm362_vm1, %v4791_v57, %v4793_v17  ;;  %v4796_v7 = vrot.slane %v4758_v14, 2 }
 0x2e4   : > { %v4798_v50 = vrot.slane %v4759_v48, 2  ;;  %v4800_v35 = vrot.slane %v4760_v52, 2  ;;  %v4802_v55 = vrot.slane %v4761_v27, 2  ;;  %v4803_v20 = vrot.slane %v4762_v51, 2 }
 0x2e5   : > { %v4797_v18 = vsel %vm362_vm1, %v4795_v38, %v4796_v7  ;;  %v4805_v22 = vrot.slane %v4763_v34, 2  ;;  %v4807_v49 = vrot.slane %v4764_v42, 2  ;;  %v4825_v41 = vadd.f32 %v4783_v1, %v4729_v45 }
 0x2e6   : > { %v4799_v61 = vsel %vm362_vm1, %v4796_v7, %v4798_v50  ;;  %v4801_v44 = vsel %vm362_vm1, %v4798_v50, %v4800_v35  ;;  %v4804_v6 = vsel %vm362_vm1, %v4802_v55, %v4803_v20  ;;  %v4826_v46 = vadd.f32 %v4785_v30, %v4730_v59  ;;  %v15850_v59 = vld [vmem:[#allocation14_spill] sm:$0xff] }
 0x2e7   : > { %v4806_v19 = vsel %vm362_vm1, %v4803_v20, %v4805_v22  ;;  %v4808_v14 = vsel %vm362_vm1, %v4805_v22, %v4807_v49  ;;  %v4827_v48 = vadd.f32 %v4787_v40, %v4731_v16  ;;  %v4828_v52 = vadd.f32 %v4786_v62, %v4732_v43 }
 0x2e8   : > { %v4829_v27 = vadd.f32 %v4790_v24, %v4733_v29  ;;  %v4830_v51 = vadd.f32 %v4792_v32, %v4734_v53  ;;  %v4831_v47 = vadd.f32 %v4794_v54, %v4735_v12  ;;  %v4832_v57 = vadd.f32 %v4793_v17, %v4736_v13 }
 0x2e9   : > { %v4833_v34 = vadd.f32 %v4797_v18, %v4737_v56  ;;  %v4834_v42 = vadd.f32 %v4799_v61, %v4738_v21  ;;  %v4835_v45 = vadd.f32 %v4801_v44, %v4739_v11  ;;  %v4836_v1 = vadd.f32 %v4800_v35, %v4740_v63 }
 0x2ea   : > { %v4837_v38 = vadd.f32 %v4804_v6, %v4741_v3  ;;  %v4838_v7 = vadd.f32 %v4806_v19, %v4742_v2  ;;  %v4839_v50 = vadd.f32 %v4808_v14, %v4743_v15  ;;  %v4840_v58 = vadd.f32 %v4807_v49, %v4744_v33  ;;  %v15851_v33 = vld [vmem:[#allocation18_spill] sm:$0xff] }
 0x2eb   : > { %v4845_v30 = vmul.f32 %v15850_v59, %v12490_v60  ;;  %v4846_v55 = vmul.f32 %v15850_v59, %v12497_v10  ;;  %v4847_v16 = vmul.f32 %v15850_v59, %v12500_v0  ;;  %v4848_v43 = vmul.f32 %v15850_v59, %v12503_v4 }
 0x2ec   : > { %v4849_v29 = vmul.f32 %v15850_v59, %v12512_v28  ;;  %v4850_v53 = vmul.f32 %v15850_v59, %v12515_v31  ;;  %v4851_v12 = vmul.f32 %v15850_v59, %v12518_v9  ;;  %v4852_v13 = vmul.f32 %v15850_v59, %v12538_v25 }
 0x2ed   : > { %v4853_v56 = vmul.f32 %v15850_v59, %v12541_v39  ;;  %v4854_v21 = vmul.f32 %v15850_v59, %v12544_v8  ;;  %v4855_v11 = vmul.f32 %v15850_v59, %v12557_v37  ;;  %v4856_v63 = vmul.f32 %v15850_v59, %v12560_v36 }
 0x2ee   : > { %v4857_v3 = vmul.f32 %v15850_v59, %v12563_v5  ;;  %v4858_v2 = vmul.f32 %v15850_v59, %v12578_v23  ;;  %v4859_v15 = vmul.f32 %v15850_v59, %v12581_v26  ;;  %v4860_v62 = vmul.f32 %v15850_v59, %v15851_v33 }
 0x2ef   : > { %v4877_v17 = vrot.slane %v4845_v30, 3  ;;  %v4878_v40 = vrot.slane %v4846_v55, 3  ;;  %v4880_v24 = vrot.slane %v4847_v16, 3  ;;  %v4882_v32 = vrot.slane %v4848_v43, 3 }
 0x2f0   : > { %v4884_v54 = vrot.slane %v4849_v29, 3  ;;  %v4885_v35 = vrot.slane %v4850_v53, 3  ;;  %v4887_v20 = vrot.slane %v4851_v12, 3  ;;  %v4889_v18 = vrot.slane %v4852_v13, 3 }
 0x2f1   : > { %v4879_v22 = vsel %vm459_vm2, %v4877_v17, %v4878_v40  ;;  %v4881_v49 = vsel %vm459_vm2, %v4878_v40, %v4880_v24  ;;  %v4883_v61 = vsel %vm459_vm2, %v4880_v24, %v4882_v32  ;;  %v4891_v44 = vrot.slane %v4853_v56, 3 }
 0x2f2   : > { %v4886_v6 = vsel %vm459_vm2, %v4884_v54, %v4885_v35  ;;  %v4888_v19 = vsel %vm459_vm2, %v4885_v35, %v4887_v20  ;;  %v4890_v14 = vsel %vm459_vm2, %v4887_v20, %v4889_v18  ;;  %v4892_v59 = vrot.slane %v4854_v21, 3 }
 0x2f3   : > { %v4894_v30 = vrot.slane %v4855_v11, 3  ;;  %v4896_v55 = vrot.slane %v4856_v63, 3  ;;  %v4898_v16 = vrot.slane %v4857_v3, 3  ;;  %v4899_v43 = vrot.slane %v4858_v2, 3 }
 0x2f4   : > { %v4893_v29 = vsel %vm459_vm2, %v4891_v44, %v4892_v59  ;;  %v4901_v53 = vrot.slane %v4859_v15, 3  ;;  %v4903_v12 = vrot.slane %v4860_v62, 3  ;;  %v4921_v13 = vadd.f32 %v4879_v22, %v4825_v41 }
 0x2f5   : > { %v4895_v17 = vsel %vm459_vm2, %v4892_v59, %v4894_v30  ;;  %v4897_v56 = vsel %vm459_vm2, %v4894_v30, %v4896_v55  ;;  %v4900_v40 = vsel %vm459_vm2, %v4898_v16, %v4899_v43  ;;  %v4922_v24 = vadd.f32 %v4881_v49, %v4826_v46  ;;  %v15852_v46 = vld [vmem:[#allocation13_spill] sm:$0xff] }
 0x2f6   : > { %v4902_v54 = vsel %vm459_vm2, %v4899_v43, %v4901_v53  ;;  %v4904_v21 = vsel %vm459_vm2, %v4901_v53, %v4903_v12  ;;  %v4923_v11 = vadd.f32 %v4883_v61, %v4827_v48  ;;  %v4924_v63 = vadd.f32 %v4882_v32, %v4828_v52 }
 0x2f7   : > { %v4925_v3 = vadd.f32 %v4886_v6, %v4829_v27  ;;  %v4926_v2 = vadd.f32 %v4888_v19, %v4830_v51  ;;  %v4927_v35 = vadd.f32 %v4890_v14, %v4831_v47  ;;  %v4928_v20 = vadd.f32 %v4889_v18, %v4832_v57 }
 0x2f8   : > { %v4929_v15 = vadd.f32 %v4893_v29, %v4833_v34  ;;  %v4930_v62 = vadd.f32 %v4895_v17, %v4834_v42  ;;  %v4931_v41 = vadd.f32 %v4897_v56, %v4835_v45  ;;  %v4932_v22 = vadd.f32 %v4896_v55, %v4836_v1  ;;  %v15853_v45 = vld [vmem:[#allocation18_spill] sm:$0xff] }
 0x2f9   : > { %v4933_v44 = vadd.f32 %v4900_v40, %v4837_v38  ;;  %v4934_v59 = vadd.f32 %v4902_v54, %v4838_v7  ;;  %v4935_v30 = vadd.f32 %v4904_v21, %v4839_v50  ;;  %v4936_v33 = vadd.f32 %v4903_v12, %v4840_v58 }
 0x2fa   : > { %v4941_v49 = vmul.f32 %v15852_v46, %v12490_v60  ;;  %v4942_v16 = vmul.f32 %v15852_v46, %v12497_v10  ;;  %v4943_v48 = vmul.f32 %v15852_v46, %v12500_v0  ;;  %v4944_v52 = vmul.f32 %v15852_v46, %v12503_v4 }
 0x2fb   : > { %v4945_v27 = vmul.f32 %v15852_v46, %v12512_v28  ;;  %v4946_v51 = vmul.f32 %v15852_v46, %v12515_v31  ;;  %v4947_v58 = vmul.f32 %v15852_v46, %v12518_v9  ;;  %v4948_v60 = vmul.f32 %v15852_v46, %v12538_v25 }
 0x2fc   : > { %v4949_v10 = vmul.f32 %v15852_v46, %v12541_v39  ;;  %v4950_v0 = vmul.f32 %v15852_v46, %v12544_v8  ;;  %v4951_v4 = vmul.f32 %v15852_v46, %v12557_v37  ;;  %v4952_v47 = vmul.f32 %v15852_v46, %v12560_v36 }
 0x2fd   : > { %v4953_v57 = vmul.f32 %v15852_v46, %v12563_v5  ;;  %v4954_v34 = vmul.f32 %v15852_v46, %v12578_v23  ;;  %v4955_v42 = vmul.f32 %v15852_v46, %v12581_v26  ;;  %v4956_v1 = vmul.f32 %v15852_v46, %v15853_v45 }
 0x2fe   : > { %v4973_v38 = vrot.slane %v4941_v49, 4  ;;  %v4974_v7 = vrot.slane %v4942_v16, 4  ;;  %v4976_v50 = vrot.slane %v4943_v48, 4  ;;  %v4978_v32 = vrot.slane %v4944_v52, 4 }
 0x2ff   : > { %v4980_v18 = vrot.slane %v4945_v27, 4  ;;  %v4981_v61 = vrot.slane %v4946_v51, 4  ;;  %v4983_v6 = vrot.slane %v4947_v58, 4  ;;  %v4985_v19 = vrot.slane %v4948_v60, 4 }
 0x300   : > { %v4975_v14 = vsel %vm556_vm3, %v4973_v38, %v4974_v7  ;;  %v4977_v55 = vsel %vm556_vm3, %v4974_v7, %v4976_v50  ;;  %v4979_v43 = vsel %vm556_vm3, %v4976_v50, %v4978_v32  ;;  %v4987_v29 = vrot.slane %v4949_v10, 4 }
 0x301   : > { %v4982_v53 = vsel %vm556_vm3, %v4980_v18, %v4981_v61  ;;  %v4984_v12 = vsel %vm556_vm3, %v4981_v61, %v4983_v6  ;;  %v4986_v17 = vsel %vm556_vm3, %v4983_v6, %v4985_v19  ;;  %v4988_v56 = vrot.slane %v4950_v0, 4  ;;  %v15855_v61 = vld [vmem:[#allocation8_spill] sm:$0xff] }
 0x302   : > { %v4990_v40 = vrot.slane %v4951_v4, 4  ;;  %v4992_v54 = vrot.slane %v4952_v47, 4  ;;  %v4994_v21 = vrot.slane %v4953_v57, 4  ;;  %v4995_v46 = vrot.slane %v4954_v34, 4  ;;  %v12764_v57 = vld [vmem:[%s15437_s1 + $0x30] sm:$0xff] }
 0x303   : > { %v4989_v49 = vsel %vm556_vm3, %v4987_v29, %v4988_v56  ;;  %v4997_v16 = vrot.slane %v4955_v42, 4  ;;  %v4999_v48 = vrot.slane %v4956_v1, 4  ;;  %v5017_v52 = vadd.f32 %v4975_v14, %v4921_v13  ;;  %15854 = vst [vmem:[#allocation10_spill] sm:$0xff] %v12764_v57  ;;  %v15856_v6 = vld [vmem:[#allocation20_spill] sm:$0xff] }
 0x304   : > { %v4991_v27 = vsel %vm556_vm3, %v4988_v56, %v4990_v40  ;;  %v4993_v51 = vsel %vm556_vm3, %v4990_v40, %v4992_v54  ;;  %v4996_v58 = vsel %vm556_vm3, %v4994_v21, %v4995_v46  ;;  %v5018_v60 = vadd.f32 %v4977_v55, %v4922_v24  ;;  %v15857_v55 = vld [vmem:[#allocation11_spill] sm:$0xff]  ;;  %v12798_v29 = vld [vmem:[%s9526_s16 + $0x230] sm:$0xff] }
 0x305   : > { %v4998_v10 = vsel %vm556_vm3, %v4995_v46, %v4997_v16  ;;  %v5000_v0 = vsel %vm556_vm3, %v4997_v16, %v4999_v48  ;;  %v5019_v4 = vadd.f32 %v4979_v43, %v4923_v11  ;;  %v5020_v47 = vadd.f32 %v4978_v32, %v4924_v63  ;;  %15871 = vst [vmem:[#allocation13_spill] sm:$0xff] %v12798_v29 }
 0x306   : > { %v5021_v34 = vadd.f32 %v4982_v53, %v4925_v3  ;;  %v5022_v13 = vadd.f32 %v4984_v12, %v4926_v2  ;;  %v5023_v42 = vadd.f32 %v4986_v17, %v4927_v35  ;;  %v5024_v1 = vadd.f32 %v4985_v19, %v4928_v20  ;;  %v15858_v2 = vld [vmem:[#allocation12_spill] sm:$0xff]  ;;  %v15860_v20 = vld [vmem:[#allocation3_spill] sm:$0xff] }
 0x307   : > { %v5025_v38 = vadd.f32 %v4989_v49, %v4929_v15  ;;  %v5026_v7 = vadd.f32 %v4991_v27, %v4930_v62  ;;  %v5027_v24 = vadd.f32 %v4993_v51, %v4931_v41  ;;  %v5028_v50 = vadd.f32 %v4992_v54, %v4932_v22  ;;  %v12779_v62 = vld [vmem:[%s9526_s16 + $0x210] sm:$0xff]  ;;  %v15869_v19 = vld [vmem:[#allocation7_spill] sm:$0xff] }
 0x308   : > { %v5029_v18 = vadd.f32 %v4996_v58, %v4933_v44  ;;  %v5030_v11 = vadd.f32 %v4998_v10, %v4934_v59  ;;  %v5031_v63 = vadd.f32 %v5000_v0, %v4935_v30  ;;  %v5032_v32 = vadd.f32 %v4999_v48, %v4936_v33  ;;  %15862 = vst [vmem:[#allocation2_spill] sm:$0xff] %v12779_v62  ;;  %v15863_v41 = vld [vmem:[#allocation4_spill] sm:$0xff]  ;;  %v15865_v33 = vld [vmem:[#allocation5_spill] sm:$0xff]  ;;  %v15867_v59 = vld [vmem:[#allocation6_spill] sm:$0xff] }
 0x309   : > { %v5052_v14 = vrot.slane %v15856_v6, %v15855_v61  ;;  %v5088_v3 = vrot.slane %v15856_v6, %v15857_v55  ;;  %v12772_v35 = vrot.slane %v15856_v6, %v15858_v2  ;;  %v12776_v15 = vrot.slane %v12764_v57, %v15860_v20  ;;  %v12801_v53 = vld [vmem:[%s9526_s16 + $0x250] sm:$0xff] }
 0x30a   : > { %v12783_v22 = vrot.slane %v12764_v57, %v15863_v41  ;;  %v12787_v44 = vrot.slane %v12764_v57, %v15865_v33  ;;  %v12791_v30 = vrot.slane %v12764_v57, %v15867_v59  ;;  %v12795_v43 = vrot.slane %v12764_v57, %v15869_v19  ;;  %15872 = vst [vmem:[#allocation18_spill] sm:$0xff] %v12801_v53  ;;  %v12804_v12 = vld [vmem:[%s9526_s16 + $0x270] sm:$0xff] }
 0x30b   : > { %15859 = vst [vmem:[#allocation9_spill] sm:$0xff] %v12772_v35  ;;  %15861 = vst [vmem:[#allocation16_spill] sm:$0xff] %v12776_v15  ;;  %v5053_v17 = vmul.f32 %v5052_v14, %v12512_v28  ;;  %v5054_v56 = vmul.f32 %v5052_v14, %v12515_v31  ;;  %v5055_v40 = vmul.f32 %v5052_v14, %v12518_v9 }
 0x30c   : > { %15864 = vst [vmem:[#allocation17_spill] sm:$0xff] %v12783_v22  ;;  %15866 = vst [vmem:[#allocation19_spill] sm:$0xff] %v12787_v44  ;;  %v5056_v54 = vmul.f32 %v5052_v14, %v12538_v25  ;;  %v5057_v21 = vmul.f32 %v5052_v14, %v12541_v39  ;;  %v5058_v46 = vmul.f32 %v5052_v14, %v12544_v8 }
 0x30d   : > { %15868 = vst [vmem:[#allocation15_spill] sm:$0xff] %v12791_v30  ;;  %15870 = vst [vmem:[#allocation14_spill] sm:$0xff] %v12795_v43  ;;  %v5059_v49 = vmul.f32 %v5052_v14, %v12557_v37  ;;  %v5060_v16 = vmul.f32 %v5052_v14, %v12560_v36  ;;  %v5061_v48 = vmul.f32 %v5052_v14, %v12563_v5 }
 0x30e   : > { %15873 = vst [vmem:[#allocation20_spill] sm:$0xff] %v12804_v12  ;;  %v5062_v27 = vmul.f32 %v5052_v14, %v12578_v23  ;;  %v5063_v51 = vmul.f32 %v5052_v14, %v12581_v26  ;;  %v5064_v58 = vmul.f32 %v5052_v14, %v15853_v45  ;;  %v5065_v10 = vmul.f32 %v12779_v62, %v5052_v14 }
 0x30f   : > { %v5066_v0 = vmul.f32 %v12798_v29, %v5052_v14  ;;  %v5067_v6 = vmul.f32 %v12801_v53, %v5052_v14  ;;  %v5068_v19 = vmul.f32 %v12804_v12, %v5052_v14  ;;  %v5069_v59 = vadd.f32 %v5053_v17, %v5017_v52 }
 0x310   : > { %v5070_v33 = vadd.f32 %v5054_v56, %v5018_v60  ;;  %v5071_v41 = vadd.f32 %v5055_v40, %v5019_v4  ;;  %v5072_v20 = vadd.f32 %v5056_v54, %v5020_v47  ;;  %v5073_v2 = vadd.f32 %v5057_v21, %v5021_v34 }
 0x311   : > { %v5074_v55 = vadd.f32 %v5058_v46, %v5022_v13  ;;  %v5075_v57 = vadd.f32 %v5059_v49, %v5023_v42  ;;  %v5076_v61 = vadd.f32 %v5060_v16, %v5024_v1  ;;  %v5077_v43 = vadd.f32 %v5061_v48, %v5025_v38 }
 0x312   : > { %v5078_v30 = vadd.f32 %v5062_v27, %v5026_v7  ;;  %v5079_v44 = vadd.f32 %v5063_v51, %v5027_v24  ;;  %v5080_v22 = vadd.f32 %v5064_v58, %v5028_v50  ;;  %v5081_v15 = vadd.f32 %v5065_v10, %v5029_v18  ;;  %v15874_v24 = vld [vmem:[#allocation2_spill] sm:$0xff]  ;;  %v15875_v18 = vld [vmem:[#allocation13_spill] sm:$0xff] }
 0x313   : > { %v5082_v35 = vadd.f32 %v5066_v0, %v5030_v11  ;;  %v5083_v62 = vadd.f32 %v5067_v6, %v5031_v63  ;;  %v5084_v29 = vadd.f32 %v5068_v19, %v5032_v32  ;;  %v5089_v53 = vmul.f32 %v5088_v3, %v12512_v28  ;;  %v15876_v63 = vld [vmem:[#allocation18_spill] sm:$0xff] }
 0x314   : > { %v5090_v14 = vmul.f32 %v5088_v3, %v12515_v31  ;;  %v5091_v52 = vmul.f32 %v5088_v3, %v12518_v9  ;;  %v5092_v60 = vmul.f32 %v5088_v3, %v12538_v25  ;;  %v5093_v4 = vmul.f32 %v5088_v3, %v12541_v39 }
 0x315   : > { %v5094_v47 = vmul.f32 %v5088_v3, %v12544_v8  ;;  %v5095_v34 = vmul.f32 %v5088_v3, %v12557_v37  ;;  %v5096_v13 = vmul.f32 %v5088_v3, %v12560_v36  ;;  %v5097_v42 = vmul.f32 %v5088_v3, %v12563_v5 }
 0x316   : > { %v5098_v1 = vmul.f32 %v5088_v3, %v12578_v23  ;;  %v5099_v38 = vmul.f32 %v5088_v3, %v12581_v26  ;;  %v5100_v7 = vmul.f32 %v5088_v3, %v15853_v45  ;;  %v5101_v50 = vmul.f32 %v15874_v24, %v5088_v3 }
 0x317   : > { %v5102_v11 = vmul.f32 %v15875_v18, %v5088_v3  ;;  %v5103_v32 = vmul.f32 %v15876_v63, %v5088_v3  ;;  %v5104_v19 = vmul.f32 %v12804_v12, %v5088_v3  ;;  %v5121_v17 = vrot.slane %v5089_v53, 1 }
 0x318   : > { %v5122_v56 = vrot.slane %v5090_v14, 1  ;;  %v5124_v40 = vrot.slane %v5091_v52, 1  ;;  %v5126_v54 = vrot.slane %v5092_v60, 1  ;;  %v5128_v21 = vrot.slane %v5093_v4, 1 }
 0x319   : > { %v5129_v46 = vrot.slane %v5094_v47, 1  ;;  %v5131_v49 = vrot.slane %v5095_v34, 1  ;;  %v5133_v16 = vrot.slane %v5096_v13, 1  ;;  %v5135_v58 = vrot.slane %v5097_v42, 1 }
 0x31a   : > { %v5123_v48 = vsel %vm265_vm0, %v5121_v17, %v5122_v56  ;;  %v5125_v27 = vsel %vm265_vm0, %v5122_v56, %v5124_v40  ;;  %v5127_v51 = vsel %vm265_vm0, %v5124_v40, %v5126_v54  ;;  %v5136_v53 = vrot.slane %v5098_v1, 1 }
 0x31b   : > { %v5130_v10 = vsel %vm265_vm0, %v5128_v21, %v5129_v46  ;;  %v5132_v0 = vsel %vm265_vm0, %v5129_v46, %v5131_v49  ;;  %v5134_v3 = vsel %vm265_vm0, %v5131_v49, %v5133_v16  ;;  %v5138_v6 = vrot.slane %v5099_v38, 1 }
 0x31c   : > { %v5140_v14 = vrot.slane %v5100_v7, 1  ;;  %v5142_v52 = vrot.slane %v5101_v50, 1  ;;  %v5143_v60 = vrot.slane %v5102_v11, 1  ;;  %v5137_v4 = vsel %vm265_vm0, %v5135_v58, %v5136_v53 }
 0x31d   : > { %v5145_v47 = vrot.slane %v5103_v32, 1  ;;  %v5147_v34 = vrot.slane %v5104_v19, 1  ;;  %v5165_v13 = vadd.f32 %v5123_v48, %v5069_v59  ;;  %v5139_v17 = vsel %vm265_vm0, %v5136_v53, %v5138_v6 }
 0x31e   : > { %v5141_v42 = vsel %vm265_vm0, %v5138_v6, %v5140_v14  ;;  %v5144_v56 = vsel %vm265_vm0, %v5142_v52, %v5143_v60  ;;  %v5166_v40 = vadd.f32 %v5125_v27, %v5070_v33  ;;  %v5167_v38 = vadd.f32 %v5127_v51, %v5071_v41  ;;  %v15877_v33 = vld [vmem:[#allocation9_spill] sm:$0xff] }
 0x31f   : > { %v5146_v21 = vsel %vm265_vm0, %v5143_v60, %v5145_v47  ;;  %v5148_v1 = vsel %vm265_vm0, %v5145_v47, %v5147_v34  ;;  %v5168_v7 = vadd.f32 %v5126_v54, %v5072_v20  ;;  %v5169_v50 = vadd.f32 %v5130_v10, %v5073_v2 }
 0x320   : > { %v5170_v11 = vadd.f32 %v5132_v0, %v5074_v55  ;;  %v5171_v46 = vadd.f32 %v5134_v3, %v5075_v57  ;;  %v5172_v49 = vadd.f32 %v5133_v16, %v5076_v61  ;;  %v5173_v32 = vadd.f32 %v5137_v4, %v5077_v43 }
 0x321   : > { %v5174_v19 = vadd.f32 %v5139_v17, %v5078_v30  ;;  %v5175_v59 = vadd.f32 %v5141_v42, %v5079_v44  ;;  %v5176_v48 = vadd.f32 %v5140_v14, %v5080_v22  ;;  %v5177_v58 = vadd.f32 %v5144_v56, %v5081_v15 }
 0x322   : > { %v5178_v53 = vadd.f32 %v5146_v21, %v5082_v35  ;;  %v5179_v6 = vadd.f32 %v5148_v1, %v5083_v62  ;;  %v5180_v12 = vadd.f32 %v5147_v34, %v5084_v29  ;;  %v5185_v27 = vmul.f32 %v15877_v33, %v12512_v28  ;;  %v15878_v29 = vld [vmem:[#allocation20_spill] sm:$0xff] }
 0x323   : > { %v5186_v52 = vmul.f32 %v15877_v33, %v12515_v31  ;;  %v5187_v2 = vmul.f32 %v15877_v33, %v12518_v9  ;;  %v5188_v57 = vmul.f32 %v15877_v33, %v12538_v25  ;;  %v5189_v61 = vmul.f32 %v15877_v33, %v12541_v39 }
 0x324   : > { %v5190_v55 = vmul.f32 %v15877_v33, %v12544_v8  ;;  %v5191_v35 = vmul.f32 %v15877_v33, %v12557_v37  ;;  %v5192_v20 = vmul.f32 %v15877_v33, %v12560_v36  ;;  %v5193_v15 = vmul.f32 %v15877_v33, %v12563_v5 }
 0x325   : > { %v5194_v62 = vmul.f32 %v15877_v33, %v12578_v23  ;;  %v5195_v41 = vmul.f32 %v15877_v33, %v12581_v26  ;;  %v5196_v22 = vmul.f32 %v15877_v33, %v15853_v45  ;;  %v5197_v44 = vmul.f32 %v15874_v24, %v15877_v33 }
 0x326   : > { %v5198_v30 = vmul.f32 %v15875_v18, %v15877_v33  ;;  %v5199_v43 = vmul.f32 %v15876_v63, %v15877_v33  ;;  %v5200_v54 = vmul.f32 %v15878_v29, %v15877_v33  ;;  %v5217_v16 = vrot.slane %v5185_v27, 2 }
 0x327   : > { %v5218_v51 = vrot.slane %v5186_v52, 2  ;;  %v5220_v10 = vrot.slane %v5187_v2, 2  ;;  %v5222_v0 = vrot.slane %v5188_v57, 2  ;;  %v5224_v3 = vrot.slane %v5189_v61, 2 }
 0x328   : > { %v5225_v14 = vrot.slane %v5190_v55, 2  ;;  %v5227_v60 = vrot.slane %v5191_v35, 2  ;;  %v5229_v4 = vrot.slane %v5192_v20, 2  ;;  %v5231_v42 = vrot.slane %v5193_v15, 2 }
 0x329   : > { %v5219_v47 = vsel %vm362_vm1, %v5217_v16, %v5218_v51  ;;  %v5221_v34 = vsel %vm362_vm1, %v5218_v51, %v5220_v10  ;;  %v5223_v17 = vsel %vm362_vm1, %v5220_v10, %v5222_v0  ;;  %v5232_v33 = vrot.slane %v5194_v62, 2 }
 0x32a   : > { %v5226_v56 = vsel %vm362_vm1, %v5224_v3, %v5225_v14  ;;  %v5228_v21 = vsel %vm362_vm1, %v5225_v14, %v5227_v60  ;;  %v5230_v1 = vsel %vm362_vm1, %v5227_v60, %v5229_v4  ;;  %v5234_v27 = vrot.slane %v5195_v41, 2 }
 0x32b   : > { %v5236_v52 = vrot.slane %v5196_v22, 2  ;;  %v5238_v2 = vrot.slane %v5197_v44, 2  ;;  %v5239_v57 = vrot.slane %v5198_v30, 2  ;;  %v5233_v61 = vsel %vm362_vm1, %v5231_v42, %v5232_v33 }
 0x32c   : > { %v5241_v55 = vrot.slane %v5199_v43, 2  ;;  %v5243_v35 = vrot.slane %v5200_v54, 2  ;;  %v5261_v20 = vadd.f32 %v5219_v47, %v5165_v13  ;;  %v5235_v16 = vsel %vm362_vm1, %v5232_v33, %v5234_v27 }
 0x32d   : > { %v5237_v15 = vsel %vm362_vm1, %v5234_v27, %v5236_v52  ;;  %v5240_v51 = vsel %vm362_vm1, %v5238_v2, %v5239_v57  ;;  %v5262_v10 = vadd.f32 %v5221_v34, %v5166_v40  ;;  %v5263_v41 = vadd.f32 %v5223_v17, %v5167_v38  ;;  %v15879_v40 = vld [vmem:[#allocation16_spill] sm:$0xff] }
 0x32e   : > { %v5242_v3 = vsel %vm362_vm1, %v5239_v57, %v5241_v55  ;;  %v5244_v62 = vsel %vm362_vm1, %v5241_v55, %v5243_v35  ;;  %v5264_v22 = vadd.f32 %v5222_v0, %v5168_v7  ;;  %v5265_v44 = vadd.f32 %v5226_v56, %v5169_v50 }
 0x32f   : > { %v5266_v30 = vadd.f32 %v5228_v21, %v5170_v11  ;;  %v5267_v14 = vadd.f32 %v5230_v1, %v5171_v46  ;;  %v5268_v60 = vadd.f32 %v5229_v4, %v5172_v49  ;;  %v5269_v43 = vadd.f32 %v5233_v61, %v5173_v32 }
 0x330   : > { %v5270_v54 = vadd.f32 %v5235_v16, %v5174_v19  ;;  %v5271_v13 = vadd.f32 %v5237_v15, %v5175_v59  ;;  %v5272_v47 = vadd.f32 %v5236_v52, %v5176_v48  ;;  %v5273_v42 = vadd.f32 %v5240_v51, %v5177_v58 }
 0x331   : > { %v5274_v33 = vadd.f32 %v5242_v3, %v5178_v53  ;;  %v5275_v27 = vadd.f32 %v5244_v62, %v5179_v6  ;;  %v5276_v29 = vadd.f32 %v5243_v35, %v5180_v12  ;;  %v5281_v34 = vmul.f32 %v15879_v40, %v12512_v28  ;;  %v15880_v6 = vld [vmem:[#allocation20_spill] sm:$0xff] }
 0x332   : > { %v5282_v2 = vmul.f32 %v15879_v40, %v12515_v31  ;;  %v5283_v38 = vmul.f32 %v15879_v40, %v12518_v9  ;;  %v5284_v7 = vmul.f32 %v15879_v40, %v12538_v25  ;;  %v5285_v50 = vmul.f32 %v15879_v40, %v12541_v39 }
 0x333   : > { %v5286_v11 = vmul.f32 %v15879_v40, %v12544_v8  ;;  %v5287_v12 = vmul.f32 %v15879_v40, %v12557_v37  ;;  %v5288_v46 = vmul.f32 %v15879_v40, %v12560_v36  ;;  %v5289_v49 = vmul.f32 %v15879_v40, %v12563_v5 }
 0x334   : > { %v5290_v32 = vmul.f32 %v15879_v40, %v12578_v23  ;;  %v5291_v19 = vmul.f32 %v15879_v40, %v12581_v26  ;;  %v5292_v59 = vmul.f32 %v15879_v40, %v15853_v45  ;;  %v5293_v48 = vmul.f32 %v15874_v24, %v15879_v40 }
 0x335   : > { %v5294_v58 = vmul.f32 %v15875_v18, %v15879_v40  ;;  %v5295_v53 = vmul.f32 %v15876_v63, %v15879_v40  ;;  %v5296_v0 = vmul.f32 %v15880_v6, %v15879_v40  ;;  %v5313_v4 = vrot.slane %v5281_v34, 3 }
 0x336   : > { %v5314_v17 = vrot.slane %v5282_v2, 3  ;;  %v5316_v56 = vrot.slane %v5283_v38, 3  ;;  %v5318_v21 = vrot.slane %v5284_v7, 3  ;;  %v5320_v1 = vrot.slane %v5285_v50, 3 }
 0x337   : > { %v5321_v52 = vrot.slane %v5286_v11, 3  ;;  %v5323_v57 = vrot.slane %v5287_v12, 3  ;;  %v5325_v61 = vrot.slane %v5288_v46, 3  ;;  %v5327_v15 = vrot.slane %v5289_v49, 3 }
 0x338   : > { %v5315_v55 = vsel %vm459_vm2, %v5313_v4, %v5314_v17  ;;  %v5317_v35 = vsel %vm459_vm2, %v5314_v17, %v5316_v56  ;;  %v5319_v16 = vsel %vm459_vm2, %v5316_v56, %v5318_v21  ;;  %v5328_v40 = vrot.slane %v5290_v32, 3 }
 0x339   : > { %v5322_v51 = vsel %vm459_vm2, %v5320_v1, %v5321_v52  ;;  %v5324_v3 = vsel %vm459_vm2, %v5321_v52, %v5323_v57  ;;  %v5326_v62 = vsel %vm459_vm2, %v5323_v57, %v5325_v61  ;;  %v5330_v34 = vrot.slane %v5291_v19, 3 }
 0x33a   : > { %v5332_v2 = vrot.slane %v5292_v59, 3  ;;  %v5334_v38 = vrot.slane %v5293_v48, 3  ;;  %v5335_v7 = vrot.slane %v5294_v58, 3  ;;  %v5329_v50 = vsel %vm459_vm2, %v5327_v15, %v5328_v40 }
 0x33b   : > { %v5337_v11 = vrot.slane %v5295_v53, 3  ;;  %v5339_v12 = vrot.slane %v5296_v0, 3  ;;  %v5357_v46 = vadd.f32 %v5315_v55, %v5261_v20  ;;  %v5331_v4 = vsel %vm459_vm2, %v5328_v40, %v5330_v34 }
 0x33c   : > { %v5333_v49 = vsel %vm459_vm2, %v5330_v34, %v5332_v2  ;;  %v5336_v17 = vsel %vm459_vm2, %v5334_v38, %v5335_v7  ;;  %v5358_v56 = vadd.f32 %v5317_v35, %v5262_v10  ;;  %v5359_v19 = vadd.f32 %v5319_v16, %v5263_v41 }
 0x33d   : > { %v5338_v1 = vsel %vm459_vm2, %v5335_v7, %v5337_v11  ;;  %v5340_v32 = vsel %vm459_vm2, %v5337_v11, %v5339_v12  ;;  %v5360_v59 = vadd.f32 %v5318_v21, %v5264_v22  ;;  %v5361_v48 = vadd.f32 %v5322_v51, %v5265_v44  ;;  %v15881_v22 = vld [vmem:[#allocation17_spill] sm:$0xff] }
 0x33e   : > { %v5362_v58 = vadd.f32 %v5324_v3, %v5266_v30  ;;  %v5363_v52 = vadd.f32 %v5326_v62, %v5267_v14  ;;  %v5364_v57 = vadd.f32 %v5325_v61, %v5268_v60  ;;  %v12938_v53 = vadd.f32 %v5329_v50, %v5269_v43 }
 0x33f   : > { %v12940_v20 = vadd.f32 %v5331_v4, %v5270_v54  ;;  %v12942_v0 = vadd.f32 %v5333_v49, %v5271_v13  ;;  %v12944_v55 = vadd.f32 %v5332_v2, %v5272_v47  ;;  %v12946_v15 = vadd.f32 %v5336_v17, %v5273_v42 }
 0x340   : > { %v12948_v10 = vadd.f32 %v5338_v1, %v5274_v33  ;;  %v12950_v35 = vadd.f32 %v5340_v32, %v5275_v27  ;;  %v12952_v41 = vadd.f32 %v5339_v12, %v5276_v29  ;;  %v5377_v44 = vmul.f32 %v15881_v22, %v12512_v28 }
 0x341   : > { %v5378_v30 = vmul.f32 %v15881_v22, %v12515_v31  ;;  %v5379_v14 = vmul.f32 %v15881_v22, %v12518_v9  ;;  %v5380_v60 = vmul.f32 %v15881_v22, %v12538_v25  ;;  %v5381_v43 = vmul.f32 %v15881_v22, %v12541_v39 }
 0x342   : > { %v5382_v54 = vmul.f32 %v15881_v22, %v12544_v8  ;;  %v5383_v29 = vmul.f32 %v15881_v22, %v12557_v37  ;;  %v5384_v28 = vmul.f32 %v15881_v22, %v12560_v36  ;;  %v5385_v31 = vmul.f32 %v15881_v22, %v12563_v5 }
 0x343   : > { %v5386_v9 = vmul.f32 %v15881_v22, %v12578_v23  ;;  %v5387_v25 = vmul.f32 %v15881_v22, %v12581_v26  ;;  %v5388_v39 = vmul.f32 %v15881_v22, %v15853_v45  ;;  %v5389_v8 = vmul.f32 %v15874_v24, %v15881_v22 }
 0x344   : > { %v5390_v37 = vmul.f32 %v15875_v18, %v15881_v22  ;;  %v5391_v36 = vmul.f32 %v15876_v63, %v15881_v22  ;;  %v5392_v5 = vmul.f32 %v15880_v6, %v15881_v22  ;;  %v5409_v13 = vrot.slane %v5377_v44, 4 }
 0x345   : > { %v5410_v23 = vrot.slane %v5378_v30, 4  ;;  %v5412_v47 = vrot.slane %v5379_v14, 4  ;;  %v5414_v42 = vrot.slane %v5380_v60, 4  ;;  %v5416_v26 = vrot.slane %v5381_v43, 4  ;;  %v12999_v43 = vld [vmem:[%s9526_s16 + $0x110] sm:$0xff] }
 0x346   : > { %v5417_v33 = vrot.slane %v5382_v54, 4  ;;  %v5419_v27 = vrot.slane %v5383_v29, 4  ;;  %v5421_v45 = vrot.slane %v5384_v28, 4  ;;  %v5423_v51 = vrot.slane %v5385_v31, 4 }
 0x347   : > { %v5411_v21 = vsel %vm556_vm3, %v5409_v13, %v5410_v23  ;;  %v5413_v61 = vsel %vm556_vm3, %v5410_v23, %v5412_v47  ;;  %v5415_v16 = vsel %vm556_vm3, %v5412_v47, %v5414_v42  ;;  %v5424_v34 = vrot.slane %v5386_v9, 4  ;;  %v13008_v9 = vld [vmem:[%s9526_s16 + $0x170] sm:$0xff]  ;;  %v15886_v13 = vld [vmem:[#allocation19_spill] sm:$0xff] }
 0x348   : > { %v5418_v3 = vsel %vm556_vm3, %v5416_v26, %v5417_v33  ;;  %v5420_v62 = vsel %vm556_vm3, %v5417_v33, %v5419_v27  ;;  %v5422_v40 = vsel %vm556_vm3, %v5419_v27, %v5421_v45  ;;  %v5426_v2 = vrot.slane %v5387_v25, 4 }
 0x349   : > { %v5428_v38 = vrot.slane %v5388_v39, 4  ;;  %v5430_v7 = vrot.slane %v5389_v8, 4  ;;  %v5431_v50 = vrot.slane %v5390_v37, 4  ;;  %v5425_v11 = vsel %vm556_vm3, %v5423_v51, %v5424_v34 }
 0x34a   : > { %v5433_v12 = vrot.slane %v5391_v36, 4  ;;  %v5435_v4 = vrot.slane %v5392_v5, 4  ;;  %v5453_v49 = vadd.f32 %v5411_v21, %v5357_v46  ;;  %v5427_v17 = vsel %vm556_vm3, %v5424_v34, %v5426_v2  ;;  %v13002_v46 = vld [vmem:[%s9526_s16 + $0x130] sm:$0xff] }
 0x34b   : > { %v5429_v1 = vsel %vm556_vm3, %v5426_v2, %v5428_v38  ;;  %v5432_v32 = vsel %vm556_vm3, %v5430_v7, %v5431_v50  ;;  %v5454_v22 = vadd.f32 %v5413_v61, %v5358_v56  ;;  %v5455_v14 = vadd.f32 %v5415_v16, %v5359_v19  ;;  %v13005_v56 = vld [vmem:[%s9526_s16 + $0x150] sm:$0xff] }
 0x34c   : > { %v5434_v44 = vsel %vm556_vm3, %v5431_v50, %v5433_v12  ;;  %v5436_v30 = vsel %vm556_vm3, %v5433_v12, %v5435_v4  ;;  %v5456_v60 = vadd.f32 %v5414_v42, %v5360_v59  ;;  %v5457_v54 = vadd.f32 %v5418_v3, %v5361_v48  ;;  %v13011_v19 = vld [vmem:[%s9526_s16 + $0x190] sm:$0xff] }
 0x34d   : > { %v5458_v29 = vadd.f32 %v5420_v62, %v5362_v58  ;;  %v5459_v28 = vadd.f32 %v5422_v40, %v5363_v52  ;;  %v5460_v31 = vadd.f32 %v5421_v45, %v5364_v57  ;;  %v5461_v59 = vadd.f32 %v5425_v11, %v12938_v53  ;;  %v13018_v58 = vld [vmem:[%s9526_s16 + $0x1b0] sm:$0xff] }
 0x34e   : > { %v5462_v25 = vadd.f32 %v5427_v17, %v12940_v20  ;;  %v5463_v39 = vadd.f32 %v5429_v1, %v12942_v0  ;;  %v5464_v48 = vadd.f32 %v5428_v38, %v12944_v55  ;;  %v13021_v52 = vld [vmem:[%s9526_s16 + $0x1d0] sm:$0xff]  ;;  %v5465_v8 = vadd.f32 %v5432_v32, %v12946_v15 }
 0x34f   : > { %v13024_v57 = vld [vmem:[%s9526_s16 + $0x1f0] sm:$0xff]  ;;  %v5466_v37 = vadd.f32 %v5434_v44, %v12948_v10  ;;  %v5467_v36 = vadd.f32 %v5436_v30, %v12950_v35  ;;  %v5468_v53 = vadd.f32 %v5435_v4, %v12952_v41  ;;  %v5489_v23 = vmul.f32 %v12999_v43, %v15886_v13 }
 0x350   : > { %v13031_v5 = vld [vmem:[%s9526_s16 + $0x290] sm:$0xff]  ;;  %v5490_v15 = vmul.f32 %v13002_v46, %v15886_v13  ;;  %v5491_v10 = vmul.f32 %v13005_v56, %v15886_v13  ;;  %v5492_v35 = vmul.f32 %v13008_v9, %v15886_v13  ;;  %v5493_v41 = vmul.f32 %v13011_v19, %v15886_v13 }
 0x351   : > { %15882 = vst [vmem:[#allocation2_spill] sm:$0xff] %v13031_v5  ;;  %v13034_v20 = vld [vmem:[%s9526_s16 + $0x2b0] sm:$0xff]  ;;  %v5494_v47 = vmul.f32 %v13018_v58, %v15886_v13  ;;  %v5495_v42 = vmul.f32 %v13021_v52, %v15886_v13  ;;  %v5496_v26 = vmul.f32 %v13024_v57, %v15886_v13  ;;  %v5497_v33 = vmul.f32 %v15874_v24, %v15886_v13 }
 0x352   : > { %15883 = vst [vmem:[#allocation13_spill] sm:$0xff] %v13034_v20  ;;  %v13037_v0 = vld [vmem:[%s9526_s16 + $0x2d0] sm:$0xff]  ;;  %v5498_v27 = vmul.f32 %v15875_v18, %v15886_v13  ;;  %v5499_v45 = vmul.f32 %v15876_v63, %v15886_v13  ;;  %v5500_v21 = vmul.f32 %v15880_v6, %v15886_v13  ;;  %v5501_v61 = vmul.f32 %v13031_v5, %v15886_v13 }
 0x353   : > { %15884 = vst [vmem:[#allocation18_spill] sm:$0xff] %v13037_v0  ;;  %v13040_v55 = vld [vmem:[%s9526_s16 + $0x2f0] sm:$0xff]  ;;  %v5502_v16 = vmul.f32 %v13034_v20, %v15886_v13  ;;  %v5503_v51 = vmul.f32 %v13037_v0, %v15886_v13  ;;  %v5505_v62 = vadd.f32 %v5489_v23, %v5453_v49  ;;  %v5506_v40 = vadd.f32 %v5490_v15, %v5454_v22  ;;  %v15887_v0 = vld [vmem:[#allocation15_spill] sm:$0xff] }
 0x354   : > { %15885 = vst [vmem:[#allocation9_spill] sm:$0xff] %v13040_v55  ;;  %v5504_v3 = vmul.f32 %v13040_v55, %v15886_v13  ;;  %v5507_v34 = vadd.f32 %v5491_v10, %v5455_v14  ;;  %v5508_v2 = vadd.f32 %v5492_v35, %v5456_v60  ;;  %v5509_v38 = vadd.f32 %v5493_v41, %v5457_v54 }
 0x355   : > { %v5510_v7 = vadd.f32 %v5494_v47, %v5458_v29  ;;  %v5511_v50 = vadd.f32 %v5495_v42, %v5459_v28  ;;  %v5512_v11 = vadd.f32 %v5496_v26, %v5460_v31  ;;  %v5513_v12 = vadd.f32 %v5497_v33, %v5461_v59 }
 0x356   : > { %v5514_v4 = vadd.f32 %v5498_v27, %v5462_v25  ;;  %v5515_v17 = vadd.f32 %v5499_v45, %v5463_v39  ;;  %v5516_v1 = vadd.f32 %v5500_v21, %v5464_v48  ;;  %v5517_v32 = vadd.f32 %v5501_v61, %v5465_v8 }
 0x357   : > { %v5518_v44 = vadd.f32 %v5502_v16, %v5466_v37  ;;  %v5519_v30 = vadd.f32 %v5503_v51, %v5467_v36  ;;  %v5520_v20 = vadd.f32 %v5504_v3, %v5468_v53  ;;  %v5525_v5 = vmul.f32 %v12999_v43, %v15887_v0 }
 0x358   : > { %v5526_v49 = vmul.f32 %v13002_v46, %v15887_v0  ;;  %v5527_v22 = vmul.f32 %v13005_v56, %v15887_v0  ;;  %v5528_v14 = vmul.f32 %v13008_v9, %v15887_v0  ;;  %v5529_v60 = vmul.f32 %v13011_v19, %v15887_v0  ;;  %v15888_v48 = vld [vmem:[#allocation2_spill] sm:$0xff] }
 0x359   : > { %v5530_v54 = vmul.f32 %v13018_v58, %v15887_v0  ;;  %v5531_v29 = vmul.f32 %v13021_v52, %v15887_v0  ;;  %v5532_v28 = vmul.f32 %v13024_v57, %v15887_v0  ;;  %v5533_v31 = vmul.f32 %v15874_v24, %v15887_v0  ;;  %v15889_v37 = vld [vmem:[#allocation13_spill] sm:$0xff] }
 0x35a   : > { %v5534_v59 = vmul.f32 %v15875_v18, %v15887_v0  ;;  %v5535_v25 = vmul.f32 %v15876_v63, %v15887_v0  ;;  %v5536_v39 = vmul.f32 %v15880_v6, %v15887_v0  ;;  %v5537_v8 = vmul.f32 %v15888_v48, %v15887_v0  ;;  %v15890_v53 = vld [vmem:[#allocation18_spill] sm:$0xff] }
 0x35b   : > { %v5538_v36 = vmul.f32 %v15889_v37, %v15887_v0  ;;  %v5539_v13 = vmul.f32 %v15890_v53, %v15887_v0  ;;  %v5540_v23 = vmul.f32 %v13040_v55, %v15887_v0  ;;  %v5557_v15 = vrot.slane %v5525_v5, 1 }
 0x35c   : > { %v5558_v10 = vrot.slane %v5526_v49, 1  ;;  %v5560_v35 = vrot.slane %v5527_v22, 1  ;;  %v5562_v41 = vrot.slane %v5528_v14, 1  ;;  %v5564_v47 = vrot.slane %v5529_v60, 1 }
 0x35d   : > { %v5565_v42 = vrot.slane %v5530_v54, 1  ;;  %v5567_v26 = vrot.slane %v5531_v29, 1  ;;  %v5569_v33 = vrot.slane %v5532_v28, 1  ;;  %v5571_v61 = vrot.slane %v5533_v31, 1 }
 0x35e   : > { %v5559_v27 = vsel %vm265_vm0, %v5557_v15, %v5558_v10  ;;  %v5561_v45 = vsel %vm265_vm0, %v5558_v10, %v5560_v35  ;;  %v5563_v21 = vsel %vm265_vm0, %v5560_v35, %v5562_v41  ;;  %v5572_v0 = vrot.slane %v5534_v59, 1 }
 0x35f   : > { %v5566_v16 = vsel %vm265_vm0, %v5564_v47, %v5565_v42  ;;  %v5568_v51 = vsel %vm265_vm0, %v5565_v42, %v5567_v26  ;;  %v5570_v5 = vsel %vm265_vm0, %v5567_v26, %v5569_v33  ;;  %v5574_v3 = vrot.slane %v5535_v25, 1 }
 0x360   : > { %v5576_v49 = vrot.slane %v5536_v39, 1  ;;  %v5578_v22 = vrot.slane %v5537_v8, 1  ;;  %v5579_v14 = vrot.slane %v5538_v36, 1  ;;  %v5573_v60 = vsel %vm265_vm0, %v5571_v61, %v5572_v0 }
 0x361   : > { %v5581_v54 = vrot.slane %v5539_v13, 1  ;;  %v5583_v29 = vrot.slane %v5540_v23, 1  ;;  %v5601_v28 = vadd.f32 %v5559_v27, %v5505_v62  ;;  %v5575_v15 = vsel %vm265_vm0, %v5572_v0, %v5574_v3 }
 0x362   : > { %v5577_v31 = vsel %vm265_vm0, %v5574_v3, %v5576_v49  ;;  %v5580_v10 = vsel %vm265_vm0, %v5578_v22, %v5579_v14  ;;  %v5602_v35 = vadd.f32 %v5561_v45, %v5506_v40  ;;  %v5603_v25 = vadd.f32 %v5563_v21, %v5507_v34  ;;  %v15891_v22 = vld [vmem:[#allocation14_spill] sm:$0xff] }
 0x363   : > { %v5582_v47 = vsel %vm265_vm0, %v5579_v14, %v5581_v54  ;;  %v5584_v59 = vsel %vm265_vm0, %v5581_v54, %v5583_v29  ;;  %v5604_v39 = vadd.f32 %v5562_v41, %v5508_v2  ;;  %v5605_v8 = vadd.f32 %v5566_v16, %v5509_v38 }
 0x364   : > { %v5606_v36 = vadd.f32 %v5568_v51, %v5510_v7  ;;  %v5607_v42 = vadd.f32 %v5570_v5, %v5511_v50  ;;  %v5608_v26 = vadd.f32 %v5569_v33, %v5512_v11  ;;  %v5609_v13 = vadd.f32 %v5573_v60, %v5513_v12 }
 0x365   : > { %v5610_v23 = vadd.f32 %v5575_v15, %v5514_v4  ;;  %v5611_v62 = vadd.f32 %v5577_v31, %v5515_v17  ;;  %v5612_v27 = vadd.f32 %v5576_v49, %v5516_v1  ;;  %v5613_v61 = vadd.f32 %v5580_v10, %v5517_v32 }
 0x366   : > { %v5614_v0 = vadd.f32 %v5582_v47, %v5518_v44  ;;  %v5615_v3 = vadd.f32 %v5584_v59, %v5519_v30  ;;  %v5616_v55 = vadd.f32 %v5583_v29, %v5520_v20  ;;  %v5621_v40 = vmul.f32 %v12999_v43, %v15891_v22  ;;  %v15892_v30 = vld [vmem:[#allocation9_spill] sm:$0xff] }
 0x367   : > { %v5622_v45 = vmul.f32 %v13002_v46, %v15891_v22  ;;  %v5623_v34 = vmul.f32 %v13005_v56, %v15891_v22  ;;  %v5624_v2 = vmul.f32 %v13008_v9, %v15891_v22  ;;  %v5625_v38 = vmul.f32 %v13011_v19, %v15891_v22 }
 0x368   : > { %v5626_v7 = vmul.f32 %v13018_v58, %v15891_v22  ;;  %v5627_v20 = vmul.f32 %v13021_v52, %v15891_v22  ;;  %v5628_v50 = vmul.f32 %v13024_v57, %v15891_v22  ;;  %v5629_v11 = vmul.f32 %v15874_v24, %v15891_v22 }
 0x369   : > { %v5630_v12 = vmul.f32 %v15875_v18, %v15891_v22  ;;  %v5631_v4 = vmul.f32 %v15876_v63, %v15891_v22  ;;  %v5632_v17 = vmul.f32 %v15880_v6, %v15891_v22  ;;  %v5633_v1 = vmul.f32 %v15888_v48, %v15891_v22 }
 0x36a   : > { %v5634_v32 = vmul.f32 %v15889_v37, %v15891_v22  ;;  %v5635_v44 = vmul.f32 %v15890_v53, %v15891_v22  ;;  %v5636_v41 = vmul.f32 %v15892_v30, %v15891_v22  ;;  %v5653_v33 = vrot.slane %v5621_v40, 2 }
 0x36b   : > { %v5654_v21 = vrot.slane %v5622_v45, 2  ;;  %v5656_v16 = vrot.slane %v5623_v34, 2  ;;  %v5658_v51 = vrot.slane %v5624_v2, 2  ;;  %v5660_v5 = vrot.slane %v5625_v38, 2 }
 0x36c   : > { %v5661_v49 = vrot.slane %v5626_v7, 2  ;;  %v5663_v14 = vrot.slane %v5627_v20, 2  ;;  %v5665_v60 = vrot.slane %v5628_v50, 2  ;;  %v5667_v31 = vrot.slane %v5629_v11, 2 }
 0x36d   : > { %v5655_v54 = vsel %vm362_vm1, %v5653_v33, %v5654_v21  ;;  %v5657_v29 = vsel %vm362_vm1, %v5654_v21, %v5656_v16  ;;  %v5659_v15 = vsel %vm362_vm1, %v5656_v16, %v5658_v51  ;;  %v5668_v22 = vrot.slane %v5630_v12, 2 }
 0x36e   : > { %v5662_v10 = vsel %vm362_vm1, %v5660_v5, %v5661_v49  ;;  %v5664_v47 = vsel %vm362_vm1, %v5661_v49, %v5663_v14  ;;  %v5666_v59 = vsel %vm362_vm1, %v5663_v14, %v5665_v60  ;;  %v5670_v40 = vrot.slane %v5631_v4, 2 }
 0x36f   : > { %v5672_v45 = vrot.slane %v5632_v17, 2  ;;  %v5674_v34 = vrot.slane %v5633_v1, 2  ;;  %v5675_v2 = vrot.slane %v5634_v32, 2  ;;  %v5669_v38 = vsel %vm362_vm1, %v5667_v31, %v5668_v22 }
 0x370   : > { %v5677_v7 = vrot.slane %v5635_v44, 2  ;;  %v5679_v20 = vrot.slane %v5636_v41, 2  ;;  %v13157_v50 = vadd.f32 %v5655_v54, %v5601_v28  ;;  %v5671_v33 = vsel %vm362_vm1, %v5668_v22, %v5670_v40  ;;  %v13173_v28 = vld [vmem:[%s15437_s1 + $0x50] sm:$0xff]  ;;  %v15895_v54 = vld [vmem:[#allocation10_spill] sm:$0xff] }
 0x371   : > { %v5673_v11 = vsel %vm362_vm1, %v5670_v40, %v5672_v45  ;;  %v5676_v21 = vsel %vm362_vm1, %v5674_v34, %v5675_v2  ;;  %v13162_v16 = vadd.f32 %v5657_v29, %v5602_v35  ;;  %v13166_v17 = vadd.f32 %v5659_v15, %v5603_v25  ;;  %15893 = vst [vmem:[#allocation16_spill] sm:$0xff] %v13173_v28  ;;  %v15903_v15 = vld [vmem:[#allocation6_spill] sm:$0xff] }
 0x372   : > { %v5678_v12 = vsel %vm362_vm1, %v5675_v2, %v5677_v7  ;;  %v5680_v4 = vsel %vm362_vm1, %v5677_v7, %v5679_v20  ;;  %v13168_v1 = vadd.f32 %v5658_v51, %v5604_v39  ;;  %v13175_v32 = vadd.f32 %v5662_v10, %v5605_v8  ;;  %v15905_v10 = vld [vmem:[#allocation7_spill] sm:$0xff] }
 0x373   : > { %v13177_v44 = vadd.f32 %v5664_v47, %v5606_v36  ;;  %v13179_v41 = vadd.f32 %v5666_v59, %v5607_v42  ;;  %v13181_v35 = vadd.f32 %v5665_v60, %v5608_v26  ;;  %v13183_v5 = vadd.f32 %v5669_v38, %v5609_v13  ;;  %v15894_v42 = vld [vmem:[#allocation8_spill] sm:$0xff]  ;;  %v15896_v60 = vld [vmem:[#allocation11_spill] sm:$0xff] }
 0x374   : > { %v13185_v49 = vadd.f32 %v5671_v33, %v5610_v23  ;;  %v13187_v25 = vadd.f32 %v5673_v11, %v5611_v62  ;;  %v13189_v39 = vadd.f32 %v5672_v45, %v5612_v27  ;;  %v13191_v51 = vadd.f32 %v5676_v21, %v5613_v61  ;;  %v15897_v23 = vld [vmem:[#allocation12_spill] sm:$0xff]  ;;  %v15898_v27 = vld [vmem:[#allocation3_spill] sm:$0xff] }
 0x375   : > { %v13193_v14 = vadd.f32 %v5678_v12, %v5614_v0  ;;  %v13195_v8 = vadd.f32 %v5680_v4, %v5615_v3  ;;  %v13197_v36 = vadd.f32 %v5679_v20, %v5616_v55  ;;  %v5716_v26 = vrot.slane %v15895_v54, %v15894_v42  ;;  %v15899_v0 = vld [vmem:[#allocation4_spill] sm:$0xff]  ;;  %v15901_v55 = vld [vmem:[#allocation5_spill] sm:$0xff] }
 0x376   : > { %v13203_v13 = vrot.slane %v15895_v54, %v15896_v60  ;;  %v13207_v62 = vrot.slane %v15895_v54, %v15897_v23  ;;  %v13211_v61 = vrot.slane %v13173_v28, %v15898_v27  ;;  %v13215_v3 = vrot.slane %v13173_v28, %v15899_v0 }
 0x377   : > { %v13219_v29 = vrot.slane %v13173_v28, %v15901_v55  ;;  %v13223_v31 = vrot.slane %v13173_v28, %v15903_v15  ;;  %v13227_v47 = vrot.slane %v13173_v28, %v15905_v10  ;;  %v5717_v59 = vmul.f32 %v12999_v43, %v5716_v26 }
 0x378   : > { %15900 = vst [vmem:[#allocation20_spill] sm:$0xff] %v13215_v3  ;;  %v5718_v22 = vmul.f32 %v13002_v46, %v5716_v26  ;;  %v5719_v40 = vmul.f32 %v13005_v56, %v5716_v26  ;;  %v5720_v45 = vmul.f32 %v13008_v9, %v5716_v26  ;;  %v5721_v34 = vmul.f32 %v13011_v19, %v5716_v26 }
 0x379   : > { %15902 = vst [vmem:[#allocation17_spill] sm:$0xff] %v13219_v29  ;;  %15904 = vst [vmem:[#allocation19_spill] sm:$0xff] %v13223_v31  ;;  %v5722_v2 = vmul.f32 %v13018_v58, %v5716_v26  ;;  %v5723_v38 = vmul.f32 %v13021_v52, %v5716_v26  ;;  %v5724_v7 = vmul.f32 %v13024_v57, %v5716_v26  ;;  %v5749_v15 = vrot.slane %v5717_v59, 3 }
 0x37a   : > { %15906 = vst [vmem:[#allocation15_spill] sm:$0xff] %v13227_v47  ;;  %v5725_v20 = vmul.f32 %v15874_v24, %v5716_v26  ;;  %v5726_v33 = vmul.f32 %v15875_v18, %v5716_v26  ;;  %v5727_v11 = vmul.f32 %v15876_v63, %v5716_v26  ;;  %v5728_v21 = vmul.f32 %v15880_v6, %v5716_v26 }
 0x37b   : > { %v5729_v12 = vmul.f32 %v15888_v48, %v5716_v26  ;;  %v5730_v4 = vmul.f32 %v15889_v37, %v5716_v26  ;;  %v5731_v54 = vmul.f32 %v15890_v53, %v5716_v26  ;;  %v5732_v10 = vmul.f32 %v15892_v30, %v5716_v26 }
 0x37c   : > { %v5750_v55 = vrot.slane %v5718_v22, 3  ;;  %v5752_v0 = vrot.slane %v5719_v40, 3  ;;  %v5754_v27 = vrot.slane %v5720_v45, 3  ;;  %v5756_v23 = vrot.slane %v5721_v34, 3 }
 0x37d   : > { %v5757_v24 = vrot.slane %v5722_v2, 3  ;;  %v5759_v60 = vrot.slane %v5723_v38, 3  ;;  %v5761_v18 = vrot.slane %v5724_v7, 3  ;;  %v5763_v42 = vrot.slane %v5725_v20, 3 }
 0x37e   : > { %v5751_v63 = vsel %vm459_vm2, %v5749_v15, %v5750_v55  ;;  %v5753_v6 = vsel %vm459_vm2, %v5750_v55, %v5752_v0  ;;  %v5755_v28 = vsel %vm459_vm2, %v5752_v0, %v5754_v27  ;;  %v5764_v59 = vrot.slane %v5726_v33, 3 }
 0x37f   : > { %v5758_v47 = vsel %vm459_vm2, %v5756_v23, %v5757_v24  ;;  %v5760_v31 = vsel %vm459_vm2, %v5757_v24, %v5759_v60  ;;  %v5762_v26 = vsel %vm459_vm2, %v5759_v60, %v5761_v18  ;;  %v5766_v22 = vrot.slane %v5727_v11, 3 }
 0x380   : > { %v5768_v40 = vrot.slane %v5728_v21, 3  ;;  %v5770_v45 = vrot.slane %v5729_v12, 3  ;;  %v5771_v34 = vrot.slane %v5730_v4, 3  ;;  %v5765_v2 = vsel %vm459_vm2, %v5763_v42, %v5764_v59 }
 0x381   : > { %v5773_v38 = vrot.slane %v5731_v54, 3  ;;  %v5775_v15 = vrot.slane %v5732_v10, 3  ;;  %v13253_v55 = vadd.f32 %v5751_v63, %v13157_v50  ;;  %v5767_v0 = vsel %vm459_vm2, %v5764_v59, %v5766_v22 }
 0x382   : > { %v5769_v23 = vsel %vm459_vm2, %v5766_v22, %v5768_v40  ;;  %v5772_v7 = vsel %vm459_vm2, %v5770_v45, %v5771_v34  ;;  %v13259_v60 = vadd.f32 %v5753_v6, %v13162_v16  ;;  %v13264_v42 = vadd.f32 %v5755_v28, %v13166_v17 }
 0x383   : > { %v5774_v20 = vsel %vm459_vm2, %v5771_v34, %v5773_v38  ;;  %v5776_v33 = vsel %vm459_vm2, %v5773_v38, %v5775_v15  ;;  %v13267_v10 = vadd.f32 %v5754_v27, %v13168_v1  ;;  %v13270_v50 = vadd.f32 %v5758_v47, %v13175_v32  ;;  %v9440_v27 = vld [vmem:[%s9526_s16 + $0x230] sm:$0xff] }
 0x384   : > { %v13273_v11 = vadd.f32 %v5760_v31, %v13177_v44  ;;  %v13276_v21 = vadd.f32 %v5762_v26, %v13179_v41  ;;  %v13279_v16 = vadd.f32 %v5761_v18, %v13181_v35  ;;  %v13282_v12 = vadd.f32 %v5765_v2, %v13183_v5  ;;  %v9441_v31 = vld [vmem:[%s9526_s16 + $0x250] sm:$0xff] }
 0x385   : > { %v13285_v17 = vadd.f32 %v5767_v0, %v13185_v49  ;;  %v13288_v1 = vadd.f32 %v5769_v23, %v13187_v25  ;;  %v13291_v28 = vadd.f32 %v5768_v40, %v13189_v39  ;;  %v13294_v32 = vadd.f32 %v5772_v7, %v13191_v51  ;;  %v9442_v47 = vld [vmem:[%s9526_s16 + $0x270] sm:$0xff] }
 0x386   : > { %v13297_v44 = vadd.f32 %v5774_v20, %v13193_v14  ;;  %v13300_v41 = vadd.f32 %v5776_v33, %v13195_v8  ;;  %v13303_v35 = vadd.f32 %v5775_v15, %v13197_v36  ;;  %v5813_v5 = vmul.f32 %v12999_v43, %v13203_v13  ;;  %v9439_v36 = vld [vmem:[%s9526_s16 + $0x210] sm:$0xff] }
 0x387   : > { %v5814_v49 = vmul.f32 %v13002_v46, %v13203_v13  ;;  %v5815_v25 = vmul.f32 %v13005_v56, %v13203_v13  ;;  %v5816_v39 = vmul.f32 %v13008_v9, %v13203_v13  ;;  %v5817_v51 = vmul.f32 %v13011_v19, %v13203_v13 }
 0x388   : > { %v5818_v14 = vmul.f32 %v13018_v58, %v13203_v13  ;;  %v5819_v8 = vmul.f32 %v13021_v52, %v13203_v13  ;;  %v5820_v43 = vmul.f32 %v13024_v57, %v13203_v13  ;;  %v5821_v46 = vmul.f32 %v9439_v36, %v13203_v13 }
 0x389   : > { %v5822_v56 = vmul.f32 %v9440_v27, %v13203_v13  ;;  %v5823_v9 = vmul.f32 %v9441_v31, %v13203_v13  ;;  %v5824_v4 = vmul.f32 %v9442_v47, %v13203_v13  ;;  %v5825_v54 = vmul.f32 %v15888_v48, %v13203_v13 }
 0x38a   : > { %v5826_v24 = vmul.f32 %v15889_v37, %v13203_v13  ;;  %v5827_v18 = vmul.f32 %v15890_v53, %v13203_v13  ;;  %v5828_v63 = vmul.f32 %v15892_v30, %v13203_v13  ;;  %v5845_v6 = vrot.slane %v5813_v5, 4 }
 0x38b   : > { %v5846_v26 = vrot.slane %v5814_v49, 4  ;;  %v5848_v59 = vrot.slane %v5815_v25, 4  ;;  %v5850_v22 = vrot.slane %v5816_v39, 4  ;;  %v5852_v40 = vrot.slane %v5817_v51, 4 }
 0x38c   : > { %v5853_v45 = vrot.slane %v5818_v14, 4  ;;  %v5855_v34 = vrot.slane %v5819_v8, 4  ;;  %v5857_v2 = vrot.slane %v5820_v43, 4  ;;  %v5859_v23 = vrot.slane %v5821_v46, 4 }
 0x38d   : > { %v5847_v38 = vsel %vm556_vm3, %v5845_v6, %v5846_v26  ;;  %v5849_v15 = vsel %vm556_vm3, %v5846_v26, %v5848_v59  ;;  %v5851_v0 = vsel %vm556_vm3, %v5848_v59, %v5850_v22  ;;  %v5860_v33 = vrot.slane %v5822_v56, 4  ;;  %v13365_v6 = vld [vmem:[%s9526_s16 + $0x230] sm:$0xff] }
 0x38e   : > { %v5854_v7 = vsel %vm556_vm3, %v5852_v40, %v5853_v45  ;;  %v5856_v20 = vsel %vm556_vm3, %v5853_v45, %v5855_v34  ;;  %v5858_v13 = vsel %vm556_vm3, %v5855_v34, %v5857_v2  ;;  %v5862_v5 = vrot.slane %v5823_v9, 4  ;;  %v13371_v26 = vld [vmem:[%s9526_s16 + $0x270] sm:$0xff] }
 0x38f   : > { %v5864_v49 = vrot.slane %v5824_v4, 4  ;;  %v5866_v25 = vrot.slane %v5825_v54, 4  ;;  %v5867_v39 = vrot.slane %v5826_v24, 4  ;;  %v5861_v51 = vsel %vm556_vm3, %v5859_v23, %v5860_v33 }
 0x390   : > { %v5869_v14 = vrot.slane %v5827_v18, 4  ;;  %v5871_v8 = vrot.slane %v5828_v63, 4  ;;  %v5889_v43 = vadd.f32 %v5847_v38, %v13253_v55  ;;  %v5863_v36 = vsel %vm556_vm3, %v5860_v33, %v5862_v5  ;;  %v13358_v18 = vld [vmem:[%s9526_s16 + $0x210] sm:$0xff] }
 0x391   : > { %v5865_v46 = vsel %vm556_vm3, %v5862_v5, %v5864_v49  ;;  %v5868_v27 = vsel %vm556_vm3, %v5866_v25, %v5867_v39  ;;  %v5890_v56 = vadd.f32 %v5849_v15, %v13259_v60  ;;  %v5891_v47 = vadd.f32 %v5851_v0, %v13264_v42 }
 0x392   : > { %v5870_v31 = vsel %vm556_vm3, %v5867_v39, %v5869_v14  ;;  %v5872_v9 = vsel %vm556_vm3, %v5869_v14, %v5871_v8  ;;  %v5892_v4 = vadd.f32 %v5850_v22, %v13267_v10  ;;  %v5893_v55 = vadd.f32 %v5854_v7, %v13270_v50  ;;  %v13378_v22 = vld [vmem:[%s9526_s16 + $0x310] sm:$0xff] }
 0x393   : > { %v5894_v54 = vadd.f32 %v5856_v20, %v13273_v11  ;;  %v5895_v24 = vadd.f32 %v5858_v13, %v13276_v21  ;;  %v5896_v60 = vadd.f32 %v5857_v2, %v13279_v16  ;;  %v5897_v63 = vadd.f32 %v5861_v51, %v13282_v12  ;;  %v13368_v11 = vld [vmem:[%s9526_s16 + $0x250] sm:$0xff]  ;;  %15907 = vst [vmem:[#allocation2_spill] sm:$0xff] %v13378_v22 }
 0x394   : > { %v5898_v42 = vadd.f32 %v5863_v36, %v13285_v17  ;;  %v5899_v10 = vadd.f32 %v5865_v46, %v13288_v1  ;;  %v5900_v50 = vadd.f32 %v5864_v49, %v13291_v28  ;;  %v5901_v21 = vadd.f32 %v5868_v27, %v13294_v32  ;;  %v13381_v17 = vld [vmem:[%s9526_s16 + $0x330] sm:$0xff] }
 0x395   : > { %v5902_v16 = vadd.f32 %v5870_v31, %v13297_v44  ;;  %v5903_v59 = vadd.f32 %v5872_v9, %v13300_v41  ;;  %v5904_v12 = vadd.f32 %v5871_v8, %v13303_v35  ;;  %15908 = vst [vmem:[#allocation13_spill] sm:$0xff] %v13381_v17  ;;  %v13384_v1 = vld [vmem:[%s9526_s16 + $0x350] sm:$0xff]  ;;  %v5925_v40 = vmul.f32 %v13011_v19, %v13207_v62 }
 0x396   : > { %15909 = vst [vmem:[#allocation18_spill] sm:$0xff] %v13384_v1  ;;  %v13387_v28 = vld [vmem:[%s9526_s16 + $0x370] sm:$0xff]  ;;  %v5926_v32 = vmul.f32 %v13018_v58, %v13207_v62  ;;  %v5927_v44 = vmul.f32 %v13021_v52, %v13207_v62  ;;  %v5928_v41 = vmul.f32 %v13024_v57, %v13207_v62  ;;  %v5929_v35 = vmul.f32 %v13358_v18, %v13207_v62 }
 0x397   : > { %15910 = vst [vmem:[#allocation14_spill] sm:$0xff] %v13387_v28  ;;  %v5930_v45 = vmul.f32 %v13365_v6, %v13207_v62  ;;  %v5931_v34 = vmul.f32 %v13368_v11, %v13207_v62  ;;  %v5932_v2 = vmul.f32 %v13371_v26, %v13207_v62  ;;  %v5933_v38 = vmul.f32 %v15888_v48, %v13207_v62 }
 0x398   : > { %v5934_v15 = vmul.f32 %v15889_v37, %v13207_v62  ;;  %v5935_v0 = vmul.f32 %v15890_v53, %v13207_v62  ;;  %v5936_v23 = vmul.f32 %v15892_v30, %v13207_v62  ;;  %v5937_v7 = vmul.f32 %v13378_v22, %v13207_v62 }
 0x399   : > { %v5938_v20 = vmul.f32 %v13381_v17, %v13207_v62  ;;  %v5939_v13 = vmul.f32 %v13384_v1, %v13207_v62  ;;  %v5940_v33 = vmul.f32 %v13387_v28, %v13207_v62  ;;  %v5941_v5 = vadd.f32 %v5925_v40, %v5889_v43 }
 0x39a   : > { %v5942_v49 = vadd.f32 %v5926_v32, %v5890_v56  ;;  %v5943_v25 = vadd.f32 %v5927_v44, %v5891_v47  ;;  %v5944_v39 = vadd.f32 %v5928_v41, %v5892_v4  ;;  %v5945_v51 = vadd.f32 %v5929_v35, %v5893_v55 }
 0x39b   : > { %v5946_v14 = vadd.f32 %v5930_v45, %v5894_v54  ;;  %v5947_v8 = vadd.f32 %v5931_v34, %v5895_v24  ;;  %v5948_v36 = vadd.f32 %v5932_v2, %v5896_v60  ;;  %v5949_v46 = vadd.f32 %v5933_v38, %v5897_v63 }
 0x39c   : > { %v5950_v27 = vadd.f32 %v5934_v15, %v5898_v42  ;;  %v5951_v31 = vadd.f32 %v5935_v0, %v5899_v10  ;;  %v5952_v9 = vadd.f32 %v5936_v23, %v5900_v50  ;;  %v5953_v29 = vadd.f32 %v5937_v7, %v5901_v21  ;;  %v15911_v10 = vld [vmem:[#allocation2_spill] sm:$0xff]  ;;  %v15912_v21 = vld [vmem:[#allocation13_spill] sm:$0xff] }
 0x39d   : > { %v5954_v3 = vadd.f32 %v5938_v20, %v5902_v16  ;;  %v5955_v17 = vadd.f32 %v5939_v13, %v5903_v59  ;;  %v5956_v22 = vadd.f32 %v5940_v33, %v5904_v12  ;;  %v5961_v1 = vmul.f32 %v13011_v19, %v13211_v61  ;;  %v15913_v59 = vld [vmem:[#allocation18_spill] sm:$0xff] }
 0x39e   : > { %v5962_v62 = vmul.f32 %v13018_v58, %v13211_v61  ;;  %v5963_v43 = vmul.f32 %v13021_v52, %v13211_v61  ;;  %v5964_v56 = vmul.f32 %v13024_v57, %v13211_v61  ;;  %v5965_v47 = vmul.f32 %v13358_v18, %v13211_v61 }
 0x39f   : > { %v5966_v4 = vmul.f32 %v13365_v6, %v13211_v61  ;;  %v5967_v55 = vmul.f32 %v13368_v11, %v13211_v61  ;;  %v5968_v54 = vmul.f32 %v13371_v26, %v13211_v61  ;;  %v5969_v24 = vmul.f32 %v15888_v48, %v13211_v61 }
 0x3a0   : > { %v5970_v60 = vmul.f32 %v15889_v37, %v13211_v61  ;;  %v5971_v63 = vmul.f32 %v15890_v53, %v13211_v61  ;;  %v5972_v42 = vmul.f32 %v15892_v30, %v13211_v61  ;;  %v5973_v50 = vmul.f32 %v15911_v10, %v13211_v61 }
 0x3a1   : > { %v5974_v16 = vmul.f32 %v15912_v21, %v13211_v61  ;;  %v5975_v12 = vmul.f32 %v15913_v59, %v13211_v61  ;;  %v5976_v40 = vmul.f32 %v13387_v28, %v13211_v61  ;;  %v5993_v32 = vrot.slane %v5961_v1, 1 }
 0x3a2   : > { %v5994_v44 = vrot.slane %v5962_v62, 1  ;;  %v5996_v41 = vrot.slane %v5963_v43, 1  ;;  %v5998_v35 = vrot.slane %v5964_v56, 1  ;;  %v6000_v45 = vrot.slane %v5965_v47, 1 }
 0x3a3   : > { %v6001_v34 = vrot.slane %v5966_v4, 1  ;;  %v6003_v2 = vrot.slane %v5967_v55, 1  ;;  %v6005_v38 = vrot.slane %v5968_v54, 1  ;;  %v6007_v7 = vrot.slane %v5969_v24, 1 }
 0x3a4   : > { %v5995_v15 = vsel %vm265_vm0, %v5993_v32, %v5994_v44  ;;  %v5997_v0 = vsel %vm265_vm0, %v5994_v44, %v5996_v41  ;;  %v5999_v23 = vsel %vm265_vm0, %v5996_v41, %v5998_v35  ;;  %v6008_v1 = vrot.slane %v5970_v60, 1 }
 0x3a5   : > { %v6002_v20 = vsel %vm265_vm0, %v6000_v45, %v6001_v34  ;;  %v6004_v13 = vsel %vm265_vm0, %v6001_v34, %v6003_v2  ;;  %v6006_v61 = vsel %vm265_vm0, %v6003_v2, %v6005_v38  ;;  %v6010_v33 = vrot.slane %v5971_v63, 1 }
 0x3a6   : > { %v6012_v62 = vrot.slane %v5972_v42, 1  ;;  %v6014_v43 = vrot.slane %v5973_v50, 1  ;;  %v6015_v56 = vrot.slane %v5974_v16, 1  ;;  %v6009_v47 = vsel %vm265_vm0, %v6007_v7, %v6008_v1 }
 0x3a7   : > { %v6017_v4 = vrot.slane %v5975_v12, 1  ;;  %v6019_v55 = vrot.slane %v5976_v40, 1  ;;  %v6037_v54 = vadd.f32 %v5995_v15, %v5941_v5  ;;  %v6011_v32 = vsel %vm265_vm0, %v6008_v1, %v6010_v33 }
 0x3a8   : > { %v6013_v24 = vsel %vm265_vm0, %v6010_v33, %v6012_v62  ;;  %v6016_v44 = vsel %vm265_vm0, %v6014_v43, %v6015_v56  ;;  %v6038_v41 = vadd.f32 %v5997_v0, %v5942_v49  ;;  %v6039_v63 = vadd.f32 %v5999_v23, %v5943_v25  ;;  %v15914_v43 = vld [vmem:[#allocation20_spill] sm:$0xff] }
 0x3a9   : > { %v6018_v45 = vsel %vm265_vm0, %v6015_v56, %v6017_v4  ;;  %v6020_v60 = vsel %vm265_vm0, %v6017_v4, %v6019_v55  ;;  %v6040_v42 = vadd.f32 %v5998_v35, %v5944_v39  ;;  %v6041_v50 = vadd.f32 %v6002_v20, %v5945_v51 }
 0x3aa   : > { %v6042_v16 = vadd.f32 %v6004_v13, %v5946_v14  ;;  %v6043_v34 = vadd.f32 %v6006_v61, %v5947_v8  ;;  %v6044_v2 = vadd.f32 %v6005_v38, %v5948_v36  ;;  %v6045_v12 = vadd.f32 %v6009_v47, %v5949_v46 }
 0x3ab   : > { %v6046_v40 = vadd.f32 %v6011_v32, %v5950_v27  ;;  %v6047_v5 = vadd.f32 %v6013_v24, %v5951_v31  ;;  %v6048_v15 = vadd.f32 %v6012_v62, %v5952_v9  ;;  %v6049_v7 = vadd.f32 %v6016_v44, %v5953_v29  ;;  %v15915_v9 = vld [vmem:[#allocation14_spill] sm:$0xff] }
 0x3ac   : > { %v6050_v1 = vadd.f32 %v6018_v45, %v5954_v3  ;;  %v6051_v33 = vadd.f32 %v6020_v60, %v5955_v17  ;;  %v6052_v28 = vadd.f32 %v6019_v55, %v5956_v22  ;;  %v6057_v49 = vmul.f32 %v13011_v19, %v15914_v43 }
 0x3ad   : > { %v6058_v0 = vmul.f32 %v13018_v58, %v15914_v43  ;;  %v6059_v25 = vmul.f32 %v13021_v52, %v15914_v43  ;;  %v6060_v39 = vmul.f32 %v13024_v57, %v15914_v43  ;;  %v6061_v51 = vmul.f32 %v13358_v18, %v15914_v43 }
 0x3ae   : > { %v6062_v3 = vmul.f32 %v13365_v6, %v15914_v43  ;;  %v6063_v29 = vmul.f32 %v13368_v11, %v15914_v43  ;;  %v6064_v22 = vmul.f32 %v13371_v26, %v15914_v43  ;;  %v6065_v17 = vmul.f32 %v15888_v48, %v15914_v43 }
 0x3af   : > { %v6066_v14 = vmul.f32 %v15889_v37, %v15914_v43  ;;  %v6067_v8 = vmul.f32 %v15890_v53, %v15914_v43  ;;  %v6068_v36 = vmul.f32 %v15892_v30, %v15914_v43  ;;  %v6069_v46 = vmul.f32 %v15911_v10, %v15914_v43 }
 0x3b0   : > { %v6070_v27 = vmul.f32 %v15912_v21, %v15914_v43  ;;  %v6071_v31 = vmul.f32 %v15913_v59, %v15914_v43  ;;  %v6072_v35 = vmul.f32 %v15915_v9, %v15914_v43  ;;  %v6089_v38 = vrot.slane %v6057_v49, 2 }
 0x3b1   : > { %v6090_v23 = vrot.slane %v6058_v0, 2  ;;  %v6092_v20 = vrot.slane %v6059_v25, 2  ;;  %v6094_v13 = vrot.slane %v6060_v39, 2  ;;  %v6096_v61 = vrot.slane %v6061_v51, 2 }
 0x3b2   : > { %v6097_v62 = vrot.slane %v6062_v3, 2  ;;  %v6099_v56 = vrot.slane %v6063_v29, 2  ;;  %v6101_v47 = vrot.slane %v6064_v22, 2  ;;  %v6103_v24 = vrot.slane %v6065_v17, 2 }
 0x3b3   : > { %v6091_v4 = vsel %vm362_vm1, %v6089_v38, %v6090_v23  ;;  %v6093_v55 = vsel %vm362_vm1, %v6090_v23, %v6092_v20  ;;  %v6095_v32 = vsel %vm362_vm1, %v6092_v20, %v6094_v13  ;;  %v6104_v43 = vrot.slane %v6066_v14, 2 }
 0x3b4   : > { %v6098_v44 = vsel %vm362_vm1, %v6096_v61, %v6097_v62  ;;  %v6100_v45 = vsel %vm362_vm1, %v6097_v62, %v6099_v56  ;;  %v6102_v60 = vsel %vm362_vm1, %v6099_v56, %v6101_v47  ;;  %v6106_v49 = vrot.slane %v6067_v8, 2 }
 0x3b5   : > { %v6108_v0 = vrot.slane %v6068_v36, 2  ;;  %v6110_v25 = vrot.slane %v6069_v46, 2  ;;  %v6111_v39 = vrot.slane %v6070_v27, 2  ;;  %v6105_v51 = vsel %vm362_vm1, %v6103_v24, %v6104_v43 }
 0x3b6   : > { %v6113_v3 = vrot.slane %v6071_v31, 2  ;;  %v6115_v29 = vrot.slane %v6072_v35, 2  ;;  %v6133_v22 = vadd.f32 %v6091_v4, %v6037_v54  ;;  %v6107_v38 = vsel %vm362_vm1, %v6104_v43, %v6106_v49 }
 0x3b7   : > { %v6109_v17 = vsel %vm362_vm1, %v6106_v49, %v6108_v0  ;;  %v6112_v23 = vsel %vm362_vm1, %v6110_v25, %v6111_v39  ;;  %v6134_v20 = vadd.f32 %v6093_v55, %v6038_v41  ;;  %v6135_v8 = vadd.f32 %v6095_v32, %v6039_v63  ;;  %v15916_v25 = vld [vmem:[#allocation17_spill] sm:$0xff] }
 0x3b8   : > { %v6114_v61 = vsel %vm362_vm1, %v6111_v39, %v6113_v3  ;;  %v6116_v14 = vsel %vm362_vm1, %v6113_v3, %v6115_v29  ;;  %v6136_v36 = vadd.f32 %v6094_v13, %v6040_v42  ;;  %v6137_v46 = vadd.f32 %v6098_v44, %v6041_v50 }
 0x3b9   : > { %v6138_v27 = vadd.f32 %v6100_v45, %v6042_v16  ;;  %v6139_v62 = vadd.f32 %v6102_v60, %v6043_v34  ;;  %v6140_v56 = vadd.f32 %v6101_v47, %v6044_v2  ;;  %v6141_v31 = vadd.f32 %v6105_v51, %v6045_v12 }
 0x3ba   : > { %v6142_v35 = vadd.f32 %v6107_v38, %v6046_v40  ;;  %v6143_v54 = vadd.f32 %v6109_v17, %v6047_v5  ;;  %v6144_v4 = vadd.f32 %v6108_v0, %v6048_v15  ;;  %v6145_v24 = vadd.f32 %v6112_v23, %v6049_v7 }
 0x3bb   : > { %v6146_v43 = vadd.f32 %v6114_v61, %v6050_v1  ;;  %v6147_v49 = vadd.f32 %v6116_v14, %v6051_v33  ;;  %v6148_v9 = vadd.f32 %v6115_v29, %v6052_v28  ;;  %v6153_v41 = vmul.f32 %v13011_v19, %v15916_v25 }
 0x3bc   : > { %v6154_v55 = vmul.f32 %v13018_v58, %v15916_v25  ;;  %v6155_v63 = vmul.f32 %v13021_v52, %v15916_v25  ;;  %v6156_v42 = vmul.f32 %v13024_v57, %v15916_v25  ;;  %v6157_v50 = vmul.f32 %v13358_v18, %v15916_v25 }
 0x3bd   : > { %v6158_v16 = vmul.f32 %v13365_v6, %v15916_v25  ;;  %v6159_v28 = vmul.f32 %v13368_v11, %v15916_v25  ;;  %v6160_v19 = vmul.f32 %v13371_v26, %v15916_v25  ;;  %v6161_v58 = vmul.f32 %v15888_v48, %v15916_v25  ;;  %v15917_v48 = vld [vmem:[#allocation14_spill] sm:$0xff] }
 0x3be   : > { %v6162_v52 = vmul.f32 %v15889_v37, %v15916_v25  ;;  %v6163_v57 = vmul.f32 %v15890_v53, %v15916_v25  ;;  %v6164_v34 = vmul.f32 %v15892_v30, %v15916_v25  ;;  %v6165_v2 = vmul.f32 %v15911_v10, %v15916_v25 }
 0x3bf   : > { %v6166_v12 = vmul.f32 %v15912_v21, %v15916_v25  ;;  %v6167_v40 = vmul.f32 %v15913_v59, %v15916_v25  ;;  %v6168_v5 = vmul.f32 %v15917_v48, %v15916_v25  ;;  %v6185_v15 = vrot.slane %v6153_v41, 3 }
 0x3c0   : > { %v6186_v37 = vrot.slane %v6154_v55, 3  ;;  %v6188_v7 = vrot.slane %v6155_v63, 3  ;;  %v6190_v1 = vrot.slane %v6156_v42, 3  ;;  %v6192_v53 = vrot.slane %v6157_v50, 3 }
 0x3c1   : > { %v6193_v33 = vrot.slane %v6158_v16, 3  ;;  %v6195_v13 = vrot.slane %v6159_v28, 3  ;;  %v6197_v30 = vrot.slane %v6160_v19, 3  ;;  %v6199_v45 = vrot.slane %v6161_v58, 3 }
 0x3c2   : > { %v6187_v47 = vsel %vm459_vm2, %v6185_v15, %v6186_v37  ;;  %v6189_v32 = vsel %vm459_vm2, %v6186_v37, %v6188_v7  ;;  %v6191_v44 = vsel %vm459_vm2, %v6188_v7, %v6190_v1  ;;  %v6200_v51 = vrot.slane %v6162_v52, 3  ;;  %v9447_v37 = vld [vmem:[%s9526_s16 + $0x290] sm:$0xff] }
 0x3c3   : > { %v6194_v60 = vsel %vm459_vm2, %v6192_v53, %v6193_v33  ;;  %v6196_v0 = vsel %vm459_vm2, %v6193_v33, %v6195_v13  ;;  %v6198_v39 = vsel %vm459_vm2, %v6195_v13, %v6197_v30  ;;  %v6202_v3 = vrot.slane %v6163_v57, 3  ;;  %v9449_v33 = vld [vmem:[%s9526_s16 + $0x2d0] sm:$0xff] }
 0x3c4   : > { %v6204_v29 = vrot.slane %v6164_v34, 3  ;;  %v6206_v38 = vrot.slane %v6165_v2, 3  ;;  %v6207_v17 = vrot.slane %v6166_v12, 3  ;;  %v6201_v23 = vsel %vm459_vm2, %v6199_v45, %v6200_v51  ;;  %v15918_v12 = vld [vmem:[#allocation19_spill] sm:$0xff] }
 0x3c5   : > { %v6209_v61 = vrot.slane %v6167_v40, 3  ;;  %v6211_v14 = vrot.slane %v6168_v5, 3  ;;  %v13548_v25 = vadd.f32 %v6187_v47, %v6133_v22  ;;  %v6203_v41 = vsel %vm459_vm2, %v6200_v51, %v6202_v3  ;;  %v9446_v40 = vld [vmem:[%s9526_s16 + $0x1f0] sm:$0xff] }
 0x3c6   : > { %v6205_v55 = vsel %vm459_vm2, %v6202_v3, %v6204_v29  ;;  %v6208_v63 = vsel %vm459_vm2, %v6206_v38, %v6207_v17  ;;  %v13553_v42 = vadd.f32 %v6189_v32, %v6134_v20  ;;  %v13557_v28 = vadd.f32 %v6191_v44, %v6135_v8 }
 0x3c7   : > { %v6210_v50 = vsel %vm459_vm2, %v6207_v17, %v6209_v61  ;;  %v6212_v16 = vsel %vm459_vm2, %v6209_v61, %v6211_v14  ;;  %v13559_v19 = vadd.f32 %v6190_v1, %v6136_v36  ;;  %v13561_v22 = vadd.f32 %v6194_v60, %v6137_v46  ;;  %v9448_v1 = vld [vmem:[%s9526_s16 + $0x2b0] sm:$0xff] }
 0x3c8   : > { %v13563_v58 = vadd.f32 %v6196_v0, %v6138_v27  ;;  %v13565_v52 = vadd.f32 %v6198_v39, %v6139_v62  ;;  %v13567_v20 = vadd.f32 %v6197_v30, %v6140_v56  ;;  %v13569_v57 = vadd.f32 %v6201_v23, %v6141_v31  ;;  %v9443_v56 = vld [vmem:[%s9526_s16 + $0x190] sm:$0xff] }
 0x3c9   : > { %v13571_v34 = vadd.f32 %v6203_v41, %v6142_v35  ;;  %v13573_v2 = vadd.f32 %v6205_v55, %v6143_v54  ;;  %v13575_v8 = vadd.f32 %v6204_v29, %v6144_v4  ;;  %v13577_v36 = vadd.f32 %v6208_v63, %v6145_v24  ;;  %v9444_v35 = vld [vmem:[%s9526_s16 + $0x1b0] sm:$0xff] }
 0x3ca   : > { %v13579_v46 = vadd.f32 %v6210_v50, %v6146_v43  ;;  %v13581_v27 = vadd.f32 %v6212_v16, %v6147_v49  ;;  %v13583_v62 = vadd.f32 %v6211_v14, %v6148_v9  ;;  %v6249_v31 = vmul.f32 %v9443_v56, %v15918_v12  ;;  %v9445_v4 = vld [vmem:[%s9526_s16 + $0x1d0] sm:$0xff] }
 0x3cb   : > { %v6250_v54 = vmul.f32 %v9444_v35, %v15918_v12  ;;  %v6251_v24 = vmul.f32 %v9445_v4, %v15918_v12  ;;  %v6252_v43 = vmul.f32 %v9446_v40, %v15918_v12  ;;  %v6253_v49 = vmul.f32 %v13358_v18, %v15918_v12  ;;  %v9450_v30 = vld [vmem:[%s9526_s16 + $0x2f0] sm:$0xff] }
 0x3cc   : > { %v6254_v9 = vmul.f32 %v13365_v6, %v15918_v12  ;;  %v6255_v5 = vmul.f32 %v13368_v11, %v15918_v12  ;;  %v6256_v15 = vmul.f32 %v13371_v26, %v15918_v12  ;;  %v6257_v7 = vmul.f32 %v9447_v37, %v15918_v12 }
 0x3cd   : > { %v6258_v53 = vmul.f32 %v9448_v1, %v15918_v12  ;;  %v6259_v13 = vmul.f32 %v9449_v33, %v15918_v12  ;;  %v6260_v47 = vmul.f32 %v9450_v30, %v15918_v12  ;;  %v6261_v32 = vmul.f32 %v15911_v10, %v15918_v12  ;;  %v13638_v30 = vld [vmem:[%s9526_s16 + $0x290] sm:$0xff] }
 0x3ce   : > { %v6262_v44 = vmul.f32 %v15912_v21, %v15918_v12  ;;  %v6263_v45 = vmul.f32 %v15913_v59, %v15918_v12  ;;  %v6264_v60 = vmul.f32 %v15917_v48, %v15918_v12  ;;  %v6281_v0 = vrot.slane %v6249_v31, 4 }
 0x3cf   : > { %v6282_v39 = vrot.slane %v6250_v54, 4  ;;  %v6284_v51 = vrot.slane %v6251_v24, 4  ;;  %v6286_v3 = vrot.slane %v6252_v43, 4  ;;  %v6288_v29 = vrot.slane %v6253_v49, 4 }
 0x3d0   : > { %v6289_v38 = vrot.slane %v6254_v9, 4  ;;  %v6291_v17 = vrot.slane %v6255_v5, 4  ;;  %v6293_v23 = vrot.slane %v6256_v15, 4  ;;  %v6295_v55 = vrot.slane %v6257_v7, 4 }
 0x3d1   : > { %v6283_v61 = vsel %vm556_vm3, %v6281_v0, %v6282_v39  ;;  %v6285_v14 = vsel %vm556_vm3, %v6282_v39, %v6284_v51  ;;  %v6287_v41 = vsel %vm556_vm3, %v6284_v51, %v6286_v3  ;;  %v6296_v56 = vrot.slane %v6258_v53, 4  ;;  %v15920_v0 = vld [vmem:[#allocation15_spill] sm:$0xff] }
 0x3d2   : > { %v6290_v63 = vsel %vm556_vm3, %v6288_v29, %v6289_v38  ;;  %v6292_v50 = vsel %vm556_vm3, %v6289_v38, %v6291_v17  ;;  %v6294_v16 = vsel %vm556_vm3, %v6291_v17, %v6293_v23  ;;  %v6298_v12 = vrot.slane %v6259_v13, 4 }
 0x3d3   : > { %v6300_v31 = vrot.slane %v6260_v47, 4  ;;  %v6302_v35 = vrot.slane %v6261_v32, 4  ;;  %v6303_v54 = vrot.slane %v6262_v44, 4  ;;  %v6297_v4 = vsel %vm556_vm3, %v6295_v55, %v6296_v56  ;;  %v13645_v32 = vld [vmem:[%s9526_s16 + $0x2b0] sm:$0xff] }
 0x3d4   : > { %v6305_v24 = vrot.slane %v6263_v45, 4  ;;  %v6307_v40 = vrot.slane %v6264_v60, 4  ;;  %v6325_v43 = vadd.f32 %v6283_v61, %v13548_v25  ;;  %v6299_v49 = vsel %vm556_vm3, %v6296_v56, %v6298_v12  ;;  %v13651_v44 = vld [vmem:[%s9526_s16 + $0x2f0] sm:$0xff] }
 0x3d5   : > { %v6301_v9 = vsel %vm556_vm3, %v6298_v12, %v6300_v31  ;;  %v6304_v5 = vsel %vm556_vm3, %v6302_v35, %v6303_v54  ;;  %v6326_v15 = vadd.f32 %v6285_v14, %v13553_v42  ;;  %v6327_v1 = vadd.f32 %v6287_v41, %v13557_v28  ;;  %v13658_v60 = vld [vmem:[%s9526_s16 + $0x390] sm:$0xff] }
 0x3d6   : > { %v6306_v37 = vsel %vm556_vm3, %v6303_v54, %v6305_v24  ;;  %v6308_v7 = vsel %vm556_vm3, %v6305_v24, %v6307_v40  ;;  %v6328_v53 = vadd.f32 %v6286_v3, %v13559_v19  ;;  %v6329_v25 = vadd.f32 %v6290_v63, %v13561_v22 }
 0x3d7   : > { %v6330_v33 = vadd.f32 %v6292_v50, %v13563_v58  ;;  %v6331_v13 = vadd.f32 %v6294_v16, %v13565_v52  ;;  %v6332_v42 = vadd.f32 %v6293_v23, %v13567_v20  ;;  %v6333_v47 = vadd.f32 %v6297_v4, %v13569_v57  ;;  %v13648_v58 = vld [vmem:[%s9526_s16 + $0x2d0] sm:$0xff] }
 0x3d8   : > { %v6334_v28 = vadd.f32 %v6299_v49, %v13571_v34  ;;  %v6335_v19 = vadd.f32 %v6301_v9, %v13573_v2  ;;  %v6336_v22 = vadd.f32 %v6300_v31, %v13575_v8  ;;  %v6337_v52 = vadd.f32 %v6304_v5, %v13577_v36  ;;  %v13661_v34 = vld [vmem:[%s9526_s16 + $0x3b0] sm:$0xff] }
 0x3d9   : > { %v6338_v20 = vadd.f32 %v6306_v37, %v13579_v46  ;;  %v6339_v45 = vadd.f32 %v6308_v7, %v13581_v27  ;;  %v6340_v57 = vadd.f32 %v6307_v40, %v13583_v62  ;;  %v13664_v2 = vld [vmem:[%s9526_s16 + $0x3d0] sm:$0xff]  ;;  %v6361_v39 = vmul.f32 %v13358_v18, %v15920_v0 }
 0x3da   : > { %v13667_v8 = vld [vmem:[%s9526_s16 + $0x3f0] sm:$0xff]  ;;  %v6362_v36 = vmul.f32 %v13365_v6, %v15920_v0  ;;  %v6363_v46 = vmul.f32 %v13368_v11, %v15920_v0  ;;  %v6364_v27 = vmul.f32 %v13371_v26, %v15920_v0  ;;  %v6365_v62 = vmul.f32 %v13638_v30, %v15920_v0 }
 0x3db   : > { %15919 = vst [vmem:[#allocation9_spill] sm:$0xff] %v13667_v8  ;;  %v6366_v51 = vmul.f32 %v13645_v32, %v15920_v0  ;;  %v6367_v3 = vmul.f32 %v13648_v58, %v15920_v0  ;;  %v6368_v29 = vmul.f32 %v13651_v44, %v15920_v0  ;;  %v6369_v38 = vmul.f32 %v15911_v10, %v15920_v0  ;;  %v13712_v31 = vld [vmem:[%s15437_s1 + $0x70] ss:$0 sm:$0xff] }
 0x3dc   : > { %v6370_v17 = vmul.f32 %v15912_v21, %v15920_v0  ;;  %v6371_v23 = vmul.f32 %v15913_v59, %v15920_v0  ;;  %v6372_v61 = vmul.f32 %v15917_v48, %v15920_v0  ;;  %v6373_v14 = vmul.f32 %v13658_v60, %v15920_v0  ;;  %15921 = vst [vmem:[#allocation10_spill] sm:$0xff] %v13712_v31 }
 0x3dd   : > { %v6374_v41 = vmul.f32 %v13661_v34, %v15920_v0  ;;  %v6375_v55 = vmul.f32 %v13664_v2, %v15920_v0  ;;  %v6376_v63 = vmul.f32 %v13667_v8, %v15920_v0  ;;  %v13701_v50 = vadd.f32 %v6361_v39, %v6325_v43 }
 0x3de   : > { %v13703_v16 = vadd.f32 %v6362_v36, %v6326_v15  ;;  %v13705_v56 = vadd.f32 %v6363_v46, %v6327_v1  ;;  %v13707_v12 = vadd.f32 %v6364_v27, %v6328_v53  ;;  %v13714_v35 = vadd.f32 %v6365_v62, %v6329_v25  ;;  %v15922_v1 = vld [vmem:[#allocation8_spill] sm:$0xff] }
 0x3df   : > { %v13716_v54 = vadd.f32 %v6366_v51, %v6330_v33  ;;  %v13718_v4 = vadd.f32 %v6367_v3, %v6331_v13  ;;  %v13720_v24 = vadd.f32 %v6368_v29, %v6332_v42  ;;  %v13722_v40 = vadd.f32 %v6369_v38, %v6333_v47  ;;  %v15923_v53 = vld [vmem:[#allocation16_spill] sm:$0xff]  ;;  %v15924_v33 = vld [vmem:[#allocation11_spill] sm:$0xff] }
 0x3e0   : > { %v13724_v43 = vadd.f32 %v6370_v17, %v6334_v28  ;;  %v13726_v49 = vadd.f32 %v6371_v23, %v6335_v19  ;;  %v13728_v9 = vadd.f32 %v6372_v61, %v6336_v22  ;;  %v13730_v5 = vadd.f32 %v6373_v14, %v6337_v52  ;;  %v15925_v42 = vld [vmem:[#allocation12_spill] sm:$0xff] }
 0x3e1   : > { %v13732_v15 = vadd.f32 %v6374_v41, %v6338_v20  ;;  %v13734_v37 = vadd.f32 %v6375_v55, %v6339_v45  ;;  %v13736_v7 = vadd.f32 %v6376_v63, %v6340_v57  ;;  %v6396_v25 = vrot.slane %v15923_v53, %v15922_v1 }
 0x3e2   : > { %v13742_v13 = vrot.slane %v15923_v53, %v15924_v33  ;;  %v13746_v47 = vrot.slane %v15923_v53, %v15925_v42  ;;  %v13750_v28 = vmul.f32 %v13712_v31, %v13358_v18  ;;  %v13754_v19 = vmul.f32 %v13712_v31, %v13365_v6 }
 0x3e3   : > { %v13758_v22 = vmul.f32 %v13712_v31, %v13368_v11  ;;  %v13762_v52 = vmul.f32 %v13712_v31, %v13371_v26  ;;  %v13766_v20 = vmul.f32 %v13712_v31, %v13638_v30  ;;  %v6397_v45 = vmul.f32 %v13358_v18, %v6396_v25 }
 0x3e4   : > { %15926 = vst [vmem:[#allocation2_spill] sm:$0xff] %v13746_v47  ;;  %15927 = vst [vmem:[#allocation13_spill] sm:$0xff] %v13750_v28  ;;  %v6398_v57 = vmul.f32 %v13365_v6, %v6396_v25  ;;  %v6399_v0 = vmul.f32 %v13368_v11, %v6396_v25  ;;  %v6400_v39 = vmul.f32 %v13371_v26, %v6396_v25 }
 0x3e5   : > { %15928 = vst [vmem:[#allocation18_spill] sm:$0xff] %v13754_v19  ;;  %15929 = vst [vmem:[#allocation20_spill] sm:$0xff] %v13758_v22  ;;  %v6401_v36 = vmul.f32 %v13638_v30, %v6396_v25  ;;  %v6402_v46 = vmul.f32 %v13645_v32, %v6396_v25  ;;  %v6403_v27 = vmul.f32 %v13648_v58, %v6396_v25  ;;  %v6429_v41 = vrot.slane %v6397_v45, 1 }
 0x3e6   : > { %15930 = vst [vmem:[#allocation17_spill] sm:$0xff] %v13762_v52  ;;  %15931 = vst [vmem:[#allocation14_spill] sm:$0xff] %v13766_v20  ;;  %v6404_v62 = vmul.f32 %v13651_v44, %v6396_v25  ;;  %v6405_v51 = vmul.f32 %v15911_v10, %v6396_v25  ;;  %v6406_v3 = vmul.f32 %v15912_v21, %v6396_v25  ;;  %v6430_v55 = vrot.slane %v6398_v57, 1 }
 0x3e7   : > { %v6407_v29 = vmul.f32 %v15913_v59, %v6396_v25  ;;  %v6408_v38 = vmul.f32 %v15917_v48, %v6396_v25  ;;  %v6409_v17 = vmul.f32 %v13658_v60, %v6396_v25  ;;  %v6410_v23 = vmul.f32 %v13661_v34, %v6396_v25 }
 0x3e8   : > { %v6411_v61 = vmul.f32 %v13664_v2, %v6396_v25  ;;  %v6412_v14 = vmul.f32 %v13667_v8, %v6396_v25  ;;  %v6432_v63 = vrot.slane %v6399_v0, 1  ;;  %v6434_v53 = vrot.slane %v6400_v39, 1 }
 0x3e9   : > { %v6436_v42 = vrot.slane %v6401_v36, 1  ;;  %v6437_v33 = vrot.slane %v6402_v46, 1  ;;  %v6439_v1 = vrot.slane %v6403_v27, 1  ;;  %v6441_v20 = vrot.slane %v6404_v62, 1 }
 0x3ea   : > { %v6431_v52 = vsel %vm265_vm0, %v6429_v41, %v6430_v55  ;;  %v6433_v22 = vsel %vm265_vm0, %v6430_v55, %v6432_v63  ;;  %v6435_v19 = vsel %vm265_vm0, %v6432_v63, %v6434_v53  ;;  %v6443_v28 = vrot.slane %v6405_v51, 1 }
 0x3eb   : > { %v6438_v31 = vsel %vm265_vm0, %v6436_v42, %v6437_v33  ;;  %v6440_v47 = vsel %vm265_vm0, %v6437_v33, %v6439_v1  ;;  %v6442_v25 = vsel %vm265_vm0, %v6439_v1, %v6441_v20  ;;  %v6444_v45 = vrot.slane %v6406_v3, 1 }
 0x3ec   : > { %v6446_v57 = vrot.slane %v6407_v29, 1  ;;  %v6448_v0 = vrot.slane %v6408_v38, 1  ;;  %v6450_v39 = vrot.slane %v6409_v17, 1  ;;  %v6451_v36 = vrot.slane %v6410_v23, 1 }
 0x3ed   : > { %v6445_v46 = vsel %vm265_vm0, %v6443_v28, %v6444_v45  ;;  %v6453_v27 = vrot.slane %v6411_v61, 1  ;;  %v6455_v62 = vrot.slane %v6412_v14, 1  ;;  %v6473_v41 = vadd.f32 %v6431_v52, %v13701_v50 }
 0x3ee   : > { %v6447_v55 = vsel %vm265_vm0, %v6444_v45, %v6446_v57  ;;  %v6449_v51 = vsel %vm265_vm0, %v6446_v57, %v6448_v0  ;;  %v6452_v42 = vsel %vm265_vm0, %v6450_v39, %v6451_v36  ;;  %v6474_v33 = vadd.f32 %v6433_v22, %v13703_v16 }
 0x3ef   : > { %v6454_v1 = vsel %vm265_vm0, %v6451_v36, %v6453_v27  ;;  %v6456_v3 = vsel %vm265_vm0, %v6453_v27, %v6455_v62  ;;  %v6475_v29 = vadd.f32 %v6435_v19, %v13705_v56  ;;  %v6476_v28 = vadd.f32 %v6434_v53, %v13707_v12 }
 0x3f0   : > { %v6477_v38 = vadd.f32 %v6438_v31, %v13714_v35  ;;  %v6478_v50 = vadd.f32 %v6440_v47, %v13716_v54  ;;  %v6479_v52 = vadd.f32 %v6442_v25, %v13718_v4  ;;  %v6480_v17 = vadd.f32 %v6441_v20, %v13720_v24 }
 0x3f1   : > { %v6481_v23 = vadd.f32 %v6445_v46, %v13722_v40  ;;  %v6482_v16 = vadd.f32 %v6447_v55, %v13724_v43  ;;  %v6483_v22 = vadd.f32 %v6449_v51, %v13726_v49  ;;  %v6484_v61 = vadd.f32 %v6448_v0, %v13728_v9 }
 0x3f2   : > { %v6485_v56 = vadd.f32 %v6452_v42, %v13730_v5  ;;  %v6486_v12 = vadd.f32 %v6454_v1, %v13732_v15  ;;  %v6487_v31 = vadd.f32 %v6456_v3, %v13734_v37  ;;  %v6488_v35 = vadd.f32 %v6455_v62, %v13736_v7 }
 0x3f3   : > { %v6493_v54 = vmul.f32 %v13358_v18, %v13742_v13  ;;  %v6494_v4 = vmul.f32 %v13365_v6, %v13742_v13  ;;  %v6495_v24 = vmul.f32 %v13368_v11, %v13742_v13  ;;  %v6496_v40 = vmul.f32 %v13371_v26, %v13742_v13 }
 0x3f4   : > { %v6497_v43 = vmul.f32 %v13638_v30, %v13742_v13  ;;  %v6498_v49 = vmul.f32 %v13645_v32, %v13742_v13  ;;  %v6499_v9 = vmul.f32 %v13648_v58, %v13742_v13  ;;  %v6500_v5 = vmul.f32 %v13651_v44, %v13742_v13 }
 0x3f5   : > { %v6501_v15 = vmul.f32 %v15911_v10, %v13742_v13  ;;  %v6502_v37 = vmul.f32 %v15912_v21, %v13742_v13  ;;  %v6503_v7 = vmul.f32 %v15913_v59, %v13742_v13  ;;  %v6504_v47 = vmul.f32 %v15917_v48, %v13742_v13 }
 0x3f6   : > { %v6505_v19 = vmul.f32 %v13658_v60, %v13742_v13  ;;  %v6506_v20 = vmul.f32 %v13661_v34, %v13742_v13  ;;  %v6507_v14 = vmul.f32 %v13664_v2, %v13742_v13  ;;  %v6508_v63 = vmul.f32 %v13667_v8, %v13742_v13 }
 0x3f7   : > { %v6525_v53 = vrot.slane %v6493_v54, 2  ;;  %v6526_v25 = vrot.slane %v6494_v4, 2  ;;  %v6528_v45 = vrot.slane %v6495_v24, 2  ;;  %v6530_v57 = vrot.slane %v6496_v40, 2 }
 0x3f8   : > { %v6532_v0 = vrot.slane %v6497_v43, 2  ;;  %v6533_v39 = vrot.slane %v6498_v49, 2  ;;  %v6535_v36 = vrot.slane %v6499_v9, 2  ;;  %v6537_v46 = vrot.slane %v6500_v5, 2 }
 0x3f9   : > { %v6527_v27 = vsel %vm362_vm1, %v6525_v53, %v6526_v25  ;;  %v6529_v62 = vsel %vm362_vm1, %v6526_v25, %v6528_v45  ;;  %v6531_v55 = vsel %vm362_vm1, %v6528_v45, %v6530_v57  ;;  %v6539_v51 = vrot.slane %v6501_v15, 2 }
 0x3fa   : > { %v6534_v42 = vsel %vm362_vm1, %v6532_v0, %v6533_v39  ;;  %v6536_v1 = vsel %vm362_vm1, %v6533_v39, %v6535_v36  ;;  %v6538_v13 = vsel %vm362_vm1, %v6535_v36, %v6537_v46  ;;  %v6540_v3 = vrot.slane %v6502_v37, 2 }
 0x3fb   : > { %v6542_v54 = vrot.slane %v6503_v7, 2  ;;  %v6544_v4 = vrot.slane %v6504_v47, 2  ;;  %v6546_v24 = vrot.slane %v6505_v19, 2  ;;  %v6547_v40 = vrot.slane %v6506_v20, 2 }
 0x3fc   : > { %v6541_v43 = vsel %vm362_vm1, %v6539_v51, %v6540_v3  ;;  %v6549_v49 = vrot.slane %v6507_v14, 2  ;;  %v6551_v9 = vrot.slane %v6508_v63, 2  ;;  %v6569_v5 = vadd.f32 %v6527_v27, %v6473_v41 }
 0x3fd   : > { %v6543_v53 = vsel %vm362_vm1, %v6540_v3, %v6542_v54  ;;  %v6545_v15 = vsel %vm362_vm1, %v6542_v54, %v6544_v4  ;;  %v6548_v25 = vsel %vm362_vm1, %v6546_v24, %v6547_v40  ;;  %v6570_v45 = vadd.f32 %v6529_v62, %v6474_v33  ;;  %v15932_v24 = vld [vmem:[#allocation2_spill] sm:$0xff] }
 0x3fe   : > { %v6550_v0 = vsel %vm362_vm1, %v6547_v40, %v6549_v49  ;;  %v6552_v37 = vsel %vm362_vm1, %v6549_v49, %v6551_v9  ;;  %v6571_v7 = vadd.f32 %v6531_v55, %v6475_v29  ;;  %v6572_v47 = vadd.f32 %v6530_v57, %v6476_v28 }
 0x3ff   : > { %v6573_v19 = vadd.f32 %v6534_v42, %v6477_v38  ;;  %v6574_v20 = vadd.f32 %v6536_v1, %v6478_v50  ;;  %v6575_v39 = vadd.f32 %v6538_v13, %v6479_v52  ;;  %v6576_v36 = vadd.f32 %v6537_v46, %v6480_v17 }
 0x400   : > { %v6577_v14 = vadd.f32 %v6541_v43, %v6481_v23  ;;  %v6578_v63 = vadd.f32 %v6543_v53, %v6482_v16  ;;  %v6579_v41 = vadd.f32 %v6545_v15, %v6483_v22  ;;  %v6580_v27 = vadd.f32 %v6544_v4, %v6484_v61  ;;  %v15933_v22 = vld [vmem:[#allocation9_spill] sm:$0xff] }
 0x401   : > { %v6581_v51 = vadd.f32 %v6548_v25, %v6485_v56  ;;  %v6582_v3 = vadd.f32 %v6550_v0, %v6486_v12  ;;  %v6583_v54 = vadd.f32 %v6552_v37, %v6487_v31  ;;  %v6584_v8 = vadd.f32 %v6551_v9, %v6488_v35 }
 0x402   : > { %v6589_v33 = vmul.f32 %v13358_v18, %v15932_v24  ;;  %v6590_v62 = vmul.f32 %v13365_v6, %v15932_v24  ;;  %v6591_v29 = vmul.f32 %v13368_v11, %v15932_v24  ;;  %v6592_v28 = vmul.f32 %v13371_v26, %v15932_v24 }
 0x403   : > { %v6593_v38 = vmul.f32 %v13638_v30, %v15932_v24  ;;  %v6594_v50 = vmul.f32 %v13645_v32, %v15932_v24  ;;  %v6595_v52 = vmul.f32 %v13648_v58, %v15932_v24  ;;  %v6596_v18 = vmul.f32 %v13651_v44, %v15932_v24 }
 0x404   : > { %v6597_v6 = vmul.f32 %v15911_v10, %v15932_v24  ;;  %v6598_v11 = vmul.f32 %v15912_v21, %v15932_v24  ;;  %v6599_v26 = vmul.f32 %v15913_v59, %v15932_v24  ;;  %v6600_v30 = vmul.f32 %v15917_v48, %v15932_v24 }
 0x405   : > { %v6601_v17 = vmul.f32 %v13658_v60, %v15932_v24  ;;  %v6602_v23 = vmul.f32 %v13661_v34, %v15932_v24  ;;  %v6603_v16 = vmul.f32 %v13664_v2, %v15932_v24  ;;  %v6604_v61 = vmul.f32 %v15933_v22, %v15932_v24 }
 0x406   : > { %v6621_v56 = vrot.slane %v6589_v33, 3  ;;  %v6622_v12 = vrot.slane %v6590_v62, 3  ;;  %v6624_v31 = vrot.slane %v6591_v29, 3  ;;  %v6626_v35 = vrot.slane %v6592_v28, 3 }
 0x407   : > { %v6628_v57 = vrot.slane %v6593_v38, 3  ;;  %v6629_v46 = vrot.slane %v6594_v50, 3  ;;  %v6631_v55 = vrot.slane %v6595_v52, 3  ;;  %v6633_v42 = vrot.slane %v6596_v18, 3 }
 0x408   : > { %v6623_v1 = vsel %vm459_vm2, %v6621_v56, %v6622_v12  ;;  %v6625_v13 = vsel %vm459_vm2, %v6622_v12, %v6624_v31  ;;  %v6627_v4 = vsel %vm459_vm2, %v6624_v31, %v6626_v35  ;;  %v6635_v40 = vrot.slane %v6597_v6, 3 }
 0x409   : > { %v6630_v43 = vsel %vm459_vm2, %v6628_v57, %v6629_v46  ;;  %v6632_v49 = vsel %vm459_vm2, %v6629_v46, %v6631_v55  ;;  %v6634_v9 = vsel %vm459_vm2, %v6631_v55, %v6633_v42  ;;  %v6636_v53 = vrot.slane %v6598_v11, 3 }
 0x40a   : > { %v6638_v15 = vrot.slane %v6599_v26, 3  ;;  %v6640_v25 = vrot.slane %v6600_v30, 3  ;;  %v6642_v0 = vrot.slane %v6601_v17, 3  ;;  %v6643_v37 = vrot.slane %v6602_v23, 3 }
 0x40b   : > { %v6637_v24 = vsel %vm459_vm2, %v6635_v40, %v6636_v53  ;;  %v6645_v33 = vrot.slane %v6603_v16, 3  ;;  %v6647_v62 = vrot.slane %v6604_v61, 3  ;;  %v6665_v29 = vadd.f32 %v6623_v1, %v6569_v5 }
 0x40c   : > { %v6639_v28 = vsel %vm459_vm2, %v6636_v53, %v6638_v15  ;;  %v6641_v38 = vsel %vm459_vm2, %v6638_v15, %v6640_v25  ;;  %v6644_v50 = vsel %vm459_vm2, %v6642_v0, %v6643_v37  ;;  %v6666_v52 = vadd.f32 %v6625_v13, %v6570_v45  ;;  %v15934_v45 = vld [vmem:[#allocation10_spill] sm:$0xff] }
 0x40d   : > { %v6646_v18 = vsel %vm459_vm2, %v6643_v37, %v6645_v33  ;;  %v6648_v6 = vsel %vm459_vm2, %v6645_v33, %v6647_v62  ;;  %v6667_v11 = vadd.f32 %v6627_v4, %v6571_v7  ;;  %v6668_v26 = vadd.f32 %v6626_v35, %v6572_v47 }
 0x40e   : > { %v6669_v30 = vadd.f32 %v6630_v43, %v6573_v19  ;;  %v6670_v17 = vadd.f32 %v6632_v49, %v6574_v20  ;;  %v6671_v23 = vadd.f32 %v6634_v9, %v6575_v39  ;;  %v6672_v56 = vadd.f32 %v6633_v42, %v6576_v36  ;;  %v15935_v39 = vld [vmem:[#allocation13_spill] sm:$0xff]  ;;  %v15936_v36 = vld [vmem:[#allocation18_spill] sm:$0xff] }
 0x40f   : > { %v6673_v16 = vadd.f32 %v6637_v24, %v6577_v14  ;;  %v6674_v61 = vadd.f32 %v6639_v28, %v6578_v63  ;;  %v6675_v5 = vadd.f32 %v6641_v38, %v6579_v41  ;;  %v6676_v12 = vadd.f32 %v6640_v25, %v6580_v27  ;;  %v15938_v41 = vld [vmem:[#allocation17_spill] sm:$0xff]  ;;  %v15939_v27 = vld [vmem:[#allocation14_spill] sm:$0xff] }
 0x410   : > { %v6677_v31 = vadd.f32 %v6644_v50, %v6581_v51  ;;  %v6678_v57 = vadd.f32 %v6646_v18, %v6582_v3  ;;  %v6679_v46 = vadd.f32 %v6648_v6, %v6583_v54  ;;  %v6680_v55 = vadd.f32 %v6647_v62, %v6584_v8 }
 0x411   : > { %v6690_v1 = vmul.f32 %v15934_v45, %v13645_v32  ;;  %v6691_v13 = vmul.f32 %v15934_v45, %v13648_v58  ;;  %v6692_v7 = vmul.f32 %v15934_v45, %v13651_v44  ;;  %v6693_v47 = vmul.f32 %v15934_v45, %v15911_v10 }
 0x412   : > { %v6694_v19 = vmul.f32 %v15934_v45, %v15912_v21  ;;  %v6695_v20 = vmul.f32 %v15934_v45, %v15913_v59  ;;  %v6696_v8 = vmul.f32 %v15934_v45, %v15917_v48  ;;  %v6697_v32 = vmul.f32 %v15934_v45, %v13658_v60  ;;  %v15937_v59 = vld [vmem:[#allocation20_spill] sm:$0xff] }
 0x413   : > { %v6698_v58 = vmul.f32 %v15934_v45, %v13661_v34  ;;  %v6699_v44 = vmul.f32 %v15934_v45, %v13664_v2  ;;  %v6700_v10 = vmul.f32 %v15934_v45, %v15933_v22  ;;  %v6717_v21 = vrot.slane %v15935_v39, 4 }
 0x414   : > { %v6718_v14 = vrot.slane %v15936_v36, 4  ;;  %v6720_v63 = vrot.slane %v15937_v59, 4  ;;  %v6722_v48 = vrot.slane %v15938_v41, 4  ;;  %v6724_v51 = vrot.slane %v15939_v27, 4  ;;  %v14001_v59 = vld [vmem:[%s9526_s16 + $0x118] sm:$0xff] }
 0x415   : > { %v6725_v60 = vrot.slane %v6690_v1, 4  ;;  %v6727_v3 = vrot.slane %v6691_v13, 4  ;;  %v6729_v54 = vrot.slane %v6692_v7, 4  ;;  %v6731_v34 = vrot.slane %v6693_v47, 4 }
 0x416   : > { %v6719_v35 = vsel %vm556_vm3, %v6717_v21, %v6718_v14  ;;  %v6721_v2 = vsel %vm556_vm3, %v6718_v14, %v6720_v63  ;;  %v6723_v22 = vsel %vm556_vm3, %v6720_v63, %v6722_v48  ;;  %v6732_v42 = vrot.slane %v6694_v19, 4  ;;  %v15946_v21 = vld [vmem:[#allocation7_spill] sm:$0xff]  ;;  %v13998_v14 = vld [vmem:[%s9526_s16 + $0xf8] sm:$0xff] }
 0x417   : > { %v6726_v4 = vsel %vm556_vm3, %v6724_v51, %v6725_v60  ;;  %v6728_v40 = vsel %vm556_vm3, %v6725_v60, %v6727_v3  ;;  %v6730_v43 = vsel %vm556_vm3, %v6727_v3, %v6729_v54  ;;  %v6734_v49 = vrot.slane %v6695_v20, 4  ;;  %v13978_v20 = vld [vmem:[%s9526_s16 + $0xd8] sm:$0xff] }
 0x418   : > { %v6733_v9 = vsel %vm556_vm3, %v6731_v34, %v6732_v42  ;;  %v6736_v53 = vrot.slane %v6696_v8, 4  ;;  %v6738_v15 = vrot.slane %v6697_v32, 4  ;;  %v6739_v25 = vrot.slane %v6698_v58, 4  ;;  %v15942_v8 = vld [vmem:[#allocation4_spill] sm:$0xff]  ;;  %v15943_v58 = vld [vmem:[#allocation5_spill] sm:$0xff] }
 0x419   : > { %v6735_v0 = vsel %vm556_vm3, %v6732_v42, %v6734_v49  ;;  %v6741_v37 = vrot.slane %v6699_v44, 4  ;;  %v6743_v24 = vrot.slane %v6700_v10, 4  ;;  %v6761_v33 = vadd.f32 %v6719_v35, %v6665_v29  ;;  %v15944_v10 = vld [vmem:[#allocation6_spill] sm:$0xff]  ;;  %v14004_v63 = vld [vmem:[%s9526_s16 + $0x138] sm:$0xff] }
 0x41a   : > { %v6737_v62 = vsel %vm556_vm3, %v6734_v49, %v6736_v53  ;;  %v6740_v28 = vsel %vm556_vm3, %v6738_v15, %v6739_v25  ;;  %v6762_v38 = vadd.f32 %v6721_v2, %v6666_v52  ;;  %v6763_v50 = vadd.f32 %v6723_v22, %v6667_v11  ;;  %v13945_v52 = vld [vmem:[%s15437_s1 + $0x18] sm:$0xff] }
 0x41b   : > { %v6742_v18 = vsel %vm556_vm3, %v6739_v25, %v6741_v37  ;;  %v6744_v6 = vsel %vm556_vm3, %v6741_v37, %v6743_v24  ;;  %v6764_v45 = vadd.f32 %v6722_v48, %v6668_v26  ;;  %v6765_v1 = vadd.f32 %v6726_v4, %v6669_v30  ;;  %6777 = vst [vmem:[%s11008_s30 + $0x10] sm:$0xff] %v6761_v33  ;;  %v14017_v60 = vld [vmem:[%s9526_s16 + $0x158] sm:$0xff] }
 0x41c   : > { %v6766_v13 = vadd.f32 %v6728_v40, %v6670_v17  ;;  %v6767_v7 = vadd.f32 %v6730_v43, %v6671_v23  ;;  %v6768_v29 = vadd.f32 %v6729_v54, %v6672_v56  ;;  %v6769_v47 = vadd.f32 %v6733_v9, %v6673_v16  ;;  %6778 = vst [vmem:[%s11008_s30 + $0x30] sm:$0xff] %v6762_v38  ;;  %v13950_v23 = vld [vmem:[%s9526_s16 + $0x18] sm:$0xff] }
 0x41d   : > { %6779 = vst [vmem:[%s11008_s30 + $0x50] sm:$0xff] %v6763_v50  ;;  %15940 = vst [vmem:[#allocation19_spill] sm:$0xff] %v13945_v52  ;;  %v6770_v11 = vadd.f32 %v6735_v0, %v6674_v61  ;;  %v6771_v26 = vadd.f32 %v6737_v62, %v6675_v5  ;;  %v6772_v30 = vadd.f32 %v6736_v53, %v6676_v12  ;;  %v13957_v61 = vld [vmem:[%s9526_s16 + $0x38] sm:$0xff] }
 0x41e   : > { %v6773_v17 = vadd.f32 %v6740_v28, %v6677_v31  ;;  %6780 = vst [vmem:[%s11008_s30 + $0x70] sm:$0xf] %v6764_v45  ;;  %6781 = vst [vmem:[%s11008_s30 + $0x90] sm:$0xff] %v6765_v1  ;;  %v6774_v56 = vadd.f32 %v6742_v18, %v6678_v57  ;;  %v6775_v16 = vadd.f32 %v6744_v6, %v6679_v46  ;;  %v13960_v5 = vld [vmem:[%s9526_s16 + $0x58] sm:$0xff]  ;;  %v15941_v31 = vld [vmem:[#allocation3_spill] sm:$0xff] }
 0x41f   : > { %v6776_v19 = vadd.f32 %v6743_v24, %v6680_v55  ;;  %6782 = vst [vmem:[%s11008_s30 + $0xb0] sm:$0xff] %v6766_v13  ;;  %6783 = vst [vmem:[%s11008_s30 + $0xd0] sm:$0xff] %v6767_v7  ;;  %v13963_v12 = vld [vmem:[%s9526_s16 + $0x78] sm:$0xff]  ;;  %v6816_v57 = vrot.slane %v13945_v52, %v15941_v31  ;;  %v6852_v32 = vrot.slane %v13945_v52, %v15942_v8 }
 0x420   : > { %6784 = vst [vmem:[%s11008_s30 + $0xf0] sm:$0xf] %v6768_v29  ;;  %6785 = vst [vmem:[%s11008_s30 + $0x110] sm:$0xff] %v6769_v47  ;;  %v13972_v46 = vld [vmem:[%s9526_s16 + $0x98] sm:$0xff]  ;;  %v13984_v44 = vrot.slane %v13945_v52, %v15943_v58  ;;  %v13988_v39 = vrot.slane %v13945_v52, %v15944_v10  ;;  %v13992_v36 = vrot.slane %v13945_v52, %v15946_v21 }
 0x421   : > { %6786 = vst [vmem:[%s11008_s30 + $0x130] sm:$0xff] %v6770_v11  ;;  %6787 = vst [vmem:[%s11008_s30 + $0x150] sm:$0xff] %v6771_v26  ;;  %v13975_v55 = vld [vmem:[%s9526_s16 + $0xb8] sm:$0xff]  ;;  %v6817_v41 = vmul.f32 %v6816_v57, %v13950_v23  ;;  %v14008_v48 = vmul.f32 %v6816_v57, %v13957_v61  ;;  %v14011_v27 = vmul.f32 %v6816_v57, %v13960_v5 }
 0x422   : > { %6788 = vst [vmem:[%s11008_s30 + $0x170] sm:$0xf] %v6772_v30  ;;  %6789 = vst [vmem:[%s11008_s30 + $0x190] sm:$0xff] %v6773_v17  ;;  %v14014_v51 = vmul.f32 %v6816_v57, %v13963_v12  ;;  %v14020_v3 = vld [vmem:[%s9526_s16 + $0x178] sm:$0xff]  ;;  %v14026_v34 = vmul.f32 %v6816_v57, %v13972_v46  ;;  %v14029_v35 = vmul.f32 %v6816_v57, %v13975_v55 }
 0x423   : > { %15945 = vst [vmem:[#allocation15_spill] sm:$0xff] %v13988_v39  ;;  %15947 = vst [vmem:[#allocation16_spill] sm:$0xff] %v13992_v36  ;;  %v14023_v54 = vld [vmem:[%s9526_s16 + $0x198] sm:$0xff]  ;;  %v14032_v2 = vmul.f32 %v6816_v57, %v13978_v20  ;;  %v14035_v22 = vmul.f32 %v6816_v57, %v13998_v14  ;;  %v6825_v43 = vmul.f32 %v6816_v57, %v14001_v59 }
 0x424   : > { %6790 = vst [vmem:[%s11008_s30 + $0x1b0] sm:$0xff] %v6774_v56  ;;  %6791 = vst [vmem:[%s11008_s30 + $0x1d0] sm:$0xff] %v6775_v16  ;;  %v14038_v42 = vld [vmem:[%s9526_s16 + $0x1b8] sm:$0xff]  ;;  %v6826_v49 = vmul.f32 %v6816_v57, %v14004_v63  ;;  %v6827_v9 = vmul.f32 %v6816_v57, %v14017_v60  ;;  %v6828_v53 = vmul.f32 %v6816_v57, %v14020_v3 }
 0x425   : > { %6792 = vst [vmem:[%s11008_s30 + $0x1f0] sm:$0xf] %v6776_v19  ;;  %v14041_v4 = vld [vmem:[%s9526_s16 + $0x1d8] sm:$0xff]  ;;  %v6829_v15 = vmul.f32 %v6816_v57, %v14023_v54  ;;  %v6830_v25 = vmul.f32 %v6816_v57, %v14038_v42  ;;  %v6853_v24 = vmul.f32 %v6852_v32, %v13950_v23  ;;  %v6854_v33 = vmul.f32 %v6852_v32, %v13957_v61 }
 0x426   : > { %v14044_v40 = vld [vmem:[%s9526_s16 + $0x1f8] sm:$0xff]  ;;  %v6831_v0 = vmul.f32 %v6816_v57, %v14041_v4  ;;  %v6855_v62 = vmul.f32 %v6852_v32, %v13960_v5  ;;  %v6856_v28 = vmul.f32 %v6852_v32, %v13963_v12  ;;  %v6857_v38 = vmul.f32 %v6852_v32, %v13972_v46 }
 0x427   : > { %15948 = vst [vmem:[#allocation2_spill] sm:$0xff] %v14044_v40  ;;  %v6832_v37 = vmul.f32 %v6816_v57, %v14044_v40  ;;  %v6858_v50 = vmul.f32 %v6852_v32, %v13975_v55  ;;  %v6859_v18 = vmul.f32 %v6852_v32, %v13978_v20  ;;  %v6860_v6 = vmul.f32 %v6852_v32, %v13998_v14 }
 0x428   : > { %v6861_v45 = vmul.f32 %v6852_v32, %v14001_v59  ;;  %v6862_v1 = vmul.f32 %v6852_v32, %v14004_v63  ;;  %v6863_v13 = vmul.f32 %v6852_v32, %v14017_v60  ;;  %v6864_v7 = vmul.f32 %v6852_v32, %v14020_v3 }
 0x429   : > { %v6865_v29 = vmul.f32 %v6852_v32, %v14023_v54  ;;  %v6866_v47 = vmul.f32 %v6852_v32, %v14038_v42  ;;  %v6867_v11 = vmul.f32 %v6852_v32, %v14041_v4  ;;  %v6868_v26 = vmul.f32 %v6852_v32, %v14044_v40 }
 0x42a   : > { %v6885_v30 = vrot.slane %v6853_v24, 1  ;;  %v6886_v17 = vrot.slane %v6854_v33, 1  ;;  %v6888_v56 = vrot.slane %v6855_v62, 1  ;;  %v6890_v16 = vrot.slane %v6856_v28, 1 }
 0x42b   : > { %v6892_v19 = vrot.slane %v6857_v38, 1  ;;  %v6893_v57 = vrot.slane %v6858_v50, 1  ;;  %v6895_v21 = vrot.slane %v6859_v18, 1  ;;  %v6897_v10 = vrot.slane %v6860_v6, 1 }
 0x42c   : > { %v6887_v58 = vsel %vm265_vm0, %v6885_v30, %v6886_v17  ;;  %v6889_v8 = vsel %vm265_vm0, %v6886_v17, %v6888_v56  ;;  %v6891_v31 = vsel %vm265_vm0, %v6888_v56, %v6890_v16  ;;  %v6899_v52 = vrot.slane %v6861_v45, 1 }
 0x42d   : > { %v6894_v36 = vsel %vm265_vm0, %v6892_v19, %v6893_v57  ;;  %v6896_v39 = vsel %vm265_vm0, %v6893_v57, %v6895_v21  ;;  %v6898_v32 = vsel %vm265_vm0, %v6895_v21, %v6897_v10  ;;  %v6900_v24 = vrot.slane %v6862_v1, 1 }
 0x42e   : > { %v6902_v33 = vrot.slane %v6863_v13, 1  ;;  %v6904_v62 = vrot.slane %v6864_v7, 1  ;;  %v6906_v28 = vrot.slane %v6865_v29, 1  ;;  %v6907_v38 = vrot.slane %v6866_v47, 1 }
 0x42f   : > { %v6901_v50 = vsel %vm265_vm0, %v6899_v52, %v6900_v24  ;;  %v6909_v18 = vrot.slane %v6867_v11, 1  ;;  %v6911_v6 = vrot.slane %v6868_v26, 1  ;;  %v6929_v30 = vadd.f32 %v6887_v58, %v6817_v41 }
 0x430   : > { %v6903_v17 = vsel %vm265_vm0, %v6900_v24, %v6902_v33  ;;  %v6905_v45 = vsel %vm265_vm0, %v6902_v33, %v6904_v62  ;;  %v6908_v56 = vsel %vm265_vm0, %v6906_v28, %v6907_v38  ;;  %v6930_v19 = vadd.f32 %v6889_v8, %v14008_v48 }
 0x431   : > { %v6910_v21 = vsel %vm265_vm0, %v6907_v38, %v6909_v18  ;;  %v6912_v1 = vsel %vm265_vm0, %v6909_v18, %v6911_v6  ;;  %v6931_v13 = vadd.f32 %v6891_v31, %v14011_v27  ;;  %v6932_v7 = vadd.f32 %v6890_v16, %v14014_v51 }
 0x432   : > { %v6933_v52 = vadd.f32 %v6894_v36, %v14026_v34  ;;  %v6934_v58 = vadd.f32 %v6896_v39, %v14029_v35  ;;  %v6935_v41 = vadd.f32 %v6898_v32, %v14032_v2  ;;  %v6936_v29 = vadd.f32 %v6897_v10, %v14035_v22 }
 0x433   : > { %v6937_v47 = vadd.f32 %v6901_v50, %v6825_v43  ;;  %v6938_v11 = vadd.f32 %v6903_v17, %v6826_v49  ;;  %v6939_v26 = vadd.f32 %v6905_v45, %v6827_v9  ;;  %v6940_v8 = vadd.f32 %v6904_v62, %v6828_v53 }
 0x434   : > { %v6941_v48 = vadd.f32 %v6908_v56, %v6829_v15  ;;  %v6942_v57 = vadd.f32 %v6910_v21, %v6830_v25  ;;  %v6943_v24 = vadd.f32 %v6912_v1, %v6831_v0  ;;  %v6944_v33 = vadd.f32 %v6911_v6, %v6832_v37 }
 0x435   : > { %v6949_v31 = vmul.f32 %v13984_v44, %v13950_v23  ;;  %v6950_v36 = vmul.f32 %v13984_v44, %v13957_v61  ;;  %v6951_v39 = vmul.f32 %v13984_v44, %v13960_v5  ;;  %v6952_v10 = vmul.f32 %v13984_v44, %v13963_v12 }
 0x436   : > { %v6953_v27 = vmul.f32 %v13984_v44, %v13972_v46  ;;  %v6954_v51 = vmul.f32 %v13984_v44, %v13975_v55  ;;  %v6955_v34 = vmul.f32 %v13984_v44, %v13978_v20  ;;  %v6956_v35 = vmul.f32 %v13984_v44, %v13998_v14 }
 0x437   : > { %v6957_v2 = vmul.f32 %v13984_v44, %v14001_v59  ;;  %v6958_v22 = vmul.f32 %v13984_v44, %v14004_v63  ;;  %v6959_v43 = vmul.f32 %v13984_v44, %v14017_v60  ;;  %v6960_v49 = vmul.f32 %v13984_v44, %v14020_v3 }
 0x438   : > { %v6961_v9 = vmul.f32 %v13984_v44, %v14023_v54  ;;  %v6962_v53 = vmul.f32 %v13984_v44, %v14038_v42  ;;  %v6963_v15 = vmul.f32 %v13984_v44, %v14041_v4  ;;  %v6964_v25 = vmul.f32 %v13984_v44, %v14044_v40 }
 0x439   : > { %v6981_v0 = vrot.slane %v6949_v31, 2  ;;  %v6982_v37 = vrot.slane %v6950_v36, 2  ;;  %v6984_v16 = vrot.slane %v6951_v39, 2  ;;  %v6986_v32 = vrot.slane %v6952_v10, 2 }
 0x43a   : > { %v6988_v62 = vrot.slane %v6953_v27, 2  ;;  %v6989_v28 = vrot.slane %v6954_v51, 2  ;;  %v6991_v38 = vrot.slane %v6955_v34, 2  ;;  %v6993_v50 = vrot.slane %v6956_v35, 2 }
 0x43b   : > { %v6983_v18 = vsel %vm362_vm1, %v6981_v0, %v6982_v37  ;;  %v6985_v6 = vsel %vm362_vm1, %v6982_v37, %v6984_v16  ;;  %v6987_v17 = vsel %vm362_vm1, %v6984_v16, %v6986_v32  ;;  %v6995_v45 = vrot.slane %v6957_v2, 2 }
 0x43c   : > { %v6990_v56 = vsel %vm362_vm1, %v6988_v62, %v6989_v28  ;;  %v6992_v21 = vsel %vm362_vm1, %v6989_v28, %v6991_v38  ;;  %v6994_v44 = vsel %vm362_vm1, %v6991_v38, %v6993_v50  ;;  %v6996_v1 = vrot.slane %v6958_v22, 2 }
 0x43d   : > { %v6998_v31 = vrot.slane %v6959_v43, 2  ;;  %v7000_v36 = vrot.slane %v6960_v49, 2  ;;  %v7002_v39 = vrot.slane %v6961_v9, 2  ;;  %v7003_v10 = vrot.slane %v6962_v53, 2 }
 0x43e   : > { %v6997_v27 = vsel %vm362_vm1, %v6995_v45, %v6996_v1  ;;  %v7005_v51 = vrot.slane %v6963_v15, 2  ;;  %v7007_v34 = vrot.slane %v6964_v25, 2  ;;  %v7025_v35 = vadd.f32 %v6983_v18, %v6929_v30 }
 0x43f   : > { %v6999_v0 = vsel %vm362_vm1, %v6996_v1, %v6998_v31  ;;  %v7001_v2 = vsel %vm362_vm1, %v6998_v31, %v7000_v36  ;;  %v7004_v37 = vsel %vm362_vm1, %v7002_v39, %v7003_v10  ;;  %v7026_v16 = vadd.f32 %v6985_v6, %v6930_v19  ;;  %v15949_v19 = vld [vmem:[#allocation15_spill] sm:$0xff] }
 0x440   : > { %v7006_v62 = vsel %vm362_vm1, %v7003_v10, %v7005_v51  ;;  %v7008_v22 = vsel %vm362_vm1, %v7005_v51, %v7007_v34  ;;  %v7027_v43 = vadd.f32 %v6987_v17, %v6931_v13  ;;  %v7028_v49 = vadd.f32 %v6986_v32, %v6932_v7 }
 0x441   : > { %v7029_v9 = vadd.f32 %v6990_v56, %v6933_v52  ;;  %v7030_v53 = vadd.f32 %v6992_v21, %v6934_v58  ;;  %v7031_v28 = vadd.f32 %v6994_v44, %v6935_v41  ;;  %v7032_v38 = vadd.f32 %v6993_v50, %v6936_v29 }
 0x442   : > { %v7033_v15 = vadd.f32 %v6997_v27, %v6937_v47  ;;  %v7034_v25 = vadd.f32 %v6999_v0, %v6938_v11  ;;  %v7035_v30 = vadd.f32 %v7001_v2, %v6939_v26  ;;  %v7036_v18 = vadd.f32 %v7000_v36, %v6940_v8 }
 0x443   : > { %v7037_v45 = vadd.f32 %v7004_v37, %v6941_v48  ;;  %v7038_v1 = vadd.f32 %v7006_v62, %v6942_v57  ;;  %v7039_v31 = vadd.f32 %v7008_v22, %v6943_v24  ;;  %v7040_v40 = vadd.f32 %v7007_v34, %v6944_v33  ;;  %v15950_v33 = vld [vmem:[#allocation2_spill] sm:$0xff] }
 0x444   : > { %v7045_v6 = vmul.f32 %v15949_v19, %v13950_v23  ;;  %v7046_v39 = vmul.f32 %v15949_v19, %v13957_v61  ;;  %v7047_v13 = vmul.f32 %v15949_v19, %v13960_v5  ;;  %v7048_v7 = vmul.f32 %v15949_v19, %v13963_v12 }
 0x445   : > { %v7049_v52 = vmul.f32 %v15949_v19, %v13972_v46  ;;  %v7050_v58 = vmul.f32 %v15949_v19, %v13975_v55  ;;  %v7051_v41 = vmul.f32 %v15949_v19, %v13978_v20  ;;  %v7052_v29 = vmul.f32 %v15949_v19, %v13998_v14 }
 0x446   : > { %v7053_v47 = vmul.f32 %v15949_v19, %v14001_v59  ;;  %v7054_v11 = vmul.f32 %v15949_v19, %v14004_v63  ;;  %v7055_v26 = vmul.f32 %v15949_v19, %v14017_v60  ;;  %v7056_v8 = vmul.f32 %v15949_v19, %v14020_v3 }
 0x447   : > { %v7057_v48 = vmul.f32 %v15949_v19, %v14023_v54  ;;  %v7058_v57 = vmul.f32 %v15949_v19, %v14038_v42  ;;  %v7059_v24 = vmul.f32 %v15949_v19, %v14041_v4  ;;  %v7060_v32 = vmul.f32 %v15949_v19, %v15950_v33 }
 0x448   : > { %v7077_v50 = vrot.slane %v7045_v6, 3  ;;  %v7078_v17 = vrot.slane %v7046_v39, 3  ;;  %v7080_v56 = vrot.slane %v7047_v13, 3  ;;  %v7082_v21 = vrot.slane %v7048_v7, 3 }
 0x449   : > { %v7084_v44 = vrot.slane %v7049_v52, 3  ;;  %v7085_v36 = vrot.slane %v7050_v58, 3  ;;  %v7087_v10 = vrot.slane %v7051_v41, 3  ;;  %v7089_v27 = vrot.slane %v7052_v29, 3 }
 0x44a   : > { %v7079_v51 = vsel %vm459_vm2, %v7077_v50, %v7078_v17  ;;  %v7081_v34 = vsel %vm459_vm2, %v7078_v17, %v7080_v56  ;;  %v7083_v0 = vsel %vm459_vm2, %v7080_v56, %v7082_v21  ;;  %v7091_v2 = vrot.slane %v7053_v47, 3 }
 0x44b   : > { %v7086_v37 = vsel %vm459_vm2, %v7084_v44, %v7085_v36  ;;  %v7088_v62 = vsel %vm459_vm2, %v7085_v36, %v7087_v10  ;;  %v7090_v22 = vsel %vm459_vm2, %v7087_v10, %v7089_v27  ;;  %v7092_v19 = vrot.slane %v7054_v11, 3 }
 0x44c   : > { %v7094_v6 = vrot.slane %v7055_v26, 3  ;;  %v7096_v39 = vrot.slane %v7056_v8, 3  ;;  %v7098_v13 = vrot.slane %v7057_v48, 3  ;;  %v7099_v7 = vrot.slane %v7058_v57, 3 }
 0x44d   : > { %v7093_v52 = vsel %vm459_vm2, %v7091_v2, %v7092_v19  ;;  %v7101_v58 = vrot.slane %v7059_v24, 3  ;;  %v7103_v41 = vrot.slane %v7060_v32, 3  ;;  %v7121_v29 = vadd.f32 %v7079_v51, %v7025_v35 }
 0x44e   : > { %v7095_v50 = vsel %vm459_vm2, %v7092_v19, %v7094_v6  ;;  %v7097_v47 = vsel %vm459_vm2, %v7094_v6, %v7096_v39  ;;  %v7100_v17 = vsel %vm459_vm2, %v7098_v13, %v7099_v7  ;;  %v7122_v56 = vadd.f32 %v7081_v34, %v7026_v16  ;;  %v15951_v16 = vld [vmem:[#allocation16_spill] sm:$0xff] }
 0x44f   : > { %v7102_v44 = vsel %vm459_vm2, %v7099_v7, %v7101_v58  ;;  %v7104_v11 = vsel %vm459_vm2, %v7101_v58, %v7103_v41  ;;  %v7123_v26 = vadd.f32 %v7083_v0, %v7027_v43  ;;  %v7124_v8 = vadd.f32 %v7082_v21, %v7028_v49 }
 0x450   : > { %v7125_v48 = vadd.f32 %v7086_v37, %v7029_v9  ;;  %v7126_v57 = vadd.f32 %v7088_v62, %v7030_v53  ;;  %v7127_v36 = vadd.f32 %v7090_v22, %v7031_v28  ;;  %v7128_v10 = vadd.f32 %v7089_v27, %v7032_v38 }
 0x451   : > { %v7129_v24 = vadd.f32 %v7093_v52, %v7033_v15  ;;  %v7130_v32 = vadd.f32 %v7095_v50, %v7034_v25  ;;  %v7131_v35 = vadd.f32 %v7097_v47, %v7035_v30  ;;  %v7132_v51 = vadd.f32 %v7096_v39, %v7036_v18  ;;  %v15952_v30 = vld [vmem:[#allocation2_spill] sm:$0xff] }
 0x452   : > { %v7133_v2 = vadd.f32 %v7100_v17, %v7037_v45  ;;  %v7134_v19 = vadd.f32 %v7102_v44, %v7038_v1  ;;  %v7135_v6 = vadd.f32 %v7104_v11, %v7039_v31  ;;  %v7136_v33 = vadd.f32 %v7103_v41, %v7040_v40 }
 0x453   : > { %v7141_v34 = vmul.f32 %v15951_v16, %v13950_v23  ;;  %v7142_v13 = vmul.f32 %v15951_v16, %v13957_v61  ;;  %v7143_v43 = vmul.f32 %v15951_v16, %v13960_v5  ;;  %v7144_v49 = vmul.f32 %v15951_v16, %v13963_v12 }
 0x454   : > { %v7145_v9 = vmul.f32 %v15951_v16, %v13972_v46  ;;  %v7146_v53 = vmul.f32 %v15951_v16, %v13975_v55  ;;  %v7147_v40 = vmul.f32 %v15951_v16, %v13978_v20  ;;  %v7148_v23 = vmul.f32 %v15951_v16, %v13998_v14 }
 0x455   : > { %v7149_v61 = vmul.f32 %v15951_v16, %v14001_v59  ;;  %v7150_v5 = vmul.f32 %v15951_v16, %v14004_v63  ;;  %v7151_v12 = vmul.f32 %v15951_v16, %v14017_v60  ;;  %v7152_v28 = vmul.f32 %v15951_v16, %v14020_v3 }
 0x456   : > { %v7153_v38 = vmul.f32 %v15951_v16, %v14023_v54  ;;  %v7154_v15 = vmul.f32 %v15951_v16, %v14038_v42  ;;  %v7155_v25 = vmul.f32 %v15951_v16, %v14041_v4  ;;  %v7156_v18 = vmul.f32 %v15951_v16, %v15952_v30 }
 0x457   : > { %v7173_v45 = vrot.slane %v7141_v34, 4  ;;  %v7174_v1 = vrot.slane %v7142_v13, 4  ;;  %v7176_v31 = vrot.slane %v7143_v43, 4  ;;  %v7178_v21 = vrot.slane %v7144_v49, 4 }
 0x458   : > { %v7180_v27 = vrot.slane %v7145_v9, 4  ;;  %v7181_v0 = vrot.slane %v7146_v53, 4  ;;  %v7183_v37 = vrot.slane %v7147_v40, 4  ;;  %v7185_v62 = vrot.slane %v7148_v23, 4 }
 0x459   : > { %v7175_v22 = vsel %vm556_vm3, %v7173_v45, %v7174_v1  ;;  %v7177_v39 = vsel %vm556_vm3, %v7174_v1, %v7176_v31  ;;  %v7179_v7 = vsel %vm556_vm3, %v7176_v31, %v7178_v21  ;;  %v7187_v52 = vrot.slane %v7149_v61, 4 }
 0x45a   : > { %v7182_v58 = vsel %vm556_vm3, %v7180_v27, %v7181_v0  ;;  %v7184_v41 = vsel %vm556_vm3, %v7181_v0, %v7183_v37  ;;  %v7186_v50 = vsel %vm556_vm3, %v7183_v37, %v7185_v62  ;;  %v7188_v47 = vrot.slane %v7150_v5, 4  ;;  %v15954_v0 = vld [vmem:[#allocation8_spill] sm:$0xff]  ;;  %v15955_v37 = vld [vmem:[#allocation19_spill] sm:$0xff] }
 0x45b   : > { %v7190_v17 = vrot.slane %v7151_v12, 4  ;;  %v7192_v44 = vrot.slane %v7152_v28, 4  ;;  %v7194_v11 = vrot.slane %v7153_v38, 4  ;;  %v7195_v16 = vrot.slane %v7154_v15, 4  ;;  %v14224_v38 = vld [vmem:[%s15437_s1 + $0x38] sm:$0xff] }
 0x45c   : > { %v7189_v34 = vsel %vm556_vm3, %v7187_v52, %v7188_v47  ;;  %v7197_v13 = vrot.slane %v7155_v25, 4  ;;  %v7199_v43 = vrot.slane %v7156_v18, 4  ;;  %v7217_v49 = vadd.f32 %v7175_v22, %v7121_v29  ;;  %15953 = vst [vmem:[#allocation9_spill] sm:$0xff] %v14224_v38  ;;  %v14258_v52 = vld [vmem:[%s9526_s16 + $0x238] sm:$0xff] }
 0x45d   : > { %v7191_v9 = vsel %vm556_vm3, %v7188_v47, %v7190_v17  ;;  %v7193_v53 = vsel %vm556_vm3, %v7190_v17, %v7192_v44  ;;  %v7196_v40 = vsel %vm556_vm3, %v7194_v11, %v7195_v16  ;;  %v7218_v23 = vadd.f32 %v7177_v39, %v7122_v56  ;;  %v15956_v39 = vld [vmem:[#allocation11_spill] sm:$0xff]  ;;  %15970 = vst [vmem:[#allocation16_spill] sm:$0xff] %v14258_v52 }
 0x45e   : > { %v7198_v61 = vsel %vm556_vm3, %v7195_v16, %v7197_v13  ;;  %v7200_v5 = vsel %vm556_vm3, %v7197_v13, %v7199_v43  ;;  %v7219_v12 = vadd.f32 %v7179_v7, %v7123_v26  ;;  %v7220_v28 = vadd.f32 %v7178_v21, %v7124_v8 }
 0x45f   : > { %v7221_v15 = vadd.f32 %v7182_v58, %v7125_v48  ;;  %v7222_v29 = vadd.f32 %v7184_v41, %v7126_v57  ;;  %v7223_v25 = vadd.f32 %v7186_v50, %v7127_v36  ;;  %v7224_v18 = vadd.f32 %v7185_v62, %v7128_v10  ;;  %v15957_v57 = vld [vmem:[#allocation12_spill] sm:$0xff]  ;;  %v15959_v10 = vld [vmem:[#allocation3_spill] sm:$0xff]  ;;  %v14261_v58 = vld [vmem:[%s9526_s16 + $0x258] sm:$0xff] }
 0x460   : > { %v7225_v45 = vadd.f32 %v7189_v34, %v7129_v24  ;;  %v7226_v1 = vadd.f32 %v7191_v9, %v7130_v32  ;;  %v7227_v56 = vadd.f32 %v7193_v53, %v7131_v35  ;;  %v7228_v31 = vadd.f32 %v7192_v44, %v7132_v51  ;;  %v14239_v32 = vld [vmem:[%s9526_s16 + $0x218] sm:$0xff]  ;;  %v15962_v35 = vld [vmem:[#allocation4_spill] sm:$0xff]  ;;  %v15968_v62 = vld [vmem:[#allocation7_spill] sm:$0xff]  ;;  %15971 = vst [vmem:[#allocation2_spill] sm:$0xff] %v14261_v58 }
 0x461   : > { %v7229_v27 = vadd.f32 %v7196_v40, %v7133_v2  ;;  %v7230_v26 = vadd.f32 %v7198_v61, %v7134_v19  ;;  %v7231_v8 = vadd.f32 %v7200_v5, %v7135_v6  ;;  %v7232_v21 = vadd.f32 %v7199_v43, %v7136_v33  ;;  %15961 = vst [vmem:[#allocation18_spill] sm:$0xff] %v14239_v32  ;;  %v15964_v33 = vld [vmem:[#allocation5_spill] sm:$0xff]  ;;  %v15966_v19 = vld [vmem:[#allocation6_spill] sm:$0xff] }
 0x462   : > { %v7252_v22 = vrot.slane %v15955_v37, %v15954_v0  ;;  %v7288_v48 = vrot.slane %v15955_v37, %v15956_v39  ;;  %v14232_v36 = vrot.slane %v15955_v37, %v15957_v57  ;;  %v14236_v24 = vrot.slane %v14224_v38, %v15959_v10  ;;  %v14264_v41 = vld [vmem:[%s9526_s16 + $0x278] sm:$0xff] }
 0x463   : > { %v14243_v51 = vrot.slane %v14224_v38, %v15962_v35  ;;  %v14247_v2 = vrot.slane %v14224_v38, %v15964_v33  ;;  %v14251_v6 = vrot.slane %v14224_v38, %v15966_v19  ;;  %v14255_v7 = vrot.slane %v14224_v38, %v15968_v62  ;;  %15972 = vst [vmem:[#allocation19_spill] sm:$0xff] %v14264_v41 }
 0x464   : > { %15958 = vst [vmem:[#allocation10_spill] sm:$0xff] %v14232_v36  ;;  %15960 = vst [vmem:[#allocation13_spill] sm:$0xff] %v14236_v24  ;;  %v7253_v50 = vmul.f32 %v7252_v22, %v13972_v46  ;;  %v7254_v47 = vmul.f32 %v7252_v22, %v13975_v55  ;;  %v7255_v17 = vmul.f32 %v7252_v22, %v13978_v20 }
 0x465   : > { %15963 = vst [vmem:[#allocation20_spill] sm:$0xff] %v14243_v51  ;;  %15965 = vst [vmem:[#allocation17_spill] sm:$0xff] %v14247_v2  ;;  %v7256_v44 = vmul.f32 %v7252_v22, %v13998_v14  ;;  %v7257_v11 = vmul.f32 %v7252_v22, %v14001_v59  ;;  %v7258_v16 = vmul.f32 %v7252_v22, %v14004_v63 }
 0x466   : > { %15967 = vst [vmem:[#allocation14_spill] sm:$0xff] %v14251_v6  ;;  %15969 = vst [vmem:[#allocation15_spill] sm:$0xff] %v14255_v7  ;;  %v7259_v34 = vmul.f32 %v7252_v22, %v14017_v60  ;;  %v7260_v13 = vmul.f32 %v7252_v22, %v14020_v3  ;;  %v7261_v43 = vmul.f32 %v7252_v22, %v14023_v54 }
 0x467   : > { %v7262_v9 = vmul.f32 %v7252_v22, %v14038_v42  ;;  %v7263_v53 = vmul.f32 %v7252_v22, %v14041_v4  ;;  %v7264_v40 = vmul.f32 %v7252_v22, %v15952_v30  ;;  %v7265_v61 = vmul.f32 %v14239_v32, %v7252_v22 }
 0x468   : > { %v7266_v5 = vmul.f32 %v14258_v52, %v7252_v22  ;;  %v7267_v37 = vmul.f32 %v14261_v58, %v7252_v22  ;;  %v7268_v62 = vmul.f32 %v14264_v41, %v7252_v22  ;;  %v7269_v19 = vadd.f32 %v7253_v50, %v7217_v49 }
 0x469   : > { %v7270_v33 = vadd.f32 %v7254_v47, %v7218_v23  ;;  %v7271_v35 = vadd.f32 %v7255_v17, %v7219_v12  ;;  %v7272_v10 = vadd.f32 %v7256_v44, %v7220_v28  ;;  %v7273_v57 = vadd.f32 %v7257_v11, %v7221_v15 }
 0x46a   : > { %v7274_v39 = vadd.f32 %v7258_v16, %v7222_v29  ;;  %v7275_v38 = vadd.f32 %v7259_v34, %v7223_v25  ;;  %v7276_v0 = vadd.f32 %v7260_v13, %v7224_v18  ;;  %v7277_v7 = vadd.f32 %v7261_v43, %v7225_v45 }
 0x46b   : > { %v7278_v6 = vadd.f32 %v7262_v9, %v7226_v1  ;;  %v7279_v2 = vadd.f32 %v7263_v53, %v7227_v56  ;;  %v7280_v51 = vadd.f32 %v7264_v40, %v7228_v31  ;;  %v7281_v24 = vadd.f32 %v7265_v61, %v7229_v27  ;;  %v15973_v56 = vld [vmem:[#allocation18_spill] sm:$0xff]  ;;  %v15974_v27 = vld [vmem:[#allocation16_spill] sm:$0xff] }
 0x46c   : > { %v7282_v36 = vadd.f32 %v7266_v5, %v7230_v26  ;;  %v7283_v32 = vadd.f32 %v7267_v37, %v7231_v8  ;;  %v7284_v52 = vadd.f32 %v7268_v62, %v7232_v21  ;;  %v7289_v58 = vmul.f32 %v7288_v48, %v13972_v46  ;;  %v15975_v8 = vld [vmem:[#allocation2_spill] sm:$0xff] }
 0x46d   : > { %v7290_v22 = vmul.f32 %v7288_v48, %v13975_v55  ;;  %v7291_v49 = vmul.f32 %v7288_v48, %v13978_v20  ;;  %v7292_v23 = vmul.f32 %v7288_v48, %v13998_v14  ;;  %v7293_v12 = vmul.f32 %v7288_v48, %v14001_v59 }
 0x46e   : > { %v7294_v28 = vmul.f32 %v7288_v48, %v14004_v63  ;;  %v7295_v15 = vmul.f32 %v7288_v48, %v14017_v60  ;;  %v7296_v29 = vmul.f32 %v7288_v48, %v14020_v3  ;;  %v7297_v25 = vmul.f32 %v7288_v48, %v14023_v54 }
 0x46f   : > { %v7298_v18 = vmul.f32 %v7288_v48, %v14038_v42  ;;  %v7299_v45 = vmul.f32 %v7288_v48, %v14041_v4  ;;  %v7300_v1 = vmul.f32 %v7288_v48, %v15952_v30  ;;  %v7301_v31 = vmul.f32 %v15973_v56, %v7288_v48 }
 0x470   : > { %v7302_v26 = vmul.f32 %v15974_v27, %v7288_v48  ;;  %v7303_v21 = vmul.f32 %v15975_v8, %v7288_v48  ;;  %v7304_v62 = vmul.f32 %v14264_v41, %v7288_v48  ;;  %v7321_v50 = vrot.slane %v7289_v58, 1 }
 0x471   : > { %v7322_v47 = vrot.slane %v7290_v22, 1  ;;  %v7324_v17 = vrot.slane %v7291_v49, 1  ;;  %v7326_v44 = vrot.slane %v7292_v23, 1  ;;  %v7328_v11 = vrot.slane %v7293_v12, 1 }
 0x472   : > { %v7329_v16 = vrot.slane %v7294_v28, 1  ;;  %v7331_v34 = vrot.slane %v7295_v15, 1  ;;  %v7333_v13 = vrot.slane %v7296_v29, 1  ;;  %v7335_v40 = vrot.slane %v7297_v25, 1 }
 0x473   : > { %v7323_v43 = vsel %vm265_vm0, %v7321_v50, %v7322_v47  ;;  %v7325_v9 = vsel %vm265_vm0, %v7322_v47, %v7324_v17  ;;  %v7327_v53 = vsel %vm265_vm0, %v7324_v17, %v7326_v44  ;;  %v7336_v58 = vrot.slane %v7298_v18, 1 }
 0x474   : > { %v7330_v61 = vsel %vm265_vm0, %v7328_v11, %v7329_v16  ;;  %v7332_v5 = vsel %vm265_vm0, %v7329_v16, %v7331_v34  ;;  %v7334_v48 = vsel %vm265_vm0, %v7331_v34, %v7333_v13  ;;  %v7338_v37 = vrot.slane %v7299_v45, 1 }
 0x475   : > { %v7340_v22 = vrot.slane %v7300_v1, 1  ;;  %v7342_v49 = vrot.slane %v7301_v31, 1  ;;  %v7343_v23 = vrot.slane %v7302_v26, 1  ;;  %v7337_v12 = vsel %vm265_vm0, %v7335_v40, %v7336_v58 }
 0x476   : > { %v7345_v28 = vrot.slane %v7303_v21, 1  ;;  %v7347_v15 = vrot.slane %v7304_v62, 1  ;;  %v7365_v29 = vadd.f32 %v7323_v43, %v7269_v19  ;;  %v7339_v50 = vsel %vm265_vm0, %v7336_v58, %v7338_v37 }
 0x477   : > { %v7341_v25 = vsel %vm265_vm0, %v7338_v37, %v7340_v22  ;;  %v7344_v47 = vsel %vm265_vm0, %v7342_v49, %v7343_v23  ;;  %v7366_v17 = vadd.f32 %v7325_v9, %v7270_v33  ;;  %v7367_v45 = vadd.f32 %v7327_v53, %v7271_v35  ;;  %v15976_v33 = vld [vmem:[#allocation10_spill] sm:$0xff] }
 0x478   : > { %v7346_v11 = vsel %vm265_vm0, %v7343_v23, %v7345_v28  ;;  %v7348_v18 = vsel %vm265_vm0, %v7345_v28, %v7347_v15  ;;  %v7368_v1 = vadd.f32 %v7326_v44, %v7272_v10  ;;  %v7369_v31 = vadd.f32 %v7330_v61, %v7273_v57 }
 0x479   : > { %v7370_v26 = vadd.f32 %v7332_v5, %v7274_v39  ;;  %v7371_v16 = vadd.f32 %v7334_v48, %v7275_v38  ;;  %v7372_v34 = vadd.f32 %v7333_v13, %v7276_v0  ;;  %v7373_v21 = vadd.f32 %v7337_v12, %v7277_v7 }
 0x47a   : > { %v7374_v62 = vadd.f32 %v7339_v50, %v7278_v6  ;;  %v7375_v19 = vadd.f32 %v7341_v25, %v7279_v2  ;;  %v7376_v43 = vadd.f32 %v7340_v22, %v7280_v51  ;;  %v7377_v40 = vadd.f32 %v7344_v47, %v7281_v24 }
 0x47b   : > { %v7378_v58 = vadd.f32 %v7346_v11, %v7282_v36  ;;  %v7379_v37 = vadd.f32 %v7348_v18, %v7283_v32  ;;  %v7380_v41 = vadd.f32 %v7347_v15, %v7284_v52  ;;  %v7385_v9 = vmul.f32 %v15976_v33, %v13972_v46  ;;  %v15977_v52 = vld [vmem:[#allocation19_spill] sm:$0xff] }
 0x47c   : > { %v7386_v49 = vmul.f32 %v15976_v33, %v13975_v55  ;;  %v7387_v57 = vmul.f32 %v15976_v33, %v13978_v20  ;;  %v7388_v38 = vmul.f32 %v15976_v33, %v13998_v14  ;;  %v7389_v0 = vmul.f32 %v15976_v33, %v14001_v59 }
 0x47d   : > { %v7390_v39 = vmul.f32 %v15976_v33, %v14004_v63  ;;  %v7391_v36 = vmul.f32 %v15976_v33, %v14017_v60  ;;  %v7392_v10 = vmul.f32 %v15976_v33, %v14020_v3  ;;  %v7393_v24 = vmul.f32 %v15976_v33, %v14023_v54 }
 0x47e   : > { %v7394_v32 = vmul.f32 %v15976_v33, %v14038_v42  ;;  %v7395_v35 = vmul.f32 %v15976_v33, %v14041_v4  ;;  %v7396_v51 = vmul.f32 %v15976_v33, %v15952_v30  ;;  %v7397_v2 = vmul.f32 %v15973_v56, %v15976_v33 }
 0x47f   : > { %v7398_v6 = vmul.f32 %v15974_v27, %v15976_v33  ;;  %v7399_v7 = vmul.f32 %v15975_v8, %v15976_v33  ;;  %v7400_v44 = vmul.f32 %v15977_v52, %v15976_v33  ;;  %v7417_v13 = vrot.slane %v7385_v9, 2 }
 0x480   : > { %v7418_v53 = vrot.slane %v7386_v49, 2  ;;  %v7420_v61 = vrot.slane %v7387_v57, 2  ;;  %v7422_v5 = vrot.slane %v7388_v38, 2  ;;  %v7424_v48 = vrot.slane %v7389_v0, 2 }
 0x481   : > { %v7425_v22 = vrot.slane %v7390_v39, 2  ;;  %v7427_v23 = vrot.slane %v7391_v36, 2  ;;  %v7429_v12 = vrot.slane %v7392_v10, 2  ;;  %v7431_v25 = vrot.slane %v7393_v24, 2 }
 0x482   : > { %v7419_v28 = vsel %vm362_vm1, %v7417_v13, %v7418_v53  ;;  %v7421_v15 = vsel %vm362_vm1, %v7418_v53, %v7420_v61  ;;  %v7423_v50 = vsel %vm362_vm1, %v7420_v61, %v7422_v5  ;;  %v7432_v33 = vrot.slane %v7394_v32, 2 }
 0x483   : > { %v7426_v47 = vsel %vm362_vm1, %v7424_v48, %v7425_v22  ;;  %v7428_v11 = vsel %vm362_vm1, %v7425_v22, %v7427_v23  ;;  %v7430_v18 = vsel %vm362_vm1, %v7427_v23, %v7429_v12  ;;  %v7434_v9 = vrot.slane %v7395_v35, 2 }
 0x484   : > { %v7436_v49 = vrot.slane %v7396_v51, 2  ;;  %v7438_v57 = vrot.slane %v7397_v2, 2  ;;  %v7439_v38 = vrot.slane %v7398_v6, 2  ;;  %v7433_v0 = vsel %vm362_vm1, %v7431_v25, %v7432_v33 }
 0x485   : > { %v7441_v39 = vrot.slane %v7399_v7, 2  ;;  %v7443_v36 = vrot.slane %v7400_v44, 2  ;;  %v7461_v10 = vadd.f32 %v7419_v28, %v7365_v29  ;;  %v7435_v13 = vsel %vm362_vm1, %v7432_v33, %v7434_v9 }
 0x486   : > { %v7437_v24 = vsel %vm362_vm1, %v7434_v9, %v7436_v49  ;;  %v7440_v53 = vsel %vm362_vm1, %v7438_v57, %v7439_v38  ;;  %v7462_v61 = vadd.f32 %v7421_v15, %v7366_v17  ;;  %v7463_v35 = vadd.f32 %v7423_v50, %v7367_v45  ;;  %v15978_v17 = vld [vmem:[#allocation13_spill] sm:$0xff] }
 0x487   : > { %v7442_v48 = vsel %vm362_vm1, %v7439_v38, %v7441_v39  ;;  %v7444_v32 = vsel %vm362_vm1, %v7441_v39, %v7443_v36  ;;  %v7464_v51 = vadd.f32 %v7422_v5, %v7368_v1  ;;  %v7465_v2 = vadd.f32 %v7426_v47, %v7369_v31 }
 0x488   : > { %v7466_v6 = vadd.f32 %v7428_v11, %v7370_v26  ;;  %v7467_v22 = vadd.f32 %v7430_v18, %v7371_v16  ;;  %v7468_v23 = vadd.f32 %v7429_v12, %v7372_v34  ;;  %v7469_v7 = vadd.f32 %v7433_v0, %v7373_v21 }
 0x489   : > { %v7470_v44 = vadd.f32 %v7435_v13, %v7374_v62  ;;  %v7471_v29 = vadd.f32 %v7437_v24, %v7375_v19  ;;  %v7472_v28 = vadd.f32 %v7436_v49, %v7376_v43  ;;  %v7473_v25 = vadd.f32 %v7440_v53, %v7377_v40 }
 0x48a   : > { %v7474_v33 = vadd.f32 %v7442_v48, %v7378_v58  ;;  %v7475_v9 = vadd.f32 %v7444_v32, %v7379_v37  ;;  %v7476_v52 = vadd.f32 %v7443_v36, %v7380_v41  ;;  %v7481_v15 = vmul.f32 %v15978_v17, %v13972_v46  ;;  %v15979_v37 = vld [vmem:[#allocation19_spill] sm:$0xff] }
 0x48b   : > { %v7482_v57 = vmul.f32 %v15978_v17, %v13975_v55  ;;  %v7483_v45 = vmul.f32 %v15978_v17, %v13978_v20  ;;  %v7484_v1 = vmul.f32 %v15978_v17, %v13998_v14  ;;  %v7485_v31 = vmul.f32 %v15978_v17, %v14001_v59 }
 0x48c   : > { %v7486_v26 = vmul.f32 %v15978_v17, %v14004_v63  ;;  %v7487_v41 = vmul.f32 %v15978_v17, %v14017_v60  ;;  %v7488_v16 = vmul.f32 %v15978_v17, %v14020_v3  ;;  %v7489_v34 = vmul.f32 %v15978_v17, %v14023_v54 }
 0x48d   : > { %v7490_v21 = vmul.f32 %v15978_v17, %v14038_v42  ;;  %v7491_v62 = vmul.f32 %v15978_v17, %v14041_v4  ;;  %v7492_v19 = vmul.f32 %v15978_v17, %v15952_v30  ;;  %v7493_v43 = vmul.f32 %v15973_v56, %v15978_v17 }
 0x48e   : > { %v7494_v40 = vmul.f32 %v15974_v27, %v15978_v17  ;;  %v7495_v58 = vmul.f32 %v15975_v8, %v15978_v17  ;;  %v7496_v5 = vmul.f32 %v15979_v37, %v15978_v17  ;;  %v7513_v12 = vrot.slane %v7481_v15, 3 }
 0x48f   : > { %v7514_v50 = vrot.slane %v7482_v57, 3  ;;  %v7516_v47 = vrot.slane %v7483_v45, 3  ;;  %v7518_v11 = vrot.slane %v7484_v1, 3  ;;  %v7520_v18 = vrot.slane %v7485_v31, 3 }
 0x490   : > { %v7521_v49 = vrot.slane %v7486_v26, 3  ;;  %v7523_v38 = vrot.slane %v7487_v41, 3  ;;  %v7525_v0 = vrot.slane %v7488_v16, 3  ;;  %v7527_v24 = vrot.slane %v7489_v34, 3 }
 0x491   : > { %v7515_v39 = vsel %vm459_vm2, %v7513_v12, %v7514_v50  ;;  %v7517_v36 = vsel %vm459_vm2, %v7514_v50, %v7516_v47  ;;  %v7519_v13 = vsel %vm459_vm2, %v7516_v47, %v7518_v11  ;;  %v7528_v17 = vrot.slane %v7490_v21, 3 }
 0x492   : > { %v7522_v53 = vsel %vm459_vm2, %v7520_v18, %v7521_v49  ;;  %v7524_v48 = vsel %vm459_vm2, %v7521_v49, %v7523_v38  ;;  %v7526_v32 = vsel %vm459_vm2, %v7523_v38, %v7525_v0  ;;  %v7530_v15 = vrot.slane %v7491_v62, 3 }
 0x493   : > { %v7532_v57 = vrot.slane %v7492_v19, 3  ;;  %v7534_v45 = vrot.slane %v7493_v43, 3  ;;  %v7535_v1 = vrot.slane %v7494_v40, 3  ;;  %v7529_v31 = vsel %vm459_vm2, %v7527_v24, %v7528_v17 }
 0x494   : > { %v7537_v26 = vrot.slane %v7495_v58, 3  ;;  %v7539_v41 = vrot.slane %v7496_v5, 3  ;;  %v7557_v16 = vadd.f32 %v7515_v39, %v7461_v10  ;;  %v7531_v12 = vsel %vm459_vm2, %v7528_v17, %v7530_v15 }
 0x495   : > { %v7533_v34 = vsel %vm459_vm2, %v7530_v15, %v7532_v57  ;;  %v7536_v50 = vsel %vm459_vm2, %v7534_v45, %v7535_v1  ;;  %v7558_v47 = vadd.f32 %v7517_v36, %v7462_v61  ;;  %v7559_v62 = vadd.f32 %v7519_v13, %v7463_v35 }
 0x496   : > { %v7538_v18 = vsel %vm459_vm2, %v7535_v1, %v7537_v26  ;;  %v7540_v21 = vsel %vm459_vm2, %v7537_v26, %v7539_v41  ;;  %v7560_v19 = vadd.f32 %v7518_v11, %v7464_v51  ;;  %v7561_v43 = vadd.f32 %v7522_v53, %v7465_v2  ;;  %v15980_v51 = vld [vmem:[#allocation20_spill] sm:$0xff] }
 0x497   : > { %v7562_v40 = vadd.f32 %v7524_v48, %v7466_v6  ;;  %v7563_v49 = vadd.f32 %v7526_v32, %v7467_v22  ;;  %v7564_v38 = vadd.f32 %v7525_v0, %v7468_v23  ;;  %v14398_v58 = vadd.f32 %v7529_v31, %v7469_v7 }
 0x498   : > { %v14400_v10 = vadd.f32 %v7531_v12, %v7470_v44  ;;  %v14402_v5 = vadd.f32 %v7533_v34, %v7471_v29  ;;  %v14404_v39 = vadd.f32 %v7532_v57, %v7472_v28  ;;  %v14406_v24 = vadd.f32 %v7536_v50, %v7473_v25 }
 0x499   : > { %v14408_v61 = vadd.f32 %v7538_v18, %v7474_v33  ;;  %v14410_v36 = vadd.f32 %v7540_v21, %v7475_v9  ;;  %v14412_v35 = vadd.f32 %v7539_v41, %v7476_v52  ;;  %v7577_v2 = vmul.f32 %v15980_v51, %v13972_v46 }
 0x49a   : > { %v7578_v6 = vmul.f32 %v15980_v51, %v13975_v55  ;;  %v7579_v22 = vmul.f32 %v15980_v51, %v13978_v20  ;;  %v7580_v23 = vmul.f32 %v15980_v51, %v13998_v14  ;;  %v7581_v7 = vmul.f32 %v15980_v51, %v14001_v59 }
 0x49b   : > { %v7582_v44 = vmul.f32 %v15980_v51, %v14004_v63  ;;  %v7583_v52 = vmul.f32 %v15980_v51, %v14017_v60  ;;  %v7584_v46 = vmul.f32 %v15980_v51, %v14020_v3  ;;  %v7585_v55 = vmul.f32 %v15980_v51, %v14023_v54 }
 0x49c   : > { %v7586_v20 = vmul.f32 %v15980_v51, %v14038_v42  ;;  %v7587_v14 = vmul.f32 %v15980_v51, %v14041_v4  ;;  %v7588_v59 = vmul.f32 %v15980_v51, %v15952_v30  ;;  %v7589_v63 = vmul.f32 %v15973_v56, %v15980_v51 }
 0x49d   : > { %v7590_v60 = vmul.f32 %v15974_v27, %v15980_v51  ;;  %v7591_v3 = vmul.f32 %v15975_v8, %v15980_v51  ;;  %v7592_v54 = vmul.f32 %v15979_v37, %v15980_v51  ;;  %v7609_v29 = vrot.slane %v7577_v2, 4 }
 0x49e   : > { %v7610_v42 = vrot.slane %v7578_v6, 4  ;;  %v7612_v28 = vrot.slane %v7579_v22, 4  ;;  %v7614_v25 = vrot.slane %v7580_v23, 4  ;;  %v7616_v4 = vrot.slane %v7581_v7, 4  ;;  %v14459_v7 = vld [vmem:[%s9526_s16 + $0x118] sm:$0xff] }
 0x49f   : > { %v7617_v33 = vrot.slane %v7582_v44, 4  ;;  %v7619_v9 = vrot.slane %v7583_v52, 4  ;;  %v7621_v30 = vrot.slane %v7584_v46, 4  ;;  %v7623_v53 = vrot.slane %v7585_v55, 4 }
 0x4a0   : > { %v7611_v11 = vsel %vm556_vm3, %v7609_v29, %v7610_v42  ;;  %v7613_v0 = vsel %vm556_vm3, %v7610_v42, %v7612_v28  ;;  %v7615_v13 = vsel %vm556_vm3, %v7612_v28, %v7614_v25  ;;  %v7624_v15 = vrot.slane %v7586_v20, 4  ;;  %v14468_v20 = vld [vmem:[%s9526_s16 + $0x178] sm:$0xff] }
 0x4a1   : > { %v7618_v48 = vsel %vm556_vm3, %v7616_v4, %v7617_v33  ;;  %v7620_v32 = vsel %vm556_vm3, %v7617_v33, %v7619_v9  ;;  %v7622_v17 = vsel %vm556_vm3, %v7619_v9, %v7621_v30  ;;  %v7626_v57 = vrot.slane %v7587_v14, 4  ;;  %v15985_v29 = vld [vmem:[#allocation17_spill] sm:$0xff] }
 0x4a2   : > { %v7628_v45 = vrot.slane %v7588_v59, 4  ;;  %v7630_v1 = vrot.slane %v7589_v63, 4  ;;  %v7631_v31 = vrot.slane %v7590_v60, 4  ;;  %v7625_v26 = vsel %vm556_vm3, %v7623_v53, %v7624_v15 }
 0x4a3   : > { %v7633_v41 = vrot.slane %v7591_v3, 4  ;;  %v7635_v12 = vrot.slane %v7592_v54, 4  ;;  %v7653_v34 = vadd.f32 %v7611_v11, %v7557_v16  ;;  %v7627_v50 = vsel %vm556_vm3, %v7624_v15, %v7626_v57  ;;  %v14462_v16 = vld [vmem:[%s9526_s16 + $0x138] sm:$0xff] }
 0x4a4   : > { %v7629_v18 = vsel %vm556_vm3, %v7626_v57, %v7628_v45  ;;  %v7632_v21 = vsel %vm556_vm3, %v7630_v1, %v7631_v31  ;;  %v7654_v51 = vadd.f32 %v7613_v0, %v7558_v47  ;;  %v7655_v22 = vadd.f32 %v7615_v13, %v7559_v62  ;;  %v14465_v47 = vld [vmem:[%s9526_s16 + $0x158] sm:$0xff] }
 0x4a5   : > { %v7634_v2 = vsel %vm556_vm3, %v7631_v31, %v7633_v41  ;;  %v7636_v6 = vsel %vm556_vm3, %v7633_v41, %v7635_v12  ;;  %v7656_v23 = vadd.f32 %v7614_v25, %v7560_v19  ;;  %v7657_v44 = vadd.f32 %v7618_v48, %v7561_v43  ;;  %v14471_v62 = vld [vmem:[%s9526_s16 + $0x198] sm:$0xff] }
 0x4a6   : > { %v7658_v52 = vadd.f32 %v7620_v32, %v7562_v40  ;;  %v7659_v46 = vadd.f32 %v7622_v17, %v7563_v49  ;;  %v7660_v55 = vadd.f32 %v7621_v30, %v7564_v38  ;;  %v7661_v19 = vadd.f32 %v7625_v26, %v14398_v58  ;;  %v14478_v40 = vld [vmem:[%s9526_s16 + $0x1b8] sm:$0xff] }
 0x4a7   : > { %v7662_v14 = vadd.f32 %v7627_v50, %v14400_v10  ;;  %v7663_v59 = vadd.f32 %v7629_v18, %v14402_v5  ;;  %v7664_v43 = vadd.f32 %v7628_v45, %v14404_v39  ;;  %v14481_v49 = vld [vmem:[%s9526_s16 + $0x1d8] sm:$0xff]  ;;  %v7665_v63 = vadd.f32 %v7632_v21, %v14406_v24 }
 0x4a8   : > { %v14484_v38 = vld [vmem:[%s9526_s16 + $0x1f8] sm:$0xff]  ;;  %v7666_v60 = vadd.f32 %v7634_v2, %v14408_v61  ;;  %v7667_v3 = vadd.f32 %v7636_v6, %v14410_v36  ;;  %v7668_v58 = vadd.f32 %v7635_v12, %v14412_v35  ;;  %v7689_v42 = vmul.f32 %v14459_v7, %v15985_v29 }
 0x4a9   : > { %v14491_v54 = vld [vmem:[%s9526_s16 + $0x298] sm:$0xff]  ;;  %v7690_v24 = vmul.f32 %v14462_v16, %v15985_v29  ;;  %v7691_v61 = vmul.f32 %v14465_v47, %v15985_v29  ;;  %v7692_v36 = vmul.f32 %v14468_v20, %v15985_v29  ;;  %v7693_v35 = vmul.f32 %v14471_v62, %v15985_v29 }
 0x4aa   : > { %15981 = vst [vmem:[#allocation18_spill] sm:$0xff] %v14491_v54  ;;  %v14494_v10 = vld [vmem:[%s9526_s16 + $0x2b8] sm:$0xff]  ;;  %v7694_v28 = vmul.f32 %v14478_v40, %v15985_v29  ;;  %v7695_v25 = vmul.f32 %v14481_v49, %v15985_v29  ;;  %v7696_v4 = vmul.f32 %v14484_v38, %v15985_v29  ;;  %v7697_v33 = vmul.f32 %v15973_v56, %v15985_v29 }
 0x4ab   : > { %15982 = vst [vmem:[#allocation16_spill] sm:$0xff] %v14494_v10  ;;  %v14497_v5 = vld [vmem:[%s9526_s16 + $0x2d8] sm:$0xff]  ;;  %v7698_v9 = vmul.f32 %v15974_v27, %v15985_v29  ;;  %v7699_v30 = vmul.f32 %v15975_v8, %v15985_v29  ;;  %v7700_v11 = vmul.f32 %v15979_v37, %v15985_v29  ;;  %v7701_v0 = vmul.f32 %v14491_v54, %v15985_v29 }
 0x4ac   : > { %15983 = vst [vmem:[#allocation2_spill] sm:$0xff] %v14497_v5  ;;  %v14500_v39 = vld [vmem:[%s9526_s16 + $0x2f8] sm:$0xff]  ;;  %v7702_v13 = vmul.f32 %v14494_v10, %v15985_v29  ;;  %v7703_v53 = vmul.f32 %v14497_v5, %v15985_v29  ;;  %v7705_v32 = vadd.f32 %v7689_v42, %v7653_v34  ;;  %v7706_v17 = vadd.f32 %v7690_v24, %v7654_v51  ;;  %v15986_v5 = vld [vmem:[#allocation14_spill] sm:$0xff] }
 0x4ad   : > { %15984 = vst [vmem:[#allocation10_spill] sm:$0xff] %v14500_v39  ;;  %v7704_v48 = vmul.f32 %v14500_v39, %v15985_v29  ;;  %v7707_v15 = vadd.f32 %v7691_v61, %v7655_v22  ;;  %v7708_v57 = vadd.f32 %v7692_v36, %v7656_v23  ;;  %v7709_v45 = vadd.f32 %v7693_v35, %v7657_v44 }
 0x4ae   : > { %v7710_v1 = vadd.f32 %v7694_v28, %v7658_v52  ;;  %v7711_v31 = vadd.f32 %v7695_v25, %v7659_v46  ;;  %v7712_v26 = vadd.f32 %v7696_v4, %v7660_v55  ;;  %v7713_v41 = vadd.f32 %v7697_v33, %v7661_v19 }
 0x4af   : > { %v7714_v12 = vadd.f32 %v7698_v9, %v7662_v14  ;;  %v7715_v50 = vadd.f32 %v7699_v30, %v7663_v59  ;;  %v7716_v18 = vadd.f32 %v7700_v11, %v7664_v43  ;;  %v7717_v21 = vadd.f32 %v7701_v0, %v7665_v63 }
 0x4b0   : > { %v7718_v2 = vadd.f32 %v7702_v13, %v7666_v60  ;;  %v7719_v6 = vadd.f32 %v7703_v53, %v7667_v3  ;;  %v7720_v10 = vadd.f32 %v7704_v48, %v7668_v58  ;;  %v7725_v54 = vmul.f32 %v14459_v7, %v15986_v5 }
 0x4b1   : > { %v7726_v34 = vmul.f32 %v14462_v16, %v15986_v5  ;;  %v7727_v51 = vmul.f32 %v14465_v47, %v15986_v5  ;;  %v7728_v22 = vmul.f32 %v14468_v20, %v15986_v5  ;;  %v7729_v23 = vmul.f32 %v14471_v62, %v15986_v5  ;;  %v15987_v43 = vld [vmem:[#allocation18_spill] sm:$0xff] }
 0x4b2   : > { %v7730_v44 = vmul.f32 %v14478_v40, %v15986_v5  ;;  %v7731_v52 = vmul.f32 %v14481_v49, %v15986_v5  ;;  %v7732_v46 = vmul.f32 %v14484_v38, %v15986_v5  ;;  %v7733_v55 = vmul.f32 %v15973_v56, %v15986_v5  ;;  %v15988_v60 = vld [vmem:[#allocation16_spill] sm:$0xff] }
 0x4b3   : > { %v7734_v19 = vmul.f32 %v15974_v27, %v15986_v5  ;;  %v7735_v14 = vmul.f32 %v15975_v8, %v15986_v5  ;;  %v7736_v59 = vmul.f32 %v15979_v37, %v15986_v5  ;;  %v7737_v63 = vmul.f32 %v15987_v43, %v15986_v5  ;;  %v15989_v58 = vld [vmem:[#allocation2_spill] sm:$0xff] }
 0x4b4   : > { %v7738_v3 = vmul.f32 %v15988_v60, %v15986_v5  ;;  %v7739_v29 = vmul.f32 %v15989_v58, %v15986_v5  ;;  %v7740_v42 = vmul.f32 %v14500_v39, %v15986_v5  ;;  %v7757_v24 = vrot.slane %v7725_v54, 1 }
 0x4b5   : > { %v7758_v61 = vrot.slane %v7726_v34, 1  ;;  %v7760_v36 = vrot.slane %v7727_v51, 1  ;;  %v7762_v35 = vrot.slane %v7728_v22, 1  ;;  %v7764_v28 = vrot.slane %v7729_v23, 1 }
 0x4b6   : > { %v7765_v25 = vrot.slane %v7730_v44, 1  ;;  %v7767_v4 = vrot.slane %v7731_v52, 1  ;;  %v7769_v33 = vrot.slane %v7732_v46, 1  ;;  %v7771_v0 = vrot.slane %v7733_v55, 1 }
 0x4b7   : > { %v7759_v9 = vsel %vm265_vm0, %v7757_v24, %v7758_v61  ;;  %v7761_v30 = vsel %vm265_vm0, %v7758_v61, %v7760_v36  ;;  %v7763_v11 = vsel %vm265_vm0, %v7760_v36, %v7762_v35  ;;  %v7772_v5 = vrot.slane %v7734_v19, 1 }
 0x4b8   : > { %v7766_v13 = vsel %vm265_vm0, %v7764_v28, %v7765_v25  ;;  %v7768_v53 = vsel %vm265_vm0, %v7765_v25, %v7767_v4  ;;  %v7770_v54 = vsel %vm265_vm0, %v7767_v4, %v7769_v33  ;;  %v7774_v48 = vrot.slane %v7735_v14, 1 }
 0x4b9   : > { %v7776_v34 = vrot.slane %v7736_v59, 1  ;;  %v7778_v51 = vrot.slane %v7737_v63, 1  ;;  %v7779_v22 = vrot.slane %v7738_v3, 1  ;;  %v7773_v23 = vsel %vm265_vm0, %v7771_v0, %v7772_v5 }
 0x4ba   : > { %v7781_v44 = vrot.slane %v7739_v29, 1  ;;  %v7783_v52 = vrot.slane %v7740_v42, 1  ;;  %v7801_v46 = vadd.f32 %v7759_v9, %v7705_v32  ;;  %v7775_v24 = vsel %vm265_vm0, %v7772_v5, %v7774_v48 }
 0x4bb   : > { %v7777_v55 = vsel %vm265_vm0, %v7774_v48, %v7776_v34  ;;  %v7780_v61 = vsel %vm265_vm0, %v7778_v51, %v7779_v22  ;;  %v7802_v36 = vadd.f32 %v7761_v30, %v7706_v17  ;;  %v7803_v14 = vadd.f32 %v7763_v11, %v7707_v15  ;;  %v15990_v51 = vld [vmem:[#allocation15_spill] sm:$0xff] }
 0x4bc   : > { %v7782_v28 = vsel %vm265_vm0, %v7779_v22, %v7781_v44  ;;  %v7784_v19 = vsel %vm265_vm0, %v7781_v44, %v7783_v52  ;;  %v7804_v59 = vadd.f32 %v7762_v35, %v7708_v57  ;;  %v7805_v63 = vadd.f32 %v7766_v13, %v7709_v45 }
 0x4bd   : > { %v7806_v3 = vadd.f32 %v7768_v53, %v7710_v1  ;;  %v7807_v25 = vadd.f32 %v7770_v54, %v7711_v31  ;;  %v7808_v4 = vadd.f32 %v7769_v33, %v7712_v26  ;;  %v7809_v29 = vadd.f32 %v7773_v23, %v7713_v41 }
 0x4be   : > { %v7810_v42 = vadd.f32 %v7775_v24, %v7714_v12  ;;  %v7811_v32 = vadd.f32 %v7777_v55, %v7715_v50  ;;  %v7812_v9 = vadd.f32 %v7776_v34, %v7716_v18  ;;  %v7813_v0 = vadd.f32 %v7780_v61, %v7717_v21 }
 0x4bf   : > { %v7814_v5 = vadd.f32 %v7782_v28, %v7718_v2  ;;  %v7815_v48 = vadd.f32 %v7784_v19, %v7719_v6  ;;  %v7816_v39 = vadd.f32 %v7783_v52, %v7720_v10  ;;  %v7821_v17 = vmul.f32 %v14459_v7, %v15990_v51  ;;  %v15991_v6 = vld [vmem:[#allocation10_spill] sm:$0xff] }
 0x4c0   : > { %v7822_v30 = vmul.f32 %v14462_v16, %v15990_v51  ;;  %v7823_v15 = vmul.f32 %v14465_v47, %v15990_v51  ;;  %v7824_v57 = vmul.f32 %v14468_v20, %v15990_v51  ;;  %v7825_v45 = vmul.f32 %v14471_v62, %v15990_v51 }
 0x4c1   : > { %v7826_v1 = vmul.f32 %v14478_v40, %v15990_v51  ;;  %v7827_v10 = vmul.f32 %v14481_v49, %v15990_v51  ;;  %v7828_v31 = vmul.f32 %v14484_v38, %v15990_v51  ;;  %v7829_v26 = vmul.f32 %v15973_v56, %v15990_v51 }
 0x4c2   : > { %v7830_v41 = vmul.f32 %v15974_v27, %v15990_v51  ;;  %v7831_v12 = vmul.f32 %v15975_v8, %v15990_v51  ;;  %v7832_v50 = vmul.f32 %v15979_v37, %v15990_v51  ;;  %v7833_v18 = vmul.f32 %v15987_v43, %v15990_v51 }
 0x4c3   : > { %v7834_v21 = vmul.f32 %v15988_v60, %v15990_v51  ;;  %v7835_v2 = vmul.f32 %v15989_v58, %v15990_v51  ;;  %v7836_v35 = vmul.f32 %v15991_v6, %v15990_v51  ;;  %v7853_v33 = vrot.slane %v7821_v17, 2 }
 0x4c4   : > { %v7854_v11 = vrot.slane %v7822_v30, 2  ;;  %v7856_v13 = vrot.slane %v7823_v15, 2  ;;  %v7858_v53 = vrot.slane %v7824_v57, 2  ;;  %v7860_v54 = vrot.slane %v7825_v45, 2 }
 0x4c5   : > { %v7861_v34 = vrot.slane %v7826_v1, 2  ;;  %v7863_v22 = vrot.slane %v7827_v10, 2  ;;  %v7865_v23 = vrot.slane %v7828_v31, 2  ;;  %v7867_v55 = vrot.slane %v7829_v26, 2 }
 0x4c6   : > { %v7855_v44 = vsel %vm362_vm1, %v7853_v33, %v7854_v11  ;;  %v7857_v52 = vsel %vm362_vm1, %v7854_v11, %v7856_v13  ;;  %v7859_v24 = vsel %vm362_vm1, %v7856_v13, %v7858_v53  ;;  %v7868_v51 = vrot.slane %v7830_v41, 2 }
 0x4c7   : > { %v7862_v61 = vsel %vm362_vm1, %v7860_v54, %v7861_v34  ;;  %v7864_v28 = vsel %vm362_vm1, %v7861_v34, %v7863_v22  ;;  %v7866_v19 = vsel %vm362_vm1, %v7863_v22, %v7865_v23  ;;  %v7870_v17 = vrot.slane %v7831_v12, 2 }
 0x4c8   : > { %v7872_v30 = vrot.slane %v7832_v50, 2  ;;  %v7874_v15 = vrot.slane %v7833_v18, 2  ;;  %v7875_v57 = vrot.slane %v7834_v21, 2  ;;  %v7869_v45 = vsel %vm362_vm1, %v7867_v55, %v7868_v51 }
 0x4c9   : > { %v7877_v1 = vrot.slane %v7835_v2, 2  ;;  %v7879_v10 = vrot.slane %v7836_v35, 2  ;;  %v14617_v31 = vadd.f32 %v7855_v44, %v7801_v46  ;;  %v7871_v33 = vsel %vm362_vm1, %v7868_v51, %v7870_v17  ;;  %v14633_v46 = vld [vmem:[%s15437_s1 + $0x58] sm:$0xff] }
 0x4ca   : > { %v7873_v26 = vsel %vm362_vm1, %v7870_v17, %v7872_v30  ;;  %v7876_v11 = vsel %vm362_vm1, %v7874_v15, %v7875_v57  ;;  %v14622_v13 = vadd.f32 %v7857_v52, %v7802_v36  ;;  %v14626_v50 = vadd.f32 %v7859_v24, %v7803_v14  ;;  %15992 = vst [vmem:[#allocation13_spill] sm:$0xff] %v14633_v46  ;;  %v15994_v44 = vld [vmem:[#allocation9_spill] sm:$0xff]  ;;  %v16002_v24 = vld [vmem:[#allocation6_spill] sm:$0xff] }
 0x4cb   : > { %v7878_v41 = vsel %vm362_vm1, %v7875_v57, %v7877_v1  ;;  %v7880_v12 = vsel %vm362_vm1, %v7877_v1, %v7879_v10  ;;  %v14628_v18 = vadd.f32 %v7858_v53, %v7804_v59  ;;  %v14635_v21 = vadd.f32 %v7862_v61, %v7805_v63  ;;  %v16004_v61 = vld [vmem:[#allocation7_spill] sm:$0xff] }
 0x4cc   : > { %v14637_v2 = vadd.f32 %v7864_v28, %v7806_v3  ;;  %v14639_v35 = vadd.f32 %v7866_v19, %v7807_v25  ;;  %v14641_v36 = vadd.f32 %v7865_v23, %v7808_v4  ;;  %v14643_v54 = vadd.f32 %v7869_v45, %v7809_v29  ;;  %v15993_v25 = vld [vmem:[#allocation8_spill] sm:$0xff]  ;;  %v15995_v23 = vld [vmem:[#allocation11_spill] sm:$0xff] }
 0x4cd   : > { %v14645_v34 = vadd.f32 %v7871_v33, %v7810_v42  ;;  %v14647_v14 = vadd.f32 %v7873_v26, %v7811_v32  ;;  %v14649_v59 = vadd.f32 %v7872_v30, %v7812_v9  ;;  %v14651_v53 = vadd.f32 %v7876_v11, %v7813_v0  ;;  %v15996_v42 = vld [vmem:[#allocation12_spill] sm:$0xff]  ;;  %v15997_v9 = vld [vmem:[#allocation3_spill] sm:$0xff] }
 0x4ce   : > { %v14653_v22 = vadd.f32 %v7878_v41, %v7814_v5  ;;  %v14655_v63 = vadd.f32 %v7880_v12, %v7815_v48  ;;  %v14657_v3 = vadd.f32 %v7879_v10, %v7816_v39  ;;  %v7916_v4 = vrot.slane %v15994_v44, %v15993_v25  ;;  %v15998_v5 = vld [vmem:[#allocation4_spill] sm:$0xff]  ;;  %v16000_v39 = vld [vmem:[#allocation5_spill] sm:$0xff] }
 0x4cf   : > { %v14663_v29 = vrot.slane %v15994_v44, %v15995_v23  ;;  %v14667_v32 = vrot.slane %v15994_v44, %v15996_v42  ;;  %v14671_v0 = vrot.slane %v14633_v46, %v15997_v9  ;;  %v14675_v48 = vrot.slane %v14633_v46, %v15998_v5 }
 0x4d0   : > { %v14679_v52 = vrot.slane %v14633_v46, %v16000_v39  ;;  %v14683_v55 = vrot.slane %v14633_v46, %v16002_v24  ;;  %v14687_v28 = vrot.slane %v14633_v46, %v16004_v61  ;;  %v7917_v19 = vmul.f32 %v14459_v7, %v7916_v4 }
 0x4d1   : > { %15999 = vst [vmem:[#allocation19_spill] sm:$0xff] %v14675_v48  ;;  %v7918_v51 = vmul.f32 %v14462_v16, %v7916_v4  ;;  %v7919_v17 = vmul.f32 %v14465_v47, %v7916_v4  ;;  %v7920_v30 = vmul.f32 %v14468_v20, %v7916_v4  ;;  %v7921_v15 = vmul.f32 %v14471_v62, %v7916_v4 }
 0x4d2   : > { %16001 = vst [vmem:[#allocation20_spill] sm:$0xff] %v14679_v52  ;;  %16003 = vst [vmem:[#allocation17_spill] sm:$0xff] %v14683_v55  ;;  %v7922_v57 = vmul.f32 %v14478_v40, %v7916_v4  ;;  %v7923_v45 = vmul.f32 %v14481_v49, %v7916_v4  ;;  %v7924_v1 = vmul.f32 %v14484_v38, %v7916_v4  ;;  %v7949_v5 = vrot.slane %v7917_v19, 3 }
 0x4d3   : > { %16005 = vst [vmem:[#allocation14_spill] sm:$0xff] %v14687_v28  ;;  %v7925_v10 = vmul.f32 %v15973_v56, %v7916_v4  ;;  %v7926_v33 = vmul.f32 %v15974_v27, %v7916_v4  ;;  %v7927_v26 = vmul.f32 %v15975_v8, %v7916_v4  ;;  %v7928_v11 = vmul.f32 %v15979_v37, %v7916_v4 }
 0x4d4   : > { %v7929_v41 = vmul.f32 %v15987_v43, %v7916_v4  ;;  %v7930_v12 = vmul.f32 %v15988_v60, %v7916_v4  ;;  %v7931_v44 = vmul.f32 %v15989_v58, %v7916_v4  ;;  %v7932_v9 = vmul.f32 %v15991_v6, %v7916_v4 }
 0x4d5   : > { %v7950_v39 = vrot.slane %v7918_v51, 3  ;;  %v7952_v24 = vrot.slane %v7919_v17, 3  ;;  %v7954_v61 = vrot.slane %v7920_v30, 3  ;;  %v7956_v42 = vrot.slane %v7921_v15, 3 }
 0x4d6   : > { %v7957_v56 = vrot.slane %v7922_v57, 3  ;;  %v7959_v23 = vrot.slane %v7923_v45, 3  ;;  %v7961_v27 = vrot.slane %v7924_v1, 3  ;;  %v7963_v25 = vrot.slane %v7925_v10, 3 }
 0x4d7   : > { %v7951_v8 = vsel %vm459_vm2, %v7949_v5, %v7950_v39  ;;  %v7953_v37 = vsel %vm459_vm2, %v7950_v39, %v7952_v24  ;;  %v7955_v46 = vsel %vm459_vm2, %v7952_v24, %v7954_v61  ;;  %v7964_v19 = vrot.slane %v7926_v33, 3 }
 0x4d8   : > { %v7958_v28 = vsel %vm459_vm2, %v7956_v42, %v7957_v56  ;;  %v7960_v55 = vsel %vm459_vm2, %v7957_v56, %v7959_v23  ;;  %v7962_v4 = vsel %vm459_vm2, %v7959_v23, %v7961_v27  ;;  %v7966_v51 = vrot.slane %v7927_v26, 3 }
 0x4d9   : > { %v7968_v17 = vrot.slane %v7928_v11, 3  ;;  %v7970_v30 = vrot.slane %v7929_v41, 3  ;;  %v7971_v15 = vrot.slane %v7930_v12, 3  ;;  %v7965_v57 = vsel %vm459_vm2, %v7963_v25, %v7964_v19 }
 0x4da   : > { %v7973_v45 = vrot.slane %v7931_v44, 3  ;;  %v7975_v1 = vrot.slane %v7932_v9, 3  ;;  %v14713_v5 = vadd.f32 %v7951_v8, %v14617_v31  ;;  %v7967_v10 = vsel %vm459_vm2, %v7964_v19, %v7966_v51  ;;  %v9454_v9 = vld [vmem:[%s9526_s16 + $0x278] sm:$0xff] }
 0x4db   : > { %v7969_v42 = vsel %vm459_vm2, %v7966_v51, %v7968_v17  ;;  %v7972_v39 = vsel %vm459_vm2, %v7970_v30, %v7971_v15  ;;  %v14719_v23 = vadd.f32 %v7953_v37, %v14622_v13  ;;  %v14724_v25 = vadd.f32 %v7955_v46, %v14626_v50 }
 0x4dc   : > { %v7974_v33 = vsel %vm459_vm2, %v7971_v15, %v7973_v45  ;;  %v7976_v26 = vsel %vm459_vm2, %v7973_v45, %v7975_v1  ;;  %v14727_v11 = vadd.f32 %v7954_v61, %v14628_v18  ;;  %v14730_v31 = vadd.f32 %v7958_v28, %v14635_v21  ;;  %v9453_v28 = vld [vmem:[%s9526_s16 + $0x258] sm:$0xff] }
 0x4dd   : > { %v14733_v41 = vadd.f32 %v7960_v55, %v14637_v2  ;;  %v14736_v12 = vadd.f32 %v7962_v4, %v14639_v35  ;;  %v14739_v13 = vadd.f32 %v7961_v27, %v14641_v36  ;;  %v14742_v44 = vadd.f32 %v7965_v57, %v14643_v54  ;;  %v9452_v55 = vld [vmem:[%s9526_s16 + $0x238] sm:$0xff] }
 0x4de   : > { %v14745_v50 = vadd.f32 %v7967_v10, %v14645_v34  ;;  %v14748_v18 = vadd.f32 %v7969_v42, %v14647_v14  ;;  %v14751_v46 = vadd.f32 %v7968_v17, %v14649_v59  ;;  %v14754_v21 = vadd.f32 %v7972_v39, %v14651_v53 }
 0x4df   : > { %v14757_v2 = vadd.f32 %v7974_v33, %v14653_v22  ;;  %v14760_v35 = vadd.f32 %v7976_v26, %v14655_v63  ;;  %v14763_v36 = vadd.f32 %v7975_v1, %v14657_v3  ;;  %v8013_v54 = vmul.f32 %v14459_v7, %v14663_v29  ;;  %v9451_v3 = vld [vmem:[%s9526_s16 + $0x218] sm:$0xff] }
 0x4e0   : > { %v8014_v34 = vmul.f32 %v14462_v16, %v14663_v29  ;;  %v8015_v14 = vmul.f32 %v14465_v47, %v14663_v29  ;;  %v8016_v59 = vmul.f32 %v14468_v20, %v14663_v29  ;;  %v8017_v53 = vmul.f32 %v14471_v62, %v14663_v29 }
 0x4e1   : > { %v8018_v22 = vmul.f32 %v14478_v40, %v14663_v29  ;;  %v8019_v63 = vmul.f32 %v14481_v49, %v14663_v29  ;;  %v8020_v7 = vmul.f32 %v14484_v38, %v14663_v29  ;;  %v8021_v16 = vmul.f32 %v9451_v3, %v14663_v29 }
 0x4e2   : > { %v8022_v47 = vmul.f32 %v9452_v55, %v14663_v29  ;;  %v8023_v20 = vmul.f32 %v9453_v28, %v14663_v29  ;;  %v8024_v24 = vmul.f32 %v9454_v9, %v14663_v29  ;;  %v8025_v61 = vmul.f32 %v15987_v43, %v14663_v29 }
 0x4e3   : > { %v8026_v56 = vmul.f32 %v15988_v60, %v14663_v29  ;;  %v8027_v27 = vmul.f32 %v15989_v58, %v14663_v29  ;;  %v8028_v8 = vmul.f32 %v15991_v6, %v14663_v29  ;;  %v8045_v37 = vrot.slane %v8013_v54, 4 }
 0x4e4   : > { %v8046_v4 = vrot.slane %v8014_v34, 4  ;;  %v8048_v19 = vrot.slane %v8015_v14, 4  ;;  %v8050_v51 = vrot.slane %v8016_v59, 4  ;;  %v8052_v17 = vrot.slane %v8017_v53, 4 }
 0x4e5   : > { %v8053_v30 = vrot.slane %v8018_v22, 4  ;;  %v8055_v15 = vrot.slane %v8019_v63, 4  ;;  %v8057_v57 = vrot.slane %v8020_v7, 4  ;;  %v8059_v42 = vrot.slane %v8021_v16, 4 }
 0x4e6   : > { %v8047_v45 = vsel %vm556_vm3, %v8045_v37, %v8046_v4  ;;  %v8049_v1 = vsel %vm556_vm3, %v8046_v4, %v8048_v19  ;;  %v8051_v10 = vsel %vm556_vm3, %v8048_v19, %v8050_v51  ;;  %v8060_v26 = vrot.slane %v8022_v47, 4  ;;  %v14825_v37 = vld [vmem:[%s9526_s16 + $0x238] sm:$0xff] }
 0x4e7   : > { %v8054_v39 = vsel %vm556_vm3, %v8052_v17, %v8053_v30  ;;  %v8056_v33 = vsel %vm556_vm3, %v8053_v30, %v8055_v15  ;;  %v8058_v29 = vsel %vm556_vm3, %v8055_v15, %v8057_v57  ;;  %v8062_v54 = vrot.slane %v8023_v20, 4  ;;  %v14831_v4 = vld [vmem:[%s9526_s16 + $0x278] sm:$0xff] }
 0x4e8   : > { %v8064_v34 = vrot.slane %v8024_v24, 4  ;;  %v8066_v14 = vrot.slane %v8025_v61, 4  ;;  %v8067_v59 = vrot.slane %v8026_v56, 4  ;;  %v8061_v53 = vsel %vm556_vm3, %v8059_v42, %v8060_v26 }
 0x4e9   : > { %v8069_v22 = vrot.slane %v8027_v27, 4  ;;  %v8071_v63 = vrot.slane %v8028_v8, 4  ;;  %v8089_v7 = vadd.f32 %v8047_v45, %v14713_v5  ;;  %v8063_v3 = vsel %vm556_vm3, %v8060_v26, %v8062_v54  ;;  %v14818_v27 = vld [vmem:[%s9526_s16 + $0x218] sm:$0xff] }
 0x4ea   : > { %v8065_v16 = vsel %vm556_vm3, %v8062_v54, %v8064_v34  ;;  %v8068_v55 = vsel %vm556_vm3, %v8066_v14, %v8067_v59  ;;  %v8090_v47 = vadd.f32 %v8049_v1, %v14719_v23  ;;  %v8091_v9 = vadd.f32 %v8051_v10, %v14724_v25 }
 0x4eb   : > { %v8070_v28 = vsel %vm556_vm3, %v8067_v59, %v8069_v22  ;;  %v8072_v20 = vsel %vm556_vm3, %v8069_v22, %v8071_v63  ;;  %v8092_v24 = vadd.f32 %v8050_v51, %v14727_v11  ;;  %v8093_v5 = vadd.f32 %v8054_v39, %v14730_v31  ;;  %v14838_v51 = vld [vmem:[%s9526_s16 + $0x318] sm:$0xff] }
 0x4ec   : > { %v8094_v61 = vadd.f32 %v8056_v33, %v14733_v41  ;;  %v8095_v56 = vadd.f32 %v8058_v29, %v14736_v12  ;;  %v8096_v23 = vadd.f32 %v8057_v57, %v14739_v13  ;;  %v8097_v8 = vadd.f32 %v8061_v53, %v14742_v44  ;;  %v14828_v41 = vld [vmem:[%s9526_s16 + $0x258] sm:$0xff]  ;;  %16006 = vst [vmem:[#allocation18_spill] sm:$0xff] %v14838_v51 }
 0x4ed   : > { %v8098_v25 = vadd.f32 %v8063_v3, %v14745_v50  ;;  %v8099_v11 = vadd.f32 %v8065_v16, %v14748_v18  ;;  %v8100_v31 = vadd.f32 %v8064_v34, %v14751_v46  ;;  %v8101_v12 = vadd.f32 %v8068_v55, %v14754_v21  ;;  %v14841_v50 = vld [vmem:[%s9526_s16 + $0x338] sm:$0xff] }
 0x4ee   : > { %v8102_v13 = vadd.f32 %v8070_v28, %v14757_v2  ;;  %v8103_v19 = vadd.f32 %v8072_v20, %v14760_v35  ;;  %v8104_v44 = vadd.f32 %v8071_v63, %v14763_v36  ;;  %16007 = vst [vmem:[#allocation16_spill] sm:$0xff] %v14841_v50  ;;  %v14844_v18 = vld [vmem:[%s9526_s16 + $0x358] sm:$0xff]  ;;  %v8125_v17 = vmul.f32 %v14471_v62, %v14667_v32 }
 0x4ef   : > { %16008 = vst [vmem:[#allocation2_spill] sm:$0xff] %v14844_v18  ;;  %v14847_v46 = vld [vmem:[%s9526_s16 + $0x378] sm:$0xff]  ;;  %v8126_v21 = vmul.f32 %v14478_v40, %v14667_v32  ;;  %v8127_v2 = vmul.f32 %v14481_v49, %v14667_v32  ;;  %v8128_v35 = vmul.f32 %v14484_v38, %v14667_v32  ;;  %v8129_v36 = vmul.f32 %v14818_v27, %v14667_v32 }
 0x4f0   : > { %16009 = vst [vmem:[#allocation15_spill] sm:$0xff] %v14847_v46  ;;  %v8130_v30 = vmul.f32 %v14825_v37, %v14667_v32  ;;  %v8131_v15 = vmul.f32 %v14828_v41, %v14667_v32  ;;  %v8132_v57 = vmul.f32 %v14831_v4, %v14667_v32  ;;  %v8133_v45 = vmul.f32 %v15987_v43, %v14667_v32 }
 0x4f1   : > { %v8134_v1 = vmul.f32 %v15988_v60, %v14667_v32  ;;  %v8135_v10 = vmul.f32 %v15989_v58, %v14667_v32  ;;  %v8136_v42 = vmul.f32 %v15991_v6, %v14667_v32  ;;  %v8137_v39 = vmul.f32 %v14838_v51, %v14667_v32 }
 0x4f2   : > { %v8138_v33 = vmul.f32 %v14841_v50, %v14667_v32  ;;  %v8139_v29 = vmul.f32 %v14844_v18, %v14667_v32  ;;  %v8140_v26 = vmul.f32 %v14847_v46, %v14667_v32  ;;  %v8141_v54 = vadd.f32 %v8125_v17, %v8089_v7 }
 0x4f3   : > { %v8142_v34 = vadd.f32 %v8126_v21, %v8090_v47  ;;  %v8143_v14 = vadd.f32 %v8127_v2, %v8091_v9  ;;  %v8144_v59 = vadd.f32 %v8128_v35, %v8092_v24  ;;  %v8145_v53 = vadd.f32 %v8129_v36, %v8093_v5 }
 0x4f4   : > { %v8146_v22 = vadd.f32 %v8130_v30, %v8094_v61  ;;  %v8147_v63 = vadd.f32 %v8131_v15, %v8095_v56  ;;  %v8148_v3 = vadd.f32 %v8132_v57, %v8096_v23  ;;  %v8149_v16 = vadd.f32 %v8133_v45, %v8097_v8 }
 0x4f5   : > { %v8150_v55 = vadd.f32 %v8134_v1, %v8098_v25  ;;  %v8151_v28 = vadd.f32 %v8135_v10, %v8099_v11  ;;  %v8152_v20 = vadd.f32 %v8136_v42, %v8100_v31  ;;  %v8153_v52 = vadd.f32 %v8137_v39, %v8101_v12  ;;  %v16010_v11 = vld [vmem:[#allocation18_spill] sm:$0xff]  ;;  %v16011_v12 = vld [vmem:[#allocation16_spill] sm:$0xff] }
 0x4f6   : > { %v8154_v48 = vadd.f32 %v8138_v33, %v8102_v13  ;;  %v8155_v50 = vadd.f32 %v8139_v29, %v8103_v19  ;;  %v8156_v51 = vadd.f32 %v8140_v26, %v8104_v44  ;;  %v8161_v18 = vmul.f32 %v14471_v62, %v14671_v0  ;;  %v16012_v19 = vld [vmem:[#allocation2_spill] sm:$0xff] }
 0x4f7   : > { %v8162_v32 = vmul.f32 %v14478_v40, %v14671_v0  ;;  %v8163_v7 = vmul.f32 %v14481_v49, %v14671_v0  ;;  %v8164_v47 = vmul.f32 %v14484_v38, %v14671_v0  ;;  %v8165_v9 = vmul.f32 %v14818_v27, %v14671_v0 }
 0x4f8   : > { %v8166_v24 = vmul.f32 %v14825_v37, %v14671_v0  ;;  %v8167_v5 = vmul.f32 %v14828_v41, %v14671_v0  ;;  %v8168_v61 = vmul.f32 %v14831_v4, %v14671_v0  ;;  %v8169_v56 = vmul.f32 %v15987_v43, %v14671_v0 }
 0x4f9   : > { %v8170_v23 = vmul.f32 %v15988_v60, %v14671_v0  ;;  %v8171_v8 = vmul.f32 %v15989_v58, %v14671_v0  ;;  %v8172_v25 = vmul.f32 %v15991_v6, %v14671_v0  ;;  %v8173_v31 = vmul.f32 %v16010_v11, %v14671_v0 }
 0x4fa   : > { %v8174_v13 = vmul.f32 %v16011_v12, %v14671_v0  ;;  %v8175_v44 = vmul.f32 %v16012_v19, %v14671_v0  ;;  %v8176_v17 = vmul.f32 %v14847_v46, %v14671_v0  ;;  %v8193_v21 = vrot.slane %v8161_v18, 1 }
 0x4fb   : > { %v8194_v2 = vrot.slane %v8162_v32, 1  ;;  %v8196_v35 = vrot.slane %v8163_v7, 1  ;;  %v8198_v36 = vrot.slane %v8164_v47, 1  ;;  %v8200_v30 = vrot.slane %v8165_v9, 1 }
 0x4fc   : > { %v8201_v15 = vrot.slane %v8166_v24, 1  ;;  %v8203_v57 = vrot.slane %v8167_v5, 1  ;;  %v8205_v45 = vrot.slane %v8168_v61, 1  ;;  %v8207_v39 = vrot.slane %v8169_v56, 1 }
 0x4fd   : > { %v8195_v1 = vsel %vm265_vm0, %v8193_v21, %v8194_v2  ;;  %v8197_v10 = vsel %vm265_vm0, %v8194_v2, %v8196_v35  ;;  %v8199_v42 = vsel %vm265_vm0, %v8196_v35, %v8198_v36  ;;  %v8208_v18 = vrot.slane %v8170_v23, 1 }
 0x4fe   : > { %v8202_v33 = vsel %vm265_vm0, %v8200_v30, %v8201_v15  ;;  %v8204_v29 = vsel %vm265_vm0, %v8201_v15, %v8203_v57  ;;  %v8206_v0 = vsel %vm265_vm0, %v8203_v57, %v8205_v45  ;;  %v8210_v26 = vrot.slane %v8171_v8, 1 }
 0x4ff   : > { %v8212_v32 = vrot.slane %v8172_v25, 1  ;;  %v8214_v7 = vrot.slane %v8173_v31, 1  ;;  %v8215_v47 = vrot.slane %v8174_v13, 1  ;;  %v8209_v9 = vsel %vm265_vm0, %v8207_v39, %v8208_v18 }
 0x500   : > { %v8217_v24 = vrot.slane %v8175_v44, 1  ;;  %v8219_v5 = vrot.slane %v8176_v17, 1  ;;  %v8237_v61 = vadd.f32 %v8195_v1, %v8141_v54  ;;  %v8211_v21 = vsel %vm265_vm0, %v8208_v18, %v8210_v26 }
 0x501   : > { %v8213_v56 = vsel %vm265_vm0, %v8210_v26, %v8212_v32  ;;  %v8216_v2 = vsel %vm265_vm0, %v8214_v7, %v8215_v47  ;;  %v8238_v35 = vadd.f32 %v8197_v10, %v8142_v34  ;;  %v8239_v8 = vadd.f32 %v8199_v42, %v8143_v14  ;;  %v16013_v7 = vld [vmem:[#allocation19_spill] sm:$0xff] }
 0x502   : > { %v8218_v30 = vsel %vm265_vm0, %v8215_v47, %v8217_v24  ;;  %v8220_v23 = vsel %vm265_vm0, %v8217_v24, %v8219_v5  ;;  %v8240_v25 = vadd.f32 %v8198_v36, %v8144_v59  ;;  %v8241_v31 = vadd.f32 %v8202_v33, %v8145_v53 }
 0x503   : > { %v8242_v13 = vadd.f32 %v8204_v29, %v8146_v22  ;;  %v8243_v15 = vadd.f32 %v8206_v0, %v8147_v63  ;;  %v8244_v57 = vadd.f32 %v8205_v45, %v8148_v3  ;;  %v8245_v44 = vadd.f32 %v8209_v9, %v8149_v16 }
 0x504   : > { %v8246_v17 = vadd.f32 %v8211_v21, %v8150_v55  ;;  %v8247_v54 = vadd.f32 %v8213_v56, %v8151_v28  ;;  %v8248_v1 = vadd.f32 %v8212_v32, %v8152_v20  ;;  %v8249_v39 = vadd.f32 %v8216_v2, %v8153_v52  ;;  %v16014_v20 = vld [vmem:[#allocation15_spill] sm:$0xff] }
 0x505   : > { %v8250_v18 = vadd.f32 %v8218_v30, %v8154_v48  ;;  %v8251_v26 = vadd.f32 %v8220_v23, %v8155_v50  ;;  %v8252_v46 = vadd.f32 %v8219_v5, %v8156_v51  ;;  %v8257_v34 = vmul.f32 %v14471_v62, %v16013_v7 }
 0x506   : > { %v8258_v10 = vmul.f32 %v14478_v40, %v16013_v7  ;;  %v8259_v14 = vmul.f32 %v14481_v49, %v16013_v7  ;;  %v8260_v59 = vmul.f32 %v14484_v38, %v16013_v7  ;;  %v8261_v53 = vmul.f32 %v14818_v27, %v16013_v7 }
 0x507   : > { %v8262_v48 = vmul.f32 %v14825_v37, %v16013_v7  ;;  %v8263_v52 = vmul.f32 %v14828_v41, %v16013_v7  ;;  %v8264_v51 = vmul.f32 %v14831_v4, %v16013_v7  ;;  %v8265_v50 = vmul.f32 %v15987_v43, %v16013_v7 }
 0x508   : > { %v8266_v22 = vmul.f32 %v15988_v60, %v16013_v7  ;;  %v8267_v63 = vmul.f32 %v15989_v58, %v16013_v7  ;;  %v8268_v3 = vmul.f32 %v15991_v6, %v16013_v7  ;;  %v8269_v16 = vmul.f32 %v16010_v11, %v16013_v7 }
 0x509   : > { %v8270_v55 = vmul.f32 %v16011_v12, %v16013_v7  ;;  %v8271_v28 = vmul.f32 %v16012_v19, %v16013_v7  ;;  %v8272_v36 = vmul.f32 %v16014_v20, %v16013_v7  ;;  %v8289_v45 = vrot.slane %v8257_v34, 2 }
 0x50a   : > { %v8290_v42 = vrot.slane %v8258_v10, 2  ;;  %v8292_v33 = vrot.slane %v8259_v14, 2  ;;  %v8294_v29 = vrot.slane %v8260_v59, 2  ;;  %v8296_v0 = vrot.slane %v8261_v53, 2 }
 0x50b   : > { %v8297_v32 = vrot.slane %v8262_v48, 2  ;;  %v8299_v47 = vrot.slane %v8263_v52, 2  ;;  %v8301_v9 = vrot.slane %v8264_v51, 2  ;;  %v8303_v56 = vrot.slane %v8265_v50, 2 }
 0x50c   : > { %v8291_v24 = vsel %vm362_vm1, %v8289_v45, %v8290_v42  ;;  %v8293_v5 = vsel %vm362_vm1, %v8290_v42, %v8292_v33  ;;  %v8295_v21 = vsel %vm362_vm1, %v8292_v33, %v8294_v29  ;;  %v8304_v7 = vrot.slane %v8266_v22, 2 }
 0x50d   : > { %v8298_v2 = vsel %vm362_vm1, %v8296_v0, %v8297_v32  ;;  %v8300_v30 = vsel %vm362_vm1, %v8297_v32, %v8299_v47  ;;  %v8302_v23 = vsel %vm362_vm1, %v8299_v47, %v8301_v9  ;;  %v8306_v34 = vrot.slane %v8267_v63, 2 }
 0x50e   : > { %v8308_v10 = vrot.slane %v8268_v3, 2  ;;  %v8310_v14 = vrot.slane %v8269_v16, 2  ;;  %v8311_v59 = vrot.slane %v8270_v55, 2  ;;  %v8305_v53 = vsel %vm362_vm1, %v8303_v56, %v8304_v7 }
 0x50f   : > { %v8313_v48 = vrot.slane %v8271_v28, 2  ;;  %v8315_v52 = vrot.slane %v8272_v36, 2  ;;  %v8333_v51 = vadd.f32 %v8291_v24, %v8237_v61  ;;  %v8307_v45 = vsel %vm362_vm1, %v8304_v7, %v8306_v34 }
 0x510   : > { %v8309_v50 = vsel %vm362_vm1, %v8306_v34, %v8308_v10  ;;  %v8312_v42 = vsel %vm362_vm1, %v8310_v14, %v8311_v59  ;;  %v8334_v33 = vadd.f32 %v8293_v5, %v8238_v35  ;;  %v8335_v63 = vadd.f32 %v8295_v21, %v8239_v8  ;;  %v16015_v14 = vld [vmem:[#allocation20_spill] sm:$0xff] }
 0x511   : > { %v8314_v0 = vsel %vm362_vm1, %v8311_v59, %v8313_v48  ;;  %v8316_v22 = vsel %vm362_vm1, %v8313_v48, %v8315_v52  ;;  %v8336_v3 = vadd.f32 %v8294_v29, %v8240_v25  ;;  %v8337_v16 = vadd.f32 %v8298_v2, %v8241_v31 }
 0x512   : > { %v8338_v55 = vadd.f32 %v8300_v30, %v8242_v13  ;;  %v8339_v32 = vadd.f32 %v8302_v23, %v8243_v15  ;;  %v8340_v47 = vadd.f32 %v8301_v9, %v8244_v57  ;;  %v8341_v28 = vadd.f32 %v8305_v53, %v8245_v44 }
 0x513   : > { %v8342_v36 = vadd.f32 %v8307_v45, %v8246_v17  ;;  %v8343_v61 = vadd.f32 %v8309_v50, %v8247_v54  ;;  %v8344_v24 = vadd.f32 %v8308_v10, %v8248_v1  ;;  %v8345_v56 = vadd.f32 %v8312_v42, %v8249_v39 }
 0x514   : > { %v8346_v7 = vadd.f32 %v8314_v0, %v8250_v18  ;;  %v8347_v34 = vadd.f32 %v8316_v22, %v8251_v26  ;;  %v8348_v20 = vadd.f32 %v8315_v52, %v8252_v46  ;;  %v8353_v35 = vmul.f32 %v14471_v62, %v16015_v14 }
 0x515   : > { %v8354_v5 = vmul.f32 %v14478_v40, %v16015_v14  ;;  %v8355_v8 = vmul.f32 %v14481_v49, %v16015_v14  ;;  %v8356_v25 = vmul.f32 %v14484_v38, %v16015_v14  ;;  %v8357_v31 = vmul.f32 %v14818_v27, %v16015_v14 }
 0x516   : > { %v8358_v13 = vmul.f32 %v14825_v37, %v16015_v14  ;;  %v8359_v46 = vmul.f32 %v14828_v41, %v16015_v14  ;;  %v8360_v62 = vmul.f32 %v14831_v4, %v16015_v14  ;;  %v8361_v40 = vmul.f32 %v15987_v43, %v16015_v14  ;;  %v16016_v43 = vld [vmem:[#allocation15_spill] sm:$0xff] }
 0x517   : > { %v8362_v49 = vmul.f32 %v15988_v60, %v16015_v14  ;;  %v8363_v38 = vmul.f32 %v15989_v58, %v16015_v14  ;;  %v8364_v15 = vmul.f32 %v15991_v6, %v16015_v14  ;;  %v8365_v57 = vmul.f32 %v16010_v11, %v16015_v14 }
 0x518   : > { %v8366_v44 = vmul.f32 %v16011_v12, %v16015_v14  ;;  %v8367_v17 = vmul.f32 %v16012_v19, %v16015_v14  ;;  %v8368_v54 = vmul.f32 %v16016_v43, %v16015_v14  ;;  %v8385_v1 = vrot.slane %v8353_v35, 3 }
 0x519   : > { %v8386_v60 = vrot.slane %v8354_v5, 3  ;;  %v8388_v39 = vrot.slane %v8355_v8, 3  ;;  %v8390_v18 = vrot.slane %v8356_v25, 3  ;;  %v8392_v58 = vrot.slane %v8357_v31, 3 }
 0x51a   : > { %v8393_v26 = vrot.slane %v8358_v13, 3  ;;  %v8395_v29 = vrot.slane %v8359_v46, 3  ;;  %v8397_v6 = vrot.slane %v8360_v62, 3  ;;  %v8399_v30 = vrot.slane %v8361_v40, 3 }
 0x51b   : > { %v8387_v9 = vsel %vm459_vm2, %v8385_v1, %v8386_v60  ;;  %v8389_v21 = vsel %vm459_vm2, %v8386_v60, %v8388_v39  ;;  %v8391_v2 = vsel %vm459_vm2, %v8388_v39, %v8390_v18  ;;  %v8400_v53 = vrot.slane %v8362_v49, 3  ;;  %v9459_v60 = vld [vmem:[%s9526_s16 + $0x298] sm:$0xff] }
 0x51c   : > { %v8394_v23 = vsel %vm459_vm2, %v8392_v58, %v8393_v26  ;;  %v8396_v10 = vsel %vm459_vm2, %v8393_v26, %v8395_v29  ;;  %v8398_v59 = vsel %vm459_vm2, %v8395_v29, %v8397_v6  ;;  %v8402_v48 = vrot.slane %v8363_v38, 3  ;;  %v9461_v26 = vld [vmem:[%s9526_s16 + $0x2d8] sm:$0xff] }
 0x51d   : > { %v8404_v52 = vrot.slane %v8364_v15, 3  ;;  %v8406_v45 = vrot.slane %v8365_v57, 3  ;;  %v8407_v50 = vrot.slane %v8366_v44, 3  ;;  %v8401_v42 = vsel %vm459_vm2, %v8399_v30, %v8400_v53  ;;  %v16017_v44 = vld [vmem:[#allocation17_spill] sm:$0xff] }
 0x51e   : > { %v8409_v0 = vrot.slane %v8367_v17, 3  ;;  %v8411_v22 = vrot.slane %v8368_v54, 3  ;;  %v15008_v14 = vadd.f32 %v8387_v9, %v8333_v51  ;;  %v8403_v35 = vsel %vm459_vm2, %v8400_v53, %v8402_v48  ;;  %v9458_v17 = vld [vmem:[%s9526_s16 + $0x1f8] sm:$0xff] }
 0x51f   : > { %v8405_v5 = vsel %vm459_vm2, %v8402_v48, %v8404_v52  ;;  %v8408_v8 = vsel %vm459_vm2, %v8406_v45, %v8407_v50  ;;  %v15013_v25 = vadd.f32 %v8389_v21, %v8334_v33  ;;  %v15017_v46 = vadd.f32 %v8391_v2, %v8335_v63 }
 0x520   : > { %v8410_v31 = vsel %vm459_vm2, %v8407_v50, %v8409_v0  ;;  %v8412_v13 = vsel %vm459_vm2, %v8409_v0, %v8411_v22  ;;  %v15019_v62 = vadd.f32 %v8390_v18, %v8336_v3  ;;  %v15021_v51 = vadd.f32 %v8394_v23, %v8337_v16  ;;  %v9460_v18 = vld [vmem:[%s9526_s16 + $0x2b8] sm:$0xff] }
 0x521   : > { %v15023_v40 = vadd.f32 %v8396_v10, %v8338_v55  ;;  %v15025_v49 = vadd.f32 %v8398_v59, %v8339_v32  ;;  %v15027_v33 = vadd.f32 %v8397_v6, %v8340_v47  ;;  %v15029_v38 = vadd.f32 %v8401_v42, %v8341_v28  ;;  %v9455_v47 = vld [vmem:[%s9526_s16 + $0x198] sm:$0xff] }
 0x522   : > { %v15031_v15 = vadd.f32 %v8403_v35, %v8342_v36  ;;  %v15033_v57 = vadd.f32 %v8405_v5, %v8343_v61  ;;  %v15035_v63 = vadd.f32 %v8404_v52, %v8344_v24  ;;  %v15037_v3 = vadd.f32 %v8408_v8, %v8345_v56  ;;  %v9456_v36 = vld [vmem:[%s9526_s16 + $0x1b8] sm:$0xff] }
 0x523   : > { %v15039_v16 = vadd.f32 %v8410_v31, %v8346_v7  ;;  %v15041_v55 = vadd.f32 %v8412_v13, %v8347_v34  ;;  %v15043_v32 = vadd.f32 %v8411_v22, %v8348_v20  ;;  %v8449_v28 = vmul.f32 %v9455_v47, %v16017_v44  ;;  %v9457_v24 = vld [vmem:[%s9526_s16 + $0x1d8] sm:$0xff] }
 0x524   : > { %v8450_v61 = vmul.f32 %v9456_v36, %v16017_v44  ;;  %v8451_v56 = vmul.f32 %v9457_v24, %v16017_v44  ;;  %v8452_v7 = vmul.f32 %v9458_v17, %v16017_v44  ;;  %v8453_v34 = vmul.f32 %v14818_v27, %v16017_v44  ;;  %v9462_v6 = vld [vmem:[%s9526_s16 + $0x2f8] sm:$0xff] }
 0x525   : > { %v8454_v20 = vmul.f32 %v14825_v37, %v16017_v44  ;;  %v8455_v54 = vmul.f32 %v14828_v41, %v16017_v44  ;;  %v8456_v1 = vmul.f32 %v14831_v4, %v16017_v44  ;;  %v8457_v39 = vmul.f32 %v9459_v60, %v16017_v44 }
 0x526   : > { %v8458_v58 = vmul.f32 %v9460_v18, %v16017_v44  ;;  %v8459_v29 = vmul.f32 %v9461_v26, %v16017_v44  ;;  %v8460_v9 = vmul.f32 %v9462_v6, %v16017_v44  ;;  %v8461_v21 = vmul.f32 %v16010_v11, %v16017_v44  ;;  %v15098_v6 = vld [vmem:[%s9526_s16 + $0x298] sm:$0xff] }
 0x527   : > { %v8462_v2 = vmul.f32 %v16011_v12, %v16017_v44  ;;  %v8463_v30 = vmul.f32 %v16012_v19, %v16017_v44  ;;  %v8464_v23 = vmul.f32 %v16016_v43, %v16017_v44  ;;  %v8481_v10 = vrot.slane %v8449_v28, 4 }
 0x528   : > { %v8482_v59 = vrot.slane %v8450_v61, 4  ;;  %v8484_v53 = vrot.slane %v8451_v56, 4  ;;  %v8486_v48 = vrot.slane %v8452_v7, 4  ;;  %v8488_v52 = vrot.slane %v8453_v34, 4 }
 0x529   : > { %v8489_v45 = vrot.slane %v8454_v20, 4  ;;  %v8491_v50 = vrot.slane %v8455_v54, 4  ;;  %v8493_v42 = vrot.slane %v8456_v1, 4  ;;  %v8495_v5 = vrot.slane %v8457_v39, 4 }
 0x52a   : > { %v8483_v0 = vsel %vm556_vm3, %v8481_v10, %v8482_v59  ;;  %v8485_v22 = vsel %vm556_vm3, %v8482_v59, %v8484_v53  ;;  %v8487_v35 = vsel %vm556_vm3, %v8484_v53, %v8486_v48  ;;  %v8496_v47 = vrot.slane %v8458_v58, 4  ;;  %v16019_v10 = vld [vmem:[#allocation14_spill] sm:$0xff] }
 0x52b   : > { %v8490_v8 = vsel %vm556_vm3, %v8488_v52, %v8489_v45  ;;  %v8492_v31 = vsel %vm556_vm3, %v8489_v45, %v8491_v50  ;;  %v8494_v13 = vsel %vm556_vm3, %v8491_v50, %v8493_v42  ;;  %v8498_v44 = vrot.slane %v8459_v29, 4 }
 0x52c   : > { %v8500_v28 = vrot.slane %v8460_v9, 4  ;;  %v8502_v36 = vrot.slane %v8461_v21, 4  ;;  %v8503_v61 = vrot.slane %v8462_v2, 4  ;;  %v8497_v24 = vsel %vm556_vm3, %v8495_v5, %v8496_v47  ;;  %v15105_v21 = vld [vmem:[%s9526_s16 + $0x2b8] sm:$0xff] }
 0x52d   : > { %v8505_v56 = vrot.slane %v8463_v30, 4  ;;  %v8507_v17 = vrot.slane %v8464_v23, 4  ;;  %v8525_v7 = vadd.f32 %v8483_v0, %v15008_v14  ;;  %v8499_v34 = vsel %vm556_vm3, %v8496_v47, %v8498_v44  ;;  %v15111_v2 = vld [vmem:[%s9526_s16 + $0x2f8] sm:$0xff] }
 0x52e   : > { %v8501_v20 = vsel %vm556_vm3, %v8498_v44, %v8500_v28  ;;  %v8504_v54 = vsel %vm556_vm3, %v8502_v36, %v8503_v61  ;;  %v8526_v1 = vadd.f32 %v8485_v22, %v15013_v25  ;;  %v8527_v18 = vadd.f32 %v8487_v35, %v15017_v46  ;;  %v15118_v23 = vld [vmem:[%s9526_s16 + $0x398] sm:$0xff] }
 0x52f   : > { %v8506_v60 = vsel %vm556_vm3, %v8503_v61, %v8505_v56  ;;  %v8508_v39 = vsel %vm556_vm3, %v8505_v56, %v8507_v17  ;;  %v8528_v58 = vadd.f32 %v8486_v48, %v15019_v62  ;;  %v8529_v14 = vadd.f32 %v8490_v8, %v15021_v51 }
 0x530   : > { %v8530_v26 = vadd.f32 %v8492_v31, %v15023_v40  ;;  %v8531_v29 = vadd.f32 %v8494_v13, %v15025_v49  ;;  %v8532_v25 = vadd.f32 %v8493_v42, %v15027_v33  ;;  %v8533_v9 = vadd.f32 %v8497_v24, %v15029_v38  ;;  %v15108_v40 = vld [vmem:[%s9526_s16 + $0x2d8] sm:$0xff] }
 0x531   : > { %v8534_v46 = vadd.f32 %v8499_v34, %v15031_v15  ;;  %v8535_v62 = vadd.f32 %v8501_v20, %v15033_v57  ;;  %v8536_v51 = vadd.f32 %v8500_v28, %v15035_v63  ;;  %v8537_v49 = vadd.f32 %v8504_v54, %v15037_v3  ;;  %v15121_v15 = vld [vmem:[%s9526_s16 + $0x3b8] sm:$0xff] }
 0x532   : > { %v8538_v33 = vadd.f32 %v8506_v60, %v15039_v16  ;;  %v8539_v30 = vadd.f32 %v8508_v39, %v15041_v55  ;;  %v8540_v38 = vadd.f32 %v8507_v17, %v15043_v32  ;;  %v15124_v57 = vld [vmem:[%s9526_s16 + $0x3d8] sm:$0xff]  ;;  %v8561_v59 = vmul.f32 %v14818_v27, %v16019_v10 }
 0x533   : > { %v15127_v63 = vld [vmem:[%s9526_s16 + $0x3f8] sm:$0xff]  ;;  %v8562_v3 = vmul.f32 %v14825_v37, %v16019_v10  ;;  %v8563_v16 = vmul.f32 %v14828_v41, %v16019_v10  ;;  %v8564_v55 = vmul.f32 %v14831_v4, %v16019_v10  ;;  %v8565_v32 = vmul.f32 %v15098_v6, %v16019_v10 }
 0x534   : > { %16018 = vst [vmem:[#allocation10_spill] sm:$0xff] %v15127_v63  ;;  %v8566_v53 = vmul.f32 %v15105_v21, %v16019_v10  ;;  %v8567_v48 = vmul.f32 %v15108_v40, %v16019_v10  ;;  %v8568_v52 = vmul.f32 %v15111_v2, %v16019_v10  ;;  %v8569_v45 = vmul.f32 %v16010_v11, %v16019_v10  ;;  %v15172_v28 = vld [vmem:[%s15437_s1 + $0x78] ss:$0 sm:$0xff] }
 0x535   : > { %v8570_v50 = vmul.f32 %v16011_v12, %v16019_v10  ;;  %v8571_v42 = vmul.f32 %v16012_v19, %v16019_v10  ;;  %v8572_v0 = vmul.f32 %v16016_v43, %v16019_v10  ;;  %v8573_v22 = vmul.f32 %v15118_v23, %v16019_v10  ;;  %16020 = vst [vmem:[#allocation9_spill] sm:$0xff] %v15172_v28 }
 0x536   : > { %v8574_v35 = vmul.f32 %v15121_v15, %v16019_v10  ;;  %v8575_v5 = vmul.f32 %v15124_v57, %v16019_v10  ;;  %v8576_v8 = vmul.f32 %v15127_v63, %v16019_v10  ;;  %v15161_v31 = vadd.f32 %v8561_v59, %v8525_v7 }
 0x537   : > { %v15163_v13 = vadd.f32 %v8562_v3, %v8526_v1  ;;  %v15165_v47 = vadd.f32 %v8563_v16, %v8527_v18  ;;  %v15167_v44 = vadd.f32 %v8564_v55, %v8528_v58  ;;  %v15174_v36 = vadd.f32 %v8565_v32, %v8529_v14  ;;  %v16021_v18 = vld [vmem:[#allocation8_spill] sm:$0xff]  ;;  %v16022_v58 = vld [vmem:[#allocation13_spill] sm:$0xff] }
 0x538   : > { %v15176_v61 = vadd.f32 %v8566_v53, %v8530_v26  ;;  %v15178_v24 = vadd.f32 %v8567_v48, %v8531_v29  ;;  %v15180_v56 = vadd.f32 %v8568_v52, %v8532_v25  ;;  %v15182_v17 = vadd.f32 %v8569_v45, %v8533_v9  ;;  %v16023_v26 = vld [vmem:[#allocation11_spill] sm:$0xff]  ;;  %v16024_v25 = vld [vmem:[#allocation12_spill] sm:$0xff] }
 0x539   : > { %v15184_v7 = vadd.f32 %v8570_v50, %v8534_v46  ;;  %v15186_v34 = vadd.f32 %v8571_v42, %v8535_v62  ;;  %v15188_v20 = vadd.f32 %v8572_v0, %v8536_v51  ;;  %v15190_v54 = vadd.f32 %v8573_v22, %v8537_v49 }
 0x53a   : > { %v15192_v1 = vadd.f32 %v8574_v35, %v8538_v33  ;;  %v15194_v60 = vadd.f32 %v8575_v5, %v8539_v30  ;;  %v15196_v39 = vadd.f32 %v8576_v8, %v8540_v38  ;;  %v8596_v14 = vrot.slane %v16022_v58, %v16021_v18 }
 0x53b   : > { %v15202_v29 = vrot.slane %v16022_v58, %v16023_v26  ;;  %v15206_v9 = vrot.slane %v16022_v58, %v16024_v25  ;;  %v15210_v46 = vmul.f32 %v15172_v28, %v14818_v27  ;;  %v15214_v62 = vmul.f32 %v15172_v28, %v14825_v37 }
 0x53c   : > { %v15218_v51 = vmul.f32 %v15172_v28, %v14828_v41  ;;  %v15222_v49 = vmul.f32 %v15172_v28, %v14831_v4  ;;  %v15226_v33 = vmul.f32 %v15172_v28, %v15098_v6  ;;  %v8597_v30 = vmul.f32 %v14818_v27, %v8596_v14 }
 0x53d   : > { %16025 = vst [vmem:[#allocation3_spill] sm:$0xff] %v15206_v9  ;;  %16026 = vst [vmem:[#allocation4_spill] sm:$0xff] %v15210_v46  ;;  %v8598_v38 = vmul.f32 %v14825_v37, %v8596_v14  ;;  %v8599_v10 = vmul.f32 %v14828_v41, %v8596_v14  ;;  %v8600_v59 = vmul.f32 %v14831_v4, %v8596_v14 }
 0x53e   : > { %16027 = vst [vmem:[#allocation5_spill] sm:$0xff] %v15214_v62  ;;  %16028 = vst [vmem:[#allocation6_spill] sm:$0xff] %v15218_v51  ;;  %v8601_v3 = vmul.f32 %v15098_v6, %v8596_v14  ;;  %v8602_v16 = vmul.f32 %v15105_v21, %v8596_v14  ;;  %v8603_v55 = vmul.f32 %v15108_v40, %v8596_v14  ;;  %v8629_v35 = vrot.slane %v8597_v30, 1 }
 0x53f   : > { %16029 = vst [vmem:[#allocation7_spill] sm:$0xff] %v15222_v49  ;;  %16030 = vst [vmem:[#allocation18_spill] sm:$0xff] %v15226_v33  ;;  %v8604_v32 = vmul.f32 %v15111_v2, %v8596_v14  ;;  %v8605_v53 = vmul.f32 %v16010_v11, %v8596_v14  ;;  %v8606_v48 = vmul.f32 %v16011_v12, %v8596_v14  ;;  %v8630_v5 = vrot.slane %v8598_v38, 1 }
 0x540   : > { %v8607_v52 = vmul.f32 %v16012_v19, %v8596_v14  ;;  %v8608_v45 = vmul.f32 %v16016_v43, %v8596_v14  ;;  %v8609_v50 = vmul.f32 %v15118_v23, %v8596_v14  ;;  %v8610_v42 = vmul.f32 %v15121_v15, %v8596_v14 }
 0x541   : > { %v8611_v0 = vmul.f32 %v15124_v57, %v8596_v14  ;;  %v8612_v22 = vmul.f32 %v15127_v63, %v8596_v14  ;;  %v8632_v8 = vrot.slane %v8599_v10, 1  ;;  %v8634_v18 = vrot.slane %v8600_v59, 1 }
 0x542   : > { %v8636_v58 = vrot.slane %v8601_v3, 1  ;;  %v8637_v26 = vrot.slane %v8602_v16, 1  ;;  %v8639_v25 = vrot.slane %v8603_v55, 1  ;;  %v8641_v33 = vrot.slane %v8604_v32, 1 }
 0x543   : > { %v8631_v49 = vsel %vm265_vm0, %v8629_v35, %v8630_v5  ;;  %v8633_v51 = vsel %vm265_vm0, %v8630_v5, %v8632_v8  ;;  %v8635_v62 = vsel %vm265_vm0, %v8632_v8, %v8634_v18  ;;  %v8643_v46 = vrot.slane %v8605_v53, 1 }
 0x544   : > { %v8638_v28 = vsel %vm265_vm0, %v8636_v58, %v8637_v26  ;;  %v8640_v9 = vsel %vm265_vm0, %v8637_v26, %v8639_v25  ;;  %v8642_v14 = vsel %vm265_vm0, %v8639_v25, %v8641_v33  ;;  %v8644_v30 = vrot.slane %v8606_v48, 1 }
 0x545   : > { %v8646_v38 = vrot.slane %v8607_v52, 1  ;;  %v8648_v10 = vrot.slane %v8608_v45, 1  ;;  %v8650_v59 = vrot.slane %v8609_v50, 1  ;;  %v8651_v3 = vrot.slane %v8610_v42, 1 }
 0x546   : > { %v8645_v16 = vsel %vm265_vm0, %v8643_v46, %v8644_v30  ;;  %v8653_v55 = vrot.slane %v8611_v0, 1  ;;  %v8655_v32 = vrot.slane %v8612_v22, 1  ;;  %v8673_v35 = vadd.f32 %v8631_v49, %v15161_v31 }
 0x547   : > { %v8647_v5 = vsel %vm265_vm0, %v8644_v30, %v8646_v38  ;;  %v8649_v53 = vsel %vm265_vm0, %v8646_v38, %v8648_v10  ;;  %v8652_v8 = vsel %vm265_vm0, %v8650_v59, %v8651_v3  ;;  %v8674_v58 = vadd.f32 %v8633_v51, %v15163_v13 }
 0x548   : > { %v8654_v48 = vsel %vm265_vm0, %v8651_v3, %v8653_v55  ;;  %v8656_v52 = vsel %vm265_vm0, %v8653_v55, %v8655_v32  ;;  %v8675_v45 = vadd.f32 %v8635_v62, %v15165_v47  ;;  %v8676_v46 = vadd.f32 %v8634_v18, %v15167_v44 }
 0x549   : > { %v8677_v50 = vadd.f32 %v8638_v28, %v15174_v36  ;;  %v8678_v31 = vadd.f32 %v8640_v9, %v15176_v61  ;;  %v8679_v49 = vadd.f32 %v8642_v14, %v15178_v24  ;;  %v8680_v42 = vadd.f32 %v8641_v33, %v15180_v56 }
 0x54a   : > { %v8681_v0 = vadd.f32 %v8645_v16, %v15182_v17  ;;  %v8682_v13 = vadd.f32 %v8647_v5, %v15184_v7  ;;  %v8683_v51 = vadd.f32 %v8649_v53, %v15186_v34  ;;  %v8684_v22 = vadd.f32 %v8648_v10, %v15188_v20 }
 0x54b   : > { %v8685_v47 = vadd.f32 %v8652_v8, %v15190_v54  ;;  %v8686_v44 = vadd.f32 %v8654_v48, %v15192_v1  ;;  %v8687_v28 = vadd.f32 %v8656_v52, %v15194_v60  ;;  %v8688_v36 = vadd.f32 %v8655_v32, %v15196_v39 }
 0x54c   : > { %v8693_v61 = vmul.f32 %v14818_v27, %v15202_v29  ;;  %v8694_v24 = vmul.f32 %v14825_v37, %v15202_v29  ;;  %v8695_v56 = vmul.f32 %v14828_v41, %v15202_v29  ;;  %v8696_v17 = vmul.f32 %v14831_v4, %v15202_v29 }
 0x54d   : > { %v8697_v7 = vmul.f32 %v15098_v6, %v15202_v29  ;;  %v8698_v34 = vmul.f32 %v15105_v21, %v15202_v29  ;;  %v8699_v20 = vmul.f32 %v15108_v40, %v15202_v29  ;;  %v8700_v54 = vmul.f32 %v15111_v2, %v15202_v29 }
 0x54e   : > { %v8701_v1 = vmul.f32 %v16010_v11, %v15202_v29  ;;  %v8702_v60 = vmul.f32 %v16011_v12, %v15202_v29  ;;  %v8703_v39 = vmul.f32 %v16012_v19, %v15202_v29  ;;  %v8704_v9 = vmul.f32 %v16016_v43, %v15202_v29 }
 0x54f   : > { %v8705_v62 = vmul.f32 %v15118_v23, %v15202_v29  ;;  %v8706_v33 = vmul.f32 %v15121_v15, %v15202_v29  ;;  %v8707_v18 = vmul.f32 %v15124_v57, %v15202_v29  ;;  %v8708_v26 = vmul.f32 %v15127_v63, %v15202_v29 }
 0x550   : > { %v8725_v25 = vrot.slane %v8693_v61, 2  ;;  %v8726_v14 = vrot.slane %v8694_v24, 2  ;;  %v8728_v30 = vrot.slane %v8695_v56, 2  ;;  %v8730_v38 = vrot.slane %v8696_v17, 2 }
 0x551   : > { %v8732_v10 = vrot.slane %v8697_v7, 2  ;;  %v8733_v59 = vrot.slane %v8698_v34, 2  ;;  %v8735_v3 = vrot.slane %v8699_v20, 2  ;;  %v8737_v16 = vrot.slane %v8700_v54, 2 }
 0x552   : > { %v8727_v55 = vsel %vm362_vm1, %v8725_v25, %v8726_v14  ;;  %v8729_v32 = vsel %vm362_vm1, %v8726_v14, %v8728_v30  ;;  %v8731_v5 = vsel %vm362_vm1, %v8728_v30, %v8730_v38  ;;  %v8739_v53 = vrot.slane %v8701_v1, 2 }
 0x553   : > { %v8734_v8 = vsel %vm362_vm1, %v8732_v10, %v8733_v59  ;;  %v8736_v48 = vsel %vm362_vm1, %v8733_v59, %v8735_v3  ;;  %v8738_v29 = vsel %vm362_vm1, %v8735_v3, %v8737_v16  ;;  %v8740_v52 = vrot.slane %v8702_v60, 2 }
 0x554   : > { %v8742_v61 = vrot.slane %v8703_v39, 2  ;;  %v8744_v24 = vrot.slane %v8704_v9, 2  ;;  %v8746_v56 = vrot.slane %v8705_v62, 2  ;;  %v8747_v17 = vrot.slane %v8706_v33, 2 }
 0x555   : > { %v8741_v7 = vsel %vm362_vm1, %v8739_v53, %v8740_v52  ;;  %v8749_v34 = vrot.slane %v8707_v18, 2  ;;  %v8751_v20 = vrot.slane %v8708_v26, 2  ;;  %v8769_v54 = vadd.f32 %v8727_v55, %v8673_v35 }
 0x556   : > { %v8743_v25 = vsel %vm362_vm1, %v8740_v52, %v8742_v61  ;;  %v8745_v1 = vsel %vm362_vm1, %v8742_v61, %v8744_v24  ;;  %v8748_v14 = vsel %vm362_vm1, %v8746_v56, %v8747_v17  ;;  %v8770_v30 = vadd.f32 %v8729_v32, %v8674_v58  ;;  %v16031_v56 = vld [vmem:[#allocation3_spill] sm:$0xff] }
 0x557   : > { %v8750_v10 = vsel %vm362_vm1, %v8747_v17, %v8749_v34  ;;  %v8752_v60 = vsel %vm362_vm1, %v8749_v34, %v8751_v20  ;;  %v8771_v39 = vadd.f32 %v8731_v5, %v8675_v45  ;;  %v8772_v9 = vadd.f32 %v8730_v38, %v8676_v46 }
 0x558   : > { %v8773_v62 = vadd.f32 %v8734_v8, %v8677_v50  ;;  %v8774_v33 = vadd.f32 %v8736_v48, %v8678_v31  ;;  %v8775_v59 = vadd.f32 %v8738_v29, %v8679_v49  ;;  %v8776_v3 = vadd.f32 %v8737_v16, %v8680_v42 }
 0x559   : > { %v8777_v18 = vadd.f32 %v8741_v7, %v8681_v0  ;;  %v8778_v26 = vadd.f32 %v8743_v25, %v8682_v13  ;;  %v8779_v35 = vadd.f32 %v8745_v1, %v8683_v51  ;;  %v8780_v55 = vadd.f32 %v8744_v24, %v8684_v22  ;;  %v16032_v51 = vld [vmem:[#allocation10_spill] sm:$0xff] }
 0x55a   : > { %v8781_v53 = vadd.f32 %v8748_v14, %v8685_v47  ;;  %v8782_v52 = vadd.f32 %v8750_v10, %v8686_v44  ;;  %v8783_v61 = vadd.f32 %v8752_v60, %v8687_v28  ;;  %v8784_v63 = vadd.f32 %v8751_v20, %v8688_v36 }
 0x55b   : > { %v8789_v58 = vmul.f32 %v14818_v27, %v16031_v56  ;;  %v8790_v32 = vmul.f32 %v14825_v37, %v16031_v56  ;;  %v8791_v45 = vmul.f32 %v14828_v41, %v16031_v56  ;;  %v8792_v46 = vmul.f32 %v14831_v4, %v16031_v56 }
 0x55c   : > { %v8793_v50 = vmul.f32 %v15098_v6, %v16031_v56  ;;  %v8794_v31 = vmul.f32 %v15105_v21, %v16031_v56  ;;  %v8795_v49 = vmul.f32 %v15108_v40, %v16031_v56  ;;  %v8796_v27 = vmul.f32 %v15111_v2, %v16031_v56 }
 0x55d   : > { %v8797_v37 = vmul.f32 %v16010_v11, %v16031_v56  ;;  %v8798_v41 = vmul.f32 %v16011_v12, %v16031_v56  ;;  %v8799_v4 = vmul.f32 %v16012_v19, %v16031_v56  ;;  %v8800_v6 = vmul.f32 %v16016_v43, %v16031_v56 }
 0x55e   : > { %v8801_v42 = vmul.f32 %v15118_v23, %v16031_v56  ;;  %v8802_v0 = vmul.f32 %v15121_v15, %v16031_v56  ;;  %v8803_v13 = vmul.f32 %v15124_v57, %v16031_v56  ;;  %v8804_v22 = vmul.f32 %v16032_v51, %v16031_v56 }
 0x55f   : > { %v8821_v47 = vrot.slane %v8789_v58, 3  ;;  %v8822_v44 = vrot.slane %v8790_v32, 3  ;;  %v8824_v28 = vrot.slane %v8791_v45, 3  ;;  %v8826_v36 = vrot.slane %v8792_v46, 3 }
 0x560   : > { %v8828_v38 = vrot.slane %v8793_v50, 3  ;;  %v8829_v16 = vrot.slane %v8794_v31, 3  ;;  %v8831_v5 = vrot.slane %v8795_v49, 3  ;;  %v8833_v8 = vrot.slane %v8796_v27, 3 }
 0x561   : > { %v8823_v48 = vsel %vm459_vm2, %v8821_v47, %v8822_v44  ;;  %v8825_v29 = vsel %vm459_vm2, %v8822_v44, %v8824_v28  ;;  %v8827_v24 = vsel %vm459_vm2, %v8824_v28, %v8826_v36  ;;  %v8835_v17 = vrot.slane %v8797_v37, 3 }
 0x562   : > { %v8830_v7 = vsel %vm459_vm2, %v8828_v38, %v8829_v16  ;;  %v8832_v34 = vsel %vm459_vm2, %v8829_v16, %v8831_v5  ;;  %v8834_v20 = vsel %vm459_vm2, %v8831_v5, %v8833_v8  ;;  %v8836_v25 = vrot.slane %v8798_v41, 3 }
 0x563   : > { %v8838_v1 = vrot.slane %v8799_v4, 3  ;;  %v8840_v14 = vrot.slane %v8800_v6, 3  ;;  %v8842_v10 = vrot.slane %v8801_v42, 3  ;;  %v8843_v60 = vrot.slane %v8802_v0, 3 }
 0x564   : > { %v8837_v56 = vsel %vm459_vm2, %v8835_v17, %v8836_v25  ;;  %v8845_v58 = vrot.slane %v8803_v13, 3  ;;  %v8847_v32 = vrot.slane %v8804_v22, 3  ;;  %v8865_v45 = vadd.f32 %v8823_v48, %v8769_v54 }
 0x565   : > { %v8839_v46 = vsel %vm459_vm2, %v8836_v25, %v8838_v1  ;;  %v8841_v50 = vsel %vm459_vm2, %v8838_v1, %v8840_v14  ;;  %v8844_v31 = vsel %vm459_vm2, %v8842_v10, %v8843_v60  ;;  %v8866_v49 = vadd.f32 %v8825_v29, %v8770_v30  ;;  %v16033_v30 = vld [vmem:[#allocation9_spill] sm:$0xff] }
 0x566   : > { %v8846_v27 = vsel %vm459_vm2, %v8843_v60, %v8845_v58  ;;  %v8848_v37 = vsel %vm459_vm2, %v8845_v58, %v8847_v32  ;;  %v8867_v41 = vadd.f32 %v8827_v24, %v8771_v39  ;;  %v8868_v4 = vadd.f32 %v8826_v36, %v8772_v9 }
 0x567   : > { %v8869_v6 = vadd.f32 %v8830_v7, %v8773_v62  ;;  %v8870_v42 = vadd.f32 %v8832_v34, %v8774_v33  ;;  %v8871_v0 = vadd.f32 %v8834_v20, %v8775_v59  ;;  %v8872_v47 = vadd.f32 %v8833_v8, %v8776_v3  ;;  %v16034_v59 = vld [vmem:[#allocation4_spill] sm:$0xff]  ;;  %v16035_v3 = vld [vmem:[#allocation5_spill] sm:$0xff] }
 0x568   : > { %v8873_v13 = vadd.f32 %v8837_v56, %v8777_v18  ;;  %v8874_v22 = vadd.f32 %v8839_v46, %v8778_v26  ;;  %v8875_v54 = vadd.f32 %v8841_v50, %v8779_v35  ;;  %v8876_v44 = vadd.f32 %v8840_v14, %v8780_v55  ;;  %v16037_v35 = vld [vmem:[#allocation7_spill] sm:$0xff]  ;;  %v16038_v55 = vld [vmem:[#allocation18_spill] sm:$0xff] }
 0x569   : > { %v8877_v28 = vadd.f32 %v8844_v31, %v8781_v53  ;;  %v8878_v38 = vadd.f32 %v8846_v27, %v8782_v52  ;;  %v8879_v16 = vadd.f32 %v8848_v37, %v8783_v61  ;;  %v8880_v5 = vadd.f32 %v8847_v32, %v8784_v63 }
 0x56a   : > { %v8890_v48 = vmul.f32 %v16033_v30, %v15105_v21  ;;  %v8891_v29 = vmul.f32 %v16033_v30, %v15108_v40  ;;  %v8892_v39 = vmul.f32 %v16033_v30, %v15111_v2  ;;  %v8893_v9 = vmul.f32 %v16033_v30, %v16010_v11 }
 0x56b   : > { %v8894_v62 = vmul.f32 %v16033_v30, %v16011_v12  ;;  %v8895_v33 = vmul.f32 %v16033_v30, %v16012_v19  ;;  %v8896_v63 = vmul.f32 %v16033_v30, %v16016_v43  ;;  %v8897_v21 = vmul.f32 %v16033_v30, %v15118_v23  ;;  %v16036_v19 = vld [vmem:[#allocation6_spill] sm:$0xff] }
 0x56c   : > { %v8898_v40 = vmul.f32 %v16033_v30, %v15121_v15  ;;  %v8899_v2 = vmul.f32 %v16033_v30, %v15124_v57  ;;  %v8900_v11 = vmul.f32 %v16033_v30, %v16032_v51  ;;  %v8917_v12 = vrot.slane %v16034_v59, 4 }
 0x56d   : > { %v8918_v18 = vrot.slane %v16035_v3, 4  ;;  %v8920_v26 = vrot.slane %v16036_v19, 4  ;;  %v8922_v43 = vrot.slane %v16037_v35, 4  ;;  %v8924_v53 = vrot.slane %v16038_v55, 4 }
 0x56e   : > { %v8925_v23 = vrot.slane %v8890_v48, 4  ;;  %v8927_v52 = vrot.slane %v8891_v29, 4  ;;  %v8929_v61 = vrot.slane %v8892_v39, 4  ;;  %v8931_v15 = vrot.slane %v8893_v9, 4 }
 0x56f   : > { %v8919_v36 = vsel %vm556_vm3, %v8917_v12, %v8918_v18  ;;  %v8921_v57 = vsel %vm556_vm3, %v8918_v18, %v8920_v26  ;;  %v8923_v51 = vsel %vm556_vm3, %v8920_v26, %v8922_v43  ;;  %v8932_v8 = vrot.slane %v8894_v62, 4 }
 0x570   : > { %v8926_v24 = vsel %vm556_vm3, %v8924_v53, %v8925_v23  ;;  %v8928_v17 = vsel %vm556_vm3, %v8925_v23, %v8927_v52  ;;  %v8930_v7 = vsel %vm556_vm3, %v8927_v52, %v8929_v61  ;;  %v8934_v34 = vrot.slane %v8895_v33, 4 }
 0x571   : > { %v8933_v20 = vsel %vm556_vm3, %v8931_v15, %v8932_v8  ;;  %v8936_v25 = vrot.slane %v8896_v63, 4  ;;  %v8938_v1 = vrot.slane %v8897_v21, 4  ;;  %v8939_v14 = vrot.slane %v8898_v40, 4 }
 0x572   : > { %v8935_v10 = vsel %vm556_vm3, %v8932_v8, %v8934_v34  ;;  %v8941_v60 = vrot.slane %v8899_v2, 4  ;;  %v8943_v56 = vrot.slane %v8900_v11, 4  ;;  %v8961_v58 = vadd.f32 %v8919_v36, %v8865_v45 }
 0x573   : > { %v8937_v32 = vsel %vm556_vm3, %v8934_v34, %v8936_v25  ;;  %v8940_v46 = vsel %vm556_vm3, %v8938_v1, %v8939_v14  ;;  %v8962_v50 = vadd.f32 %v8921_v57, %v8866_v49  ;;  %v8963_v31 = vadd.f32 %v8923_v51, %v8867_v41 }
 0x574   : > { %v8942_v27 = vsel %vm556_vm3, %v8939_v14, %v8941_v60  ;;  %v8944_v37 = vsel %vm556_vm3, %v8941_v60, %v8943_v56  ;;  %v8964_v30 = vadd.f32 %v8922_v43, %v8868_v4  ;;  %v8965_v48 = vadd.f32 %v8926_v24, %v8869_v6  ;;  %8978 = vst.msk [vmem:[%s11008_s30 + $0x18] sm:$0xff] %vm8977_vm4, %v8961_v58 }
 0x575   : > { %v8966_v29 = vadd.f32 %v8928_v17, %v8870_v42  ;;  %v8967_v39 = vadd.f32 %v8930_v7, %v8871_v0  ;;  %v8968_v45 = vadd.f32 %v8929_v61, %v8872_v47  ;;  %v8969_v9 = vadd.f32 %v8933_v20, %v8873_v13  ;;  %8979 = vst.msk [vmem:[%s11008_s30 + $0x38] sm:$0xff] %vm8977_vm4, %v8962_v50 }
 0x576   : > { %v8970_v62 = vadd.f32 %v8935_v10, %v8874_v22  ;;  %v8971_v49 = vadd.f32 %v8937_v32, %v8875_v54  ;;  %v8972_v41 = vadd.f32 %v8936_v25, %v8876_v44  ;;  %v8973_v33 = vadd.f32 %v8940_v46, %v8877_v28  ;;  %8980 = vst.msk [vmem:[%s11008_s30 + $0x58] sm:$0xff] %vm8977_vm4, %v8963_v31 }
 0x577   : > { %v8974_v63 = vadd.f32 %v8942_v27, %v8878_v38  ;;  %v8975_v4 = vadd.f32 %v8944_v37, %v8879_v16  ;;  %v8976_v6 = vadd.f32 %v8943_v56, %v8880_v5  ;;  %8983 = vst.msk [vmem:[%s11008_s30 + $0x98] sm:$0xff] %vm8977_vm4, %v8965_v48  ;;  %8984 = vst.msk [vmem:[%s11008_s30 + $0xb8] sm:$0xff] %vm8977_vm4, %v8966_v29 }
 0x578   : > { %8985 = vst.msk [vmem:[%s11008_s30 + $0xd8] sm:$0xff] %vm8977_vm4, %v8967_v39  ;;  %8987 = vst.msk [vmem:[%s11008_s30 + $0x118] sm:$0xff] %vm8977_vm4, %v8969_v9 }
 0x579   : > { %8988 = vst.msk [vmem:[%s11008_s30 + $0x138] sm:$0xff] %vm8977_vm4, %v8970_v62  ;;  %8989 = vst.msk [vmem:[%s11008_s30 + $0x158] sm:$0xff] %vm8977_vm4, %v8971_v49 }
 0x57a   : > { %8991 = vst.msk [vmem:[%s11008_s30 + $0x198] sm:$0xff] %vm8977_vm4, %v8973_v33  ;;  %8992 = vst.msk [vmem:[%s11008_s30 + $0x1b8] sm:$0xff] %vm8977_vm4, %v8974_v63 }
 0x57b   : > { %8982 = vst.msk [vmem:[%s11008_s30 + $0x78] sm:$0xf] %vm8981_vm5, %v8964_v30  ;;  %8986 = vst.msk [vmem:[%s11008_s30 + $0xf8] sm:$0xf] %vm8981_vm5, %v8968_v45 }
 0x57c   : > { %8990 = vst.msk [vmem:[%s11008_s30 + $0x178] sm:$0xf] %vm8981_vm5, %v8972_v41  ;;  %8994 = vst.msk [vmem:[%s11008_s30 + $0x1f8] sm:$0xf] %vm8981_vm5, %v8976_v6 }
 0x57d   : > { %8993 = vst.msk [vmem:[%s11008_s30 + $0x1d8] sm:$0xff] %vm8977_vm4, %v8975_v4 }
 0x57e PF: > { %s12_s11 = sadd.s32 1, %s9485_s11   ;;  %s16039_s9 = smov %s9481_s10 }
 0x57f   : > { %p9_p5 = scmp.ge.s32.totalorder %s12_s11, 9   ;;  %s16040_s10 = smov %s16042_s12 }
 0x581   :  { %11 = sbr.rel (!%p9_p5) target bundleno = 2 (0x2), region = 63 }

</bundles_post_ra>
